<compile_context>
chip_gen: v5e
topology: v5e:2x2
jax: 0.10.0
libtpu: 0.0.40
codegen_flags: <defaults>
</compile_context>

<pallas_src>
import functools

import jax
import jax.numpy as jnp
from jax import lax
from jax.experimental import pallas as pl
from jax.experimental.pallas import tpu as pltpu


# ----------------------------------------------------------------------------
# Pallas kernel: Bt images per grid step, lane-dense (C, Bt*HW) layout.
# ----------------------------------------------------------------------------
def _parallel_cell_kernel(x_ref, rc_ref, w1_ref, b1_ref, dw_ref,
                          gpA_ref, gpb_ref, w2lo_ref, w2hi_ref, w2p_ref,
                          b2_ref, segavg_ref, segexp_ref, out_ref, *, H, W):
    Bt, Cin, HW = x_ref.shape
    L = Bt * HW
    C4 = gpA_ref.shape[0]
    C2 = 2 * C4

    # ---- gather the Bt images into one lane-dense (Cin, Bt*HW) slab ---------
    if Bt == 1:
        xf = x_ref[0]
    else:
        xf = jnp.concatenate([x_ref[b] for b in range(Bt)], axis=1)

    # ---- proj_conv1: 1x1 conv (+ folded BN) + ReLU (channel-permuted) -------
    y1 = jnp.dot(w1_ref[...], xf, preferred_element_type=jnp.float32)
    y1 = jnp.maximum(y1 + b1_ref[...], 0.0)            # (Cout, L) f32
    # row order after the wrapper permutation: [7x7 | 5x5 | 3x3 | pool]

    # ---- validity masks for the shift-and-accumulate depthwise convs --------
    row = rc_ref[0:1, :]                                # (1, L) int32: h within image
    col = rc_ref[1:2, :]                                # (1, L) int32: w within image
    P = 3                                               # max pad (7x7 branch)
    row_ok = {d: (row >= -d) & (row < H - d) for d in range(-P, P + 1)}
    col_ok = {d: (col >= -d) & (col < W - d) for d in range(-P, P + 1)}

    # packed depthwise weights, loaded once: cols [0,49) = lo taps, [49,58) = hi
    dw = dw_ref[...]                                    # (2*C4, 58) f32

    def shift_acc(g, taps):
        # g: (2*C4, L); out[c, n] = sum_t dw[c, t] * g[c, n + di*W + dj]
        # with zero padding expressed through the row/col validity masks
        # (rolls wrap -- including across image boundaries -- masks kill the
        # wrapped contributions).
        acc = jnp.zeros_like(g)
        for di, dj, t in taps:
            s = di * W + dj
            shifted = g if s == 0 else pltpu.roll(g, (-s) % L, axis=1)
            valid = row_ok[di] & col_ok[dj]
            acc = acc + dw[:, t:t + 1] * jnp.where(valid, shifted, 0.0)
        return acc

    taps_lo = [(di, dj, (di + 3) * 7 + (dj + 3))
               for di in range(-3, 4) for dj in range(-3, 4)]          # 49 taps
    taps_hi = [(di, dj, 49 + (di + 1) * 3 + (dj + 1))
               for di in range(-1, 2) for dj in range(-1, 2)]          # 9 taps

    # lo group rows: [7x7 chunk ; 5x5 chunk]; hi group rows: [3x3 chunk ; pool]
    acc_lo = shift_acc(y1[0:C2], taps_lo)               # (2*C4, L)
    acc_hi = shift_acc(y1[C2:2 * C2], taps_hi)          # (2*C4, L); pool rows -> 0

    # ---- global-pool branch: per-image mean -> folded affine -> ReLU --------
    x3 = y1[3 * C4:4 * C4]                              # (C4, L) pool chunk
    if Bt == 1:
        m = jnp.sum(x3, axis=1, keepdims=True) * (1.0 / HW)            # (C4, 1)
    else:
        m = jnp.dot(x3, segavg_ref[...],
                    preferred_element_type=jnp.float32)                # (C4, Bt)
    v = jnp.maximum(
        jnp.dot(gpA_ref[...], m, preferred_element_type=jnp.float32) + gpb_ref[...],
        0.0)                                                           # (C4, Bt)
    # bilinear upsample 1x1 -> HxW == per-image broadcast; folded through
    # proj_conv2 into a per-image bias.
    pool_b = jnp.dot(w2p_ref[...], v, preferred_element_type=jnp.float32)  # (Cout, Bt)
    if Bt == 1:
        pool_add = pool_b                               # (Cout, 1) broadcasts
    else:
        pool_add = jnp.dot(pool_b, segexp_ref[...],
                           preferred_element_type=jnp.float32)         # (Cout, L)

    # ---- proj_conv2 as two K=2*C4 matmuls (no concat) + ReLU ----------------
    w2lo = w2lo_ref[...]
    w2hi = w2hi_ref[...]
    mm = w2lo.dtype
    y2 = (jnp.dot(w2lo, acc_lo.astype(mm), preferred_element_type=jnp.float32)
          + jnp.dot(w2hi, acc_hi.astype(mm), preferred_element_type=jnp.float32))
    y2 = jnp.maximum(y2 + pool_add + b2_ref[...], 0.0)

    # ---- per-image lane-dense stores (HW is a multiple of 128 here) ---------
    for b in range(Bt):
        out_ref[b] = y2[:, b * HW:(b + 1) * HW].astype(out_ref.dtype)


def _pick_batch_tile(N, max_bt):
    divisors = [d for d in range(1, min(N, max_bt) + 1) if N % d == 0]
    # prefer >= 2 grid steps so v7x's two TensorCores both get work
    pref = [d for d in divisors if N // d >= 2]
    return max(pref) if pref else max(divisors)


def parallel_cell_pallas(x, params, *, matmul_dtype=jnp.float32, batch_tile=8):
    N, Cin, H, W = x.shape
    HW = H * W
    Cout = params["w1f"].shape[0]
    C4 = params["dw3"].shape[0]
    assert Cout == 4 * C4, "ParallelCell with ops_list=[0,1,2,3] needs Cout % 4 == 0"

    Bt = _pick_batch_tile(N, batch_tile)
    L = Bt * HW

    x_flat = x.reshape(N, Cin, HW)
    if matmul_dtype != jnp.float32:
        x_flat = x_flat.astype(matmul_dtype)   # halve x HBM read on the bf16 path

    # per-position (row, col) within each image, for the roll-validity masks
    ids = jnp.arange(L, dtype=jnp.int32)
    q = ids % HW
    rc = jnp.stack([q // W, q % W], axis=0)    # (2, L)

    # channel permutation of the proj_conv1 output: [7x7 | 5x5 | 3x3 | pool]
    perm = jnp.asarray(
        list(range(2 * C4, 3 * C4)) + list(range(C4, 2 * C4))
        + list(range(0, C4)) + list(range(3 * C4, 4 * C4)), dtype=jnp.int32)
    w1p = jnp.take(params["w1f"], perm, axis=0).astype(matmul_dtype)
    b1p = jnp.take(params["b1"], perm, axis=0)

    # packed depthwise weights: lo group = [dw7 ; dw5 zero-padded to 7x7] over
    # 49 taps, hi group = [dw3 ; zeros(pool)] over the inner 9 taps.
    dw7 = params["dw7"].reshape(C4, 49)
    dw5p = jnp.pad(params["dw5"], ((0, 0), (1, 1), (1, 1))).reshape(C4, 49)
    dw3 = params["dw3"].reshape(C4, 9)
    dw_lo = jnp.concatenate([dw7, dw5p], axis=0)                        # (2C4, 49)
    dw_hi = jnp.concatenate([dw3, jnp.zeros((C4, 9), dw3.dtype)], axis=0)  # (2C4, 9)
    dw_pack = jnp.concatenate([dw_lo, dw_hi], axis=1)                   # (2C4, 58)

    w2 = params["w2f"]
    w2_lo = jnp.concatenate([w2[:, 2 * C4:3 * C4], w2[:, C4:2 * C4]],
                            axis=1).astype(matmul_dtype)                # (Cout, 2C4)
    w2_hi = jnp.concatenate([w2[:, 0:C4], jnp.zeros((Cout, C4), w2.dtype)],
                            axis=1).astype(matmul_dtype)                # (Cout, 2C4)
    w2p = w2[:, 3 * C4:4 * C4]                                          # (Cout, C4) f32

    # per-image segment matrices for the pool branch (used when Bt > 1)
    img_id = ids // HW
    onehot = (img_id[:, None] == jnp.arange(Bt, dtype=jnp.int32)[None, :]
              ).astype(jnp.float32)                                     # (L, Bt)
    seg_avg = onehot * (1.0 / HW)                                       # (L, Bt)
    seg_exp = onehot.T                                                  # (Bt, L)

    param_inputs = (rc, w1p, b1p, dw_pack, params["gpA"], params["gpb"],
                    w2_lo, w2_hi, w2p, params["b2"], seg_avg, seg_exp)

    const2 = lambda n: (0, 0)      # grid-invariant params: fetched once
    grid_spec = pltpu.PrefetchScalarGridSpec(
        num_scalar_prefetch=0,
        grid=(N // Bt,),
        in_specs=[pl.BlockSpec((Bt, Cin, HW), lambda n: (n, 0, 0))]
                 + [pl.BlockSpec(tuple(a.shape), const2) for a in param_inputs],
        out_specs=pl.BlockSpec((Bt, Cout, HW), lambda n: (n, 0, 0)),
    )

    x_bytes = int(x_flat.size) * x_flat.dtype.itemsize
    out_bytes = N * Cout * HW * 4
    param_bytes = sum(int(a.size) * a.dtype.itemsize for a in param_inputs)
    flops = int(N * HW * 2 * (Cout * Cin + Cout * 4 * C4 + 58 * 2 * C4 + Cout + C4))
    cost = pl.CostEstimate(flops=flops, transcendentals=0,
                           bytes_accessed=int(x_bytes + out_bytes + param_bytes))

    out_flat = pl.pallas_call(
        functools.partial(_parallel_cell_kernel, H=H, W=W),
        out_shape=jax.ShapeDtypeStruct((N, Cout, HW), jnp.float32),
        grid_spec=grid_spec,
        compiler_params=pltpu.CompilerParams(
            dimension_semantics=("parallel",),       # shard batch steps on v7x
            vmem_limit_bytes=32 * 1024 * 1024),      # safe on v5e/v6e/v7x
        cost_estimate=cost,
    )(x_flat, *param_inputs)

    return out_flat.reshape(N, Cout, H, W)


# ----------------------------------------------------------------------------
# Parameter construction (deterministic) + BN folding (glue, plain JAX).
# ----------------------------------------------------------------------------
def make_params(key, in_channels, out_channels):
    C4 = out_channels // 4
    eps = 1e-5
    ks = jax.random.split(key, 20)

    def bn(kg, kb, km, kv, c):
        gamma = jax.random.uniform(kg, (c,), minval=0.5, maxval=1.5)
        beta = 0.1 * jax.random.normal(kb, (c,))
        rmean = 0.1 * jax.random.normal(km, (c,))
        rvar = jax.random.uniform(kv, (c,), minval=0.5, maxval=1.5)
        scale = gamma / jnp.sqrt(rvar + eps)
        shift = beta - rmean * scale
        return scale, shift

    # proj_conv1: Conv2d(Cin, Cout, 1, bias=False) + BN (eval) folded
    w1 = 0.3 * jax.random.normal(ks[0], (out_channels, in_channels))
    s1, sh1 = bn(ks[1], ks[2], ks[3], ks[4], out_channels)
    w1f = w1 * s1[:, None]
    b1 = sh1[:, None]

    # depthwise branches (groups=channel, no bias)
    dw3 = 0.3 * jax.random.normal(ks[5], (C4, 3, 3))
    dw5 = 0.2 * jax.random.normal(ks[6], (C4, 5, 5))
    dw7 = 0.15 * jax.random.normal(ks[7], (C4, 7, 7))

    # global_pool branch: depthwise 1x1 (no bias) -> pointwise 1x1 (bias) -> BN
    dws = 0.5 + 0.3 * jax.random.normal(ks[8], (C4,))
    wp = 0.3 * jax.random.normal(ks[9], (C4, C4))
    bp = 0.1 * jax.random.normal(ks[10], (C4,))
    sg, shg = bn(ks[11], ks[12], ks[13], ks[14], C4)
    gpA = sg[:, None] * wp * dws[None, :]
    gpb = (sg * bp + shg)[:, None]

    # proj_conv2: Conv2d(Cout, Cout, 1, bias=False) + BN folded
    w2 = 0.2 * jax.random.normal(ks[15], (out_channels, out_channels))
    s2, sh2 = bn(ks[16], ks[17], ks[18], ks[19], out_channels)
    w2f = w2 * s2[:, None]
    b2 = sh2[:, None]

    return dict(w1f=w1f, b1=b1, dw3=dw3, dw5=dw5, dw7=dw7,
                gpA=gpA, gpb=gpb, w2f=w2f, b2=b2)


# ----------------------------------------------------------------------------
# Pure-JAX reference (for correctness check only).
# ----------------------------------------------------------------------------
def parallel_cell_ref(x, p):
    Cout = p["w1f"].shape[0]
    C4 = p["dw3"].shape[0]

    y = jnp.einsum("oc,nchw->nohw", p["w1f"], x) + p["b1"].reshape(1, Cout, 1, 1)
    y = jnp.maximum(y, 0.0)

    outs = []
    for idx, (k, wdw) in enumerate([(3, p["dw3"]), (5, p["dw5"]), (7, p["dw7"])]):
        pad = (k - 1) // 2
        chunk = y[:, idx * C4:(idx + 1) * C4]
        o = lax.conv_general_dilated(
            chunk, wdw.reshape(C4, 1, k, k), (1, 1),
            [(pad, pad), (pad, pad)], feature_group_count=C4,
            dimension_numbers=("NCHW", "OIHW", "NCHW"))
        outs.append(o)
    chunk3 = y[:, 3 * C4:4 * C4]
    m = chunk3.mean(axis=(2, 3))                       # (N, C4)
    v = jnp.maximum(m @ p["gpA"].T + p["gpb"][:, 0][None, :], 0.0)
    outs.append(jnp.broadcast_to(v[:, :, None, None], chunk3.shape))

    cat = jnp.concatenate(outs, axis=1)
    y2 = jnp.einsum("oc,nchw->nohw", p["w2f"], cat) + p["b2"].reshape(1, Cout, 1, 1)
    return jnp.maximum(y2, 0.0)


if __name__ == "__main__":
    Cin, Cout, H, W = 4, 16, 16, 16
    key = jax.random.PRNGKey(0)
    kx, kp = jax.random.split(key)
    params = make_params(kp, Cin, Cout)

    # Batched path: N=8 -> Bt=4 images per step, grid=(2,).
    x8 = jax.random.normal(kx, (8, Cin, H, W), dtype=jnp.float32)
    ref8 = jax.block_until_ready(parallel_cell_ref(x8, params))
    out8 = jax.block_until_ready(parallel_cell_pallas(x8, params))
    assert out8.shape == (8, Cout, H, W)
    assert jnp.allclose(out8, ref8, atol=5e-4, rtol=5e-4), (
        float(jnp.max(jnp.abs(out8 - ref8))))

    # Bt == 1 path: N=2 -> grid=(2,), one image per step.
    x2 = x8[:2]
    out2 = jax.block_until_ready(parallel_cell_pallas(x2, params))
    assert jnp.allclose(out2, ref8[:2], atol=5e-4, rtol=5e-4), (
        float(jnp.max(jnp.abs(out2 - ref8[:2]))))

    # bf16-MXU / bf16-x path (recommended for v6e/v7x); loose tolerance for casts.
    out_bf16 = jax.block_until_ready(
        parallel_cell_pallas(x8, params, matmul_dtype=jnp.bfloat16))
    rel = jnp.linalg.norm(out_bf16 - ref8) / (jnp.linalg.norm(ref8) + 1e-6)
    assert float(rel) < 5e-2, float(rel)

    print("KERNEL_OK")
</pallas_src>

<mosaic_0001>
module attributes {stable_mosaic.version = 11 : i64} {
  func.func @_parallel_cell_kernel(%arg0: i32, %arg1: memref<4x4x256xf32, #tpu.memory_space<vmem>>, %arg2: memref<2x1024xi32, #tpu.memory_space<vmem>>, %arg3: memref<16x4xf32, #tpu.memory_space<vmem>>, %arg4: memref<16x1xf32, #tpu.memory_space<vmem>>, %arg5: memref<8x58xf32, #tpu.memory_space<vmem>>, %arg6: memref<4x4xf32, #tpu.memory_space<vmem>>, %arg7: memref<4x1xf32, #tpu.memory_space<vmem>>, %arg8: memref<16x8xf32, #tpu.memory_space<vmem>>, %arg9: memref<16x8xf32, #tpu.memory_space<vmem>>, %arg10: memref<16x4xf32, #tpu.memory_space<vmem>>, %arg11: memref<16x1xf32, #tpu.memory_space<vmem>>, %arg12: memref<1024x4xf32, #tpu.memory_space<vmem>>, %arg13: memref<4x1024xf32, #tpu.memory_space<vmem>>, %arg14: memref<4x16x256xf32, #tpu.memory_space<vmem>>) attributes {dimension_semantics = [#tpu.dimension_semantics<parallel>], iteration_bounds = array<i64: 2>, scalar_prefetch = 0 : i64, scratch_operands = 0 : i64, tpu.core_type = #tpu.core_type<tc>, window_params = [{transform_indices = @transform_0, window_bounds = array<i64: 4, 4, 256>}, {pipeline_mode = #tpu.pipeline_mode<synchronous>, transform_indices = @transform_1, window_bounds = array<i64: 2, 1024>}, {pipeline_mode = #tpu.pipeline_mode<synchronous>, transform_indices = @transform_2, window_bounds = array<i64: 16, 4>}, {pipeline_mode = #tpu.pipeline_mode<synchronous>, transform_indices = @transform_3, window_bounds = array<i64: 16, 1>}, {pipeline_mode = #tpu.pipeline_mode<synchronous>, transform_indices = @transform_4, window_bounds = array<i64: 8, 58>}, {pipeline_mode = #tpu.pipeline_mode<synchronous>, transform_indices = @transform_5, window_bounds = array<i64: 4, 4>}, {pipeline_mode = #tpu.pipeline_mode<synchronous>, transform_indices = @transform_6, window_bounds = array<i64: 4, 1>}, {pipeline_mode = #tpu.pipeline_mode<synchronous>, transform_indices = @transform_7, window_bounds = array<i64: 16, 8>}, {pipeline_mode = #tpu.pipeline_mode<synchronous>, transform_indices = @transform_8, window_bounds = array<i64: 16, 8>}, {pipeline_mode = #tpu.pipeline_mode<synchronous>, transform_indices = @transform_9, window_bounds = array<i64: 16, 4>}, {pipeline_mode = #tpu.pipeline_mode<synchronous>, transform_indices = @transform_10, window_bounds = array<i64: 16, 1>}, {pipeline_mode = #tpu.pipeline_mode<synchronous>, transform_indices = @transform_11, window_bounds = array<i64: 1024, 4>}, {pipeline_mode = #tpu.pipeline_mode<synchronous>, transform_indices = @transform_12, window_bounds = array<i64: 4, 1024>}, {transform_indices = @transform_13, window_bounds = array<i64: 4, 16, 256>}]} {
    %c0 = arith.constant 0 : index
    %c0_0 = arith.constant 0 : index
    %c0_1 = arith.constant 0 : index
    %0 = vector.load %arg1[%c0, %c0_0, %c0_1] : memref<4x4x256xf32, #tpu.memory_space<vmem>>, vector<1x4x256xf32>
    %1 = vector.shape_cast %0 : vector<1x4x256xf32> to vector<4x256xf32>
    %c1 = arith.constant 1 : index
    %c0_2 = arith.constant 0 : index
    %c0_3 = arith.constant 0 : index
    %2 = vector.load %arg1[%c1, %c0_2, %c0_3] : memref<4x4x256xf32, #tpu.memory_space<vmem>>, vector<1x4x256xf32>
    %3 = vector.shape_cast %2 : vector<1x4x256xf32> to vector<4x256xf32>
    %c2 = arith.constant 2 : index
    %c0_4 = arith.constant 0 : index
    %c0_5 = arith.constant 0 : index
    %4 = vector.load %arg1[%c2, %c0_4, %c0_5] : memref<4x4x256xf32, #tpu.memory_space<vmem>>, vector<1x4x256xf32>
    %5 = vector.shape_cast %4 : vector<1x4x256xf32> to vector<4x256xf32>
    %c3 = arith.constant 3 : index
    %c0_6 = arith.constant 0 : index
    %c0_7 = arith.constant 0 : index
    %6 = vector.load %arg1[%c3, %c0_6, %c0_7] : memref<4x4x256xf32, #tpu.memory_space<vmem>>, vector<1x4x256xf32>
    %7 = vector.shape_cast %6 : vector<1x4x256xf32> to vector<4x256xf32>
    %8 = tpu.concatenate %1, %3, %5, %7 in 1 : vector<4x256xf32>, vector<4x256xf32>, vector<4x256xf32>, vector<4x256xf32> -> vector<4x1024xf32>
    %c0_8 = arith.constant 0 : index
    %c0_9 = arith.constant 0 : index
    %9 = vector.load %arg3[%c0_8, %c0_9] : memref<16x4xf32, #tpu.memory_space<vmem>>, vector<16x4xf32>
    %cst = arith.constant dense<0.000000e+00> : vector<16x1024xf32>
    %10 = tpu.matmul %9, %8, %cst {dimension_numbers = #tpu.dot_dimension_numbers<[1], [0], [0], [1], [0, 0, 1, 1], [], []>} : vector<16x4xf32>, vector<4x1024xf32>, vector<16x1024xf32> -> vector<16x1024xf32>
    %c0_10 = arith.constant 0 : index
    %c0_11 = arith.constant 0 : index
    %11 = vector.load %arg4[%c0_10, %c0_11] : memref<16x1xf32, #tpu.memory_space<vmem>>, vector<16x1xf32>
    %12 = vector.broadcast %11 : vector<16x1xf32> to vector<16x1024xf32>
    %13 = arith.addf %10, %12 : vector<16x1024xf32>
    %cst_12 = arith.constant 0.000000e+00 : f32
    %14 = vector.broadcast %cst_12 : f32 to vector<16x1024xf32>
    %15 = arith.maximumf %13, %14 : vector<16x1024xf32>
    %c0_13 = arith.constant 0 : index
    %c0_14 = arith.constant 0 : index
    %16 = vector.load %arg2[%c0_13, %c0_14] : memref<2x1024xi32, #tpu.memory_space<vmem>>, vector<1x1024xi32>
    %c1_15 = arith.constant 1 : index
    %c0_16 = arith.constant 0 : index
    %17 = vector.load %arg2[%c1_15, %c0_16] : memref<2x1024xi32, #tpu.memory_space<vmem>>, vector<1x1024xi32>
    %c3_i32 = arith.constant 3 : i32
    %18 = vector.broadcast %c3_i32 : i32 to vector<1x1024xi32>
    %19 = arith.cmpi sge, %16, %18 : vector<1x1024xi32>
    %c19_i32 = arith.constant 19 : i32
    %20 = vector.broadcast %c19_i32 : i32 to vector<1x1024xi32>
    %21 = arith.cmpi slt, %16, %20 : vector<1x1024xi32>
    %22 = arith.andi %19, %21 : vector<1x1024xi1>
    %c2_i32 = arith.constant 2 : i32
    %23 = vector.broadcast %c2_i32 : i32 to vector<1x1024xi32>
    %24 = arith.cmpi sge, %16, %23 : vector<1x1024xi32>
    %c18_i32 = arith.constant 18 : i32
    %25 = vector.broadcast %c18_i32 : i32 to vector<1x1024xi32>
    %26 = arith.cmpi slt, %16, %25 : vector<1x1024xi32>
    %27 = arith.andi %24, %26 : vector<1x1024xi1>
    %c1_i32 = arith.constant 1 : i32
    %28 = vector.broadcast %c1_i32 : i32 to vector<1x1024xi32>
    %29 = arith.cmpi sge, %16, %28 : vector<1x1024xi32>
    %c17_i32 = arith.constant 17 : i32
    %30 = vector.broadcast %c17_i32 : i32 to vector<1x1024xi32>
    %31 = arith.cmpi slt, %16, %30 : vector<1x1024xi32>
    %32 = arith.andi %29, %31 : vector<1x1024xi1>
    %c0_i32 = arith.constant 0 : i32
    %33 = vector.broadcast %c0_i32 : i32 to vector<1x1024xi32>
    %34 = arith.cmpi sge, %16, %33 : vector<1x1024xi32>
    %c16_i32 = arith.constant 16 : i32
    %35 = vector.broadcast %c16_i32 : i32 to vector<1x1024xi32>
    %36 = arith.cmpi slt, %16, %35 : vector<1x1024xi32>
    %37 = arith.andi %34, %36 : vector<1x1024xi1>
    %c-1_i32 = arith.constant -1 : i32
    %38 = vector.broadcast %c-1_i32 : i32 to vector<1x1024xi32>
    %39 = arith.cmpi sge, %16, %38 : vector<1x1024xi32>
    %c15_i32 = arith.constant 15 : i32
    %40 = vector.broadcast %c15_i32 : i32 to vector<1x1024xi32>
    %41 = arith.cmpi slt, %16, %40 : vector<1x1024xi32>
    %42 = arith.andi %39, %41 : vector<1x1024xi1>
    %c-2_i32 = arith.constant -2 : i32
    %43 = vector.broadcast %c-2_i32 : i32 to vector<1x1024xi32>
    %44 = arith.cmpi sge, %16, %43 : vector<1x1024xi32>
    %c14_i32 = arith.constant 14 : i32
    %45 = vector.broadcast %c14_i32 : i32 to vector<1x1024xi32>
    %46 = arith.cmpi slt, %16, %45 : vector<1x1024xi32>
    %47 = arith.andi %44, %46 : vector<1x1024xi1>
    %c-3_i32 = arith.constant -3 : i32
    %48 = vector.broadcast %c-3_i32 : i32 to vector<1x1024xi32>
    %49 = arith.cmpi sge, %16, %48 : vector<1x1024xi32>
    %c13_i32 = arith.constant 13 : i32
    %50 = vector.broadcast %c13_i32 : i32 to vector<1x1024xi32>
    %51 = arith.cmpi slt, %16, %50 : vector<1x1024xi32>
    %52 = arith.andi %49, %51 : vector<1x1024xi1>
    %c3_i32_17 = arith.constant 3 : i32
    %53 = vector.broadcast %c3_i32_17 : i32 to vector<1x1024xi32>
    %54 = arith.cmpi sge, %17, %53 : vector<1x1024xi32>
    %c19_i32_18 = arith.constant 19 : i32
    %55 = vector.broadcast %c19_i32_18 : i32 to vector<1x1024xi32>
    %56 = arith.cmpi slt, %17, %55 : vector<1x1024xi32>
    %57 = arith.andi %54, %56 : vector<1x1024xi1>
    %c2_i32_19 = arith.constant 2 : i32
    %58 = vector.broadcast %c2_i32_19 : i32 to vector<1x1024xi32>
    %59 = arith.cmpi sge, %17, %58 : vector<1x1024xi32>
    %c18_i32_20 = arith.constant 18 : i32
    %60 = vector.broadcast %c18_i32_20 : i32 to vector<1x1024xi32>
    %61 = arith.cmpi slt, %17, %60 : vector<1x1024xi32>
    %62 = arith.andi %59, %61 : vector<1x1024xi1>
    %c1_i32_21 = arith.constant 1 : i32
    %63 = vector.broadcast %c1_i32_21 : i32 to vector<1x1024xi32>
    %64 = arith.cmpi sge, %17, %63 : vector<1x1024xi32>
    %c17_i32_22 = arith.constant 17 : i32
    %65 = vector.broadcast %c17_i32_22 : i32 to vector<1x1024xi32>
    %66 = arith.cmpi slt, %17, %65 : vector<1x1024xi32>
    %67 = arith.andi %64, %66 : vector<1x1024xi1>
    %c0_i32_23 = arith.constant 0 : i32
    %68 = vector.broadcast %c0_i32_23 : i32 to vector<1x1024xi32>
    %69 = arith.cmpi sge, %17, %68 : vector<1x1024xi32>
    %c16_i32_24 = arith.constant 16 : i32
    %70 = vector.broadcast %c16_i32_24 : i32 to vector<1x1024xi32>
    %71 = arith.cmpi slt, %17, %70 : vector<1x1024xi32>
    %72 = arith.andi %69, %71 : vector<1x1024xi1>
    %c-1_i32_25 = arith.constant -1 : i32
    %73 = vector.broadcast %c-1_i32_25 : i32 to vector<1x1024xi32>
    %74 = arith.cmpi sge, %17, %73 : vector<1x1024xi32>
    %c15_i32_26 = arith.constant 15 : i32
    %75 = vector.broadcast %c15_i32_26 : i32 to vector<1x1024xi32>
    %76 = arith.cmpi slt, %17, %75 : vector<1x1024xi32>
    %77 = arith.andi %74, %76 : vector<1x1024xi1>
    %c-2_i32_27 = arith.constant -2 : i32
    %78 = vector.broadcast %c-2_i32_27 : i32 to vector<1x1024xi32>
    %79 = arith.cmpi sge, %17, %78 : vector<1x1024xi32>
    %c14_i32_28 = arith.constant 14 : i32
    %80 = vector.broadcast %c14_i32_28 : i32 to vector<1x1024xi32>
    %81 = arith.cmpi slt, %17, %80 : vector<1x1024xi32>
    %82 = arith.andi %79, %81 : vector<1x1024xi1>
    %c-3_i32_29 = arith.constant -3 : i32
    %83 = vector.broadcast %c-3_i32_29 : i32 to vector<1x1024xi32>
    %84 = arith.cmpi sge, %17, %83 : vector<1x1024xi32>
    %c13_i32_30 = arith.constant 13 : i32
    %85 = vector.broadcast %c13_i32_30 : i32 to vector<1x1024xi32>
    %86 = arith.cmpi slt, %17, %85 : vector<1x1024xi32>
    %87 = arith.andi %84, %86 : vector<1x1024xi1>
    %c0_31 = arith.constant 0 : index
    %c0_32 = arith.constant 0 : index
    %88 = vector.load %arg5[%c0_31, %c0_32] : memref<8x58xf32, #tpu.memory_space<vmem>>, vector<8x58xf32>
    %89 = vector.extract_strided_slice %15 {offsets = [0, 0], sizes = [8, 1024], strides = [1, 1]} : vector<16x1024xf32> to vector<8x1024xf32>
    %cst_33 = arith.constant 0.000000e+00 : f32
    %90 = vector.broadcast %cst_33 : f32 to vector<8x1024xf32>
    %c51_i32 = arith.constant 51 : i32
    %91 = tpu.dynamic_rotate %89 by %c51_i32 dim 1 : vector<8x1024xf32>, i32 -> vector<8x1024xf32>
    %92 = arith.andi %22, %57 : vector<1x1024xi1>
    %93 = vector.extract_strided_slice %88 {offsets = [0, 0], sizes = [8, 1], strides = [1, 1]} : vector<8x58xf32> to vector<8x1xf32>
    %cst_34 = arith.constant 0.000000e+00 : f32
    %94 = vector.shape_cast %92 : vector<1x1024xi1> to vector<1x1024xi1>
    %95 = vector.broadcast %94 : vector<1x1024xi1> to vector<8x1024xi1>
    %96 = vector.broadcast %cst_34 : f32 to vector<8x1024xf32>
    %97 = arith.select %95, %91, %96 : vector<8x1024xi1>, vector<8x1024xf32>
    %98 = vector.broadcast %93 : vector<8x1xf32> to vector<8x1024xf32>
    %99 = arith.mulf %98, %97 : vector<8x1024xf32>
    %100 = arith.addf %90, %99 : vector<8x1024xf32>
    %c50_i32 = arith.constant 50 : i32
    %101 = tpu.dynamic_rotate %89 by %c50_i32 dim 1 : vector<8x1024xf32>, i32 -> vector<8x1024xf32>
    %102 = arith.andi %22, %62 : vector<1x1024xi1>
    %103 = vector.extract_strided_slice %88 {offsets = [0, 1], sizes = [8, 1], strides = [1, 1]} : vector<8x58xf32> to vector<8x1xf32>
    %cst_35 = arith.constant 0.000000e+00 : f32
    %104 = vector.shape_cast %102 : vector<1x1024xi1> to vector<1x1024xi1>
    %105 = vector.broadcast %104 : vector<1x1024xi1> to vector<8x1024xi1>
    %106 = vector.broadcast %cst_35 : f32 to vector<8x1024xf32>
    %107 = arith.select %105, %101, %106 : vector<8x1024xi1>, vector<8x1024xf32>
    %108 = vector.broadcast %103 : vector<8x1xf32> to vector<8x1024xf32>
    %109 = arith.mulf %108, %107 : vector<8x1024xf32>
    %110 = arith.addf %100, %109 : vector<8x1024xf32>
    %c49_i32 = arith.constant 49 : i32
    %111 = tpu.dynamic_rotate %89 by %c49_i32 dim 1 : vector<8x1024xf32>, i32 -> vector<8x1024xf32>
    %112 = arith.andi %22, %67 : vector<1x1024xi1>
    %113 = vector.extract_strided_slice %88 {offsets = [0, 2], sizes = [8, 1], strides = [1, 1]} : vector<8x58xf32> to vector<8x1xf32>
    %cst_36 = arith.constant 0.000000e+00 : f32
    %114 = vector.shape_cast %112 : vector<1x1024xi1> to vector<1x1024xi1>
    %115 = vector.broadcast %114 : vector<1x1024xi1> to vector<8x1024xi1>
    %116 = vector.broadcast %cst_36 : f32 to vector<8x1024xf32>
    %117 = arith.select %115, %111, %116 : vector<8x1024xi1>, vector<8x1024xf32>
    %118 = vector.broadcast %113 : vector<8x1xf32> to vector<8x1024xf32>
    %119 = arith.mulf %118, %117 : vector<8x1024xf32>
    %120 = arith.addf %110, %119 : vector<8x1024xf32>
    %c48_i32 = arith.constant 48 : i32
    %121 = tpu.dynamic_rotate %89 by %c48_i32 dim 1 : vector<8x1024xf32>, i32 -> vector<8x1024xf32>
    %122 = arith.andi %22, %72 : vector<1x1024xi1>
    %123 = vector.extract_strided_slice %88 {offsets = [0, 3], sizes = [8, 1], strides = [1, 1]} : vector<8x58xf32> to vector<8x1xf32>
    %cst_37 = arith.constant 0.000000e+00 : f32
    %124 = vector.shape_cast %122 : vector<1x1024xi1> to vector<1x1024xi1>
    %125 = vector.broadcast %124 : vector<1x1024xi1> to vector<8x1024xi1>
    %126 = vector.broadcast %cst_37 : f32 to vector<8x1024xf32>
    %127 = arith.select %125, %121, %126 : vector<8x1024xi1>, vector<8x1024xf32>
    %128 = vector.broadcast %123 : vector<8x1xf32> to vector<8x1024xf32>
    %129 = arith.mulf %128, %127 : vector<8x1024xf32>
    %130 = arith.addf %120, %129 : vector<8x1024xf32>
    %c47_i32 = arith.constant 47 : i32
    %131 = tpu.dynamic_rotate %89 by %c47_i32 dim 1 : vector<8x1024xf32>, i32 -> vector<8x1024xf32>
    %132 = arith.andi %22, %77 : vector<1x1024xi1>
    %133 = vector.extract_strided_slice %88 {offsets = [0, 4], sizes = [8, 1], strides = [1, 1]} : vector<8x58xf32> to vector<8x1xf32>
    %cst_38 = arith.constant 0.000000e+00 : f32
    %134 = vector.shape_cast %132 : vector<1x1024xi1> to vector<1x1024xi1>
    %135 = vector.broadcast %134 : vector<1x1024xi1> to vector<8x1024xi1>
    %136 = vector.broadcast %cst_38 : f32 to vector<8x1024xf32>
    %137 = arith.select %135, %131, %136 : vector<8x1024xi1>, vector<8x1024xf32>
    %138 = vector.broadcast %133 : vector<8x1xf32> to vector<8x1024xf32>
    %139 = arith.mulf %138, %137 : vector<8x1024xf32>
    %140 = arith.addf %130, %139 : vector<8x1024xf32>
    %c46_i32 = arith.constant 46 : i32
    %141 = tpu.dynamic_rotate %89 by %c46_i32 dim 1 : vector<8x1024xf32>, i32 -> vector<8x1024xf32>
    %142 = arith.andi %22, %82 : vector<1x1024xi1>
    %143 = vector.extract_strided_slice %88 {offsets = [0, 5], sizes = [8, 1], strides = [1, 1]} : vector<8x58xf32> to vector<8x1xf32>
    %cst_39 = arith.constant 0.000000e+00 : f32
    %144 = vector.shape_cast %142 : vector<1x1024xi1> to vector<1x1024xi1>
    %145 = vector.broadcast %144 : vector<1x1024xi1> to vector<8x1024xi1>
    %146 = vector.broadcast %cst_39 : f32 to vector<8x1024xf32>
    %147 = arith.select %145, %141, %146 : vector<8x1024xi1>, vector<8x1024xf32>
    %148 = vector.broadcast %143 : vector<8x1xf32> to vector<8x1024xf32>
    %149 = arith.mulf %148, %147 : vector<8x1024xf32>
    %150 = arith.addf %140, %149 : vector<8x1024xf32>
    %c45_i32 = arith.constant 45 : i32
    %151 = tpu.dynamic_rotate %89 by %c45_i32 dim 1 : vector<8x1024xf32>, i32 -> vector<8x1024xf32>
    %152 = arith.andi %22, %87 : vector<1x1024xi1>
    %153 = vector.extract_strided_slice %88 {offsets = [0, 6], sizes = [8, 1], strides = [1, 1]} : vector<8x58xf32> to vector<8x1xf32>
    %cst_40 = arith.constant 0.000000e+00 : f32
    %154 = vector.shape_cast %152 : vector<1x1024xi1> to vector<1x1024xi1>
    %155 = vector.broadcast %154 : vector<1x1024xi1> to vector<8x1024xi1>
    %156 = vector.broadcast %cst_40 : f32 to vector<8x1024xf32>
    %157 = arith.select %155, %151, %156 : vector<8x1024xi1>, vector<8x1024xf32>
    %158 = vector.broadcast %153 : vector<8x1xf32> to vector<8x1024xf32>
    %159 = arith.mulf %158, %157 : vector<8x1024xf32>
    %160 = arith.addf %150, %159 : vector<8x1024xf32>
    %c35_i32 = arith.constant 35 : i32
    %161 = tpu.dynamic_rotate %89 by %c35_i32 dim 1 : vector<8x1024xf32>, i32 -> vector<8x1024xf32>
    %162 = arith.andi %27, %57 : vector<1x1024xi1>
    %163 = vector.extract_strided_slice %88 {offsets = [0, 7], sizes = [8, 1], strides = [1, 1]} : vector<8x58xf32> to vector<8x1xf32>
    %cst_41 = arith.constant 0.000000e+00 : f32
    %164 = vector.shape_cast %162 : vector<1x1024xi1> to vector<1x1024xi1>
    %165 = vector.broadcast %164 : vector<1x1024xi1> to vector<8x1024xi1>
    %166 = vector.broadcast %cst_41 : f32 to vector<8x1024xf32>
    %167 = arith.select %165, %161, %166 : vector<8x1024xi1>, vector<8x1024xf32>
    %168 = vector.broadcast %163 : vector<8x1xf32> to vector<8x1024xf32>
    %169 = arith.mulf %168, %167 : vector<8x1024xf32>
    %170 = arith.addf %160, %169 : vector<8x1024xf32>
    %c34_i32 = arith.constant 34 : i32
    %171 = tpu.dynamic_rotate %89 by %c34_i32 dim 1 : vector<8x1024xf32>, i32 -> vector<8x1024xf32>
    %172 = arith.andi %27, %62 : vector<1x1024xi1>
    %173 = vector.extract_strided_slice %88 {offsets = [0, 8], sizes = [8, 1], strides = [1, 1]} : vector<8x58xf32> to vector<8x1xf32>
    %cst_42 = arith.constant 0.000000e+00 : f32
    %174 = vector.shape_cast %172 : vector<1x1024xi1> to vector<1x1024xi1>
    %175 = vector.broadcast %174 : vector<1x1024xi1> to vector<8x1024xi1>
    %176 = vector.broadcast %cst_42 : f32 to vector<8x1024xf32>
    %177 = arith.select %175, %171, %176 : vector<8x1024xi1>, vector<8x1024xf32>
    %178 = vector.broadcast %173 : vector<8x1xf32> to vector<8x1024xf32>
    %179 = arith.mulf %178, %177 : vector<8x1024xf32>
    %180 = arith.addf %170, %179 : vector<8x1024xf32>
    %c33_i32 = arith.constant 33 : i32
    %181 = tpu.dynamic_rotate %89 by %c33_i32 dim 1 : vector<8x1024xf32>, i32 -> vector<8x1024xf32>
    %182 = arith.andi %27, %67 : vector<1x1024xi1>
    %183 = vector.extract_strided_slice %88 {offsets = [0, 9], sizes = [8, 1], strides = [1, 1]} : vector<8x58xf32> to vector<8x1xf32>
    %cst_43 = arith.constant 0.000000e+00 : f32
    %184 = vector.shape_cast %182 : vector<1x1024xi1> to vector<1x1024xi1>
    %185 = vector.broadcast %184 : vector<1x1024xi1> to vector<8x1024xi1>
    %186 = vector.broadcast %cst_43 : f32 to vector<8x1024xf32>
    %187 = arith.select %185, %181, %186 : vector<8x1024xi1>, vector<8x1024xf32>
    %188 = vector.broadcast %183 : vector<8x1xf32> to vector<8x1024xf32>
    %189 = arith.mulf %188, %187 : vector<8x1024xf32>
    %190 = arith.addf %180, %189 : vector<8x1024xf32>
    %c32_i32 = arith.constant 32 : i32
    %191 = tpu.dynamic_rotate %89 by %c32_i32 dim 1 : vector<8x1024xf32>, i32 -> vector<8x1024xf32>
    %192 = arith.andi %27, %72 : vector<1x1024xi1>
    %193 = vector.extract_strided_slice %88 {offsets = [0, 10], sizes = [8, 1], strides = [1, 1]} : vector<8x58xf32> to vector<8x1xf32>
    %cst_44 = arith.constant 0.000000e+00 : f32
    %194 = vector.shape_cast %192 : vector<1x1024xi1> to vector<1x1024xi1>
    %195 = vector.broadcast %194 : vector<1x1024xi1> to vector<8x1024xi1>
    %196 = vector.broadcast %cst_44 : f32 to vector<8x1024xf32>
    %197 = arith.select %195, %191, %196 : vector<8x1024xi1>, vector<8x1024xf32>
    %198 = vector.broadcast %193 : vector<8x1xf32> to vector<8x1024xf32>
    %199 = arith.mulf %198, %197 : vector<8x1024xf32>
    %200 = arith.addf %190, %199 : vector<8x1024xf32>
    %c31_i32 = arith.constant 31 : i32
    %201 = tpu.dynamic_rotate %89 by %c31_i32 dim 1 : vector<8x1024xf32>, i32 -> vector<8x1024xf32>
    %202 = arith.andi %27, %77 : vector<1x1024xi1>
    %203 = vector.extract_strided_slice %88 {offsets = [0, 11], sizes = [8, 1], strides = [1, 1]} : vector<8x58xf32> to vector<8x1xf32>
    %cst_45 = arith.constant 0.000000e+00 : f32
    %204 = vector.shape_cast %202 : vector<1x1024xi1> to vector<1x1024xi1>
    %205 = vector.broadcast %204 : vector<1x1024xi1> to vector<8x1024xi1>
    %206 = vector.broadcast %cst_45 : f32 to vector<8x1024xf32>
    %207 = arith.select %205, %201, %206 : vector<8x1024xi1>, vector<8x1024xf32>
    %208 = vector.broadcast %203 : vector<8x1xf32> to vector<8x1024xf32>
    %209 = arith.mulf %208, %207 : vector<8x1024xf32>
    %210 = arith.addf %200, %209 : vector<8x1024xf32>
    %c30_i32 = arith.constant 30 : i32
    %211 = tpu.dynamic_rotate %89 by %c30_i32 dim 1 : vector<8x1024xf32>, i32 -> vector<8x1024xf32>
    %212 = arith.andi %27, %82 : vector<1x1024xi1>
    %213 = vector.extract_strided_slice %88 {offsets = [0, 12], sizes = [8, 1], strides = [1, 1]} : vector<8x58xf32> to vector<8x1xf32>
    %cst_46 = arith.constant 0.000000e+00 : f32
    %214 = vector.shape_cast %212 : vector<1x1024xi1> to vector<1x1024xi1>
    %215 = vector.broadcast %214 : vector<1x1024xi1> to vector<8x1024xi1>
    %216 = vector.broadcast %cst_46 : f32 to vector<8x1024xf32>
    %217 = arith.select %215, %211, %216 : vector<8x1024xi1>, vector<8x1024xf32>
    %218 = vector.broadcast %213 : vector<8x1xf32> to vector<8x1024xf32>
    %219 = arith.mulf %218, %217 : vector<8x1024xf32>
    %220 = arith.addf %210, %219 : vector<8x1024xf32>
    %c29_i32 = arith.constant 29 : i32
    %221 = tpu.dynamic_rotate %89 by %c29_i32 dim 1 : vector<8x1024xf32>, i32 -> vector<8x1024xf32>
    %222 = arith.andi %27, %87 : vector<1x1024xi1>
    %223 = vector.extract_strided_slice %88 {offsets = [0, 13], sizes = [8, 1], strides = [1, 1]} : vector<8x58xf32> to vector<8x1xf32>
    %cst_47 = arith.constant 0.000000e+00 : f32
    %224 = vector.shape_cast %222 : vector<1x1024xi1> to vector<1x1024xi1>
    %225 = vector.broadcast %224 : vector<1x1024xi1> to vector<8x1024xi1>
    %226 = vector.broadcast %cst_47 : f32 to vector<8x1024xf32>
    %227 = arith.select %225, %221, %226 : vector<8x1024xi1>, vector<8x1024xf32>
    %228 = vector.broadcast %223 : vector<8x1xf32> to vector<8x1024xf32>
    %229 = arith.mulf %228, %227 : vector<8x1024xf32>
    %230 = arith.addf %220, %229 : vector<8x1024xf32>
    %c19_i32_48 = arith.constant 19 : i32
    %231 = tpu.dynamic_rotate %89 by %c19_i32_48 dim 1 : vector<8x1024xf32>, i32 -> vector<8x1024xf32>
    %232 = arith.andi %32, %57 : vector<1x1024xi1>
    %233 = vector.extract_strided_slice %88 {offsets = [0, 14], sizes = [8, 1], strides = [1, 1]} : vector<8x58xf32> to vector<8x1xf32>
    %cst_49 = arith.constant 0.000000e+00 : f32
    %234 = vector.shape_cast %232 : vector<1x1024xi1> to vector<1x1024xi1>
    %235 = vector.broadcast %234 : vector<1x1024xi1> to vector<8x1024xi1>
    %236 = vector.broadcast %cst_49 : f32 to vector<8x1024xf32>
    %237 = arith.select %235, %231, %236 : vector<8x1024xi1>, vector<8x1024xf32>
    %238 = vector.broadcast %233 : vector<8x1xf32> to vector<8x1024xf32>
    %239 = arith.mulf %238, %237 : vector<8x1024xf32>
    %240 = arith.addf %230, %239 : vector<8x1024xf32>
    %c18_i32_50 = arith.constant 18 : i32
    %241 = tpu.dynamic_rotate %89 by %c18_i32_50 dim 1 : vector<8x1024xf32>, i32 -> vector<8x1024xf32>
    %242 = arith.andi %32, %62 : vector<1x1024xi1>
    %243 = vector.extract_strided_slice %88 {offsets = [0, 15], sizes = [8, 1], strides = [1, 1]} : vector<8x58xf32> to vector<8x1xf32>
    %cst_51 = arith.constant 0.000000e+00 : f32
    %244 = vector.shape_cast %242 : vector<1x1024xi1> to vector<1x1024xi1>
    %245 = vector.broadcast %244 : vector<1x1024xi1> to vector<8x1024xi1>
    %246 = vector.broadcast %cst_51 : f32 to vector<8x1024xf32>
    %247 = arith.select %245, %241, %246 : vector<8x1024xi1>, vector<8x1024xf32>
    %248 = vector.broadcast %243 : vector<8x1xf32> to vector<8x1024xf32>
    %249 = arith.mulf %248, %247 : vector<8x1024xf32>
    %250 = arith.addf %240, %249 : vector<8x1024xf32>
    %c17_i32_52 = arith.constant 17 : i32
    %251 = tpu.dynamic_rotate %89 by %c17_i32_52 dim 1 : vector<8x1024xf32>, i32 -> vector<8x1024xf32>
    %252 = arith.andi %32, %67 : vector<1x1024xi1>
    %253 = vector.extract_strided_slice %88 {offsets = [0, 16], sizes = [8, 1], strides = [1, 1]} : vector<8x58xf32> to vector<8x1xf32>
    %cst_53 = arith.constant 0.000000e+00 : f32
    %254 = vector.shape_cast %252 : vector<1x1024xi1> to vector<1x1024xi1>
    %255 = vector.broadcast %254 : vector<1x1024xi1> to vector<8x1024xi1>
    %256 = vector.broadcast %cst_53 : f32 to vector<8x1024xf32>
    %257 = arith.select %255, %251, %256 : vector<8x1024xi1>, vector<8x1024xf32>
    %258 = vector.broadcast %253 : vector<8x1xf32> to vector<8x1024xf32>
    %259 = arith.mulf %258, %257 : vector<8x1024xf32>
    %260 = arith.addf %250, %259 : vector<8x1024xf32>
    %c16_i32_54 = arith.constant 16 : i32
    %261 = tpu.dynamic_rotate %89 by %c16_i32_54 dim 1 : vector<8x1024xf32>, i32 -> vector<8x1024xf32>
    %262 = arith.andi %32, %72 : vector<1x1024xi1>
    %263 = vector.extract_strided_slice %88 {offsets = [0, 17], sizes = [8, 1], strides = [1, 1]} : vector<8x58xf32> to vector<8x1xf32>
    %cst_55 = arith.constant 0.000000e+00 : f32
    %264 = vector.shape_cast %262 : vector<1x1024xi1> to vector<1x1024xi1>
    %265 = vector.broadcast %264 : vector<1x1024xi1> to vector<8x1024xi1>
    %266 = vector.broadcast %cst_55 : f32 to vector<8x1024xf32>
    %267 = arith.select %265, %261, %266 : vector<8x1024xi1>, vector<8x1024xf32>
    %268 = vector.broadcast %263 : vector<8x1xf32> to vector<8x1024xf32>
    %269 = arith.mulf %268, %267 : vector<8x1024xf32>
    %270 = arith.addf %260, %269 : vector<8x1024xf32>
    %c15_i32_56 = arith.constant 15 : i32
    %271 = tpu.dynamic_rotate %89 by %c15_i32_56 dim 1 : vector<8x1024xf32>, i32 -> vector<8x1024xf32>
    %272 = arith.andi %32, %77 : vector<1x1024xi1>
    %273 = vector.extract_strided_slice %88 {offsets = [0, 18], sizes = [8, 1], strides = [1, 1]} : vector<8x58xf32> to vector<8x1xf32>
    %cst_57 = arith.constant 0.000000e+00 : f32
    %274 = vector.shape_cast %272 : vector<1x1024xi1> to vector<1x1024xi1>
    %275 = vector.broadcast %274 : vector<1x1024xi1> to vector<8x1024xi1>
    %276 = vector.broadcast %cst_57 : f32 to vector<8x1024xf32>
    %277 = arith.select %275, %271, %276 : vector<8x1024xi1>, vector<8x1024xf32>
    %278 = vector.broadcast %273 : vector<8x1xf32> to vector<8x1024xf32>
    %279 = arith.mulf %278, %277 : vector<8x1024xf32>
    %280 = arith.addf %270, %279 : vector<8x1024xf32>
    %c14_i32_58 = arith.constant 14 : i32
    %281 = tpu.dynamic_rotate %89 by %c14_i32_58 dim 1 : vector<8x1024xf32>, i32 -> vector<8x1024xf32>
    %282 = arith.andi %32, %82 : vector<1x1024xi1>
    %283 = vector.extract_strided_slice %88 {offsets = [0, 19], sizes = [8, 1], strides = [1, 1]} : vector<8x58xf32> to vector<8x1xf32>
    %cst_59 = arith.constant 0.000000e+00 : f32
    %284 = vector.shape_cast %282 : vector<1x1024xi1> to vector<1x1024xi1>
    %285 = vector.broadcast %284 : vector<1x1024xi1> to vector<8x1024xi1>
    %286 = vector.broadcast %cst_59 : f32 to vector<8x1024xf32>
    %287 = arith.select %285, %281, %286 : vector<8x1024xi1>, vector<8x1024xf32>
    %288 = vector.broadcast %283 : vector<8x1xf32> to vector<8x1024xf32>
    %289 = arith.mulf %288, %287 : vector<8x1024xf32>
    %290 = arith.addf %280, %289 : vector<8x1024xf32>
    %c13_i32_60 = arith.constant 13 : i32
    %291 = tpu.dynamic_rotate %89 by %c13_i32_60 dim 1 : vector<8x1024xf32>, i32 -> vector<8x1024xf32>
    %292 = arith.andi %32, %87 : vector<1x1024xi1>
    %293 = vector.extract_strided_slice %88 {offsets = [0, 20], sizes = [8, 1], strides = [1, 1]} : vector<8x58xf32> to vector<8x1xf32>
    %cst_61 = arith.constant 0.000000e+00 : f32
    %294 = vector.shape_cast %292 : vector<1x1024xi1> to vector<1x1024xi1>
    %295 = vector.broadcast %294 : vector<1x1024xi1> to vector<8x1024xi1>
    %296 = vector.broadcast %cst_61 : f32 to vector<8x1024xf32>
    %297 = arith.select %295, %291, %296 : vector<8x1024xi1>, vector<8x1024xf32>
    %298 = vector.broadcast %293 : vector<8x1xf32> to vector<8x1024xf32>
    %299 = arith.mulf %298, %297 : vector<8x1024xf32>
    %300 = arith.addf %290, %299 : vector<8x1024xf32>
    %c3_i32_62 = arith.constant 3 : i32
    %301 = tpu.dynamic_rotate %89 by %c3_i32_62 dim 1 : vector<8x1024xf32>, i32 -> vector<8x1024xf32>
    %302 = arith.andi %37, %57 : vector<1x1024xi1>
    %303 = vector.extract_strided_slice %88 {offsets = [0, 21], sizes = [8, 1], strides = [1, 1]} : vector<8x58xf32> to vector<8x1xf32>
    %cst_63 = arith.constant 0.000000e+00 : f32
    %304 = vector.shape_cast %302 : vector<1x1024xi1> to vector<1x1024xi1>
    %305 = vector.broadcast %304 : vector<1x1024xi1> to vector<8x1024xi1>
    %306 = vector.broadcast %cst_63 : f32 to vector<8x1024xf32>
    %307 = arith.select %305, %301, %306 : vector<8x1024xi1>, vector<8x1024xf32>
    %308 = vector.broadcast %303 : vector<8x1xf32> to vector<8x1024xf32>
    %309 = arith.mulf %308, %307 : vector<8x1024xf32>
    %310 = arith.addf %300, %309 : vector<8x1024xf32>
    %c2_i32_64 = arith.constant 2 : i32
    %311 = tpu.dynamic_rotate %89 by %c2_i32_64 dim 1 : vector<8x1024xf32>, i32 -> vector<8x1024xf32>
    %312 = arith.andi %37, %62 : vector<1x1024xi1>
    %313 = vector.extract_strided_slice %88 {offsets = [0, 22], sizes = [8, 1], strides = [1, 1]} : vector<8x58xf32> to vector<8x1xf32>
    %cst_65 = arith.constant 0.000000e+00 : f32
    %314 = vector.shape_cast %312 : vector<1x1024xi1> to vector<1x1024xi1>
    %315 = vector.broadcast %314 : vector<1x1024xi1> to vector<8x1024xi1>
    %316 = vector.broadcast %cst_65 : f32 to vector<8x1024xf32>
    %317 = arith.select %315, %311, %316 : vector<8x1024xi1>, vector<8x1024xf32>
    %318 = vector.broadcast %313 : vector<8x1xf32> to vector<8x1024xf32>
    %319 = arith.mulf %318, %317 : vector<8x1024xf32>
    %320 = arith.addf %310, %319 : vector<8x1024xf32>
    %c1_i32_66 = arith.constant 1 : i32
    %321 = tpu.dynamic_rotate %89 by %c1_i32_66 dim 1 : vector<8x1024xf32>, i32 -> vector<8x1024xf32>
    %322 = arith.andi %37, %67 : vector<1x1024xi1>
    %323 = vector.extract_strided_slice %88 {offsets = [0, 23], sizes = [8, 1], strides = [1, 1]} : vector<8x58xf32> to vector<8x1xf32>
    %cst_67 = arith.constant 0.000000e+00 : f32
    %324 = vector.shape_cast %322 : vector<1x1024xi1> to vector<1x1024xi1>
    %325 = vector.broadcast %324 : vector<1x1024xi1> to vector<8x1024xi1>
    %326 = vector.broadcast %cst_67 : f32 to vector<8x1024xf32>
    %327 = arith.select %325, %321, %326 : vector<8x1024xi1>, vector<8x1024xf32>
    %328 = vector.broadcast %323 : vector<8x1xf32> to vector<8x1024xf32>
    %329 = arith.mulf %328, %327 : vector<8x1024xf32>
    %330 = arith.addf %320, %329 : vector<8x1024xf32>
    %331 = arith.andi %37, %72 : vector<1x1024xi1>
    %332 = vector.extract_strided_slice %88 {offsets = [0, 24], sizes = [8, 1], strides = [1, 1]} : vector<8x58xf32> to vector<8x1xf32>
    %cst_68 = arith.constant 0.000000e+00 : f32
    %333 = vector.shape_cast %331 : vector<1x1024xi1> to vector<1x1024xi1>
    %334 = vector.broadcast %333 : vector<1x1024xi1> to vector<8x1024xi1>
    %335 = vector.broadcast %cst_68 : f32 to vector<8x1024xf32>
    %336 = arith.select %334, %89, %335 : vector<8x1024xi1>, vector<8x1024xf32>
    %337 = vector.broadcast %332 : vector<8x1xf32> to vector<8x1024xf32>
    %338 = arith.mulf %337, %336 : vector<8x1024xf32>
    %339 = arith.addf %330, %338 : vector<8x1024xf32>
    %c1023_i32 = arith.constant 1023 : i32
    %340 = tpu.dynamic_rotate %89 by %c1023_i32 dim 1 : vector<8x1024xf32>, i32 -> vector<8x1024xf32>
    %341 = arith.andi %37, %77 : vector<1x1024xi1>
    %342 = vector.extract_strided_slice %88 {offsets = [0, 25], sizes = [8, 1], strides = [1, 1]} : vector<8x58xf32> to vector<8x1xf32>
    %cst_69 = arith.constant 0.000000e+00 : f32
    %343 = vector.shape_cast %341 : vector<1x1024xi1> to vector<1x1024xi1>
    %344 = vector.broadcast %343 : vector<1x1024xi1> to vector<8x1024xi1>
    %345 = vector.broadcast %cst_69 : f32 to vector<8x1024xf32>
    %346 = arith.select %344, %340, %345 : vector<8x1024xi1>, vector<8x1024xf32>
    %347 = vector.broadcast %342 : vector<8x1xf32> to vector<8x1024xf32>
    %348 = arith.mulf %347, %346 : vector<8x1024xf32>
    %349 = arith.addf %339, %348 : vector<8x1024xf32>
    %c1022_i32 = arith.constant 1022 : i32
    %350 = tpu.dynamic_rotate %89 by %c1022_i32 dim 1 : vector<8x1024xf32>, i32 -> vector<8x1024xf32>
    %351 = arith.andi %37, %82 : vector<1x1024xi1>
    %352 = vector.extract_strided_slice %88 {offsets = [0, 26], sizes = [8, 1], strides = [1, 1]} : vector<8x58xf32> to vector<8x1xf32>
    %cst_70 = arith.constant 0.000000e+00 : f32
    %353 = vector.shape_cast %351 : vector<1x1024xi1> to vector<1x1024xi1>
    %354 = vector.broadcast %353 : vector<1x1024xi1> to vector<8x1024xi1>
    %355 = vector.broadcast %cst_70 : f32 to vector<8x1024xf32>
    %356 = arith.select %354, %350, %355 : vector<8x1024xi1>, vector<8x1024xf32>
    %357 = vector.broadcast %352 : vector<8x1xf32> to vector<8x1024xf32>
    %358 = arith.mulf %357, %356 : vector<8x1024xf32>
    %359 = arith.addf %349, %358 : vector<8x1024xf32>
    %c1021_i32 = arith.constant 1021 : i32
    %360 = tpu.dynamic_rotate %89 by %c1021_i32 dim 1 : vector<8x1024xf32>, i32 -> vector<8x1024xf32>
    %361 = arith.andi %37, %87 : vector<1x1024xi1>
    %362 = vector.extract_strided_slice %88 {offsets = [0, 27], sizes = [8, 1], strides = [1, 1]} : vector<8x58xf32> to vector<8x1xf32>
    %cst_71 = arith.constant 0.000000e+00 : f32
    %363 = vector.shape_cast %361 : vector<1x1024xi1> to vector<1x1024xi1>
    %364 = vector.broadcast %363 : vector<1x1024xi1> to vector<8x1024xi1>
    %365 = vector.broadcast %cst_71 : f32 to vector<8x1024xf32>
    %366 = arith.select %364, %360, %365 : vector<8x1024xi1>, vector<8x1024xf32>
    %367 = vector.broadcast %362 : vector<8x1xf32> to vector<8x1024xf32>
    %368 = arith.mulf %367, %366 : vector<8x1024xf32>
    %369 = arith.addf %359, %368 : vector<8x1024xf32>
    %c1011_i32 = arith.constant 1011 : i32
    %370 = tpu.dynamic_rotate %89 by %c1011_i32 dim 1 : vector<8x1024xf32>, i32 -> vector<8x1024xf32>
    %371 = arith.andi %42, %57 : vector<1x1024xi1>
    %372 = vector.extract_strided_slice %88 {offsets = [0, 28], sizes = [8, 1], strides = [1, 1]} : vector<8x58xf32> to vector<8x1xf32>
    %cst_72 = arith.constant 0.000000e+00 : f32
    %373 = vector.shape_cast %371 : vector<1x1024xi1> to vector<1x1024xi1>
    %374 = vector.broadcast %373 : vector<1x1024xi1> to vector<8x1024xi1>
    %375 = vector.broadcast %cst_72 : f32 to vector<8x1024xf32>
    %376 = arith.select %374, %370, %375 : vector<8x1024xi1>, vector<8x1024xf32>
    %377 = vector.broadcast %372 : vector<8x1xf32> to vector<8x1024xf32>
    %378 = arith.mulf %377, %376 : vector<8x1024xf32>
    %379 = arith.addf %369, %378 : vector<8x1024xf32>
    %c1010_i32 = arith.constant 1010 : i32
    %380 = tpu.dynamic_rotate %89 by %c1010_i32 dim 1 : vector<8x1024xf32>, i32 -> vector<8x1024xf32>
    %381 = arith.andi %42, %62 : vector<1x1024xi1>
    %382 = vector.extract_strided_slice %88 {offsets = [0, 29], sizes = [8, 1], strides = [1, 1]} : vector<8x58xf32> to vector<8x1xf32>
    %cst_73 = arith.constant 0.000000e+00 : f32
    %383 = vector.shape_cast %381 : vector<1x1024xi1> to vector<1x1024xi1>
    %384 = vector.broadcast %383 : vector<1x1024xi1> to vector<8x1024xi1>
    %385 = vector.broadcast %cst_73 : f32 to vector<8x1024xf32>
    %386 = arith.select %384, %380, %385 : vector<8x1024xi1>, vector<8x1024xf32>
    %387 = vector.broadcast %382 : vector<8x1xf32> to vector<8x1024xf32>
    %388 = arith.mulf %387, %386 : vector<8x1024xf32>
    %389 = arith.addf %379, %388 : vector<8x1024xf32>
    %c1009_i32 = arith.constant 1009 : i32
    %390 = tpu.dynamic_rotate %89 by %c1009_i32 dim 1 : vector<8x1024xf32>, i32 -> vector<8x1024xf32>
    %391 = arith.andi %42, %67 : vector<1x1024xi1>
    %392 = vector.extract_strided_slice %88 {offsets = [0, 30], sizes = [8, 1], strides = [1, 1]} : vector<8x58xf32> to vector<8x1xf32>
    %cst_74 = arith.constant 0.000000e+00 : f32
    %393 = vector.shape_cast %391 : vector<1x1024xi1> to vector<1x1024xi1>
    %394 = vector.broadcast %393 : vector<1x1024xi1> to vector<8x1024xi1>
    %395 = vector.broadcast %cst_74 : f32 to vector<8x1024xf32>
    %396 = arith.select %394, %390, %395 : vector<8x1024xi1>, vector<8x1024xf32>
    %397 = vector.broadcast %392 : vector<8x1xf32> to vector<8x1024xf32>
    %398 = arith.mulf %397, %396 : vector<8x1024xf32>
    %399 = arith.addf %389, %398 : vector<8x1024xf32>
    %c1008_i32 = arith.constant 1008 : i32
    %400 = tpu.dynamic_rotate %89 by %c1008_i32 dim 1 : vector<8x1024xf32>, i32 -> vector<8x1024xf32>
    %401 = arith.andi %42, %72 : vector<1x1024xi1>
    %402 = vector.extract_strided_slice %88 {offsets = [0, 31], sizes = [8, 1], strides = [1, 1]} : vector<8x58xf32> to vector<8x1xf32>
    %cst_75 = arith.constant 0.000000e+00 : f32
    %403 = vector.shape_cast %401 : vector<1x1024xi1> to vector<1x1024xi1>
    %404 = vector.broadcast %403 : vector<1x1024xi1> to vector<8x1024xi1>
    %405 = vector.broadcast %cst_75 : f32 to vector<8x1024xf32>
    %406 = arith.select %404, %400, %405 : vector<8x1024xi1>, vector<8x1024xf32>
    %407 = vector.broadcast %402 : vector<8x1xf32> to vector<8x1024xf32>
    %408 = arith.mulf %407, %406 : vector<8x1024xf32>
    %409 = arith.addf %399, %408 : vector<8x1024xf32>
    %c1007_i32 = arith.constant 1007 : i32
    %410 = tpu.dynamic_rotate %89 by %c1007_i32 dim 1 : vector<8x1024xf32>, i32 -> vector<8x1024xf32>
    %411 = arith.andi %42, %77 : vector<1x1024xi1>
    %412 = vector.extract_strided_slice %88 {offsets = [0, 32], sizes = [8, 1], strides = [1, 1]} : vector<8x58xf32> to vector<8x1xf32>
    %cst_76 = arith.constant 0.000000e+00 : f32
    %413 = vector.shape_cast %411 : vector<1x1024xi1> to vector<1x1024xi1>
    %414 = vector.broadcast %413 : vector<1x1024xi1> to vector<8x1024xi1>
    %415 = vector.broadcast %cst_76 : f32 to vector<8x1024xf32>
    %416 = arith.select %414, %410, %415 : vector<8x1024xi1>, vector<8x1024xf32>
    %417 = vector.broadcast %412 : vector<8x1xf32> to vector<8x1024xf32>
    %418 = arith.mulf %417, %416 : vector<8x1024xf32>
    %419 = arith.addf %409, %418 : vector<8x1024xf32>
    %c1006_i32 = arith.constant 1006 : i32
    %420 = tpu.dynamic_rotate %89 by %c1006_i32 dim 1 : vector<8x1024xf32>, i32 -> vector<8x1024xf32>
    %421 = arith.andi %42, %82 : vector<1x1024xi1>
    %422 = vector.extract_strided_slice %88 {offsets = [0, 33], sizes = [8, 1], strides = [1, 1]} : vector<8x58xf32> to vector<8x1xf32>
    %cst_77 = arith.constant 0.000000e+00 : f32
    %423 = vector.shape_cast %421 : vector<1x1024xi1> to vector<1x1024xi1>
    %424 = vector.broadcast %423 : vector<1x1024xi1> to vector<8x1024xi1>
    %425 = vector.broadcast %cst_77 : f32 to vector<8x1024xf32>
    %426 = arith.select %424, %420, %425 : vector<8x1024xi1>, vector<8x1024xf32>
    %427 = vector.broadcast %422 : vector<8x1xf32> to vector<8x1024xf32>
    %428 = arith.mulf %427, %426 : vector<8x1024xf32>
    %429 = arith.addf %419, %428 : vector<8x1024xf32>
    %c1005_i32 = arith.constant 1005 : i32
    %430 = tpu.dynamic_rotate %89 by %c1005_i32 dim 1 : vector<8x1024xf32>, i32 -> vector<8x1024xf32>
    %431 = arith.andi %42, %87 : vector<1x1024xi1>
    %432 = vector.extract_strided_slice %88 {offsets = [0, 34], sizes = [8, 1], strides = [1, 1]} : vector<8x58xf32> to vector<8x1xf32>
    %cst_78 = arith.constant 0.000000e+00 : f32
    %433 = vector.shape_cast %431 : vector<1x1024xi1> to vector<1x1024xi1>
    %434 = vector.broadcast %433 : vector<1x1024xi1> to vector<8x1024xi1>
    %435 = vector.broadcast %cst_78 : f32 to vector<8x1024xf32>
    %436 = arith.select %434, %430, %435 : vector<8x1024xi1>, vector<8x1024xf32>
    %437 = vector.broadcast %432 : vector<8x1xf32> to vector<8x1024xf32>
    %438 = arith.mulf %437, %436 : vector<8x1024xf32>
    %439 = arith.addf %429, %438 : vector<8x1024xf32>
    %c995_i32 = arith.constant 995 : i32
    %440 = tpu.dynamic_rotate %89 by %c995_i32 dim 1 : vector<8x1024xf32>, i32 -> vector<8x1024xf32>
    %441 = arith.andi %47, %57 : vector<1x1024xi1>
    %442 = vector.extract_strided_slice %88 {offsets = [0, 35], sizes = [8, 1], strides = [1, 1]} : vector<8x58xf32> to vector<8x1xf32>
    %cst_79 = arith.constant 0.000000e+00 : f32
    %443 = vector.shape_cast %441 : vector<1x1024xi1> to vector<1x1024xi1>
    %444 = vector.broadcast %443 : vector<1x1024xi1> to vector<8x1024xi1>
    %445 = vector.broadcast %cst_79 : f32 to vector<8x1024xf32>
    %446 = arith.select %444, %440, %445 : vector<8x1024xi1>, vector<8x1024xf32>
    %447 = vector.broadcast %442 : vector<8x1xf32> to vector<8x1024xf32>
    %448 = arith.mulf %447, %446 : vector<8x1024xf32>
    %449 = arith.addf %439, %448 : vector<8x1024xf32>
    %c994_i32 = arith.constant 994 : i32
    %450 = tpu.dynamic_rotate %89 by %c994_i32 dim 1 : vector<8x1024xf32>, i32 -> vector<8x1024xf32>
    %451 = arith.andi %47, %62 : vector<1x1024xi1>
    %452 = vector.extract_strided_slice %88 {offsets = [0, 36], sizes = [8, 1], strides = [1, 1]} : vector<8x58xf32> to vector<8x1xf32>
    %cst_80 = arith.constant 0.000000e+00 : f32
    %453 = vector.shape_cast %451 : vector<1x1024xi1> to vector<1x1024xi1>
    %454 = vector.broadcast %453 : vector<1x1024xi1> to vector<8x1024xi1>
    %455 = vector.broadcast %cst_80 : f32 to vector<8x1024xf32>
    %456 = arith.select %454, %450, %455 : vector<8x1024xi1>, vector<8x1024xf32>
    %457 = vector.broadcast %452 : vector<8x1xf32> to vector<8x1024xf32>
    %458 = arith.mulf %457, %456 : vector<8x1024xf32>
    %459 = arith.addf %449, %458 : vector<8x1024xf32>
    %c993_i32 = arith.constant 993 : i32
    %460 = tpu.dynamic_rotate %89 by %c993_i32 dim 1 : vector<8x1024xf32>, i32 -> vector<8x1024xf32>
    %461 = arith.andi %47, %67 : vector<1x1024xi1>
    %462 = vector.extract_strided_slice %88 {offsets = [0, 37], sizes = [8, 1], strides = [1, 1]} : vector<8x58xf32> to vector<8x1xf32>
    %cst_81 = arith.constant 0.000000e+00 : f32
    %463 = vector.shape_cast %461 : vector<1x1024xi1> to vector<1x1024xi1>
    %464 = vector.broadcast %463 : vector<1x1024xi1> to vector<8x1024xi1>
    %465 = vector.broadcast %cst_81 : f32 to vector<8x1024xf32>
    %466 = arith.select %464, %460, %465 : vector<8x1024xi1>, vector<8x1024xf32>
    %467 = vector.broadcast %462 : vector<8x1xf32> to vector<8x1024xf32>
    %468 = arith.mulf %467, %466 : vector<8x1024xf32>
    %469 = arith.addf %459, %468 : vector<8x1024xf32>
    %c992_i32 = arith.constant 992 : i32
    %470 = tpu.dynamic_rotate %89 by %c992_i32 dim 1 : vector<8x1024xf32>, i32 -> vector<8x1024xf32>
    %471 = arith.andi %47, %72 : vector<1x1024xi1>
    %472 = vector.extract_strided_slice %88 {offsets = [0, 38], sizes = [8, 1], strides = [1, 1]} : vector<8x58xf32> to vector<8x1xf32>
    %cst_82 = arith.constant 0.000000e+00 : f32
    %473 = vector.shape_cast %471 : vector<1x1024xi1> to vector<1x1024xi1>
    %474 = vector.broadcast %473 : vector<1x1024xi1> to vector<8x1024xi1>
    %475 = vector.broadcast %cst_82 : f32 to vector<8x1024xf32>
    %476 = arith.select %474, %470, %475 : vector<8x1024xi1>, vector<8x1024xf32>
    %477 = vector.broadcast %472 : vector<8x1xf32> to vector<8x1024xf32>
    %478 = arith.mulf %477, %476 : vector<8x1024xf32>
    %479 = arith.addf %469, %478 : vector<8x1024xf32>
    %c991_i32 = arith.constant 991 : i32
    %480 = tpu.dynamic_rotate %89 by %c991_i32 dim 1 : vector<8x1024xf32>, i32 -> vector<8x1024xf32>
    %481 = arith.andi %47, %77 : vector<1x1024xi1>
    %482 = vector.extract_strided_slice %88 {offsets = [0, 39], sizes = [8, 1], strides = [1, 1]} : vector<8x58xf32> to vector<8x1xf32>
    %cst_83 = arith.constant 0.000000e+00 : f32
    %483 = vector.shape_cast %481 : vector<1x1024xi1> to vector<1x1024xi1>
    %484 = vector.broadcast %483 : vector<1x1024xi1> to vector<8x1024xi1>
    %485 = vector.broadcast %cst_83 : f32 to vector<8x1024xf32>
    %486 = arith.select %484, %480, %485 : vector<8x1024xi1>, vector<8x1024xf32>
    %487 = vector.broadcast %482 : vector<8x1xf32> to vector<8x1024xf32>
    %488 = arith.mulf %487, %486 : vector<8x1024xf32>
    %489 = arith.addf %479, %488 : vector<8x1024xf32>
    %c990_i32 = arith.constant 990 : i32
    %490 = tpu.dynamic_rotate %89 by %c990_i32 dim 1 : vector<8x1024xf32>, i32 -> vector<8x1024xf32>
    %491 = arith.andi %47, %82 : vector<1x1024xi1>
    %492 = vector.extract_strided_slice %88 {offsets = [0, 40], sizes = [8, 1], strides = [1, 1]} : vector<8x58xf32> to vector<8x1xf32>
    %cst_84 = arith.constant 0.000000e+00 : f32
    %493 = vector.shape_cast %491 : vector<1x1024xi1> to vector<1x1024xi1>
    %494 = vector.broadcast %493 : vector<1x1024xi1> to vector<8x1024xi1>
    %495 = vector.broadcast %cst_84 : f32 to vector<8x1024xf32>
    %496 = arith.select %494, %490, %495 : vector<8x1024xi1>, vector<8x1024xf32>
    %497 = vector.broadcast %492 : vector<8x1xf32> to vector<8x1024xf32>
    %498 = arith.mulf %497, %496 : vector<8x1024xf32>
    %499 = arith.addf %489, %498 : vector<8x1024xf32>
    %c989_i32 = arith.constant 989 : i32
    %500 = tpu.dynamic_rotate %89 by %c989_i32 dim 1 : vector<8x1024xf32>, i32 -> vector<8x1024xf32>
    %501 = arith.andi %47, %87 : vector<1x1024xi1>
    %502 = vector.extract_strided_slice %88 {offsets = [0, 41], sizes = [8, 1], strides = [1, 1]} : vector<8x58xf32> to vector<8x1xf32>
    %cst_85 = arith.constant 0.000000e+00 : f32
    %503 = vector.shape_cast %501 : vector<1x1024xi1> to vector<1x1024xi1>
    %504 = vector.broadcast %503 : vector<1x1024xi1> to vector<8x1024xi1>
    %505 = vector.broadcast %cst_85 : f32 to vector<8x1024xf32>
    %506 = arith.select %504, %500, %505 : vector<8x1024xi1>, vector<8x1024xf32>
    %507 = vector.broadcast %502 : vector<8x1xf32> to vector<8x1024xf32>
    %508 = arith.mulf %507, %506 : vector<8x1024xf32>
    %509 = arith.addf %499, %508 : vector<8x1024xf32>
    %c979_i32 = arith.constant 979 : i32
    %510 = tpu.dynamic_rotate %89 by %c979_i32 dim 1 : vector<8x1024xf32>, i32 -> vector<8x1024xf32>
    %511 = arith.andi %52, %57 : vector<1x1024xi1>
    %512 = vector.extract_strided_slice %88 {offsets = [0, 42], sizes = [8, 1], strides = [1, 1]} : vector<8x58xf32> to vector<8x1xf32>
    %cst_86 = arith.constant 0.000000e+00 : f32
    %513 = vector.shape_cast %511 : vector<1x1024xi1> to vector<1x1024xi1>
    %514 = vector.broadcast %513 : vector<1x1024xi1> to vector<8x1024xi1>
    %515 = vector.broadcast %cst_86 : f32 to vector<8x1024xf32>
    %516 = arith.select %514, %510, %515 : vector<8x1024xi1>, vector<8x1024xf32>
    %517 = vector.broadcast %512 : vector<8x1xf32> to vector<8x1024xf32>
    %518 = arith.mulf %517, %516 : vector<8x1024xf32>
    %519 = arith.addf %509, %518 : vector<8x1024xf32>
    %c978_i32 = arith.constant 978 : i32
    %520 = tpu.dynamic_rotate %89 by %c978_i32 dim 1 : vector<8x1024xf32>, i32 -> vector<8x1024xf32>
    %521 = arith.andi %52, %62 : vector<1x1024xi1>
    %522 = vector.extract_strided_slice %88 {offsets = [0, 43], sizes = [8, 1], strides = [1, 1]} : vector<8x58xf32> to vector<8x1xf32>
    %cst_87 = arith.constant 0.000000e+00 : f32
    %523 = vector.shape_cast %521 : vector<1x1024xi1> to vector<1x1024xi1>
    %524 = vector.broadcast %523 : vector<1x1024xi1> to vector<8x1024xi1>
    %525 = vector.broadcast %cst_87 : f32 to vector<8x1024xf32>
    %526 = arith.select %524, %520, %525 : vector<8x1024xi1>, vector<8x1024xf32>
    %527 = vector.broadcast %522 : vector<8x1xf32> to vector<8x1024xf32>
    %528 = arith.mulf %527, %526 : vector<8x1024xf32>
    %529 = arith.addf %519, %528 : vector<8x1024xf32>
    %c977_i32 = arith.constant 977 : i32
    %530 = tpu.dynamic_rotate %89 by %c977_i32 dim 1 : vector<8x1024xf32>, i32 -> vector<8x1024xf32>
    %531 = arith.andi %52, %67 : vector<1x1024xi1>
    %532 = vector.extract_strided_slice %88 {offsets = [0, 44], sizes = [8, 1], strides = [1, 1]} : vector<8x58xf32> to vector<8x1xf32>
    %cst_88 = arith.constant 0.000000e+00 : f32
    %533 = vector.shape_cast %531 : vector<1x1024xi1> to vector<1x1024xi1>
    %534 = vector.broadcast %533 : vector<1x1024xi1> to vector<8x1024xi1>
    %535 = vector.broadcast %cst_88 : f32 to vector<8x1024xf32>
    %536 = arith.select %534, %530, %535 : vector<8x1024xi1>, vector<8x1024xf32>
    %537 = vector.broadcast %532 : vector<8x1xf32> to vector<8x1024xf32>
    %538 = arith.mulf %537, %536 : vector<8x1024xf32>
    %539 = arith.addf %529, %538 : vector<8x1024xf32>
    %c976_i32 = arith.constant 976 : i32
    %540 = tpu.dynamic_rotate %89 by %c976_i32 dim 1 : vector<8x1024xf32>, i32 -> vector<8x1024xf32>
    %541 = arith.andi %52, %72 : vector<1x1024xi1>
    %542 = vector.extract_strided_slice %88 {offsets = [0, 45], sizes = [8, 1], strides = [1, 1]} : vector<8x58xf32> to vector<8x1xf32>
    %cst_89 = arith.constant 0.000000e+00 : f32
    %543 = vector.shape_cast %541 : vector<1x1024xi1> to vector<1x1024xi1>
    %544 = vector.broadcast %543 : vector<1x1024xi1> to vector<8x1024xi1>
    %545 = vector.broadcast %cst_89 : f32 to vector<8x1024xf32>
    %546 = arith.select %544, %540, %545 : vector<8x1024xi1>, vector<8x1024xf32>
    %547 = vector.broadcast %542 : vector<8x1xf32> to vector<8x1024xf32>
    %548 = arith.mulf %547, %546 : vector<8x1024xf32>
    %549 = arith.addf %539, %548 : vector<8x1024xf32>
    %c975_i32 = arith.constant 975 : i32
    %550 = tpu.dynamic_rotate %89 by %c975_i32 dim 1 : vector<8x1024xf32>, i32 -> vector<8x1024xf32>
    %551 = arith.andi %52, %77 : vector<1x1024xi1>
    %552 = vector.extract_strided_slice %88 {offsets = [0, 46], sizes = [8, 1], strides = [1, 1]} : vector<8x58xf32> to vector<8x1xf32>
    %cst_90 = arith.constant 0.000000e+00 : f32
    %553 = vector.shape_cast %551 : vector<1x1024xi1> to vector<1x1024xi1>
    %554 = vector.broadcast %553 : vector<1x1024xi1> to vector<8x1024xi1>
    %555 = vector.broadcast %cst_90 : f32 to vector<8x1024xf32>
    %556 = arith.select %554, %550, %555 : vector<8x1024xi1>, vector<8x1024xf32>
    %557 = vector.broadcast %552 : vector<8x1xf32> to vector<8x1024xf32>
    %558 = arith.mulf %557, %556 : vector<8x1024xf32>
    %559 = arith.addf %549, %558 : vector<8x1024xf32>
    %c974_i32 = arith.constant 974 : i32
    %560 = tpu.dynamic_rotate %89 by %c974_i32 dim 1 : vector<8x1024xf32>, i32 -> vector<8x1024xf32>
    %561 = arith.andi %52, %82 : vector<1x1024xi1>
    %562 = vector.extract_strided_slice %88 {offsets = [0, 47], sizes = [8, 1], strides = [1, 1]} : vector<8x58xf32> to vector<8x1xf32>
    %cst_91 = arith.constant 0.000000e+00 : f32
    %563 = vector.shape_cast %561 : vector<1x1024xi1> to vector<1x1024xi1>
    %564 = vector.broadcast %563 : vector<1x1024xi1> to vector<8x1024xi1>
    %565 = vector.broadcast %cst_91 : f32 to vector<8x1024xf32>
    %566 = arith.select %564, %560, %565 : vector<8x1024xi1>, vector<8x1024xf32>
    %567 = vector.broadcast %562 : vector<8x1xf32> to vector<8x1024xf32>
    %568 = arith.mulf %567, %566 : vector<8x1024xf32>
    %569 = arith.addf %559, %568 : vector<8x1024xf32>
    %c973_i32 = arith.constant 973 : i32
    %570 = tpu.dynamic_rotate %89 by %c973_i32 dim 1 : vector<8x1024xf32>, i32 -> vector<8x1024xf32>
    %571 = arith.andi %52, %87 : vector<1x1024xi1>
    %572 = vector.extract_strided_slice %88 {offsets = [0, 48], sizes = [8, 1], strides = [1, 1]} : vector<8x58xf32> to vector<8x1xf32>
    %cst_92 = arith.constant 0.000000e+00 : f32
    %573 = vector.shape_cast %571 : vector<1x1024xi1> to vector<1x1024xi1>
    %574 = vector.broadcast %573 : vector<1x1024xi1> to vector<8x1024xi1>
    %575 = vector.broadcast %cst_92 : f32 to vector<8x1024xf32>
    %576 = arith.select %574, %570, %575 : vector<8x1024xi1>, vector<8x1024xf32>
    %577 = vector.broadcast %572 : vector<8x1xf32> to vector<8x1024xf32>
    %578 = arith.mulf %577, %576 : vector<8x1024xf32>
    %579 = arith.addf %569, %578 : vector<8x1024xf32>
    %580 = vector.extract_strided_slice %15 {offsets = [8, 0], sizes = [8, 1024], strides = [1, 1]} : vector<16x1024xf32> to vector<8x1024xf32>
    %cst_93 = arith.constant 0.000000e+00 : f32
    %581 = vector.broadcast %cst_93 : f32 to vector<8x1024xf32>
    %c17_i32_94 = arith.constant 17 : i32
    %582 = tpu.dynamic_rotate %580 by %c17_i32_94 dim 1 : vector<8x1024xf32>, i32 -> vector<8x1024xf32>
    %583 = arith.andi %32, %67 : vector<1x1024xi1>
    %584 = vector.extract_strided_slice %88 {offsets = [0, 49], sizes = [8, 1], strides = [1, 1]} : vector<8x58xf32> to vector<8x1xf32>
    %cst_95 = arith.constant 0.000000e+00 : f32
    %585 = vector.shape_cast %583 : vector<1x1024xi1> to vector<1x1024xi1>
    %586 = vector.broadcast %585 : vector<1x1024xi1> to vector<8x1024xi1>
    %587 = vector.broadcast %cst_95 : f32 to vector<8x1024xf32>
    %588 = arith.select %586, %582, %587 : vector<8x1024xi1>, vector<8x1024xf32>
    %589 = vector.broadcast %584 : vector<8x1xf32> to vector<8x1024xf32>
    %590 = arith.mulf %589, %588 : vector<8x1024xf32>
    %591 = arith.addf %581, %590 : vector<8x1024xf32>
    %c16_i32_96 = arith.constant 16 : i32
    %592 = tpu.dynamic_rotate %580 by %c16_i32_96 dim 1 : vector<8x1024xf32>, i32 -> vector<8x1024xf32>
    %593 = arith.andi %32, %72 : vector<1x1024xi1>
    %594 = vector.extract_strided_slice %88 {offsets = [0, 50], sizes = [8, 1], strides = [1, 1]} : vector<8x58xf32> to vector<8x1xf32>
    %cst_97 = arith.constant 0.000000e+00 : f32
    %595 = vector.shape_cast %593 : vector<1x1024xi1> to vector<1x1024xi1>
    %596 = vector.broadcast %595 : vector<1x1024xi1> to vector<8x1024xi1>
    %597 = vector.broadcast %cst_97 : f32 to vector<8x1024xf32>
    %598 = arith.select %596, %592, %597 : vector<8x1024xi1>, vector<8x1024xf32>
    %599 = vector.broadcast %594 : vector<8x1xf32> to vector<8x1024xf32>
    %600 = arith.mulf %599, %598 : vector<8x1024xf32>
    %601 = arith.addf %591, %600 : vector<8x1024xf32>
    %c15_i32_98 = arith.constant 15 : i32
    %602 = tpu.dynamic_rotate %580 by %c15_i32_98 dim 1 : vector<8x1024xf32>, i32 -> vector<8x1024xf32>
    %603 = arith.andi %32, %77 : vector<1x1024xi1>
    %604 = vector.extract_strided_slice %88 {offsets = [0, 51], sizes = [8, 1], strides = [1, 1]} : vector<8x58xf32> to vector<8x1xf32>
    %cst_99 = arith.constant 0.000000e+00 : f32
    %605 = vector.shape_cast %603 : vector<1x1024xi1> to vector<1x1024xi1>
    %606 = vector.broadcast %605 : vector<1x1024xi1> to vector<8x1024xi1>
    %607 = vector.broadcast %cst_99 : f32 to vector<8x1024xf32>
    %608 = arith.select %606, %602, %607 : vector<8x1024xi1>, vector<8x1024xf32>
    %609 = vector.broadcast %604 : vector<8x1xf32> to vector<8x1024xf32>
    %610 = arith.mulf %609, %608 : vector<8x1024xf32>
    %611 = arith.addf %601, %610 : vector<8x1024xf32>
    %c1_i32_100 = arith.constant 1 : i32
    %612 = tpu.dynamic_rotate %580 by %c1_i32_100 dim 1 : vector<8x1024xf32>, i32 -> vector<8x1024xf32>
    %613 = arith.andi %37, %67 : vector<1x1024xi1>
    %614 = vector.extract_strided_slice %88 {offsets = [0, 52], sizes = [8, 1], strides = [1, 1]} : vector<8x58xf32> to vector<8x1xf32>
    %cst_101 = arith.constant 0.000000e+00 : f32
    %615 = vector.shape_cast %613 : vector<1x1024xi1> to vector<1x1024xi1>
    %616 = vector.broadcast %615 : vector<1x1024xi1> to vector<8x1024xi1>
    %617 = vector.broadcast %cst_101 : f32 to vector<8x1024xf32>
    %618 = arith.select %616, %612, %617 : vector<8x1024xi1>, vector<8x1024xf32>
    %619 = vector.broadcast %614 : vector<8x1xf32> to vector<8x1024xf32>
    %620 = arith.mulf %619, %618 : vector<8x1024xf32>
    %621 = arith.addf %611, %620 : vector<8x1024xf32>
    %622 = arith.andi %37, %72 : vector<1x1024xi1>
    %623 = vector.extract_strided_slice %88 {offsets = [0, 53], sizes = [8, 1], strides = [1, 1]} : vector<8x58xf32> to vector<8x1xf32>
    %cst_102 = arith.constant 0.000000e+00 : f32
    %624 = vector.shape_cast %622 : vector<1x1024xi1> to vector<1x1024xi1>
    %625 = vector.broadcast %624 : vector<1x1024xi1> to vector<8x1024xi1>
    %626 = vector.broadcast %cst_102 : f32 to vector<8x1024xf32>
    %627 = arith.select %625, %580, %626 : vector<8x1024xi1>, vector<8x1024xf32>
    %628 = vector.broadcast %623 : vector<8x1xf32> to vector<8x1024xf32>
    %629 = arith.mulf %628, %627 : vector<8x1024xf32>
    %630 = arith.addf %621, %629 : vector<8x1024xf32>
    %c1023_i32_103 = arith.constant 1023 : i32
    %631 = tpu.dynamic_rotate %580 by %c1023_i32_103 dim 1 : vector<8x1024xf32>, i32 -> vector<8x1024xf32>
    %632 = arith.andi %37, %77 : vector<1x1024xi1>
    %633 = vector.extract_strided_slice %88 {offsets = [0, 54], sizes = [8, 1], strides = [1, 1]} : vector<8x58xf32> to vector<8x1xf32>
    %cst_104 = arith.constant 0.000000e+00 : f32
    %634 = vector.shape_cast %632 : vector<1x1024xi1> to vector<1x1024xi1>
    %635 = vector.broadcast %634 : vector<1x1024xi1> to vector<8x1024xi1>
    %636 = vector.broadcast %cst_104 : f32 to vector<8x1024xf32>
    %637 = arith.select %635, %631, %636 : vector<8x1024xi1>, vector<8x1024xf32>
    %638 = vector.broadcast %633 : vector<8x1xf32> to vector<8x1024xf32>
    %639 = arith.mulf %638, %637 : vector<8x1024xf32>
    %640 = arith.addf %630, %639 : vector<8x1024xf32>
    %c1009_i32_105 = arith.constant 1009 : i32
    %641 = tpu.dynamic_rotate %580 by %c1009_i32_105 dim 1 : vector<8x1024xf32>, i32 -> vector<8x1024xf32>
    %642 = arith.andi %42, %67 : vector<1x1024xi1>
    %643 = vector.extract_strided_slice %88 {offsets = [0, 55], sizes = [8, 1], strides = [1, 1]} : vector<8x58xf32> to vector<8x1xf32>
    %cst_106 = arith.constant 0.000000e+00 : f32
    %644 = vector.shape_cast %642 : vector<1x1024xi1> to vector<1x1024xi1>
    %645 = vector.broadcast %644 : vector<1x1024xi1> to vector<8x1024xi1>
    %646 = vector.broadcast %cst_106 : f32 to vector<8x1024xf32>
    %647 = arith.select %645, %641, %646 : vector<8x1024xi1>, vector<8x1024xf32>
    %648 = vector.broadcast %643 : vector<8x1xf32> to vector<8x1024xf32>
    %649 = arith.mulf %648, %647 : vector<8x1024xf32>
    %650 = arith.addf %640, %649 : vector<8x1024xf32>
    %c1008_i32_107 = arith.constant 1008 : i32
    %651 = tpu.dynamic_rotate %580 by %c1008_i32_107 dim 1 : vector<8x1024xf32>, i32 -> vector<8x1024xf32>
    %652 = arith.andi %42, %72 : vector<1x1024xi1>
    %653 = vector.extract_strided_slice %88 {offsets = [0, 56], sizes = [8, 1], strides = [1, 1]} : vector<8x58xf32> to vector<8x1xf32>
    %cst_108 = arith.constant 0.000000e+00 : f32
    %654 = vector.shape_cast %652 : vector<1x1024xi1> to vector<1x1024xi1>
    %655 = vector.broadcast %654 : vector<1x1024xi1> to vector<8x1024xi1>
    %656 = vector.broadcast %cst_108 : f32 to vector<8x1024xf32>
    %657 = arith.select %655, %651, %656 : vector<8x1024xi1>, vector<8x1024xf32>
    %658 = vector.broadcast %653 : vector<8x1xf32> to vector<8x1024xf32>
    %659 = arith.mulf %658, %657 : vector<8x1024xf32>
    %660 = arith.addf %650, %659 : vector<8x1024xf32>
    %c1007_i32_109 = arith.constant 1007 : i32
    %661 = tpu.dynamic_rotate %580 by %c1007_i32_109 dim 1 : vector<8x1024xf32>, i32 -> vector<8x1024xf32>
    %662 = arith.andi %42, %77 : vector<1x1024xi1>
    %663 = vector.extract_strided_slice %88 {offsets = [0, 57], sizes = [8, 1], strides = [1, 1]} : vector<8x58xf32> to vector<8x1xf32>
    %cst_110 = arith.constant 0.000000e+00 : f32
    %664 = vector.shape_cast %662 : vector<1x1024xi1> to vector<1x1024xi1>
    %665 = vector.broadcast %664 : vector<1x1024xi1> to vector<8x1024xi1>
    %666 = vector.broadcast %cst_110 : f32 to vector<8x1024xf32>
    %667 = arith.select %665, %661, %666 : vector<8x1024xi1>, vector<8x1024xf32>
    %668 = vector.broadcast %663 : vector<8x1xf32> to vector<8x1024xf32>
    %669 = arith.mulf %668, %667 : vector<8x1024xf32>
    %670 = arith.addf %660, %669 : vector<8x1024xf32>
    %671 = vector.extract_strided_slice %15 {offsets = [12, 0], sizes = [4, 1024], strides = [1, 1]} : vector<16x1024xf32> to vector<4x1024xf32>
    %c0_111 = arith.constant 0 : index
    %c0_112 = arith.constant 0 : index
    %672 = vector.load %arg12[%c0_111, %c0_112] : memref<1024x4xf32, #tpu.memory_space<vmem>>, vector<1024x4xf32>
    %cst_113 = arith.constant dense<0.000000e+00> : vector<4x4xf32>
    %673 = tpu.matmul %671, %672, %cst_113 {dimension_numbers = #tpu.dot_dimension_numbers<[1], [0], [0], [1], [0, 0, 1, 1], [], []>} : vector<4x1024xf32>, vector<1024x4xf32>, vector<4x4xf32> -> vector<4x4xf32>
    %c0_114 = arith.constant 0 : index
    %c0_115 = arith.constant 0 : index
    %674 = vector.load %arg6[%c0_114, %c0_115] : memref<4x4xf32, #tpu.memory_space<vmem>>, vector<4x4xf32>
    %cst_116 = arith.constant dense<0.000000e+00> : vector<4x4xf32>
    %675 = tpu.matmul %674, %673, %cst_116 {dimension_numbers = #tpu.dot_dimension_numbers<[1], [0], [0], [1], [0, 0, 1, 1], [], []>} : vector<4x4xf32>, vector<4x4xf32>, vector<4x4xf32> -> vector<4x4xf32>
    %c0_117 = arith.constant 0 : index
    %c0_118 = arith.constant 0 : index
    %676 = vector.load %arg7[%c0_117, %c0_118] : memref<4x1xf32, #tpu.memory_space<vmem>>, vector<4x1xf32>
    %677 = vector.broadcast %676 : vector<4x1xf32> to vector<4x4xf32>
    %678 = arith.addf %675, %677 : vector<4x4xf32>
    %cst_119 = arith.constant 0.000000e+00 : f32
    %679 = vector.broadcast %cst_119 : f32 to vector<4x4xf32>
    %680 = arith.maximumf %678, %679 : vector<4x4xf32>
    %c0_120 = arith.constant 0 : index
    %c0_121 = arith.constant 0 : index
    %681 = vector.load %arg10[%c0_120, %c0_121] : memref<16x4xf32, #tpu.memory_space<vmem>>, vector<16x4xf32>
    %cst_122 = arith.constant dense<0.000000e+00> : vector<16x4xf32>
    %682 = tpu.matmul %681, %680, %cst_122 {dimension_numbers = #tpu.dot_dimension_numbers<[1], [0], [0], [1], [0, 0, 1, 1], [], []>} : vector<16x4xf32>, vector<4x4xf32>, vector<16x4xf32> -> vector<16x4xf32>
    %c0_123 = arith.constant 0 : index
    %c0_124 = arith.constant 0 : index
    %683 = vector.load %arg13[%c0_123, %c0_124] : memref<4x1024xf32, #tpu.memory_space<vmem>>, vector<4x1024xf32>
    %cst_125 = arith.constant dense<0.000000e+00> : vector<16x1024xf32>
    %684 = tpu.matmul %682, %683, %cst_125 {dimension_numbers = #tpu.dot_dimension_numbers<[1], [0], [0], [1], [0, 0, 1, 1], [], []>} : vector<16x4xf32>, vector<4x1024xf32>, vector<16x1024xf32> -> vector<16x1024xf32>
    %c0_126 = arith.constant 0 : index
    %c0_127 = arith.constant 0 : index
    %685 = vector.load %arg8[%c0_126, %c0_127] : memref<16x8xf32, #tpu.memory_space<vmem>>, vector<16x8xf32>
    %c0_128 = arith.constant 0 : index
    %c0_129 = arith.constant 0 : index
    %686 = vector.load %arg9[%c0_128, %c0_129] : memref<16x8xf32, #tpu.memory_space<vmem>>, vector<16x8xf32>
    %cst_130 = arith.constant dense<0.000000e+00> : vector<16x1024xf32>
    %687 = tpu.matmul %685, %579, %cst_130 {dimension_numbers = #tpu.dot_dimension_numbers<[1], [0], [0], [1], [0, 0, 1, 1], [], []>} : vector<16x8xf32>, vector<8x1024xf32>, vector<16x1024xf32> -> vector<16x1024xf32>
    %cst_131 = arith.constant dense<0.000000e+00> : vector<16x1024xf32>
    %688 = tpu.matmul %686, %670, %cst_131 {dimension_numbers = #tpu.dot_dimension_numbers<[1], [0], [0], [1], [0, 0, 1, 1], [], []>} : vector<16x8xf32>, vector<8x1024xf32>, vector<16x1024xf32> -> vector<16x1024xf32>
    %689 = arith.addf %687, %688 : vector<16x1024xf32>
    %690 = arith.addf %689, %684 : vector<16x1024xf32>
    %c0_132 = arith.constant 0 : index
    %c0_133 = arith.constant 0 : index
    %691 = vector.load %arg11[%c0_132, %c0_133] : memref<16x1xf32, #tpu.memory_space<vmem>>, vector<16x1xf32>
    %692 = vector.broadcast %691 : vector<16x1xf32> to vector<16x1024xf32>
    %693 = arith.addf %690, %692 : vector<16x1024xf32>
    %cst_134 = arith.constant 0.000000e+00 : f32
    %694 = vector.broadcast %cst_134 : f32 to vector<16x1024xf32>
    %695 = arith.maximumf %693, %694 : vector<16x1024xf32>
    %696 = vector.extract_strided_slice %695 {offsets = [0, 0], sizes = [16, 256], strides = [1, 1]} : vector<16x1024xf32> to vector<16x256xf32>
    %c0_135 = arith.constant 0 : index
    %c0_136 = arith.constant 0 : index
    %c0_137 = arith.constant 0 : index
    %697 = vector.load %arg14[%c0_135, %c0_136, %c0_137] : memref<4x16x256xf32, #tpu.memory_space<vmem>>, vector<1x16x256xf32>
    %698 = vector.shape_cast %697 : vector<1x16x256xf32> to vector<16x256xf32>
    %699 = vector.shape_cast %696 : vector<16x256xf32> to vector<1x16x256xf32>
    tpu.vector_store %arg14[%c0_135, %c0_136, %c0_137], %699 {strides = array<i32>} : memref<4x16x256xf32, #tpu.memory_space<vmem>>, vector<1x16x256xf32>,
    %700 = vector.extract_strided_slice %695 {offsets = [0, 256], sizes = [16, 256], strides = [1, 1]} : vector<16x1024xf32> to vector<16x256xf32>
    %c1_138 = arith.constant 1 : index
    %c0_139 = arith.constant 0 : index
    %c0_140 = arith.constant 0 : index
    %701 = vector.load %arg14[%c1_138, %c0_139, %c0_140] : memref<4x16x256xf32, #tpu.memory_space<vmem>>, vector<1x16x256xf32>
    %702 = vector.shape_cast %701 : vector<1x16x256xf32> to vector<16x256xf32>
    %703 = vector.shape_cast %700 : vector<16x256xf32> to vector<1x16x256xf32>
    tpu.vector_store %arg14[%c1_138, %c0_139, %c0_140], %703 {strides = array<i32>} : memref<4x16x256xf32, #tpu.memory_space<vmem>>, vector<1x16x256xf32>,
    %704 = vector.extract_strided_slice %695 {offsets = [0, 512], sizes = [16, 256], strides = [1, 1]} : vector<16x1024xf32> to vector<16x256xf32>
    %c2_141 = arith.constant 2 : index
    %c0_142 = arith.constant 0 : index
    %c0_143 = arith.constant 0 : index
    %705 = vector.load %arg14[%c2_141, %c0_142, %c0_143] : memref<4x16x256xf32, #tpu.memory_space<vmem>>, vector<1x16x256xf32>
    %706 = vector.shape_cast %705 : vector<1x16x256xf32> to vector<16x256xf32>
    %707 = vector.shape_cast %704 : vector<16x256xf32> to vector<1x16x256xf32>
    tpu.vector_store %arg14[%c2_141, %c0_142, %c0_143], %707 {strides = array<i32>} : memref<4x16x256xf32, #tpu.memory_space<vmem>>, vector<1x16x256xf32>,
    %708 = vector.extract_strided_slice %695 {offsets = [0, 768], sizes = [16, 256], strides = [1, 1]} : vector<16x1024xf32> to vector<16x256xf32>
    %c3_144 = arith.constant 3 : index
    %c0_145 = arith.constant 0 : index
    %c0_146 = arith.constant 0 : index
    %709 = vector.load %arg14[%c3_144, %c0_145, %c0_146] : memref<4x16x256xf32, #tpu.memory_space<vmem>>, vector<1x16x256xf32>
    %710 = vector.shape_cast %709 : vector<1x16x256xf32> to vector<16x256xf32>
    %711 = vector.shape_cast %708 : vector<16x256xf32> to vector<1x16x256xf32>
    tpu.vector_store %arg14[%c3_144, %c0_145, %c0_146], %711 {strides = array<i32>} : memref<4x16x256xf32, #tpu.memory_space<vmem>>, vector<1x16x256xf32>,
    return
  }
  func.func @transform_0(%arg0: i32) -> (i32, i32, i32) {
    %c0_i32 = arith.constant 0 : i32
    %c0_i32_0 = arith.constant 0 : i32
    %c0_i32_1 = arith.constant 0 : i32
    return %arg0, %c0_i32, %c0_i32_0 : i32, i32, i32
  }
  func.func @transform_1(%arg0: i32) -> (i32, i32) {
    %c0_i32 = arith.constant 0 : i32
    %c0_i32_0 = arith.constant 0 : i32
    %c0_i32_1 = arith.constant 0 : i32
    return %c0_i32, %c0_i32_0 : i32, i32
  }
  func.func @transform_2(%arg0: i32) -> (i32, i32) {
    %c0_i32 = arith.constant 0 : i32
    %c0_i32_0 = arith.constant 0 : i32
    %c0_i32_1 = arith.constant 0 : i32
    return %c0_i32, %c0_i32_0 : i32, i32
  }
  func.func @transform_3(%arg0: i32) -> (i32, i32) {
    %c0_i32 = arith.constant 0 : i32
    %c0_i32_0 = arith.constant 0 : i32
    %c0_i32_1 = arith.constant 0 : i32
    return %c0_i32, %c0_i32_0 : i32, i32
  }
  func.func @transform_4(%arg0: i32) -> (i32, i32) {
    %c0_i32 = arith.constant 0 : i32
    %c0_i32_0 = arith.constant 0 : i32
    %c0_i32_1 = arith.constant 0 : i32
    return %c0_i32, %c0_i32_0 : i32, i32
  }
  func.func @transform_5(%arg0: i32) -> (i32, i32) {
    %c0_i32 = arith.constant 0 : i32
    %c0_i32_0 = arith.constant 0 : i32
    %c0_i32_1 = arith.constant 0 : i32
    return %c0_i32, %c0_i32_0 : i32, i32
  }
  func.func @transform_6(%arg0: i32) -> (i32, i32) {
    %c0_i32 = arith.constant 0 : i32
    %c0_i32_0 = arith.constant 0 : i32
    %c0_i32_1 = arith.constant 0 : i32
    return %c0_i32, %c0_i32_0 : i32, i32
  }
  func.func @transform_7(%arg0: i32) -> (i32, i32) {
    %c0_i32 = arith.constant 0 : i32
    %c0_i32_0 = arith.constant 0 : i32
    %c0_i32_1 = arith.constant 0 : i32
    return %c0_i32, %c0_i32_0 : i32, i32
  }
  func.func @transform_8(%arg0: i32) -> (i32, i32) {
    %c0_i32 = arith.constant 0 : i32
    %c0_i32_0 = arith.constant 0 : i32
    %c0_i32_1 = arith.constant 0 : i32
    return %c0_i32, %c0_i32_0 : i32, i32
  }
  func.func @transform_9(%arg0: i32) -> (i32, i32) {
    %c0_i32 = arith.constant 0 : i32
    %c0_i32_0 = arith.constant 0 : i32
    %c0_i32_1 = arith.constant 0 : i32
    return %c0_i32, %c0_i32_0 : i32, i32
  }
  func.func @transform_10(%arg0: i32) -> (i32, i32) {
    %c0_i32 = arith.constant 0 : i32
    %c0_i32_0 = arith.constant 0 : i32
    %c0_i32_1 = arith.constant 0 : i32
    return %c0_i32, %c0_i32_0 : i32, i32
  }
  func.func @transform_11(%arg0: i32) -> (i32, i32) {
    %c0_i32 = arith.constant 0 : i32
    %c0_i32_0 = arith.constant 0 : i32
    %c0_i32_1 = arith.constant 0 : i32
    return %c0_i32, %c0_i32_0 : i32, i32
  }
  func.func @transform_12(%arg0: i32) -> (i32, i32) {
    %c0_i32 = arith.constant 0 : i32
    %c0_i32_0 = arith.constant 0 : i32
    %c0_i32_1 = arith.constant 0 : i32
    return %c0_i32, %c0_i32_0 : i32, i32
  }
  func.func @transform_13(%arg0: i32) -> (i32, i32, i32) {
    %c0_i32 = arith.constant 0 : i32
    %c0_i32_0 = arith.constant 0 : i32
    %c0_i32_1 = arith.constant 0 : i32
    return %arg0, %c0_i32, %c0_i32_0 : i32, i32, i32
  }
}

</mosaic_0001>

<bundles_post_ra>
// kernel: tpu_custom_call.1
= control target key start
LH: loop header
LB: loop body
LE: loop exit
PB: predicated region body
PF: predicated region fallthrough
CT: control target
= control target key end

     0   :  { %s15172_s0 = inlined_call_operand.vmem [shape: f32[8,4,256], index: 0, kind: input, shape index: {}]   ;;  %s15173_s1 = inlined_call_operand.vmem [shape: s32[2,1024], index: 1, kind: input, shape index: {}]   ;;  %s15174_s2 = inlined_call_operand.vmem [shape: f32[16,4], index: 2, kind: input, shape index: {}]   ;;  %s15175_s3 = inlined_call_operand.vmem [shape: f32[16,1], index: 3, kind: input, shape index: {}]   ;;  %s15176_s4 = inlined_call_operand.vmem [shape: f32[8,58], index: 4, kind: input, shape index: {}]   ;;  %s15177_s5 = inlined_call_operand.vmem [shape: f32[4,4], index: 5, kind: input, shape index: {}]   ;;  %s15178_s6 = inlined_call_operand.vmem [shape: f32[4,1], index: 6, kind: input, shape index: {}]   ;;  %s15179_s7 = inlined_call_operand.vmem [shape: f32[16,8], index: 7, kind: input, shape index: {}]   ;;  %s15180_s8 = inlined_call_operand.vmem [shape: f32[16,8], index: 8, kind: input, shape index: {}]   ;;  %s15181_s9 = inlined_call_operand.vmem [shape: f32[16,4], index: 9, kind: input, shape index: {}]   ;;  %s15182_s10 = inlined_call_operand.vmem [shape: f32[16,1], index: 10, kind: input, shape index: {}]   ;;  %s15183_s11 = inlined_call_operand.vmem [shape: f32[1024,4], index: 11, kind: input, shape index: {}]   ;;  %s15184_s12 = inlined_call_operand.vmem [shape: f32[4,1024], index: 12, kind: input, shape index: {}]   ;;  %s15185_s13 = inlined_call_operand.hbm [shape: f32[8,16,256], index: 13, kind: output, shape index: {}]  }
   0x1   :  { %15770 = sst [smem:[#allocation222_spill]] %s15172_s0 }
   0x2   :  { %15771 = sst [smem:[#allocation223_spill]] %s15173_s1 }
   0x3   :  { %18 = vsyncpa [#allocation3], 0 }
   0x4   :  { %20 = vsyncpa [#allocation3 + $0x1], 0  ;;  %s6383_s25 = smov 0   ;;  %s6385_s26 = smov 0  }
   0x5   :  { %s6387_s27 = smov 0   ;;  %s6389_s28 = smov 0  }
   0x6 LB: > { %s6404_s29 = sadd.s32 4294967295, %s6204_s28   ;;  %s5805_s30 = sadd.s32 4294967294, %s6204_s28   ;;  %s6204_s28 = sphi %s6389_s28, %s17820_s28   ;;  %s6200_s27 = sphi %s6387_s27, %s17819_s27   ;;  %s6196_s26 = sphi %s6385_s26, %s17818_s26   ;;  %s6192_s25 = sphi %s6383_s25, %s17817_s25  }
   0x7   : > { %s6408_s14 = sadd.s32 1, %s6204_s28   ;;  %s311_s15 = sadd.s32 1, %s6200_s27 }
   0x8   : > { %s308_s16 = ssub.s32 %s6204_s28, %s6408_s14  ;;  %p321_p0 = scmp.ne.s32.totalorder %s6200_s27, %s6196_s26 }
   0x9   : > { %p309_p1 = scmp.eq.s32.totalorder %s308_s16, 0  ;;  %p322_p2 = scmp.eq.s32.totalorder %s6404_s29, 1 }
   0xa   : > { %p327_p3 = scmp.ne.s32.totalorder %s6196_s26, %s6192_s25  ;;  %p328_p4 = scmp.eq.s32.totalorder %s5805_s30, 1 }
   0xb   : > { %s6419_s17 = scalar_select %p309_p1, %s6200_s27, %s311_s15  }
   0xc   : > { %p6421_p5 = por %p322_p2, %p321_p0  ;;  %p6425_p6 = por %p328_p4, %p327_p3 }
   0xd   : > { %15772 = sst [smem:[#allocation5_spill]] %s6419_s17  ;;  %p5808_p7 = scmp.ge.s32.totalorder %s6204_s28, 1 }
   0xe   : > { %p392_p8 = scmp.lt.s32.totalorder %s6204_s28, 3 }
  0x10   : > { %p393_p9 = pnand %p5808_p7, %p392_p8 }
  0x12   : > { %396 = sbr.rel (%p393_p9) target bundleno = 1894 (0x766), region = 72 }
  0x17   : > { %s5810_s20 = sshll.u32 %s6404_s29, 2  ;;  %v15186_v0 = vmov 0   ;;  %v470_v1 = vld [vmem:[%s15175_s3] sm:$0xff]  ;;  %s15775_s0 = sld [smem:[#allocation222_spill]]  ;;  %v471_v3 = vld [vmem:[%s15175_s3 + $0x8] sm:$0xff]  ;;  %vm15368_vm0 = vcmask 1043456  }
  0x18   : > { %p438_p10 = scmp.lt.s32.totalorder %s5810_s20, 7  ;;  %6070 = vset.pattern.permute.xlu0 %v15186_v0  ;;  %6071 = vset.pattern.permute.xlu1 %v15186_v0  ;;  %v468_v5 = vld [vmem:[%s15174_s2] sm:$0xff]  ;;  %vm15369_vm1 = vcmask 31744   ;;  %v6453_v6 = vld [vmem:[%s15174_s2 + $0x8] sm:$0xff]  ;;  %v6207_v13 = vmov 1   ;;  %v4668_v17 = vld [vmem:[%s15183_s11 + $0x78] sm:$0xff] }
  0x19   : > { %474 = vperm.xlu0 %6070, %v470_v1   ;;  %v6465_v9 = vld [vmem:[%s15176_s4] sm:$0xff]  ;;  %v4684_v18 = vld [vmem:[%s15183_s11 + $0xf8] sm:$0xff]  ;;  %v4667_v19 = vld [vmem:[%s15183_s11 + $0x70] sm:$0xff]  ;;  %v6208_v21 = vmov 2   ;;  %v6209_v36 = vmov 3   ;;  %v6210_v51 = vmov 4  }
  0x1a   : > { %s17822_s20 = smov (!%p438_p10, %s5810_s20), 7  ;;  %807 = vperm.xlu1 %6071, %v6465_v9   ;;  %v4683_v20 = vld [vmem:[%s15183_s11 + $0xf0] sm:$0xff]  ;;  %v4666_v22 = vld [vmem:[%s15183_s11 + $0x68] sm:$0xff]  ;;  %v5033_v23 = vld [vmem:[%s15184_s12] sm:$0xff]  ;;  %s6212_s22 = smov 50  }
  0x1b   : > { %s5920_s23 = sshll.u32 %s17822_s20, 3  ;;  %v4682_v26 = vld [vmem:[%s15183_s11 + $0xe8] sm:$0xff]  ;;  %v4665_v27 = vld [vmem:[%s15183_s11 + $0x60] sm:$0xff]  ;;  %v4700_v28 = vld [vmem:[%s15183_s11 + $0x178] sm:$0xff]  ;;  %s6214_s24 = smov 49  }
  0x1c   : > { %v4716_v29 = vld [vmem:[%s15183_s11 + $0x1f8] sm:$0xff]  ;;  %v4681_v30 = vld [vmem:[%s15183_s11 + $0xe0] sm:$0xff]  ;;  %v4699_v32 = vld [vmem:[%s15183_s11 + $0x170] sm:$0xff]  ;;  %s6215_s16 = smov 48   ;;  %s6216_s21 = smov 47  }
  0x1d   : > { %s6440_s15 = scalar_lea.vmem %s15775_s0, %s5920_s23  ;;  %v4664_v31 = vld [vmem:[%s15183_s11 + $0x58] sm:$0xff]  ;;  %v4663_v34 = vld [vmem:[%s15183_s11 + $0x50] sm:$0xff]  ;;  %v4662_v38 = vld [vmem:[%s15183_s11 + $0x48] sm:$0xff]  ;;  %s6217_s0 = smov 46  }
  0x1e   : > { %v445_v2 = vld [vmem:[%s6440_s15] sm:$0xff]  ;;  %v5813_v4 = vld [vmem:[%s6440_s15 + $0x8] sm:$0xff]  ;;  %v5814_v10 = vld [vmem:[%s6440_s15 + $0x10] sm:$0xff]  ;;  %s6218_s20 = smov 45   ;;  %s6220_s23 = smov 35  }
  0x1f   : > { %453 = vst [vmem:[#allocation1] ss:$2 sm:$0xff] %v445_v2  ;;  %v5815_v14 = vld [vmem:[%s6440_s15 + $0x18] sm:$0xff]  ;;  %v4715_v35 = vld [vmem:[%s15183_s11 + $0x1f0] sm:$0xff]  ;;  %v4678_v39 = vld [vmem:[%s15183_s11 + $0xc8] sm:$0xff]  ;;  %s6213_s15 = smov 51  }
  0x20   : > { %v4680_v33 = vld [vmem:[%s15183_s11 + $0xd8] sm:$0xff]  ;;  %v4679_v37 = vld [vmem:[%s15183_s11 + $0xd0] sm:$0xff]  ;;  %v4698_v40 = vld [vmem:[%s15183_s11 + $0x168] sm:$0xff]  ;;  %s6226_s30 = smov 32   ;;  %s6244_s17 = smov 14  }
  0x21   : > { %479 = vperm.xlu0 %6070, %v471_v3   ;;  %v4661_v41 = vld [vmem:[%s15183_s11 + $0x40] sm:$0xff]  ;;  %v4714_v42 = vld [vmem:[%s15183_s11 + $0x1e8] sm:$0xff]  ;;  %v4660_v45 = vld [vmem:[%s15183_s11 + $0x38] sm:$0xff]  ;;  %s15954_s1 = sld [smem:[#allocation223_spill]] }
  0x22   : > { %6072 = vset.pattern.permute.xlu1 %v6207_v13  ;;  %v4677_v43 = vld [vmem:[%s15183_s11 + $0xc0] sm:$0xff]  ;;  %v4676_v47 = vld [vmem:[%s15183_s11 + $0xb8] sm:$0xff]  ;;  %v4659_v48 = vld [vmem:[%s15183_s11 + $0x30] sm:$0xff] }
  0x23   : > { %878 = vperm.xlu1 %6072, %v6465_v9   ;;  %v4697_v44 = vld [vmem:[%s15183_s11 + $0x160] sm:$0xff]  ;;  %v4675_v49 = vld [vmem:[%s15183_s11 + $0xb0] sm:$0xff]  ;;  %v4696_v50 = vld [vmem:[%s15183_s11 + $0x158] sm:$0xff] }
  0x24   : > { %v4713_v46 = vld [vmem:[%s15183_s11 + $0x1e0] sm:$0xff]  ;;  %v4658_v52 = vld [vmem:[%s15183_s11 + $0x28] sm:$0xff]  ;;  %v4712_v53 = vld [vmem:[%s15183_s11 + $0x1d8] sm:$0xff] }
  0x25   : > { %v4674_v54 = vld [vmem:[%s15183_s11 + $0xa8] sm:$0xff]  ;;  %v4657_v55 = vld [vmem:[%s15183_s11 + $0x20] sm:$0xff]  ;;  %v4656_v57 = vld [vmem:[%s15183_s11 + $0x18] sm:$0xff] }
  0x26   : > { %v454_v7 = vld.sshfl [vmem:[#allocation1] sm:$0xff pattern:$0x75316420]  ;;  %v455_v8 = vld.sshfl [vmem:[#allocation1 + $0x8] sm:$0xff pattern:$0x75316420] }
  0x27   : > { %5816 = vmatpush.msk.msra.mxu0 %vm15368_vm0, %v454_v7  ;;  %457 = vst [vmem:[#allocation1] ss:$2 sm:$0xff] %v5813_v4  ;;  %5819 = vmatpush.msk.msra.mxu1 %vm15368_vm0, %v455_v8  ;;  %v4673_v56 = vld [vmem:[%s15183_s11 + $0xa0] sm:$0xff]  ;;  %v4672_v58 = vld [vmem:[%s15183_s11 + $0x98] sm:$0xff]  ;;  %v4695_v59 = vld [vmem:[%s15183_s11 + $0x150] sm:$0xff] }
  0x28   : > { %5923 = vmatpush.msk.msra.mxu2 %vm15368_vm0, %v455_v8  ;;  %5817 = vmatmul.msk.f32.vlgmr.msra.gmra.mxu0 %vm15369_vm1, %v468_v5  ;;  %v4711_v60 = vld [vmem:[%s15183_s11 + $0x1d0] sm:$0xff]  ;;  %v4694_v63 = vld [vmem:[%s15183_s11 + $0x148] sm:$0xff]  ;;  %v4693_v4 = vld [vmem:[%s15183_s11 + $0x140] sm:$0xff] }
  0x29   : > { %5820 = vmatmul.msk.f32.vlgmr.msra.gmra.mxu1 %vm15369_vm1, %v468_v5  ;;  %5821 = vmatmul.msk.f32.vlgmr.msra.gmra.mxu2 %vm15369_vm1, %v6453_v6  ;;  %v4655_v61 = vld [vmem:[%s15183_s11 + $0x10] sm:$0xff]  ;;  %v4710_v1 = vld [vmem:[%s15183_s11 + $0x1c8] sm:$0xff]  ;;  %v4653_v7 = vld [vmem:[%s15183_s11] sm:$0xff] }
  0x2a   : > { %v4671_v62 = vld [vmem:[%s15183_s11 + $0x90] sm:$0xff]  ;;  %v4654_v2 = vld [vmem:[%s15183_s11 + $0x8] sm:$0xff]  ;;  %v4669_v8 = vld [vmem:[%s15183_s11 + $0x80] sm:$0xff] }
  0x2b   : > { %6073 = vset.pattern.permute.xlu1 %v6208_v21  ;;  %v4670_v3 = vld [vmem:[%s15183_s11 + $0x88] sm:$0xff]  ;;  %v4748_v13 = vld [vmem:[%s15183_s11 + $0x2f8] sm:$0xff] }
  0x2c   : > { %949 = vperm.xlu1 %6073, %v6465_v9   ;;  %v4746_v21 = vld [vmem:[%s15183_s11 + $0x2e8] sm:$0xff] }
  0x2e   : > { %v458_v11 = vld.sshfl [vmem:[#allocation1] sm:$0xff pattern:$0x75316420]  ;;  %v459_v12 = vld.sshfl [vmem:[#allocation1 + $0x8] sm:$0xff pattern:$0x75316420] }
  0x2f   : > { %5822 = vmatpush.msk.msrb.mxu2 %vm15368_vm0, %v458_v11  ;;  %461 = vst [vmem:[#allocation1] ss:$2 sm:$0xff] %v5814_v10  ;;  %5825 = vmatpush.msk.msra.mxu3 %vm15368_vm0, %v459_v12  ;;  %v4692_v10 = vld [vmem:[%s15183_s11 + $0x138] sm:$0xff] }
  0x30   : > { %5818 = vmatmul.msk.f32.gmra.mxu0 %vm15369_vm1, %v6453_v6  ;;  %5826 = vmatmul.msk.f32.vlgmr.msra.gmra.mxu3 %vm15369_vm1, %v468_v5  ;;  %v4708_v11 = vld [vmem:[%s15183_s11 + $0x1b8] sm:$0xff] }
  0x31   : > { %5823 = vmatmul.msk.f32.vlgmr.msrb.gmra.mxu2 %vm15369_vm1, %v468_v5  ;;  %v4732_v12 = vld [vmem:[%s15183_s11 + $0x278] sm:$0xff] }
  0x34   : > { %6074 = vset.pattern.permute.xlu1 %v6209_v36  ;;  %v4726_v36 = vld [vmem:[%s15183_s11 + $0x248] sm:$0xff] }
  0x35   : > { %1020 = vperm.xlu1 %6074, %v6465_v9  }
  0x36   : > { %v462_v15 = vld.sshfl [vmem:[#allocation1] sm:$0xff pattern:$0x75316420]  ;;  %v463_v16 = vld.sshfl [vmem:[#allocation1 + $0x8] sm:$0xff pattern:$0x75316420] }
  0x37   : > { %5828 = vmatpush.msk.msrb.mxu0 %vm15368_vm0, %v462_v15  ;;  %465 = vst [vmem:[#allocation1] ss:$2 sm:$0xff] %v5815_v14  ;;  %5831 = vmatpush.msk.msrb.mxu1 %vm15368_vm0, %v463_v16  ;;  %v4691_v14 = vld [vmem:[%s15183_s11 + $0x130] sm:$0xff] }
  0x38   : > { %5827 = vmatmul.msk.f32.gmra.mxu3 %vm15369_vm1, %v6453_v6  ;;  %5829 = vmatmul.msk.f32.vlgmr.msrb.gmra.mxu0 %vm15369_vm1, %v468_v5  ;;  %v4707_v15 = vld [vmem:[%s15183_s11 + $0x1b0] sm:$0xff] }
  0x39   : > { %5824 = vmatmul.msk.f32.gmra.mxu2 %vm15369_vm1, %v6453_v6  ;;  %5832 = vmatmul.msk.f32.vlgmr.msrb.gmra.mxu1 %vm15369_vm1, %v468_v5  ;;  %v4731_v16 = vld [vmem:[%s15183_s11 + $0x270] sm:$0xff] }
  0x3a   : > { %4805 = vmatpush.msra.mxu0 %v4668_v17  ;;  %4825 = vmatpush.msra.mxu1 %v4684_v18  ;;  %v4747_v17 = vld [vmem:[%s15183_s11 + $0x2f0] sm:$0xff]  ;;  %v4690_v18 = vld [vmem:[%s15183_s11 + $0x128] sm:$0xff] }
  0x3c   : > { %4806 = vmatpush.msra.mxu0 %v4667_v19  ;;  %4826 = vmatpush.msra.mxu1 %v4683_v20  ;;  %v4706_v19 = vld [vmem:[%s15183_s11 + $0x1a8] sm:$0xff] }
  0x3d   : > { %6075 = vset.pattern.permute.xlu1 %v6210_v51  ;;  %v4730_v20 = vld [vmem:[%s15183_s11 + $0x268] sm:$0xff] }
  0x3e   : > { %v466_v24 = vld.sshfl [vmem:[#allocation1] sm:$0xff pattern:$0x75316420]  ;;  %v467_v25 = vld.sshfl [vmem:[#allocation1 + $0x8] sm:$0xff pattern:$0x75316420]  ;;  %4807 = vmatpush.msra.mxu0 %v4666_v22  ;;  %4827 = vmatpush.msra.mxu1 %v4682_v26 }
  0x3f   : > { %5834 = vmatpush.msk.msra.mxu2 %vm15368_vm0, %v466_v24  ;;  %5837 = vmatpush.msk.msrb.mxu3 %vm15368_vm0, %v467_v25  ;;  %5041 = vst [vmem:[#allocation1] ss:$2 sm:$0xff] %v5033_v23  ;;  %v4689_v22 = vld [vmem:[%s15183_s11 + $0x120] sm:$0xff]  ;;  %v4688_v26 = vld [vmem:[%s15183_s11 + $0x118] sm:$0xff]  ;;  %v4778_v51 = vld [vmem:[%s15183_s11 + $0x3e8] sm:$0xff] }
  0x40   : > { %5830 = vmatmul.msk.f32.gmra.mxu0 %vm15369_vm1, %v6453_v6  ;;  %5838 = vmatmul.msk.f32.vlgmr.msrb.gmra.mxu3 %vm15369_vm1, %v468_v5  ;;  %v4705_v23 = vld [vmem:[%s15183_s11 + $0x1a0] sm:$0xff] }
  0x41   : > { %5833 = vmatmul.msk.f32.gmra.mxu1 %vm15369_vm1, %v6453_v6  ;;  %5835 = vmatmul.msk.f32.vlgmr.msra.gmra.mxu2 %vm15369_vm1, %v468_v5  ;;  %v4709_v5 = vld [vmem:[%s15183_s11 + $0x1c0] sm:$0xff] }
  0x42   : > { %4808 = vmatpush.msra.mxu0 %v4665_v27  ;;  %4845 = vmatpush.msrb.mxu2 %v4700_v28  ;;  %v4729_v24 = vld [vmem:[%s15183_s11 + $0x260] sm:$0xff]  ;;  %v4704_v27 = vld [vmem:[%s15183_s11 + $0x198] sm:$0xff] }
  0x43   : > { %4865 = vmatpush.msra.mxu3 %v4716_v29  ;;  %4828 = vmatpush.msra.mxu1 %v4681_v30  ;;  %v4745_v25 = vld [vmem:[%s15183_s11 + $0x2e0] sm:$0xff]  ;;  %v4728_v28 = vld [vmem:[%s15183_s11 + $0x258] sm:$0xff]  ;;  %v4687_v30 = vld [vmem:[%s15183_s11 + $0x110] sm:$0xff] }
  0x44   : > { %4809 = vmatpush.msra.mxu0 %v4664_v31  ;;  %4846 = vmatpush.msrb.mxu2 %v4699_v32  ;;  %v4744_v29 = vld [vmem:[%s15183_s11 + $0x2d8] sm:$0xff]  ;;  %v4703_v31 = vld [vmem:[%s15183_s11 + $0x190] sm:$0xff] }
  0x45   : > { %4829 = vmatpush.msra.mxu1 %v4680_v33  ;;  %4866 = vmatpush.msra.mxu3 %v4715_v35  ;;  %v4727_v32 = vld [vmem:[%s15183_s11 + $0x250] sm:$0xff]  ;;  %v4702_v35 = vld [vmem:[%s15183_s11 + $0x188] sm:$0xff] }
  0x46   : > { %4810 = vmatpush.msra.mxu0 %v4663_v34  ;;  %4847 = vmatpush.msrb.mxu2 %v4698_v40  ;;  %v4743_v33 = vld [vmem:[%s15183_s11 + $0x2d0] sm:$0xff]  ;;  %v4686_v34 = vld [vmem:[%s15183_s11 + $0x108] sm:$0xff]  ;;  %v4725_v40 = vld [vmem:[%s15183_s11 + $0x240] sm:$0xff] }
  0x47   : > { %4830 = vmatpush.msra.mxu1 %v4679_v37  ;;  %4867 = vmatpush.msra.mxu3 %v4714_v42  ;;  %v4742_v37 = vld [vmem:[%s15183_s11 + $0x2c8] sm:$0xff]  ;;  %v4764_v42 = vld [vmem:[%s15183_s11 + $0x378] sm:$0xff] }
  0x48   : > { %5839 = vmatmul.msk.f32.gmra.mxu3 %vm15369_vm1, %v6453_v6  ;;  %4811 = vmatpush.msra.mxu0 %v4662_v38  ;;  %v4685_v38 = vld [vmem:[%s15183_s11 + $0x100] sm:$0xff] }
  0x49   : > { %5836 = vmatmul.msk.f32.gmra.mxu2 %vm15369_vm1, %v6453_v6  ;;  %4831 = vmatpush.msra.mxu1 %v4678_v39  ;;  %v6211_v6 = vmov 5   ;;  %v4701_v39 = vld [vmem:[%s15183_s11 + $0x180] sm:$0xff] }
  0x4a   : > { %4812 = vmatpush.msra.mxu0 %v4661_v41  ;;  %4848 = vmatpush.msrb.mxu2 %v4697_v44  ;;  %v4741_v41 = vld [vmem:[%s15183_s11 + $0x2c0] sm:$0xff]  ;;  %v4724_v44 = vld [vmem:[%s15183_s11 + $0x238] sm:$0xff] }
  0x4b   : > { %4832 = vmatpush.msra.mxu1 %v4677_v43  ;;  %4868 = vmatpush.msra.mxu3 %v4713_v46  ;;  %v4780_v43 = vld [vmem:[%s15183_s11 + $0x3f8] sm:$0xff]  ;;  %v4763_v46 = vld [vmem:[%s15183_s11 + $0x370] sm:$0xff] }
  0x4c   : > { %4813 = vmatpush.msra.mxu0 %v4660_v45  ;;  %1091 = vperm.xlu1 %6075, %v6465_v9   ;;  %v4740_v45 = vld [vmem:[%s15183_s11 + $0x2b8] sm:$0xff] }
  0x4d   : > { %4833 = vmatpush.msra.mxu1 %v4676_v47  ;;  %4849 = vmatpush.msrb.mxu2 %v4696_v50  ;;  %v4779_v47 = vld [vmem:[%s15183_s11 + $0x3f0] sm:$0xff]  ;;  %v4762_v50 = vld [vmem:[%s15183_s11 + $0x368] sm:$0xff] }
  0x4e   : > { %4814 = vmatpush.msra.mxu0 %v4659_v48  ;;  %4869 = vmatpush.msra.mxu3 %v4712_v53  ;;  %v4723_v48 = vld [vmem:[%s15183_s11 + $0x230] sm:$0xff]  ;;  %v4738_v53 = vld [vmem:[%s15183_s11 + $0x2a8] sm:$0xff] }
  0x4f   : > { %4834 = vmatpush.msra.mxu1 %v4675_v49  ;;  %4850 = vmatpush.msrb.mxu2 %v4695_v59  ;;  %v4739_v49 = vld [vmem:[%s15183_s11 + $0x2b0] sm:$0xff]  ;;  %v4776_v59 = vld [vmem:[%s15183_s11 + $0x3d8] sm:$0xff] }
  0x50   : > { %4815 = vmatpush.msra.mxu0 %v4658_v52  ;;  %4870 = vmatpush.msra.mxu3 %v4711_v60  ;;  %v4722_v52 = vld [vmem:[%s15183_s11 + $0x228] sm:$0xff]  ;;  %v4720_v60 = vld [vmem:[%s15183_s11 + $0x218] sm:$0xff] }
  0x51   : > { %4835 = vmatpush.msra.mxu1 %v4674_v54  ;;  %4851 = vmatpush.msrb.mxu2 %v4694_v63  ;;  %v4761_v54 = vld [vmem:[%s15183_s11 + $0x360] sm:$0xff]  ;;  %v4775_v63 = vld [vmem:[%s15183_s11 + $0x3d0] sm:$0xff] }
  0x52   : > { %4816 = vmatpush.msra.mxu0 %v4657_v55  ;;  %4871 = vmatpush.msra.mxu3 %v4710_v1  ;;  %v4777_v55 = vld [vmem:[%s15183_s11 + $0x3e0] sm:$0xff]  ;;  %v4719_v1 = vld [vmem:[%s15183_s11 + $0x210] sm:$0xff] }
  0x53   : > { %4836 = vmatpush.msra.mxu1 %v4673_v56  ;;  %4852 = vmatpush.msrb.mxu2 %v4693_v4  ;;  %v4721_v56 = vld [vmem:[%s15183_s11 + $0x220] sm:$0xff]  ;;  %v4774_v4 = vld [vmem:[%s15183_s11 + $0x3c8] sm:$0xff] }
  0x54   : > { %4817 = vmatpush.msra.mxu0 %v4656_v57  ;;  %6076 = vset.pattern.permute.xlu1 %v6211_v6  ;;  %v4737_v57 = vld [vmem:[%s15183_s11 + $0x2a0] sm:$0xff]  ;;  %v4734_v6 = vld [vmem:[%s15183_s11 + $0x288] sm:$0xff] }
  0x55   : > { %4837 = vmatpush.msra.mxu1 %v4672_v58  ;;  %1162 = vperm.xlu1 %6076, %v6465_v9   ;;  %v4760_v58 = vld [vmem:[%s15183_s11 + $0x358] sm:$0xff] }
  0x56   : > { %4818 = vmatpush.msra.mxu0 %v4655_v61  ;;  %4872 = vmatpush.msra.mxu3 %v4709_v5  ;;  %v4736_v61 = vld [vmem:[%s15183_s11 + $0x298] sm:$0xff]  ;;  %v4718_v5 = vld [vmem:[%s15183_s11 + $0x208] sm:$0xff] }
  0x57   : > { %4838 = vmatpush.msra.mxu1 %v4671_v62  ;;  %4853 = vmatpush.msrb.mxu2 %v4692_v10  ;;  %v4759_v62 = vld [vmem:[%s15183_s11 + $0x350] sm:$0xff]  ;;  %v4773_v10 = vld [vmem:[%s15183_s11 + $0x3c0] sm:$0xff] }
  0x58   : > { %4819 = vmatpush.msra.mxu0 %v4654_v2  ;;  %4873 = vmatpush.msra.mxu3 %v4708_v11  ;;  %v4735_v2 = vld [vmem:[%s15183_s11 + $0x290] sm:$0xff]  ;;  %v4717_v11 = vld [vmem:[%s15183_s11 + $0x200] sm:$0xff] }
  0x59   : > { %4839 = vmatpush.msra.mxu1 %v4670_v3  ;;  %4854 = vmatpush.msrb.mxu2 %v4691_v14  ;;  %v4758_v3 = vld [vmem:[%s15183_s11 + $0x348] sm:$0xff] }
  0x5a   : > { %4820 = vmatpush.msra.mxu0 %v4653_v7  ;;  %4874 = vmatpush.msra.mxu3 %v4707_v15  ;;  %v4757_v7 = vld [vmem:[%s15183_s11 + $0x340] sm:$0xff]  ;;  %v4772_v15 = vld [vmem:[%s15183_s11 + $0x3b8] sm:$0xff] }
  0x5b   : > { %4840 = vmatpush.msra.mxu1 %v4669_v8  ;;  %4855 = vmatpush.msrb.mxu2 %v4690_v18  ;;  %v4755_v18 = vld [vmem:[%s15183_s11 + $0x330] sm:$0xff] }
  0x5c   : > { %4885 = vmatpush.msrb.mxu0 %v4732_v12  ;;  %4875 = vmatpush.msra.mxu3 %v4706_v19  ;;  %v4733_v12 = vld [vmem:[%s15183_s11 + $0x280] sm:$0xff]  ;;  %v4771_v19 = vld [vmem:[%s15183_s11 + $0x3b0] sm:$0xff] }
  0x5d   : > { %4905 = vmatpush.msrb.mxu1 %v4748_v13  ;;  %4856 = vmatpush.msrb.mxu2 %v4689_v22  ;;  %v4756_v13 = vld [vmem:[%s15183_s11 + $0x338] sm:$0xff]  ;;  %v4754_v22 = vld [vmem:[%s15183_s11 + $0x328] sm:$0xff] }
  0x5e   : > { %4886 = vmatpush.msrb.mxu0 %v4731_v16  ;;  %4876 = vmatpush.msra.mxu3 %v4705_v23 }
  0x5f   : > { %4906 = vmatpush.msrb.mxu1 %v4747_v17  ;;  %4857 = vmatpush.msrb.mxu2 %v4688_v26  ;;  %v4769_v26 = vld [vmem:[%s15183_s11 + $0x3a0] sm:$0xff] }
  0x60   : > { %4887 = vmatpush.msrb.mxu0 %v4730_v20  ;;  %4877 = vmatpush.msra.mxu3 %v4704_v27 }
  0x61   : > { %4907 = vmatpush.msrb.mxu1 %v4746_v21  ;;  %4858 = vmatpush.msrb.mxu2 %v4687_v30 }
  0x62   : > { %4888 = vmatpush.msrb.mxu0 %v4729_v24  ;;  %4878 = vmatpush.msra.mxu3 %v4703_v31  ;;  %v4770_v24 = vld [vmem:[%s15183_s11 + $0x3a8] sm:$0xff] }
  0x63   : > { %4908 = vmatpush.msrb.mxu1 %v4745_v25  ;;  %4859 = vmatpush.msrb.mxu2 %v4686_v34  ;;  %v4753_v25 = vld [vmem:[%s15183_s11 + $0x320] sm:$0xff]  ;;  %v4751_v34 = vld [vmem:[%s15183_s11 + $0x310] sm:$0xff] }
  0x64   : > { %4889 = vmatpush.msrb.mxu0 %v4728_v28  ;;  %4879 = vmatpush.msra.mxu3 %v4702_v35 }
  0x65   : > { %4909 = vmatpush.msrb.mxu1 %v4744_v29  ;;  %4860 = vmatpush.msrb.mxu2 %v4685_v38  ;;  %v4752_v29 = vld [vmem:[%s15183_s11 + $0x318] sm:$0xff]  ;;  %v4767_v38 = vld [vmem:[%s15183_s11 + $0x390] sm:$0xff] }
  0x66   : > { %4890 = vmatpush.msrb.mxu0 %v4727_v32  ;;  %4880 = vmatpush.msra.mxu3 %v4701_v39  ;;  %v4768_v32 = vld [vmem:[%s15183_s11 + $0x398] sm:$0xff] }
  0x67   : > { %4910 = vmatpush.msrb.mxu1 %v4743_v33  ;;  %4925 = vmatpush.msra.mxu2 %v4764_v42  ;;  %v4766_v42 = vld [vmem:[%s15183_s11 + $0x388] sm:$0xff] }
  0x68   : > { %4891 = vmatpush.msrb.mxu0 %v4726_v36  ;;  %4945 = vmatpush.msrb.mxu3 %v4780_v43 }
  0x69   : > { %4911 = vmatpush.msrb.mxu1 %v4742_v37  ;;  %4926 = vmatpush.msra.mxu2 %v4763_v46 }
  0x6a   : > { %4892 = vmatpush.msrb.mxu0 %v4725_v40  ;;  %4946 = vmatpush.msrb.mxu3 %v4779_v47  ;;  %v4750_v40 = vld [vmem:[%s15183_s11 + $0x308] sm:$0xff]  ;;  %v4765_v47 = vld [vmem:[%s15183_s11 + $0x380] sm:$0xff] }
  0x6b   : > { %4912 = vmatpush.msrb.mxu1 %v4741_v41  ;;  %4927 = vmatpush.msra.mxu2 %v4762_v50 }
  0x6c   : > { %4893 = vmatpush.msrb.mxu0 %v4724_v44  ;;  %4947 = vmatpush.msrb.mxu3 %v4778_v51  ;;  %v4749_v44 = vld [vmem:[%s15183_s11 + $0x300] sm:$0xff] }
  0x6d   : > { %4913 = vmatpush.msrb.mxu1 %v4740_v45  ;;  %4928 = vmatpush.msra.mxu2 %v4761_v54 }
  0x6e   : > { %4894 = vmatpush.msrb.mxu0 %v4723_v48  ;;  %4948 = vmatpush.msrb.mxu3 %v4777_v55 }
  0x6f   : > { %4914 = vmatpush.msrb.mxu1 %v4739_v49  ;;  %4929 = vmatpush.msra.mxu2 %v4760_v58 }
  0x70   : > { %4895 = vmatpush.msrb.mxu0 %v4722_v52  ;;  %4949 = vmatpush.msrb.mxu3 %v4776_v59 }
  0x71   : > { %4915 = vmatpush.msrb.mxu1 %v4738_v53  ;;  %4930 = vmatpush.msra.mxu2 %v4759_v62 }
  0x72   : > { %4896 = vmatpush.msrb.mxu0 %v4721_v56  ;;  %4950 = vmatpush.msrb.mxu3 %v4775_v63 }
  0x73   : > { %4916 = vmatpush.msrb.mxu1 %v4737_v57  ;;  %4931 = vmatpush.msra.mxu2 %v4758_v3 }
  0x74   : > { %4897 = vmatpush.msrb.mxu0 %v4720_v60  ;;  %4951 = vmatpush.msrb.mxu3 %v4774_v4 }
  0x75   : > { %4917 = vmatpush.msrb.mxu1 %v4736_v61  ;;  %4932 = vmatpush.msra.mxu2 %v4757_v7 }
  0x76   : > { %4898 = vmatpush.msrb.mxu0 %v4719_v1  ;;  %4952 = vmatpush.msrb.mxu3 %v4773_v10 }
  0x77   : > { %4918 = vmatpush.msrb.mxu1 %v4735_v2  ;;  %4933 = vmatpush.msra.mxu2 %v4756_v13 }
  0x78   : > { %4899 = vmatpush.msrb.mxu0 %v4718_v5  ;;  %4953 = vmatpush.msrb.mxu3 %v4772_v15 }
  0x79   : > { %4919 = vmatpush.msrb.mxu1 %v4734_v6  ;;  %4934 = vmatpush.msra.mxu2 %v4755_v18 }
  0x7a   : > { %4900 = vmatpush.msrb.mxu0 %v4717_v11  ;;  %4954 = vmatpush.msrb.mxu3 %v4771_v19 }
  0x7b   : > { %4920 = vmatpush.msrb.mxu1 %v4733_v12  ;;  %4935 = vmatpush.msra.mxu2 %v4754_v22 }
  0x7c   : > { %4955 = vmatpush.msrb.mxu3 %v4770_v24 }
  0x7d   : > { %4936 = vmatpush.msra.mxu2 %v4753_v25 }
  0x7e   : > { %4956 = vmatpush.msrb.mxu3 %v4769_v26 }
  0x7f   : > { %4937 = vmatpush.msra.mxu2 %v4752_v29 }
  0x80   : > { %4957 = vmatpush.msrb.mxu3 %v4768_v32 }
  0x81   : > { %4938 = vmatpush.msra.mxu2 %v4751_v34 }
  0x82   : > { %4958 = vmatpush.msrb.mxu3 %v4767_v38 }
  0x83   : > { %4939 = vmatpush.msra.mxu2 %v4750_v40 }
  0x84   : > { %4959 = vmatpush.msrb.mxu3 %v4766_v42 }
  0x85   : > { %4940 = vmatpush.msra.mxu2 %v4749_v44 }
  0x86   : > { %4960 = vmatpush.msrb.mxu3 %v4765_v47 }
  0x8b   : > { %v6831_v8 = vpop.permute.xlu0 %474 }
  0x8c   : > { %v6990_v19 = vpop.permute.xlu1 %807 }
  0x93   : > { %v6878_v27 = vpop.permute.xlu0 %479 }
  0x95   : > { %v7006_v24 = vpop.permute.xlu1 %878 }
  0x9e   : > { %v7016_v25 = vpop.permute.xlu1 %949 }
  0xa5   : > { %v523_v14 = vpop.f32.mrf.mxu0 }
  0xa6   : > { %v524_v16 = vadd.f32 %v523_v14, %v6831_v8  ;;  %v546_v17 = vpop.f32.mrf.mxu1 }
  0xa7   : > { %v547_v20 = vadd.f32 %v546_v17, %v6831_v8  ;;  %v7024_v26 = vpop.permute.xlu1 %1020 }
  0xa8   : > { %v6856_v21 = vmax.f32 %v524_v16, 0.0  ;;  %15788 = vst [vmem:[#allocation18_spill] sm:$0xff] %v7024_v26 }
  0xa9   : > { %v6861_v23 = vmax.f32 %v547_v20, 0.0 }
  0xaa   : > { %15776 = vst [vmem:[#allocation6_spill] sm:$0xff] %v6856_v21  ;;  %826 = vrot.lane.b32.xlu2 %v6856_v21, %s6212_s22  ;;  %752 = vrot.lane.b32.xlu1 %v6856_v21, %s6213_s15 }
  0xab   : > { %15777 = vst [vmem:[#allocation7_spill] sm:$0xff] %v6861_v23  ;;  %828 = vrot.lane.b32.xlu0 %v6861_v23, %s6212_s22 }
  0xac   : > { %v549_v28 = vpop.f32.mrf.mxu2 }
  0xad   : > { %v550_v30 = vadd.f32 %v549_v28, %v6878_v27  ;;  %v526_v31 = vpop.f32.mrf.mxu0 }
  0xae   : > { %v527_v33 = vadd.f32 %v526_v31, %v6878_v27 }
  0xaf   : > { %v6891_v35 = vmax.f32 %v550_v30, 0.0 }
  0xb0   : > { %v6893_v36 = vmax.f32 %v527_v33, 0.0 }
  0xb1   : > { %15778 = vst [vmem:[#allocation8_spill] sm:$0xff] %v6891_v35  ;;  %v4790_v37 = vrot.slane %v6891_v35, 4 }
  0xb2   : > { %15779 = vst [vmem:[#allocation9_spill] sm:$0xff] %v6893_v36  ;;  %897 = vrot.lane.b32.xlu2 %v6856_v21, %s6214_s24  ;;  %754 = vrot.lane.b32.xlu1 %v6861_v23, %s6213_s15  ;;  %v4789_v39 = vrot.slane %v6893_v36, 4 }
  0xb3   : > { %899 = vrot.lane.b32.xlu0 %v6861_v23, %s6214_s24  ;;  %4841 = vmatmul.f32.vlgmr.msra.gmra.mxu1 %v4790_v37  ;;  %v6909_v41 = vpop.f32.mrf.mxu3 }
  0xb4   : > { %v569_v43 = vpop.f32.mrf.mxu2  ;;  %4821 = vmatmul.f32.vlgmr.msra.gmra.mxu0 %v4789_v39  ;;  %v593_v17 = vadd.f32 %v6909_v41, %v6831_v8 }
  0xb5   : > { %v570_v45 = vadd.f32 %v569_v43, %v6831_v8  ;;  %v615_v46 = vpop.f32.mrf.mxu0 }
  0xb6   : > { %v6921_v48 = vpop.f32.mrf.mxu1  ;;  %v616_v15 = vadd.f32 %v615_v46, %v6831_v8  ;;  %v6988_v18 = vmax.f32 %v593_v17, 0.0 }
  0xb7   : > { %v6923_v49 = vmax.f32 %v570_v45, 0.0  ;;  %v639_v20 = vadd.f32 %v6921_v48, %v6831_v8  ;;  %v6221_v45 = vmov 7  }
  0xb8   : > { %v6978_v16 = vmax.f32 %v616_v15, 0.0 }
  0xb9   : > { %v7000_v22 = vmax.f32 %v639_v20, 0.0 }
  0xba   : > { %968 = vrot.lane.b32.xlu2 %v6856_v21, %s6215_s16  ;;  %830 = vrot.lane.b32.xlu1 %v6923_v49, %s6212_s22  ;;  %15786 = vst [vmem:[#allocation16_spill] sm:$0xff] %v6978_v16 }
  0xbb   : > { %970 = vrot.lane.b32.xlu0 %v6861_v23, %s6215_s16  ;;  %v595_v50 = vpop.f32.mrf.mxu3  ;;  %15787 = vst [vmem:[#allocation17_spill] sm:$0xff] %v7000_v22 }
  0xbc   : > { %v572_v51 = vpop.f32.mrf.mxu2  ;;  %v596_v52 = vadd.f32 %v595_v50, %v6878_v27 }
  0xbd   : > { %v573_v53 = vadd.f32 %v572_v51, %v6878_v27  ;;  %v618_v54 = vpop.f32.mrf.mxu0 }
  0xbe   : > { %v6933_v55 = vmax.f32 %v596_v52, 0.0  ;;  %v619_v56 = vadd.f32 %v618_v54, %v6878_v27  ;;  %v641_v57 = vpop.f32.mrf.mxu1  ;;  %v7034_v29 = vpop.permute.xlu1 %1091 }
  0xbf   : > { %v6936_v58 = vmax.f32 %v573_v53, 0.0  ;;  %v642_v59 = vadd.f32 %v641_v57, %v6878_v27  ;;  %15790 = vst [vmem:[#allocation20_spill] sm:$0xff] %v7034_v29  ;;  %v6223_v57 = vmov 8  }
  0xc0   : > { %15780 = vst [vmem:[#allocation10_spill] sm:$0xff] %v6933_v55  ;;  %v6939_v60 = vmax.f32 %v619_v56, 0.0  ;;  %v4792_v61 = vrot.slane %v6933_v55, 4  ;;  %v6229_v55 = vmov 11  }
  0xc1   : > { %15781 = vst [vmem:[#allocation11_spill] sm:$0xff] %v6936_v58  ;;  %v6942_v62 = vmax.f32 %v642_v59, 0.0  ;;  %v4791_v63 = vrot.slane %v6936_v58, 4 }
  0xc2   : > { %15782 = vst [vmem:[#allocation12_spill] sm:$0xff] %v6939_v60  ;;  %1039 = vrot.lane.b32.xlu2 %v6856_v21, %s6216_s21  ;;  %901 = vrot.lane.b32.xlu1 %v6923_v49, %s6214_s24  ;;  %v4793_v1 = vrot.slane %v6939_v60, 4 }
  0xc3   : > { %15783 = vst [vmem:[#allocation13_spill] sm:$0xff] %v6942_v62  ;;  %1041 = vrot.lane.b32.xlu0 %v6861_v23, %s6216_s21  ;;  %4861 = vmatmul.f32.vlgmr.msrb.gmra.mxu2 %v4791_v63  ;;  %v6952_v2 = vpop.f32.mrf.mxu3  ;;  %v4794_v3 = vrot.slane %v6942_v62, 4 }
  0xc4   : > { %4881 = vmatmul.f32.vlgmr.msra.gmra.mxu3 %v4792_v61  ;;  %v6955_v4 = vpop.f32.mrf.mxu2  ;;  %4901 = vmatmul.f32.vlgmr.msrb.gmra.mxu0 %v4793_v1  ;;  %v685_v33 = vadd.f32 %v6952_v2, %v6831_v8 }
  0xc5   : > { %4921 = vmatmul.f32.vlgmr.msrb.gmra.mxu1 %v4794_v3  ;;  %v662_v40 = vadd.f32 %v6955_v4, %v6831_v8 }
  0xc6   : > { %v7056_v34 = vmax.f32 %v685_v33, 0.0 }
  0xc7   : > { %v7048_v31 = vpop.permute.xlu1 %1162  ;;  %v7083_v44 = vmax.f32 %v662_v40, 0.0 }
  0xc8   : > { %15793 = vst [vmem:[#allocation23_spill] sm:$0xff] %v7056_v34 }
  0xc9   : > { %15797 = vst [vmem:[#allocation27_spill] sm:$0xff] %v7083_v44 }
  0xca   : > { %1110 = vrot.lane.b32.xlu2 %v6856_v21, %s6217_s0  ;;  %972 = vrot.lane.b32.xlu1 %v6923_v49, %s6215_s16 }
  0xcb   : > { %1112 = vrot.lane.b32.xlu0 %v6861_v23, %s6217_s0  ;;  %v687_v5 = vpop.f32.mrf.mxu3 }
  0xcc   : > { %v664_v6 = vpop.f32.mrf.mxu2  ;;  %v688_v7 = vadd.f32 %v687_v5, %v6878_v27 }
  0xcd   : > { %v665_v10 = vadd.f32 %v664_v6, %v6878_v27  ;;  %v6219_v27 = vmov 6  }
  0xce   : > { %v6965_v11 = vmax.f32 %v688_v7, 0.0  ;;  %6077 = vset.pattern.permute.xlu1 %v6219_v27 }
  0xcf   : > { %v6967_v12 = vmax.f32 %v665_v10, 0.0 }
  0xd0   : > { %15784 = vst [vmem:[#allocation14_spill] sm:$0xff] %v6965_v11  ;;  %v4796_v13 = vrot.slane %v6965_v11, 4 }
  0xd1   : > { %15785 = vst [vmem:[#allocation15_spill] sm:$0xff] %v6967_v12  ;;  %v4795_v14 = vrot.slane %v6967_v12, 4 }
  0xd2   : > { %1181 = vrot.lane.b32.xlu2 %v6856_v21, %s6218_s20  ;;  %1043 = vrot.lane.b32.xlu1 %v6923_v49, %s6216_s21 }
  0xd3   : > { %1183 = vrot.lane.b32.xlu0 %v6861_v23, %s6218_s20  ;;  %4941 = vmatmul.f32.vlgmr.msra.gmra.mxu2 %v4795_v14 }
  0xd4   : > { %4961 = vmatmul.f32.vlgmr.msrb.gmra.mxu3 %v4796_v13 }
  0xda   : > { %1114 = vrot.lane.b32.xlu1 %v6923_v49, %s6217_s0  ;;  %756 = vrot.lane.b32.xlu2 %v6923_v49, %s6213_s15 }
  0xdb   : > { %760 = vrot.lane.b32.xlu0 %v6978_v16, %s6213_s15 }
  0xe2   : > { %1185 = vrot.lane.b32.xlu1 %v6923_v49, %s6218_s20  ;;  %758 = vrot.lane.b32.xlu2 %v6988_v18, %s6213_s15 }
  0xe3   : > { %834 = vrot.lane.b32.xlu0 %v6978_v16, %s6212_s22 }
  0xea   : > { %832 = vrot.lane.b32.xlu2 %v6988_v18, %s6212_s22  ;;  %762 = vrot.lane.b32.xlu1 %v7000_v22, %s6213_s15 }
  0xeb   : > { %905 = vrot.lane.b32.xlu0 %v6978_v16, %s6214_s24 }
  0xf2   : > { %903 = vrot.lane.b32.xlu2 %v6988_v18, %s6214_s24  ;;  %836 = vrot.lane.b32.xlu1 %v7000_v22, %s6212_s22 }
  0xf3   : > { %976 = vrot.lane.b32.xlu0 %v6978_v16, %s6215_s16 }
  0xfa   : > { %974 = vrot.lane.b32.xlu2 %v6988_v18, %s6215_s16  ;;  %907 = vrot.lane.b32.xlu1 %v7000_v22, %s6214_s24 }
  0xfb   : > { %1047 = vrot.lane.b32.xlu0 %v6978_v16, %s6216_s21 }
 0x102   : > { %1045 = vrot.lane.b32.xlu2 %v6988_v18, %s6216_s21  ;;  %978 = vrot.lane.b32.xlu1 %v7000_v22, %s6215_s16 }
 0x103   : > { %1118 = vrot.lane.b32.xlu0 %v6978_v16, %s6217_s0 }
 0x104   : > { %v7032_v28 = vpop.permute.xlu2 %826 }
 0x105   : > { %15789 = vst [vmem:[#allocation19_spill] sm:$0xff] %v7032_v28 }
 0x10a   : > { %1116 = vrot.lane.b32.xlu2 %v6988_v18, %s6217_s0  ;;  %1049 = vrot.lane.b32.xlu1 %v7000_v22, %s6216_s21 }
 0x10b   : > { %1189 = vrot.lane.b32.xlu0 %v6978_v16, %s6218_s20 }
 0x10c   : > { %v7042_v30 = vpop.permute.xlu2 %897 }
 0x10d   : > { %15791 = vst [vmem:[#allocation21_spill] sm:$0xff] %v7042_v30 }
 0x112   : > { %1187 = vrot.lane.b32.xlu2 %v6988_v18, %s6218_s20  ;;  %1120 = vrot.lane.b32.xlu1 %v7000_v22, %s6217_s0 }
 0x113   : > { %1254 = vrot.lane.b32.xlu0 %v6861_v23, %s6220_s23 }
 0x114   : > { %v7052_v32 = vpop.permute.xlu2 %968 }
 0x115   : > { %15792 = vst [vmem:[#allocation22_spill] sm:$0xff] %v7052_v32 }
 0x11a   : > { %1252 = vrot.lane.b32.xlu2 %v6856_v21, %s6220_s23  ;;  %1191 = vrot.lane.b32.xlu1 %v7000_v22, %s6218_s20 }
 0x11b   : > { %766 = vrot.lane.b32.xlu0 %v7056_v34, %s6213_s15 }
 0x11c   : > { %v7064_v37 = vpop.permute.xlu2 %1039  ;;  %v7066_v38 = vpop.permute.xlu1 %752 }
 0x11d   : > { %15794 = vst [vmem:[#allocation24_spill] sm:$0xff] %v7064_v37  ;;  %v7068_v39 = vpop.permute.xlu0 %828 }
 0x11e   : > { %15795 = vst [vmem:[#allocation25_spill] sm:$0xff] %v7066_v38 }
 0x122   : > { %1258 = vrot.lane.b32.xlu2 %v6988_v18, %s6220_s23  ;;  %1233 = vperm.xlu1 %6077, %v6465_v9  }
 0x123   : > { %840 = vrot.lane.b32.xlu0 %v7056_v34, %s6212_s22 }
 0x124   : > { %v7077_v41 = vpop.permute.xlu2 %1110  ;;  %v7079_v42 = vpop.permute.xlu1 %754 }
 0x125   : > { %15796 = vst [vmem:[#allocation26_spill] sm:$0xff] %v7077_v41  ;;  %v7081_v43 = vpop.permute.xlu0 %899 }
 0x12a   : > { %1256 = vrot.lane.b32.xlu1 %v6923_v49, %s6220_s23  ;;  %764 = vrot.lane.b32.xlu2 %v7083_v44, %s6213_s15  ;;  %s6224_s15 = smov 33  }
 0x12b   : > { %911 = vrot.lane.b32.xlu0 %v7056_v34, %s6214_s24  ;;  %6078 = vset.pattern.permute.xlu1 %v6221_v45 }
 0x12c   : > { %v7091_v8 = vpop.permute.xlu2 %1181  ;;  %v7093_v46 = vpop.permute.xlu1 %830 }
 0x12d   : > { %15798 = vst [vmem:[#allocation28_spill] sm:$0xff] %v7091_v8  ;;  %v7095_v47 = vpop.permute.xlu0 %970 }
 0x130   : > { %v4842_v1 = vpop.f32.mrf.mxu1 }
 0x131   : > { %v4822_v56 = vpop.f32.mrf.mxu0 }
 0x132   : > { %1262 = vrot.lane.b32.xlu1 %v7000_v22, %s6220_s23  ;;  %838 = vrot.lane.b32.xlu2 %v7083_v44, %s6212_s22  ;;  %s6222_s22 = smov 34   ;;  %v4843_v3 = vadd.f32 %v4842_v1, %v4822_v56 }
 0x133   : > { %982 = vrot.lane.b32.xlu0 %v7056_v34, %s6215_s16 }
 0x134   : > { %v7103_v48 = vpop.permute.xlu1 %901  ;;  %v7105_v50 = vpop.permute.xlu2 %756 }
 0x135   : > { %v7107_v51 = vpop.permute.xlu0 %1041 }
 0x13a   : > { %1304 = vperm.xlu1 %6078, %v6465_v9   ;;  %909 = vrot.lane.b32.xlu2 %v7083_v44, %s6214_s24  ;;  %s6242_s24 = smov 15  }
 0x13b   : > { %1053 = vrot.lane.b32.xlu0 %v7056_v34, %s6216_s21 }
 0x13c   : > { %v7114_v52 = vpop.permute.xlu1 %972  ;;  %v7116_v53 = vpop.permute.xlu2 %758 }
 0x13d   : > { %v7118_v54 = vpop.permute.xlu0 %1112 }
 0x141   : > { %v4902_v14 = vpop.f32.mrf.mxu0 }
 0x142   : > { %1327 = vrot.lane.b32.xlu1 %v6923_v49, %s6222_s22  ;;  %980 = vrot.lane.b32.xlu2 %v7083_v44, %s6215_s16  ;;  %v4922_v17 = vpop.f32.mrf.mxu1  ;;  %s6228_s16 = smov 31  }
 0x143   : > { %1124 = vrot.lane.b32.xlu0 %v7056_v34, %s6217_s0  ;;  %6079 = vset.pattern.permute.xlu1 %v6223_v57 }
 0x144   : > { %v7126_v59 = vpop.permute.xlu1 %1043  ;;  %v7128_v61 = vpop.permute.xlu2 %832 }
 0x145   : > { %v7130_v63 = vpop.permute.xlu0 %1183 }
 0x146   : > { %v4862_v2 = vpop.f32.mrf.mxu2 }
 0x147   : > { %v4863_v4 = vadd.f32 %v4862_v2, %v4843_v3  ;;  %v4882_v5 = vpop.f32.mrf.mxu3  ;;  %v6225_v3 = vmov 9  }
 0x149   : > { %v4883_v10 = vadd.f32 %v4882_v5, %v4863_v4 }
 0x14a   : > { %1333 = vrot.lane.b32.xlu1 %v7000_v22, %s6222_s22  ;;  %1051 = vrot.lane.b32.xlu2 %v7083_v44, %s6216_s21  ;;  %s6230_s21 = smov 30  }
 0x14b   : > { %1195 = vrot.lane.b32.xlu0 %v7056_v34, %s6218_s20  ;;  %v4903_v15 = vadd.f32 %v4902_v14, %v4883_v10 }
 0x14c   : > { %v7138_v6 = vpop.permute.xlu1 %1114  ;;  %v7140_v7 = vpop.permute.xlu2 %903 }
 0x14d   : > { %v7142_v13 = vpop.permute.xlu0 %760  ;;  %v4923_v40 = vadd.f32 %v4922_v17, %v4903_v15  ;;  %v7183_v15 = vld [vmem:[%s15176_s4] sm:$0xff] }
 0x152   : > { %1375 = vperm.xlu1 %6079, %v6465_v9   ;;  %1122 = vrot.lane.b32.xlu2 %v7083_v44, %s6217_s0  ;;  %s6232_s0 = smov 29  }
 0x153   : > { %1260 = vrot.lane.b32.xlu0 %v6978_v16, %s6220_s23 }
 0x154   : > { %v7149_v20 = vpop.permute.xlu1 %1185  ;;  %v7151_v27 = vpop.permute.xlu2 %974 }
 0x155   : > { %15799 = vst [vmem:[#allocation29_spill] sm:$0xff] %v7149_v20  ;;  %v7153_v33 = vpop.permute.xlu0 %834  ;;  %v15988_v20 = vmov 0 }
 0x156   : > { %15800 = vst [vmem:[#allocation30_spill] sm:$0xff] %v7153_v33  ;;  %v4942_v45 = vpop.f32.mrf.mxu2 }
 0x157   : > { %v4943_v56 = vadd.f32 %v4942_v45, %v4923_v40  ;;  %v4962_v57 = vpop.f32.mrf.mxu3 }
 0x159   : > { %v4963_v1 = vadd.f32 %v4962_v57, %v4943_v56  ;;  %v6227_v56 = vmov 10  }
 0x15a   : > { %1398 = vrot.lane.b32.xlu1 %v6923_v49, %s6224_s15  ;;  %1193 = vrot.lane.b32.xlu2 %v7083_v44, %s6218_s20  ;;  %s6234_s20 = smov 19  }
 0x15b   : > { %1266 = vrot.lane.b32.xlu0 %v7056_v34, %s6220_s23  ;;  %5841 = vmatpush.msk.msra.mxu0 %vm15368_vm0, %v4963_v1 }
 0x15c   : > { %v7162_v9 = vpop.permute.xlu2 %1045  ;;  %v7164_v2 = vpop.permute.xlu1 %762  ;;  %6080 = vset.pattern.permute.xlu1 %v6225_v3 }
 0x15d   : > { %15801 = vst [vmem:[#allocation31_spill] sm:$0xff] %v7162_v9  ;;  %v7166_v4 = vpop.permute.xlu0 %905 }
 0x15e   : > { %15802 = vst [vmem:[#allocation32_spill] sm:$0xff] %v7164_v2 }
 0x15f   : > { %15803 = vst [vmem:[#allocation33_spill] sm:$0xff] %v7166_v4  ;;  %v15992_v4 = vmov 0 }
 0x162   : > { %1404 = vrot.lane.b32.xlu1 %v7000_v22, %s6224_s15  ;;  %1264 = vrot.lane.b32.xlu2 %v7083_v44, %s6220_s23  ;;  %s6236_s23 = smov 18  }
 0x163   : > { %1325 = vrot.lane.b32.xlu0 %v6861_v23, %s6222_s22 }
 0x164   : > { %v7174_v5 = vpop.permute.xlu2 %1116  ;;  %v7176_v10 = vpop.permute.xlu1 %836 }
 0x165   : > { %15804 = vst [vmem:[#allocation34_spill] sm:$0xff] %v7174_v5  ;;  %v7178_v14 = vpop.permute.xlu0 %976  ;;  %v15980_v5 = vmov 0 }
 0x166   : > { %15805 = vst [vmem:[#allocation35_spill] sm:$0xff] %v7176_v10  ;;  %v15985_v10 = vmov 0 }
 0x167   : > { %15806 = vst [vmem:[#allocation36_spill] sm:$0xff] %v7178_v14 }
 0x16a   : > { %1446 = vperm.xlu1 %6080, %v7183_v15   ;;  %1323 = vrot.lane.b32.xlu2 %v6856_v21, %s6222_s22 }
 0x16b   : > { %1331 = vrot.lane.b32.xlu0 %v6978_v16, %s6222_s22 }
 0x16c   : > { %v7190_v17 = vpop.permute.xlu2 %1187  ;;  %v7192_v40 = vpop.permute.xlu1 %907 }
 0x16d   : > { %15807 = vst [vmem:[#allocation37_spill] sm:$0xff] %v7190_v17  ;;  %v7194_v45 = vpop.permute.xlu0 %1047 }
 0x16e   : > { %15808 = vst [vmem:[#allocation38_spill] sm:$0xff] %v7192_v40  ;;  %v768_v40 = vlaneseq }
 0x16f   : > { %15809 = vst [vmem:[#allocation39_spill] sm:$0xff] %v7194_v45 }
 0x170   : > { %v7906_v9 = vand.u32 127, %v768_v40 }
 0x172   : > { %1469 = vrot.lane.b32.xlu1 %v6923_v49, %s6226_s30  ;;  %1329 = vrot.lane.b32.xlu2 %v6988_v18, %s6222_s22 }
 0x173   : > { %1337 = vrot.lane.b32.xlu0 %v7056_v34, %s6222_s22  ;;  %6081 = vset.pattern.permute.xlu1 %v6227_v56 }
 0x174   : > { %v7202_v57 = vpop.permute.xlu2 %1252  ;;  %v7204_v1 = vpop.permute.xlu1 %978 }
 0x175   : > { %15810 = vst [vmem:[#allocation40_spill] sm:$0xff] %v7202_v57  ;;  %v7206_v3 = vpop.permute.xlu0 %1118 }
 0x176   : > { %15811 = vst [vmem:[#allocation41_spill] sm:$0xff] %v7204_v1 }
 0x177   : > { %15812 = vst [vmem:[#allocation42_spill] sm:$0xff] %v7206_v3 }
 0x17a   : > { %1475 = vrot.lane.b32.xlu1 %v7000_v22, %s6226_s30  ;;  %1335 = vrot.lane.b32.xlu2 %v7083_v44, %s6222_s22  ;;  %s6238_s22 = smov 17  }
 0x17b   : > { %1396 = vrot.lane.b32.xlu0 %v6861_v23, %s6224_s15 }
 0x17c   : > { %v7214_v0 = vpop.permute.xlu2 %1258  ;;  %v7216_v12 = vpop.permute.xlu1 %1049 }
 0x17d   : > { %15813 = vst [vmem:[#allocation43_spill] sm:$0xff] %v7214_v0  ;;  %v7218_v56 = vpop.permute.xlu0 %1189 }
 0x17e   : > { %15814 = vst [vmem:[#allocation44_spill] sm:$0xff] %v7216_v12 }
 0x17f   : > { %15815 = vst [vmem:[#allocation45_spill] sm:$0xff] %v7218_v56 }
 0x182   : > { %1517 = vperm.xlu1 %6081, %v7183_v15   ;;  %1394 = vrot.lane.b32.xlu2 %v6856_v21, %s6224_s15 }
 0x183   : > { %1402 = vrot.lane.b32.xlu0 %v6978_v16, %s6224_s15 }
 0x184   : > { %v7225_v62 = vpop.permute.xlu1 %1120  ;;  %v7227_v60 = vpop.permute.xlu2 %764 }
 0x185   : > { %15816 = vst [vmem:[#allocation46_spill] sm:$0xff] %v7225_v62  ;;  %v7229_v58 = vpop.permute.xlu0 %1254  ;;  %v15971_v62 = vmov 0 }
 0x186   : > { %15817 = vst [vmem:[#allocation47_spill] sm:$0xff] %v7227_v60  ;;  %v15962_v60 = vmov 0 }
 0x187   : > { %15818 = vst [vmem:[#allocation48_spill] sm:$0xff] %v7229_v58 }
 0x18a   : > { %1540 = vrot.lane.b32.xlu1 %v6923_v49, %s6228_s16  ;;  %1400 = vrot.lane.b32.xlu2 %v6988_v18, %s6224_s15 }
 0x18b   : > { %1408 = vrot.lane.b32.xlu0 %v7056_v34, %s6224_s15  ;;  %6082 = vset.pattern.permute.xlu1 %v6229_v55 }
 0x18c   : > { %v7237_v35 = vpop.permute.xlu1 %1191  ;;  %v7239_v36 = vpop.permute.xlu2 %838 }
 0x18d   : > { %15819 = vst [vmem:[#allocation49_spill] sm:$0xff] %v7237_v35  ;;  %v7241_v11 = vpop.permute.xlu0 %766 }
 0x18e   : > { %15820 = vst [vmem:[#allocation50_spill] sm:$0xff] %v7239_v36  ;;  %v15959_v36 = vmov 0 }
 0x18f   : > { %15821 = vst [vmem:[#allocation51_spill] sm:$0xff] %v7241_v11 }
 0x192   : > { %1546 = vrot.lane.b32.xlu1 %v7000_v22, %s6228_s16  ;;  %1406 = vrot.lane.b32.xlu2 %v7083_v44, %s6224_s15  ;;  %s15769_s15 = smov 16  }
 0x193   : > { %1467 = vrot.lane.b32.xlu0 %v6861_v23, %s6226_s30 }
 0x194   : > { %v7249_v0 = vpop.permute.xlu1 %1233  ;;  %v7251_v57 = vpop.permute.xlu2 %909 }
 0x195   : > { %15822 = vst [vmem:[#allocation52_spill] sm:$0xff] %v7249_v0  ;;  %v7253_v55 = vpop.permute.xlu0 %840  ;;  %v6231_v0 = vmov 12  }
 0x196   : > { %15823 = vst [vmem:[#allocation53_spill] sm:$0xff] %v7251_v57 }
 0x197   : > { %15824 = vst [vmem:[#allocation54_spill] sm:$0xff] %v7253_v55 }
 0x19a   : > { %1588 = vperm.xlu1 %6082, %v7183_v15   ;;  %1465 = vrot.lane.b32.xlu2 %v6856_v21, %s6226_s30 }
 0x19b   : > { %1473 = vrot.lane.b32.xlu0 %v6978_v16, %s6226_s30 }
 0x19c   : > { %v7260_v35 = vpop.permute.xlu1 %1256  ;;  %v7262_v11 = vpop.permute.xlu2 %980 }
 0x19d   : > { %15825 = vst [vmem:[#allocation55_spill] sm:$0xff] %v7260_v35  ;;  %v7264_v58 = vpop.permute.xlu0 %911 }
 0x19e   : > { %15826 = vst [vmem:[#allocation56_spill] sm:$0xff] %v7262_v11 }
 0x19f   : > { %15827 = vst [vmem:[#allocation57_spill] sm:$0xff] %v7264_v58 }
 0x1a2   : > { %1611 = vrot.lane.b32.xlu1 %v6923_v49, %s6230_s21  ;;  %1471 = vrot.lane.b32.xlu2 %v6988_v18, %s6226_s30 }
 0x1a3   : > { %1479 = vrot.lane.b32.xlu0 %v7056_v34, %s6226_s30  ;;  %6083 = vset.pattern.permute.xlu1 %v6231_v0 }
 0x1a4   : > { %v7272_v55 = vpop.permute.xlu1 %1262  ;;  %v7274_v57 = vpop.permute.xlu2 %1051 }
 0x1a5   : > { %15828 = vst [vmem:[#allocation58_spill] sm:$0xff] %v7272_v55  ;;  %v7276_v35 = vpop.permute.xlu0 %982 }
 0x1a6   : > { %15829 = vst [vmem:[#allocation59_spill] sm:$0xff] %v7274_v57 }
 0x1a7   : > { %15830 = vst [vmem:[#allocation60_spill] sm:$0xff] %v7276_v35 }
 0x1aa   : > { %1617 = vrot.lane.b32.xlu1 %v7000_v22, %s6230_s21  ;;  %1477 = vrot.lane.b32.xlu2 %v7083_v44, %s6226_s30  ;;  %s6246_s30 = smov 13  }
 0x1ab   : > { %1538 = vrot.lane.b32.xlu0 %v6861_v23, %s6228_s16 }
 0x1ac   : > { %v7284_v11 = vpop.permute.xlu1 %1304  ;;  %v7286_v58 = vpop.permute.xlu2 %1122 }
 0x1ad   : > { %15831 = vst [vmem:[#allocation61_spill] sm:$0xff] %v7284_v11  ;;  %v7288_v0 = vpop.permute.xlu0 %1053  ;;  %v6233_v11 = vmov 13  }
 0x1ae   : > { %15832 = vst [vmem:[#allocation62_spill] sm:$0xff] %v7286_v58 }
 0x1af   : > { %15833 = vst [vmem:[#allocation63_spill] sm:$0xff] %v7288_v0 }
 0x1b2   : > { %1659 = vperm.xlu1 %6083, %v7183_v15   ;;  %1536 = vrot.lane.b32.xlu2 %v6856_v21, %s6228_s16 }
 0x1b3   : > { %1544 = vrot.lane.b32.xlu0 %v6978_v16, %s6228_s16 }
 0x1b4   : > { %v7295_v55 = vpop.permute.xlu1 %1327  ;;  %v7297_v57 = vpop.permute.xlu2 %1193 }
 0x1b5   : > { %15834 = vst [vmem:[#allocation64_spill] sm:$0xff] %v7295_v55  ;;  %v7299_v35 = vpop.permute.xlu0 %1124 }
 0x1b6   : > { %15835 = vst [vmem:[#allocation65_spill] sm:$0xff] %v7297_v57 }
 0x1b7   : > { %15836 = vst [vmem:[#allocation66_spill] sm:$0xff] %v7299_v35 }
 0x1ba   : > { %1682 = vrot.lane.b32.xlu1 %v6923_v49, %s6232_s0  ;;  %1542 = vrot.lane.b32.xlu2 %v6988_v18, %s6228_s16 }
 0x1bb   : > { %1550 = vrot.lane.b32.xlu0 %v7056_v34, %s6228_s16  ;;  %6084 = vset.pattern.permute.xlu1 %v6233_v11 }
 0x1bc   : > { %v7307_v0 = vpop.permute.xlu1 %1333  ;;  %v7309_v58 = vpop.permute.xlu2 %1264 }
 0x1bd   : > { %15837 = vst [vmem:[#allocation67_spill] sm:$0xff] %v7307_v0  ;;  %v7311_v55 = vpop.permute.xlu0 %1195 }
 0x1be   : > { %15838 = vst [vmem:[#allocation68_spill] sm:$0xff] %v7309_v58 }
 0x1bf   : > { %15839 = vst [vmem:[#allocation69_spill] sm:$0xff] %v7311_v55 }
 0x1c2   : > { %1688 = vrot.lane.b32.xlu1 %v7000_v22, %s6232_s0  ;;  %1548 = vrot.lane.b32.xlu2 %v7083_v44, %s6228_s16  ;;  %s6248_s16 = smov 3  }
 0x1c3   : > { %1609 = vrot.lane.b32.xlu0 %v6861_v23, %s6230_s21 }
 0x1c4   : > { %v7319_v35 = vpop.permute.xlu1 %1375  ;;  %v7321_v57 = vpop.permute.xlu2 %1323 }
 0x1c5   : > { %15840 = vst [vmem:[#allocation70_spill] sm:$0xff] %v7319_v35  ;;  %v7323_v11 = vpop.permute.xlu0 %1260  ;;  %v6235_v35 = vmov 14  }
 0x1c6   : > { %15841 = vst [vmem:[#allocation71_spill] sm:$0xff] %v7321_v57 }
 0x1c7   : > { %15842 = vst [vmem:[#allocation72_spill] sm:$0xff] %v7323_v11 }
 0x1ca   : > { %1730 = vperm.xlu1 %6084, %v7183_v15   ;;  %1607 = vrot.lane.b32.xlu2 %v6856_v21, %s6230_s21 }
 0x1cb   : > { %1615 = vrot.lane.b32.xlu0 %v6978_v16, %s6230_s21 }
 0x1cc   : > { %v7330_v0 = vpop.permute.xlu1 %1398  ;;  %v7332_v55 = vpop.permute.xlu2 %1329 }
 0x1cd   : > { %15843 = vst [vmem:[#allocation73_spill] sm:$0xff] %v7330_v0  ;;  %v7334_v58 = vpop.permute.xlu0 %1266 }
 0x1ce   : > { %15844 = vst [vmem:[#allocation74_spill] sm:$0xff] %v7332_v55 }
 0x1cf   : > { %15845 = vst [vmem:[#allocation75_spill] sm:$0xff] %v7334_v58 }
 0x1d2   : > { %1753 = vrot.lane.b32.xlu1 %v6923_v49, %s6234_s20  ;;  %1613 = vrot.lane.b32.xlu2 %v6988_v18, %s6230_s21 }
 0x1d3   : > { %1621 = vrot.lane.b32.xlu0 %v7056_v34, %s6230_s21  ;;  %6085 = vset.pattern.permute.xlu1 %v6235_v35 }
 0x1d4   : > { %v7342_v57 = vpop.permute.xlu1 %1404  ;;  %v7344_v11 = vpop.permute.xlu2 %1335 }
 0x1d5   : > { %15846 = vst [vmem:[#allocation76_spill] sm:$0xff] %v7342_v57  ;;  %v7346_v0 = vpop.permute.xlu0 %1325 }
 0x1d6   : > { %15847 = vst [vmem:[#allocation77_spill] sm:$0xff] %v7344_v11 }
 0x1d7   : > { %15848 = vst [vmem:[#allocation78_spill] sm:$0xff] %v7346_v0 }
 0x1da   : > { %1759 = vrot.lane.b32.xlu1 %v7000_v22, %s6234_s20  ;;  %1619 = vrot.lane.b32.xlu2 %v7083_v44, %s6230_s21  ;;  %s6250_s21 = smov 2  }
 0x1db   : > { %1680 = vrot.lane.b32.xlu0 %v6861_v23, %s6232_s0 }
 0x1dc   : > { %v7354_v55 = vpop.permute.xlu1 %1446  ;;  %v7356_v58 = vpop.permute.xlu2 %1394 }
 0x1dd   : > { %15849 = vst [vmem:[#allocation79_spill] sm:$0xff] %v7354_v55  ;;  %v7358_v35 = vpop.permute.xlu0 %1331  ;;  %v6237_v55 = vmov 15  }
 0x1de   : > { %15850 = vst [vmem:[#allocation80_spill] sm:$0xff] %v7356_v58 }
 0x1df   : > { %15851 = vst [vmem:[#allocation81_spill] sm:$0xff] %v7358_v35 }
 0x1e2   : > { %1801 = vperm.xlu1 %6085, %v7183_v15   ;;  %1678 = vrot.lane.b32.xlu2 %v6856_v21, %s6232_s0 }
 0x1e3   : > { %1686 = vrot.lane.b32.xlu0 %v6978_v16, %s6232_s0 }
 0x1e4   : > { %v7365_v57 = vpop.permute.xlu1 %1469  ;;  %v7367_v11 = vpop.permute.xlu2 %1400 }
 0x1e5   : > { %15852 = vst [vmem:[#allocation82_spill] sm:$0xff] %v7365_v57  ;;  %v7369_v0 = vpop.permute.xlu0 %1337 }
 0x1e6   : > { %15853 = vst [vmem:[#allocation83_spill] sm:$0xff] %v7367_v11 }
 0x1e7   : > { %15854 = vst [vmem:[#allocation84_spill] sm:$0xff] %v7369_v0 }
 0x1ea   : > { %1824 = vrot.lane.b32.xlu1 %v6923_v49, %s6236_s23  ;;  %1684 = vrot.lane.b32.xlu2 %v6988_v18, %s6232_s0 }
 0x1eb   : > { %1692 = vrot.lane.b32.xlu0 %v7056_v34, %s6232_s0  ;;  %6086 = vset.pattern.permute.xlu1 %v6237_v55 }
 0x1ec   : > { %v7377_v58 = vpop.permute.xlu1 %1475  ;;  %v7379_v35 = vpop.permute.xlu2 %1406 }
 0x1ed   : > { %15855 = vst [vmem:[#allocation85_spill] sm:$0xff] %v7377_v58  ;;  %v7381_v57 = vpop.permute.xlu0 %1396 }
 0x1ee   : > { %15856 = vst [vmem:[#allocation86_spill] sm:$0xff] %v7379_v35 }
 0x1ef   : > { %15857 = vst [vmem:[#allocation87_spill] sm:$0xff] %v7381_v57 }
 0x1f2   : > { %1830 = vrot.lane.b32.xlu1 %v7000_v22, %s6236_s23  ;;  %1690 = vrot.lane.b32.xlu2 %v7083_v44, %s6232_s0  ;;  %s15337_s0 = smov 1  }
 0x1f3   : > { %1751 = vrot.lane.b32.xlu0 %v6861_v23, %s6234_s20 }
 0x1f4   : > { %v7389_v11 = vpop.permute.xlu1 %1517  ;;  %v7391_v0 = vpop.permute.xlu2 %1465 }
 0x1f5   : > { %15858 = vst [vmem:[#allocation88_spill] sm:$0xff] %v7389_v11  ;;  %v7393_v55 = vpop.permute.xlu0 %1402  ;;  %v6239_v11 = vmov 16  }
 0x1f6   : > { %15859 = vst [vmem:[#allocation89_spill] sm:$0xff] %v7391_v0 }
 0x1f7   : > { %15860 = vst [vmem:[#allocation90_spill] sm:$0xff] %v7393_v55 }
 0x1fa   : > { %1872 = vperm.xlu1 %6086, %v7183_v15   ;;  %1749 = vrot.lane.b32.xlu2 %v6856_v21, %s6234_s20 }
 0x1fb   : > { %1757 = vrot.lane.b32.xlu0 %v6978_v16, %s6234_s20 }
 0x1fc   : > { %v7400_v58 = vpop.permute.xlu1 %1540  ;;  %v7402_v57 = vpop.permute.xlu2 %1471 }
 0x1fd   : > { %15861 = vst [vmem:[#allocation91_spill] sm:$0xff] %v7400_v58  ;;  %v7404_v35 = vpop.permute.xlu0 %1408 }
 0x1fe   : > { %15862 = vst [vmem:[#allocation92_spill] sm:$0xff] %v7402_v57 }
 0x1ff   : > { %15863 = vst [vmem:[#allocation93_spill] sm:$0xff] %v7404_v35 }
 0x202   : > { %1895 = vrot.lane.b32.xlu1 %v6923_v49, %s6238_s22  ;;  %1755 = vrot.lane.b32.xlu2 %v6988_v18, %s6234_s20 }
 0x203   : > { %1763 = vrot.lane.b32.xlu0 %v7056_v34, %s6234_s20  ;;  %6087 = vset.pattern.permute.xlu1 %v6239_v11 }
 0x204   : > { %v7412_v0 = vpop.permute.xlu1 %1546  ;;  %v7414_v55 = vpop.permute.xlu2 %1477 }
 0x205   : > { %15864 = vst [vmem:[#allocation94_spill] sm:$0xff] %v7412_v0  ;;  %v7416_v58 = vpop.permute.xlu0 %1467 }
 0x206   : > { %15865 = vst [vmem:[#allocation95_spill] sm:$0xff] %v7414_v55 }
 0x207   : > { %15866 = vst [vmem:[#allocation96_spill] sm:$0xff] %v7416_v58 }
 0x20a   : > { %1901 = vrot.lane.b32.xlu1 %v7000_v22, %s6238_s22  ;;  %1761 = vrot.lane.b32.xlu2 %v7083_v44, %s6234_s20  ;;  %s6254_s20 = smov 127  }
 0x20b   : > { %1822 = vrot.lane.b32.xlu0 %v6861_v23, %s6236_s23 }
 0x20c   : > { %v7424_v57 = vpop.permute.xlu1 %1588  ;;  %v7426_v35 = vpop.permute.xlu2 %1536 }
 0x20d   : > { %15867 = vst [vmem:[#allocation97_spill] sm:$0xff] %v7424_v57  ;;  %v7428_v11 = vpop.permute.xlu0 %1473  ;;  %v6241_v57 = vmov 17  }
 0x20e   : > { %15868 = vst [vmem:[#allocation98_spill] sm:$0xff] %v7426_v35 }
 0x20f   : > { %15869 = vst [vmem:[#allocation99_spill] sm:$0xff] %v7428_v11 }
 0x212   : > { %1943 = vperm.xlu1 %6087, %v7183_v15   ;;  %1820 = vrot.lane.b32.xlu2 %v6856_v21, %s6236_s23 }
 0x213   : > { %1828 = vrot.lane.b32.xlu0 %v6978_v16, %s6236_s23 }
 0x214   : > { %v7435_v0 = vpop.permute.xlu1 %1611  ;;  %v7437_v58 = vpop.permute.xlu2 %1542 }
 0x215   : > { %15870 = vst [vmem:[#allocation100_spill] sm:$0xff] %v7435_v0  ;;  %v7439_v55 = vpop.permute.xlu0 %1479 }
 0x216   : > { %15871 = vst [vmem:[#allocation101_spill] sm:$0xff] %v7437_v58 }
 0x217   : > { %15872 = vst [vmem:[#allocation102_spill] sm:$0xff] %v7439_v55 }
 0x21a   : > { %1966 = vrot.lane.b32.xlu1 %v6923_v49, %s15769_s15  ;;  %1826 = vrot.lane.b32.xlu2 %v6988_v18, %s6236_s23 }
 0x21b   : > { %1834 = vrot.lane.b32.xlu0 %v7056_v34, %s6236_s23  ;;  %6088 = vset.pattern.permute.xlu1 %v6241_v57 }
 0x21c   : > { %v7447_v35 = vpop.permute.xlu1 %1617  ;;  %v7449_v11 = vpop.permute.xlu2 %1548 }
 0x21d   : > { %15873 = vst [vmem:[#allocation103_spill] sm:$0xff] %v7447_v35  ;;  %v7451_v0 = vpop.permute.xlu0 %1538 }
 0x21e   : > { %15874 = vst [vmem:[#allocation104_spill] sm:$0xff] %v7449_v11 }
 0x21f   : > { %15875 = vst [vmem:[#allocation105_spill] sm:$0xff] %v7451_v0 }
 0x222   : > { %1972 = vrot.lane.b32.xlu1 %v7000_v22, %s15769_s15  ;;  %1832 = vrot.lane.b32.xlu2 %v7083_v44, %s6236_s23  ;;  %s6256_s23 = smov 126  }
 0x223   : > { %1893 = vrot.lane.b32.xlu0 %v6861_v23, %s6238_s22 }
 0x224   : > { %v7459_v58 = vpop.permute.xlu1 %1659  ;;  %v7461_v55 = vpop.permute.xlu2 %1607 }
 0x225   : > { %15876 = vst [vmem:[#allocation106_spill] sm:$0xff] %v7459_v58  ;;  %v7463_v57 = vpop.permute.xlu0 %1544 }
 0x226   : > { %15877 = vst [vmem:[#allocation107_spill] sm:$0xff] %v7461_v55  ;;  %v6243_v55 = vmov 18  }
 0x227   : > { %15878 = vst [vmem:[#allocation108_spill] sm:$0xff] %v7463_v57 }
 0x22a   : > { %2014 = vperm.xlu1 %6088, %v7183_v15   ;;  %1891 = vrot.lane.b32.xlu2 %v6856_v21, %s6238_s22 }
 0x22b   : > { %1899 = vrot.lane.b32.xlu0 %v6978_v16, %s6238_s22 }
 0x22c   : > { %v7470_v35 = vpop.permute.xlu1 %1682  ;;  %v7472_v0 = vpop.permute.xlu2 %1613 }
 0x22d   : > { %15879 = vst [vmem:[#allocation109_spill] sm:$0xff] %v7470_v35  ;;  %v7474_v11 = vpop.permute.xlu0 %1550 }
 0x22e   : > { %15880 = vst [vmem:[#allocation110_spill] sm:$0xff] %v7472_v0 }
 0x22f   : > { %15881 = vst [vmem:[#allocation111_spill] sm:$0xff] %v7474_v11 }
 0x232   : > { %2037 = vrot.lane.b32.xlu1 %v6923_v49, %s6242_s24  ;;  %1897 = vrot.lane.b32.xlu2 %v6988_v18, %s6238_s22 }
 0x233   : > { %1905 = vrot.lane.b32.xlu0 %v7056_v34, %s6238_s22  ;;  %6089 = vset.pattern.permute.xlu1 %v6243_v55 }
 0x234   : > { %v7482_v58 = vpop.permute.xlu1 %1688  ;;  %v7484_v57 = vpop.permute.xlu2 %1619 }
 0x235   : > { %15882 = vst [vmem:[#allocation112_spill] sm:$0xff] %v7482_v58  ;;  %v7486_v35 = vpop.permute.xlu0 %1609 }
 0x236   : > { %15883 = vst [vmem:[#allocation113_spill] sm:$0xff] %v7484_v57 }
 0x237   : > { %15884 = vst [vmem:[#allocation114_spill] sm:$0xff] %v7486_v35 }
 0x23a   : > { %2043 = vrot.lane.b32.xlu1 %v7000_v22, %s6242_s24  ;;  %1903 = vrot.lane.b32.xlu2 %v7083_v44, %s6238_s22 }
 0x23b   : > { %1964 = vrot.lane.b32.xlu0 %v6861_v23, %s15769_s15 }
 0x23c   : > { %v7494_v0 = vpop.permute.xlu1 %1730  ;;  %v7496_v11 = vpop.permute.xlu2 %1678 }
 0x23d   : > { %15885 = vst [vmem:[#allocation115_spill] sm:$0xff] %v7494_v0  ;;  %v7498_v55 = vpop.permute.xlu0 %1615  ;;  %v6245_v0 = vmov 19  }
 0x23e   : > { %15886 = vst [vmem:[#allocation116_spill] sm:$0xff] %v7496_v11 }
 0x23f   : > { %15887 = vst [vmem:[#allocation117_spill] sm:$0xff] %v7498_v55 }
 0x242   : > { %2085 = vperm.xlu1 %6089, %v7183_v15   ;;  %1962 = vrot.lane.b32.xlu2 %v6856_v21, %s15769_s15 }
 0x243   : > { %1970 = vrot.lane.b32.xlu0 %v6978_v16, %s15769_s15 }
 0x244   : > { %v7505_v58 = vpop.permute.xlu1 %1753  ;;  %v7507_v35 = vpop.permute.xlu2 %1684 }
 0x245   : > { %15888 = vst [vmem:[#allocation118_spill] sm:$0xff] %v7505_v58  ;;  %v7509_v57 = vpop.permute.xlu0 %1621 }
 0x246   : > { %15889 = vst [vmem:[#allocation119_spill] sm:$0xff] %v7507_v35 }
 0x247   : > { %15890 = vst [vmem:[#allocation120_spill] sm:$0xff] %v7509_v57 }
 0x24a   : > { %2108 = vrot.lane.b32.xlu1 %v6923_v49, %s6244_s17  ;;  %1968 = vrot.lane.b32.xlu2 %v6988_v18, %s15769_s15 }
 0x24b   : > { %1976 = vrot.lane.b32.xlu0 %v7056_v34, %s15769_s15  ;;  %6090 = vset.pattern.permute.xlu1 %v6245_v0 }
 0x24c   : > { %v7517_v11 = vpop.permute.xlu1 %1759  ;;  %v7519_v55 = vpop.permute.xlu2 %1690 }
 0x24d   : > { %15891 = vst [vmem:[#allocation121_spill] sm:$0xff] %v7517_v11  ;;  %v7521_v58 = vpop.permute.xlu0 %1680 }
 0x24e   : > { %15892 = vst [vmem:[#allocation122_spill] sm:$0xff] %v7519_v55 }
 0x24f   : > { %15893 = vst [vmem:[#allocation123_spill] sm:$0xff] %v7521_v58 }
 0x252   : > { %2114 = vrot.lane.b32.xlu1 %v7000_v22, %s6244_s17  ;;  %1974 = vrot.lane.b32.xlu2 %v7083_v44, %s15769_s15 }
 0x253   : > { %2035 = vrot.lane.b32.xlu0 %v6861_v23, %s6242_s24 }
 0x254   : > { %v7529_v57 = vpop.permute.xlu1 %1801  ;;  %v7531_v35 = vpop.permute.xlu2 %1749 }
 0x255   : > { %15894 = vst [vmem:[#allocation124_spill] sm:$0xff] %v7529_v57  ;;  %v7533_v0 = vpop.permute.xlu0 %1686  ;;  %v6247_v57 = vmov 20  }
 0x256   : > { %15895 = vst [vmem:[#allocation125_spill] sm:$0xff] %v7531_v35 }
 0x257   : > { %15896 = vst [vmem:[#allocation126_spill] sm:$0xff] %v7533_v0 }
 0x25a   : > { %2156 = vperm.xlu1 %6090, %v7183_v15   ;;  %2033 = vrot.lane.b32.xlu2 %v6856_v21, %s6242_s24 }
 0x25b   : > { %2041 = vrot.lane.b32.xlu0 %v6978_v16, %s6242_s24 }
 0x25c   : > { %v7540_v11 = vpop.permute.xlu1 %1824  ;;  %v7542_v58 = vpop.permute.xlu2 %1755 }
 0x25d   : > { %15897 = vst [vmem:[#allocation127_spill] sm:$0xff] %v7540_v11  ;;  %v7544_v55 = vpop.permute.xlu0 %1692 }
 0x25e   : > { %15898 = vst [vmem:[#allocation128_spill] sm:$0xff] %v7542_v58 }
 0x25f   : > { %15899 = vst [vmem:[#allocation129_spill] sm:$0xff] %v7544_v55 }
 0x262   : > { %2179 = vrot.lane.b32.xlu1 %v6923_v49, %s6246_s30  ;;  %2039 = vrot.lane.b32.xlu2 %v6988_v18, %s6242_s24 }
 0x263   : > { %2047 = vrot.lane.b32.xlu0 %v7056_v34, %s6242_s24  ;;  %6091 = vset.pattern.permute.xlu1 %v6247_v57 }
 0x264   : > { %v7552_v35 = vpop.permute.xlu1 %1830  ;;  %v7554_v0 = vpop.permute.xlu2 %1761 }
 0x265   : > { %15900 = vst [vmem:[#allocation130_spill] sm:$0xff] %v7552_v35  ;;  %v7556_v11 = vpop.permute.xlu0 %1751 }
 0x266   : > { %15901 = vst [vmem:[#allocation131_spill] sm:$0xff] %v7554_v0 }
 0x267   : > { %15902 = vst [vmem:[#allocation132_spill] sm:$0xff] %v7556_v11 }
 0x26a   : > { %2185 = vrot.lane.b32.xlu1 %v7000_v22, %s6246_s30  ;;  %2045 = vrot.lane.b32.xlu2 %v7083_v44, %s6242_s24 }
 0x26b   : > { %2106 = vrot.lane.b32.xlu0 %v6861_v23, %s6244_s17 }
 0x26c   : > { %v7564_v58 = vpop.permute.xlu1 %1872  ;;  %v7566_v55 = vpop.permute.xlu2 %1820 }
 0x26d   : > { %15903 = vst [vmem:[#allocation133_spill] sm:$0xff] %v7564_v58  ;;  %v7568_v57 = vpop.permute.xlu0 %1757  ;;  %v6249_v58 = vmov 21  }
 0x26e   : > { %15904 = vst [vmem:[#allocation134_spill] sm:$0xff] %v7566_v55 }
 0x26f   : > { %15905 = vst [vmem:[#allocation135_spill] sm:$0xff] %v7568_v57 }
 0x272   : > { %2227 = vperm.xlu1 %6091, %v7183_v15   ;;  %2104 = vrot.lane.b32.xlu2 %v6856_v21, %s6244_s17 }
 0x273   : > { %2112 = vrot.lane.b32.xlu0 %v6978_v16, %s6244_s17 }
 0x274   : > { %v7575_v35 = vpop.permute.xlu1 %1895  ;;  %v7577_v11 = vpop.permute.xlu2 %1826 }
 0x275   : > { %15906 = vst [vmem:[#allocation136_spill] sm:$0xff] %v7575_v35  ;;  %v7579_v0 = vpop.permute.xlu0 %1763 }
 0x276   : > { %15907 = vst [vmem:[#allocation137_spill] sm:$0xff] %v7577_v11 }
 0x277   : > { %15908 = vst [vmem:[#allocation138_spill] sm:$0xff] %v7579_v0 }
 0x27a   : > { %2250 = vrot.lane.b32.xlu1 %v6923_v49, %s6248_s16  ;;  %2110 = vrot.lane.b32.xlu2 %v6988_v18, %s6244_s17 }
 0x27b   : > { %2118 = vrot.lane.b32.xlu0 %v7056_v34, %s6244_s17  ;;  %6092 = vset.pattern.permute.xlu1 %v6249_v58 }
 0x27c   : > { %v7587_v55 = vpop.permute.xlu1 %1901  ;;  %v7589_v57 = vpop.permute.xlu2 %1832 }
 0x27d   : > { %15909 = vst [vmem:[#allocation139_spill] sm:$0xff] %v7587_v55  ;;  %v7591_v35 = vpop.permute.xlu0 %1822 }
 0x27e   : > { %15910 = vst [vmem:[#allocation140_spill] sm:$0xff] %v7589_v57 }
 0x27f   : > { %15911 = vst [vmem:[#allocation141_spill] sm:$0xff] %v7591_v35 }
 0x282   : > { %2256 = vrot.lane.b32.xlu1 %v7000_v22, %s6248_s16  ;;  %2116 = vrot.lane.b32.xlu2 %v7083_v44, %s6244_s17  ;;  %s6259_s17 = smov 115  }
 0x283   : > { %2177 = vrot.lane.b32.xlu0 %v6861_v23, %s6246_s30 }
 0x284   : > { %v7599_v11 = vpop.permute.xlu1 %1943  ;;  %v7601_v0 = vpop.permute.xlu2 %1891 }
 0x285   : > { %15912 = vst [vmem:[#allocation142_spill] sm:$0xff] %v7599_v11  ;;  %v7603_v58 = vpop.permute.xlu0 %1828  ;;  %v6251_v11 = vmov 22  }
 0x286   : > { %15913 = vst [vmem:[#allocation143_spill] sm:$0xff] %v7601_v0 }
 0x287   : > { %15914 = vst [vmem:[#allocation144_spill] sm:$0xff] %v7603_v58 }
 0x28a   : > { %2298 = vperm.xlu1 %6092, %v7183_v15   ;;  %2175 = vrot.lane.b32.xlu2 %v6856_v21, %s6246_s30 }
 0x28b   : > { %2183 = vrot.lane.b32.xlu0 %v6978_v16, %s6246_s30 }
 0x28c   : > { %v7610_v55 = vpop.permute.xlu1 %1966  ;;  %v7612_v57 = vpop.permute.xlu2 %1897 }
 0x28d   : > { %15915 = vst [vmem:[#allocation145_spill] sm:$0xff] %v7610_v55  ;;  %v7614_v35 = vpop.permute.xlu0 %1834 }
 0x28e   : > { %15916 = vst [vmem:[#allocation146_spill] sm:$0xff] %v7612_v57 }
 0x28f   : > { %15917 = vst [vmem:[#allocation147_spill] sm:$0xff] %v7614_v35 }
 0x292   : > { %2321 = vrot.lane.b32.xlu1 %v6923_v49, %s6250_s21  ;;  %2181 = vrot.lane.b32.xlu2 %v6988_v18, %s6246_s30 }
 0x293   : > { %2189 = vrot.lane.b32.xlu0 %v7056_v34, %s6246_s30  ;;  %6093 = vset.pattern.permute.xlu1 %v6251_v11 }
 0x294   : > { %v7622_v0 = vpop.permute.xlu1 %1972  ;;  %v7624_v58 = vpop.permute.xlu2 %1903 }
 0x295   : > { %15918 = vst [vmem:[#allocation148_spill] sm:$0xff] %v7622_v0  ;;  %v7626_v55 = vpop.permute.xlu0 %1893 }
 0x296   : > { %15919 = vst [vmem:[#allocation149_spill] sm:$0xff] %v7624_v58 }
 0x297   : > { %15920 = vst [vmem:[#allocation150_spill] sm:$0xff] %v7626_v55 }
 0x29a   : > { %2327 = vrot.lane.b32.xlu1 %v7000_v22, %s6250_s21  ;;  %2187 = vrot.lane.b32.xlu2 %v7083_v44, %s6246_s30  ;;  %s6279_s30 = smov 96  }
 0x29b   : > { %2248 = vrot.lane.b32.xlu0 %v6861_v23, %s6248_s16 }
 0x29c   : > { %v7634_v35 = vpop.permute.xlu1 %2014  ;;  %v7636_v57 = vpop.permute.xlu2 %1962 }
 0x29d   : > { %15921 = vst [vmem:[#allocation151_spill] sm:$0xff] %v7634_v35  ;;  %v7638_v11 = vpop.permute.xlu0 %1899  ;;  %v6253_v35 = vmov 23  }
 0x29e   : > { %15922 = vst [vmem:[#allocation152_spill] sm:$0xff] %v7636_v57 }
 0x29f   : > { %15923 = vst [vmem:[#allocation153_spill] sm:$0xff] %v7638_v11 }
 0x2a2   : > { %2369 = vperm.xlu1 %6093, %v7183_v15   ;;  %2246 = vrot.lane.b32.xlu2 %v6856_v21, %s6248_s16 }
 0x2a3   : > { %2254 = vrot.lane.b32.xlu0 %v6978_v16, %s6248_s16 }
 0x2a4   : > { %v7645_v0 = vpop.permute.xlu1 %2037  ;;  %v7647_v55 = vpop.permute.xlu2 %1968 }
 0x2a5   : > { %15924 = vst [vmem:[#allocation154_spill] sm:$0xff] %v7645_v0  ;;  %v7649_v58 = vpop.permute.xlu0 %1905 }
 0x2a6   : > { %15925 = vst [vmem:[#allocation155_spill] sm:$0xff] %v7647_v55 }
 0x2a7   : > { %15926 = vst [vmem:[#allocation156_spill] sm:$0xff] %v7649_v58 }
 0x2aa   : > { %2392 = vrot.lane.b32.xlu1 %v6923_v49, %s15337_s0  ;;  %2252 = vrot.lane.b32.xlu2 %v6988_v18, %s6248_s16 }
 0x2ab   : > { %2260 = vrot.lane.b32.xlu0 %v7056_v34, %s6248_s16  ;;  %6094 = vset.pattern.permute.xlu1 %v6253_v35 }
 0x2ac   : > { %v7657_v57 = vpop.permute.xlu1 %2043  ;;  %v7659_v11 = vpop.permute.xlu2 %1974 }
 0x2ad   : > { %15927 = vst [vmem:[#allocation157_spill] sm:$0xff] %v7657_v57  ;;  %v7661_v0 = vpop.permute.xlu0 %1964 }
 0x2ae   : > { %15928 = vst [vmem:[#allocation158_spill] sm:$0xff] %v7659_v11 }
 0x2af   : > { %15929 = vst [vmem:[#allocation159_spill] sm:$0xff] %v7661_v0 }
 0x2b2   : > { %2398 = vrot.lane.b32.xlu1 %v7000_v22, %s15337_s0  ;;  %2258 = vrot.lane.b32.xlu2 %v7083_v44, %s6248_s16  ;;  %s6263_s16 = smov 113  }
 0x2b3   : > { %2319 = vrot.lane.b32.xlu0 %v6861_v23, %s6250_s21 }
 0x2b4   : > { %v7669_v58 = vpop.permute.xlu1 %2085  ;;  %v7671_v55 = vpop.permute.xlu2 %2033 }
 0x2b5   : > { %15930 = vst [vmem:[#allocation160_spill] sm:$0xff] %v7669_v58  ;;  %v7673_v35 = vpop.permute.xlu0 %1970 }
 0x2b6   : > { %15931 = vst [vmem:[#allocation161_spill] sm:$0xff] %v7671_v55 }
 0x2b7   : > { %15932 = vst [vmem:[#allocation162_spill] sm:$0xff] %v7673_v35 }
 0x2ba   : > { %2440 = vperm.xlu1 %6094, %v7183_v15   ;;  %2317 = vrot.lane.b32.xlu2 %v6856_v21, %s6250_s21 }
 0x2bb   : > { %2325 = vrot.lane.b32.xlu0 %v6978_v16, %s6250_s21 }
 0x2bc   : > { %v7680_v57 = vpop.permute.xlu1 %2108  ;;  %v7682_v0 = vpop.permute.xlu2 %2039 }
 0x2bd   : > { %15933 = vst [vmem:[#allocation163_spill] sm:$0xff] %v7680_v57  ;;  %v7684_v11 = vpop.permute.xlu0 %1976  ;;  %v6255_v57 = vmov 24  }
 0x2be   : > { %15934 = vst [vmem:[#allocation164_spill] sm:$0xff] %v7682_v0  ;;  %6095 = vset.pattern.permute.xlu2 %v6255_v57 }
 0x2bf   : > { %15935 = vst [vmem:[#allocation165_spill] sm:$0xff] %v7684_v11 }
 0x2c2   : > { %2507 = vrot.lane.b32.xlu1 %v6861_v23, %s6254_s20  ;;  %2323 = vrot.lane.b32.xlu2 %v6988_v18, %s6250_s21 }
 0x2c3   : > { %2331 = vrot.lane.b32.xlu0 %v7056_v34, %s6250_s21 }
 0x2c4   : > { %v7692_v58 = vpop.permute.xlu1 %2114  ;;  %v7694_v55 = vpop.permute.xlu2 %2045 }
 0x2c5   : > { %15936 = vst [vmem:[#allocation166_spill] sm:$0xff] %v7692_v58  ;;  %v7696_v35 = vpop.permute.xlu0 %2035 }
 0x2c6   : > { %15937 = vst [vmem:[#allocation167_spill] sm:$0xff] %v7694_v55 }
 0x2c7   : > { %15938 = vst [vmem:[#allocation168_spill] sm:$0xff] %v7696_v35 }
 0x2ca   : > { %2513 = vrot.lane.b32.xlu1 %v6978_v16, %s6254_s20  ;;  %2329 = vrot.lane.b32.xlu2 %v7083_v44, %s6250_s21  ;;  %s15513_s21 = smov 112  }
 0x2cb   : > { %2390 = vrot.lane.b32.xlu0 %v6861_v23, %s15337_s0 }
 0x2cc   : > { %v7704_v0 = vpop.permute.xlu1 %2156  ;;  %v7706_v11 = vpop.permute.xlu2 %2104 }
 0x2cd   : > { %15939 = vst [vmem:[#allocation169_spill] sm:$0xff] %v7704_v0  ;;  %v7708_v58 = vpop.permute.xlu0 %2041 }
 0x2ce   : > { %15940 = vst [vmem:[#allocation170_spill] sm:$0xff] %v7706_v11 }
 0x2cf   : > { %15941 = vst [vmem:[#allocation171_spill] sm:$0xff] %v7708_v58 }
 0x2d2   : > { %2519 = vrot.lane.b32.xlu1 %v7056_v34, %s6254_s20  ;;  %2388 = vrot.lane.b32.xlu2 %v6856_v21, %s15337_s0 }
 0x2d3   : > { %2396 = vrot.lane.b32.xlu0 %v6978_v16, %s15337_s0 }
 0x2d4   : > { %v7716_v57 = vpop.permute.xlu1 %2179  ;;  %v7718_v55 = vpop.permute.xlu2 %2110 }
 0x2d5   : > { %15942 = vst [vmem:[#allocation172_spill] sm:$0xff] %v7716_v57  ;;  %v7720_v35 = vpop.permute.xlu0 %2047 }
 0x2d6   : > { %15943 = vst [vmem:[#allocation173_spill] sm:$0xff] %v7718_v55 }
 0x2d7   : > { %15944 = vst [vmem:[#allocation174_spill] sm:$0xff] %v7720_v35 }
 0x2da   : > { %2578 = vrot.lane.b32.xlu1 %v6861_v23, %s6256_s23  ;;  %2394 = vrot.lane.b32.xlu2 %v6988_v18, %s15337_s0 }
 0x2db   : > { %2402 = vrot.lane.b32.xlu0 %v7056_v34, %s15337_s0 }
 0x2dc   : > { %v7728_v0 = vpop.permute.xlu1 %2185  ;;  %v7730_v11 = vpop.permute.xlu2 %2116 }
 0x2dd   : > { %15945 = vst [vmem:[#allocation175_spill] sm:$0xff] %v7728_v0  ;;  %v7732_v58 = vpop.permute.xlu0 %2106 }
 0x2de   : > { %15946 = vst [vmem:[#allocation176_spill] sm:$0xff] %v7730_v11 }
 0x2df   : > { %15947 = vst [vmem:[#allocation177_spill] sm:$0xff] %v7732_v58 }
 0x2e2   : > { %2584 = vrot.lane.b32.xlu1 %v6978_v16, %s6256_s23  ;;  %2400 = vrot.lane.b32.xlu2 %v7083_v44, %s15337_s0  ;;  %s6257_s0 = smov 125  }
 0x2e3   : > { %2505 = vrot.lane.b32.xlu0 %v6856_v21, %s6254_s20 }
 0x2e4   : > { %v7740_v57 = vpop.permute.xlu1 %2227  ;;  %v7742_v35 = vpop.permute.xlu2 %2175 }
 0x2e5   : > { %15948 = vst [vmem:[#allocation178_spill] sm:$0xff] %v7740_v57  ;;  %v7744_v55 = vpop.permute.xlu0 %2112  ;;  %v7760_v57 = vld [vmem:[%s15954_s1 + $0x1] ss:$2 sm:$0xff] }
 0x2e6   : > { %15949 = vst [vmem:[#allocation179_spill] sm:$0xff] %v7742_v35  ;;  %v7765_v35 = vld [vmem:[%s15954_s1] ss:$2 sm:$0xff]  ;;  %vm739_vm2 = vcmp.ge.s32.totalorder %v7760_v57, 0  ;;  %vm740_vm3 = vcmp.lt.s32.totalorder %v7760_v57, 16  ;;  %vm733_vm11 = vcmp.ge.s32.totalorder %v7760_v57, 2 }
 0x2e7   : > { %15950 = vst [vmem:[#allocation180_spill] sm:$0xff] %v7744_v55  ;;  %vm718_vm4 = vcmp.ge.s32.totalorder %v7765_v35, 0  ;;  %vm719_vm5 = vcmp.lt.s32.totalorder %v7765_v35, 16  ;;  %vm7783_vm6 = vmand %vm739_vm2, %vm740_vm3  ;;  %vm709_vm8 = vcmp.ge.s32.totalorder %v7765_v35, 3  ;;  %vm710_vm9 = vcmp.lt.s32.totalorder %v7765_v35, 19 }
 0x2e8   : > { %15955 = vst [vmem:[#allocation184_spill] sm:$0xff] %v7765_v35  ;;  %v15960_v36 = vsel %vm7783_vm6, 4294967295, %v15959_v36  ;;  %vm7787_vm7 = vmand %vm718_vm4, %vm719_vm5  ;;  %vm734_vm12 = vcmp.lt.s32.totalorder %v7760_v57, 18  ;;  %vm730_vm14 = vcmp.ge.s32.totalorder %v7760_v57, 3  ;;  %vm731_vm15 = vcmp.lt.s32.totalorder %v7760_v57, 19 }
 0x2e9   : > { %15961 = vst [vmem:[#allocation188_spill] sm:$0xff] %v15960_v36  ;;  %v15963_v60 = vsel %vm7787_vm7, 4294967295, %v15962_v60  ;;  %vm2459_vm10 = vmand %vm7787_vm7, %vm7783_vm6  ;;  %vm736_vm3 = vcmp.ge.s32.totalorder %v7760_v57, 1  ;;  %vm737_vm4 = vcmp.lt.s32.totalorder %v7760_v57, 17 }
 0x2ea   : > { %2590 = vrot.lane.b32.xlu1 %v7056_v34, %s6256_s23  ;;  %2486 = vperm.xlu2 %6095, %v7183_v15   ;;  %15964 = vst [vmem:[#allocation189_spill] sm:$0xff] %v15963_v60  ;;  %vm7809_vm13 = vmand %vm709_vm8, %vm710_vm9  ;;  %v15970_v60 = vmov 0   ;;  %vm742_vm9 = vcmp.ge.s32.totalorder %v7760_v57, 4294967295 }
 0x2eb   : > { %2511 = vrot.lane.b32.xlu0 %v6988_v18, %s6254_s20  ;;  %v2460_v56 = vsel %vm2459_vm10, 1, %v15970_v60  ;;  %vm7818_vm2 = vmand %vm733_vm11, %vm734_vm12  ;;  %vm743_vm10 = vcmp.lt.s32.totalorder %v7760_v57, 15 }
 0x2ec   : > { %v7751_v0 = vpop.permute.xlu1 %2250  ;;  %v7753_v11 = vpop.permute.xlu2 %2181  ;;  %v15972_v62 = vsel %vm7818_vm2, 4294967295, %v15971_v62  ;;  %vm7824_vm5 = vmand %vm730_vm14, %vm731_vm15  ;;  %v2461_v12 = vperm.slane %v2460_v56, 0  ;;  %v2463_v17 = vperm.slane %v2460_v56, 2  ;;  %v2464_v3 = vperm.slane %v2460_v56, 3 }
 0x2ed   : > { %15951 = vst [vmem:[#allocation181_spill] sm:$0xff] %v7751_v0  ;;  %v7755_v58 = vpop.permute.xlu0 %2118  ;;  %v6258_v0 = vmov 25   ;;  %vm851_vm8 = vmand %vm7809_vm13, %vm7818_vm2  ;;  %v2465_v1 = vperm.slane %v2460_v56, 4  ;;  %v2466_v45 = vperm.slane %v2460_v56, 5  ;;  %vm16187_vm2 = vcmp.lt.s32.totalorder %v7906_v9, 51 }
 0x2ee   : > { %15952 = vst [vmem:[#allocation182_spill] sm:$0xff] %v7753_v11  ;;  %vm7834_vm11 = vmand %vm736_vm3, %vm737_vm4  ;;  %vm7859_vm3 = vcmp.eq.s32.totalorder %v2461_v12, 1  ;;  %vm7883_vm1 = vcmp.eq.s32.totalorder %v2463_v17, 1  ;;  %v16001_v17 = vmov 0  ;;  %vm16004_vm4 = vcmp.ge.s32.totalorder %v7760_v57, 4294967294 }
 0x2ef   : > { %15953 = vst [vmem:[#allocation183_spill] sm:$0xff] %v7755_v58  ;;  %vm779_vm12 = vmand %vm7809_vm13, %vm7824_vm5  ;;  %v15989_v20 = vsel %vm7859_vm3, 4294967295, %v15988_v20  ;;  %v15993_v4 = vsel %vm7883_vm1, 4294967295, %v15992_v4  ;;  %vm7902_vm0 = vcmp.eq.s32.totalorder %v2466_v45, 1  ;;  %vm16044_vm1 = vcmp.lt.s32.totalorder %v7906_v9, 48 }
 0x2f0   : > { %15973 = vst [vmem:[#allocation193_spill] sm:$0xff] %v15972_v62  ;;  %vm7847_vm14 = vmand %vm742_vm9, %vm743_vm10  ;;  %vm746_vm10 = vcmp.lt.s32.totalorder %v7760_v57, 14  ;;  %v7877_v12 = vsel %vm779_vm12, 1, %v15970_v60  ;;  %vm7894_vm12 = vcmp.eq.s32.totalorder %v2464_v3, 1  ;;  %vm7898_vm9 = vcmp.eq.s32.totalorder %v2465_v1, 1 }
 0x2f1   : > { %v15981_v5 = vsel %vm7847_vm14, 4294967295, %v15980_v5  ;;  %15990 = vst [vmem:[#allocation200_spill] sm:$0xff] %v15989_v20  ;;  %v16002_v17 = vsel %vm7902_vm0, 4294967295, %v16001_v17  ;;  %v7914_v3 = vsel %vm851_vm8, 1, %v15970_v60  ;;  %vm7918_vm3 = vmand %vm16004_vm4, %vm746_vm10  ;;  %v16005_v1 = vmov 0 }
 0x2f2   : > { %2649 = vrot.lane.b32.xlu1 %v6861_v23, %s6257_s0  ;;  %2509 = vrot.lane.b32.xlu2 %v6923_v49, %s6254_s20  ;;  %15982 = vst [vmem:[#allocation196_spill] sm:$0xff] %v15981_v5  ;;  %v16006_v1 = vsel %vm7918_vm3, 4294967295, %v16005_v1  ;;  %vm16008_vm7 = vmand %vm7809_vm13, %vm7834_vm11  ;;  %v16009_v20 = vmov 0  ;;  %v16012_v62 = vmov 0  ;;  %vm15407_vm10 = vcmp.lt.s32.totalorder %v7906_v9, 51 }
 0x2f3   : > { %2517 = vrot.lane.b32.xlu0 %v7083_v44, %s6254_s20  ;;  %6096 = vset.pattern.permute.xlu2 %v6258_v0  ;;  %15994 = vst [vmem:[#allocation202_spill] sm:$0xff] %v15993_v4  ;;  %v7931_v40 = vsel %vm16008_vm7, 1, %v15970_v60  ;;  %v777_v5 = vsel %vm15407_vm10, %v7066_v38, %v7079_v42  ;;  %vm16026_vm10 = vmand %vm7809_vm13, %vm7918_vm3  ;;  %v783_v38 = vperm.slane %v7877_v12, 2 }
 0x2f4   : > { %v7775_v58 = vpop.permute.xlu1 %2256  ;;  %v7777_v11 = vpop.permute.xlu2 %2187  ;;  %16003 = vst [vmem:[#allocation205_spill] sm:$0xff] %v16002_v17  ;;  %v926_v17 = vperm.slane %v7931_v40, 2 }
 0x2f5   : > { %15956 = vst [vmem:[#allocation185_spill] sm:$0xff] %v7775_v58  ;;  %v7781_v55 = vpop.permute.xlu0 %2177 }
 0x2f6   : > { %15957 = vst [vmem:[#allocation186_spill] sm:$0xff] %v7777_v11 }
 0x2f7   : > { %15958 = vst [vmem:[#allocation187_spill] sm:$0xff] %v7781_v55 }
 0x2f8   : > { %16007 = vst [vmem:[#allocation206_spill] sm:$0xff] %v16006_v1 }
 0x2fa   : > { %2655 = vrot.lane.b32.xlu1 %v6978_v16, %s6257_s0  ;;  %2515 = vrot.lane.b32.xlu2 %v7000_v22, %s6254_s20 }
 0x2fb   : > { %2576 = vrot.lane.b32.xlu0 %v6856_v21, %s6256_s23 }
 0x2fc   : > { %v7805_v0 = vpop.permute.xlu1 %2298  ;;  %v7807_v58 = vpop.permute.xlu2 %2246 }
 0x2fd   : > { %15965 = vst [vmem:[#allocation190_spill] sm:$0xff] %v7805_v0  ;;  %v7815_v11 = vpop.permute.xlu0 %2183  ;;  %v2462_v0 = vperm.slane %v2460_v56, 1 }
 0x2fe   : > { %15966 = vst [vmem:[#allocation191_spill] sm:$0xff] %v7807_v58  ;;  %v15974_v58 = vmov 0 }
 0x2ff   : > { %15969 = vst [vmem:[#allocation192_spill] sm:$0xff] %v7815_v11  ;;  %v15975_v58 = vsel %vm7824_vm5, 4294967295, %v15974_v58  ;;  %v15977_v11 = vmov 0  ;;  %vm7855_vm15 = vcmp.eq.s32.totalorder %v2462_v0, 1  ;;  %v2468_v0 = vperm.slane %v2460_v56, 7 }
 0x300   : > { %15976 = vst [vmem:[#allocation194_spill] sm:$0xff] %v15975_v58  ;;  %v15978_v11 = vsel %vm7834_vm11, 4294967295, %v15977_v11  ;;  %v15986_v10 = vsel %vm7855_vm15, 4294967295, %v15985_v10  ;;  %v15998_v58 = vmov 0  ;;  %vm16015_vm15 = vmand %vm7809_vm13, %vm7783_vm6  ;;  %vm749_vm11 = vcmp.lt.s32.totalorder %v7760_v57, 13 }
 0x301   : > { %15979 = vst [vmem:[#allocation195_spill] sm:$0xff] %v15978_v11  ;;  %v15999_v58 = vsel %vm7898_vm9, 4294967295, %v15998_v58  ;;  %vm7938_vm4 = vcmp.eq.s32.totalorder %v2468_v0, 1  ;;  %v7949_v45 = vsel %vm16015_vm15, 1, %v15970_v60  ;;  %vm16016_vm15 = vmand %vm7809_vm13, %vm7847_vm14  ;;  %v925_v11 = vperm.slane %v7931_v40, 1 }
 0x302   : > { %2661 = vrot.lane.b32.xlu1 %v7056_v34, %s6257_s0  ;;  %2557 = vperm.xlu2 %6096, %v7183_v15   ;;  %15987 = vst [vmem:[#allocation199_spill] sm:$0xff] %v15986_v10  ;;  %v16013_v62 = vsel %vm7938_vm4, 4294967295, %v16012_v62  ;;  %v7964_v0 = vsel %vm16016_vm15, 1, %v15970_v60  ;;  %v6260_v10 = vmov 26   ;;  %vm16021_vm15 = vcmp.ge.s32.totalorder %v7760_v57, 4294967293 }
 0x303   : > { %2582 = vrot.lane.b32.xlu0 %v6988_v18, %s6256_s23  ;;  %16000 = vst [vmem:[#allocation204_spill] sm:$0xff] %v15999_v58  ;;  %vm8004_vm9 = vmand %vm16021_vm15, %vm749_vm11  ;;  %v1067_v36 = vperm.slane %v7964_v0, 1  ;;  %v8018_v58 = vsel %vm16026_vm10, 1, %v15970_v60  ;;  %vm16029_vm15 = vcmp.lt.s32.totalorder %v7906_v9, 50  ;;  %vm8036_vm0 = vcmp.eq.s32.totalorder %v925_v11, 1 }
 0x304   : > { %v7851_v14 = vpop.permute.xlu1 %2321  ;;  %v7853_v2 = vpop.permute.xlu2 %2252  ;;  %16014 = vst [vmem:[#allocation208_spill] sm:$0xff] %v16013_v62  ;;  %v1138_v4 = vperm.slane %v8018_v58, 1  ;;  %v997_v55 = vperm.slane %v7949_v45, 2  ;;  %vm8073_vm10 = vcmp.eq.s32.totalorder %v783_v38, 1  ;;  %vm16043_vm4 = vcmp.lt.s32.totalorder %v7906_v9, 49 }
 0x305   : > { %15983 = vst [vmem:[#allocation197_spill] sm:$0xff] %v7851_v14  ;;  %v7869_v14 = vpop.permute.xlu0 %2189  ;;  %v991_v38 = vsel %vm16044_vm1, %v7052_v32, %v7095_v47  ;;  %v1068_v32 = vperm.slane %v7964_v0, 2  ;;  %v1139_v62 = vperm.slane %v8018_v58, 2 }
 0x306   : > { %15984 = vst [vmem:[#allocation198_spill] sm:$0xff] %v7853_v2  ;;  %v2467_v2 = vperm.slane %v2460_v56, 6  ;;  %v782_v56 = vperm.slane %v7877_v12, 1  ;;  %vm8114_vm1 = vcmp.eq.s32.totalorder %v997_v55, 1 }
 0x307   : > { %15991 = vst [vmem:[#allocation201_spill] sm:$0xff] %v7869_v14  ;;  %v15995_v14 = vmov 0 }
 0x308   : > { %v15996_v14 = vsel %vm7894_vm12, 4294967295, %v15995_v14  ;;  %vm7934_vm8 = vcmp.eq.s32.totalorder %v2467_v2, 1  ;;  %v854_v2 = vperm.slane %v7914_v3, 1  ;;  %vm7990_vm7 = vcmp.eq.s32.totalorder %v782_v56, 1 }
 0x309   : > { %15997 = vst [vmem:[#allocation203_spill] sm:$0xff] %v15996_v14  ;;  %v16010_v20 = vsel %vm7934_vm8, 4294967295, %v16009_v20  ;;  %v996_v14 = vperm.slane %v7949_v45, 1 }
 0x30a   : > { %16011 = vst [vmem:[#allocation207_spill] sm:$0xff] %v16010_v20  ;;  %2720 = vrot.lane.b32.xlu1 %v6861_v23, %s6259_s17  ;;  %2580 = vrot.lane.b32.xlu2 %v6923_v49, %s6256_s23  ;;  %vm8023_vm11 = vcmp.eq.s32.totalorder %v854_v2, 1  ;;  %v798_v2 = vsel %vm7990_vm7, %v777_v5, 0.0  ;;  %vm8059_vm7 = vcmp.eq.s32.totalorder %v1067_v36, 1 }
 0x30b   : > { %2588 = vrot.lane.b32.xlu0 %v7083_v44, %s6256_s23  ;;  %6097 = vset.pattern.permute.xlu2 %v6260_v10  ;;  %v16022_v10 = vmov 0  ;;  %vm8047_vm12 = vcmp.eq.s32.totalorder %v996_v14, 1  ;;  %v8428_v14 = vld [vmem:[%s15176_s4] sm:$0xff] }
 0x30c   : > { %v7980_v35 = vpop.permute.xlu1 %2327  ;;  %v7982_v33 = vpop.permute.xlu2 %2258  ;;  %v16023_v10 = vsel %vm8004_vm9, 4294967295, %v16022_v10 }
 0x30d   : > { %16017 = vst [vmem:[#allocation209_spill] sm:$0xff] %v7980_v35  ;;  %v855_v35 = vperm.slane %v7914_v3, 2  ;;  %v8008_v56 = vpop.permute.xlu0 %2248 }
 0x30e   : > { %16018 = vst [vmem:[#allocation210_spill] sm:$0xff] %v7982_v33 }
 0x30f   : > { %16024 = vst [vmem:[#allocation211_spill] sm:$0xff] %v16023_v10  ;;  %vm8051_vm8 = vcmp.eq.s32.totalorder %v855_v35, 1  ;;  %v811_v35 = vmul.f32 %v6990_v19, %v798_v2 }
 0x310   : > { %16025 = vst [vmem:[#allocation212_spill] sm:$0xff] %v8008_v56  ;;  %v849_v56 = vsel %vm16029_vm15, %v7032_v28, %v7068_v39  ;;  %vm1206_vm15 = vmand %vm7809_vm13, %vm8004_vm9  ;;  %vm8063_vm13 = vcmp.eq.s32.totalorder %v926_v17, 1  ;;  %vm15444_vm9 = vcmp.lt.s32.totalorder %v7906_v9, 46 }
 0x311   : > { %v870_v5 = vsel %vm8023_vm11, %v849_v56, 0.0  ;;  %vm16042_vm11 = vcmp.lt.s32.totalorder %v7906_v9, 51  ;;  %v8082_v17 = vsel %vm1206_vm15, 1, %v15970_v60  ;;  %v920_v56 = vsel %vm16043_vm4, %v7042_v30, %v7081_v43 }
 0x312   : > { %2726 = vrot.lane.b32.xlu1 %v6978_v16, %s6259_s17  ;;  %2586 = vrot.lane.b32.xlu2 %v7000_v22, %s6256_s23  ;;  %v776_v36 = vsel %vm16042_vm11, %v7079_v42, %v7105_v50  ;;  %v784_v42 = vperm.slane %v7877_v12, 3  ;;  %v882_v10 = vmul.f32 %v7006_v24, %v870_v5  ;;  %vm16047_vm15 = vcmp.lt.s32.totalorder %v7906_v9, 50  ;;  %s6261_s23 = smov 114  }
 0x313   : > { %2647 = vrot.lane.b32.xlu0 %v6856_v21, %s6257_s0  ;;  %v848_v30 = vsel %vm16047_vm15, %v7068_v39, %v7093_v46  ;;  %vm8105_vm4 = vcmp.eq.s32.totalorder %v1138_v4, 1  ;;  %v1209_v5 = vperm.slane %v8082_v17, 1  ;;  %v856_v21 = vperm.slane %v7914_v3, 3 }
 0x314   : > { %v8096_v2 = vpop.permute.xlu1 %2369  ;;  %v8098_v20 = vpop.permute.xlu2 %2317  ;;  %v941_v39 = vsel %vm8036_vm0, %v920_v56, 0.0  ;;  %v890_v4 = vadd.f32 %v882_v10, %v811_v35  ;;  %v1012_v22 = vsel %vm8047_vm12, %v991_v38, 0.0  ;;  %vm16053_vm11 = vcmp.lt.s32.totalorder %v7906_v9, 47 }
 0x315   : > { %16045 = vst [vmem:[#allocation213_spill] sm:$0xff] %v8096_v2  ;;  %v8110_v60 = vpop.permute.xlu0 %2254  ;;  %v799_v2 = vsel %vm8073_vm10, %v776_v36, 0.0  ;;  %v1062_v33 = vsel %vm16053_vm11, %v7064_v37, %v7107_v51  ;;  %v871_v55 = vsel %vm8051_vm8, %v848_v30, 0.0  ;;  %vm16054_vm10 = vcmp.lt.s32.totalorder %v7906_v9, 49 }
 0x316   : > { %16046 = vst [vmem:[#allocation214_spill] sm:$0xff] %v8098_v20  ;;  %v919_v36 = vsel %vm16054_vm10, %v7081_v43, %v7103_v48  ;;  %v927_v10 = vperm.slane %v7931_v40, 3  ;;  %v812_v57 = vmul.f32 %v6990_v19, %v799_v2  ;;  %vm8137_vm0 = vcmp.eq.s32.totalorder %v784_v42, 1 }
 0x317   : > { %16050 = vst [vmem:[#allocation215_spill] sm:$0xff] %v8110_v60  ;;  %vm8142_vm15 = vcmp.eq.s32.totalorder %v1068_v32, 1  ;;  %v953_v30 = vmul.f32 %v7016_v25, %v941_v39  ;;  %v1024_v43 = vmul.f32 %v7024_v26, %v1012_v22  ;;  %v1083_v56 = vsel %vm8059_vm7, %v1062_v33, 0.0  ;;  %v16119_v60 = vld [vmem:[#allocation35_spill] sm:$0xff]  ;;  %v16280_v39 = vld [vmem:[#allocation65_spill] sm:$0xff] }
 0x318   : > { %v785_v38 = vperm.slane %v7877_v12, 4  ;;  %v883_v42 = vmul.f32 %v7006_v24, %v871_v55  ;;  %v942_v32 = vsel %vm8063_vm13, %v919_v36, 0.0  ;;  %vm8157_vm8 = vcmp.eq.s32.totalorder %v856_v21, 1 }
 0x319   : > { %v998_v22 = vperm.slane %v7949_v45, 3  ;;  %v961_v11 = vadd.f32 %v953_v30, %v890_v4  ;;  %vm16061_vm7 = vcmp.lt.s32.totalorder %v7906_v9, 48  ;;  %vm8168_vm11 = vcmp.eq.s32.totalorder %v1209_v5, 1 }
 0x31a   : > { %2732 = vrot.lane.b32.xlu1 %v7056_v34, %s6259_s17  ;;  %2628 = vperm.xlu2 %6097, %v7183_v15   ;;  %v990_v15 = vsel %vm16061_vm7, %v7095_v47, %v7114_v52  ;;  %vm8172_vm13 = vcmp.eq.s32.totalorder %v1139_v62, 1  ;;  %vm8176_vm10 = vcmp.eq.s32.totalorder %v927_v10, 1  ;;  %v1095_v55 = vmul.f32 %v7034_v29, %v1083_v56 }
 0x31b   : > { %2653 = vrot.lane.b32.xlu0 %v6988_v18, %s6257_s0  ;;  %v891_v36 = vadd.f32 %v883_v42, %v812_v57  ;;  %v1133_v47 = vsel %vm15444_vm9, %v7077_v41, %v7118_v54  ;;  %v857_v5 = vperm.slane %v7914_v3, 4  ;;  %v1032_v10 = vadd.f32 %v1024_v43, %v961_v11 }
 0x31c   : > { %v8180_v33 = vpop.permute.xlu1 %2392  ;;  %v8182_v4 = vpop.permute.xlu2 %2323  ;;  %v954_v30 = vmul.f32 %v7016_v25, %v942_v32  ;;  %vm16071_vm7 = vcmp.lt.s32.totalorder %v7906_v9, 51  ;;  %vm8197_vm12 = vcmp.eq.s32.totalorder %v785_v38, 1  ;;  %v1210_v57 = vperm.slane %v8082_v17, 2 }
 0x31d   : > { %16068 = vst [vmem:[#allocation216_spill] sm:$0xff] %v8180_v33  ;;  %v8190_v62 = vpop.permute.xlu0 %2260  ;;  %v775_v33 = vsel %vm16071_vm7, %v7105_v50, %v7116_v53  ;;  %v1013_v42 = vsel %vm8114_vm1, %v990_v15, 0.0  ;;  %vm8204_vm9 = vcmp.eq.s32.totalorder %v998_v22, 1  ;;  %v1069_v43 = vperm.slane %v7964_v0, 3 }
 0x31e   : > { %16069 = vst [vmem:[#allocation217_spill] sm:$0xff] %v8182_v4  ;;  %v928_v32 = vperm.slane %v7931_v40, 4  ;;  %v1154_v50 = vsel %vm8105_vm4, %v1133_v47, 0.0  ;;  %vm16076_vm7 = vcmp.lt.s32.totalorder %v7906_v9, 47  ;;  %vm16077_vm1 = vcmp.lt.s32.totalorder %v7906_v9, 50  ;;  %v16105_v4 = vld [vmem:[#allocation17_spill] sm:$0xff] }
 0x31f   : > { %16070 = vst [vmem:[#allocation218_spill] sm:$0xff] %v8190_v62  ;;  %v1061_v38 = vsel %vm16076_vm7, %v7107_v51, %v7126_v59  ;;  %v847_v20 = vsel %vm16077_vm1, %v7093_v46, %v7128_v61  ;;  %v1103_v22 = vadd.f32 %v1095_v55, %v1032_v10  ;;  %v962_v11 = vadd.f32 %v954_v30, %v891_v36 }
 0x320   : > { %v800_v15 = vsel %vm8137_vm0, %v775_v33, 0.0  ;;  %vm8222_vm3 = vcmp.eq.s32.totalorder %v857_v5, 1  ;;  %v1025_v28 = vmul.f32 %v7024_v26, %v1013_v42  ;;  %vm16080_vm4 = vcmp.lt.s32.totalorder %v7906_v9, 46 }
 0x321   : > { %v1132_v51 = vsel %vm16080_vm4, %v7118_v54, %v7138_v6  ;;  %vm16081_vm7 = vcmp.lt.s32.totalorder %v7906_v9, 49  ;;  %v786_v55 = vperm.slane %v7877_v12, 5  ;;  %v1166_v35 = vmul.f32 %v7048_v31, %v1154_v50 }
 0x322   : > { %v918_v46 = vsel %vm16081_vm7, %v7103_v48, %v7140_v7  ;;  %2791 = vrot.lane.b32.xlu1 %v6861_v23, %s6261_s23  ;;  %2651 = vrot.lane.b32.xlu2 %v6923_v49, %s6257_s0  ;;  %v1084_v33 = vsel %vm8142_vm15, %v1061_v38, 0.0  ;;  %v872_v54 = vsel %vm8157_vm8, %v847_v20, 0.0  ;;  %v858_v36 = vperm.slane %v7914_v3, 5 }
 0x323   : > { %2659 = vrot.lane.b32.xlu0 %v7083_v44, %s6257_s0  ;;  %v6262_v48 = vmov 27   ;;  %v813_v47 = vmul.f32 %v6990_v19, %v800_v15  ;;  %vm16082_vm0 = vcmp.lt.s32.totalorder %v7906_v9, 45  ;;  %vm8255_vm1 = vcmp.eq.s32.totalorder %v1210_v57, 1 }
 0x324   : > { %6098 = vset.pattern.permute.xlu2 %v6262_v48  ;;  %v8253_v5 = vsel %vm16082_vm0, %v7091_v8, %v7130_v63  ;;  %vm8259_vm15 = vcmp.eq.s32.totalorder %v1069_v43, 1  ;;  %vm8263_vm8 = vcmp.eq.s32.totalorder %v928_v32, 1  ;;  %v8267_v30 = vpop.permute.xlu1 %2398  ;;  %v8269_v42 = vpop.permute.xlu2 %2329  ;;  %v1155_v50 = vsel %vm8172_vm13, %v1132_v51, 0.0  ;;  %v16193_v8 = vld [vmem:[#allocation25_spill] sm:$0xff] }
 0x325   : > { %16089 = vst [vmem:[#allocation219_spill] sm:$0xff] %v8267_v30  ;;  %v943_v57 = vsel %vm8176_vm10, %v918_v46, 0.0  ;;  %v1140_v38 = vperm.slane %v8018_v58, 3  ;;  %v999_v43 = vperm.slane %v7949_v45, 4  ;;  %v8277_v20 = vpop.permute.xlu0 %2319  ;;  %v1096_v32 = vmul.f32 %v7034_v29, %v1084_v33  ;;  %v16111_v33 = vld [vmem:[#allocation29_spill] sm:$0xff] }
 0x326   : > { %16090 = vst [vmem:[#allocation220_spill] sm:$0xff] %v8269_v42  ;;  %v884_v15 = vmul.f32 %v7006_v24, %v872_v54  ;;  %vm16092_vm4 = vcmp.lt.s32.totalorder %v7906_v9, 51  ;;  %vm16093_vm13 = vcmp.lt.s32.totalorder %v7906_v9, 48  ;;  %vm8289_vm10 = vcmp.eq.s32.totalorder %v786_v55, 1 }
 0x327   : > { %16091 = vst [vmem:[#allocation221_spill] sm:$0xff] %v8277_v20  ;;  %v774_v48 = vsel %vm16092_vm4, %v7116_v53, %v7142_v13  ;;  %v989_v21 = vsel %vm16093_vm13, %v7114_v52, %v7151_v27  ;;  %v8293_v51 = vadd.f32 %v1166_v35, %v1103_v22  ;;  %v1033_v46 = vadd.f32 %v1025_v28, %v962_v11  ;;  %v16098_v52 = vld [vmem:[#allocation30_spill] sm:$0xff] }
 0x328   : > { %vm8298_vm7 = vcmp.eq.s32.totalorder %v858_v36, 1  ;;  %v1167_v53 = vmul.f32 %v7048_v31, %v1155_v50  ;;  %v955_v30 = vmul.f32 %v7016_v25, %v943_v57  ;;  %vm16099_vm0 = vcmp.lt.s32.totalorder %v7906_v9, 50  ;;  %v16102_v36 = vld [vmem:[#allocation184_spill] sm:$0xff] }
 0x329   : > { %v846_v55 = vsel %vm16099_vm0, %v7128_v61, %v16098_v52  ;;  %v929_v22 = vperm.slane %v7931_v40, 5  ;;  %v801_v11 = vsel %vm8197_vm12, %v774_v48, 0.0  ;;  %v1014_v28 = vsel %vm8204_vm9, %v989_v21, 0.0  ;;  %v16106_v48 = vld [vmem:[#allocation31_spill] sm:$0xff]  ;;  %v16110_v21 = vld [vmem:[#allocation6_spill] sm:$0xff] }
 0x32a   : > { %vm8313_vm4 = vcmp.eq.s32.totalorder %v1140_v38, 1  ;;  %vm712_vm13 = vcmp.ge.s32.totalorder %v16102_v36, 2  ;;  %vm713_vm14 = vcmp.lt.s32.totalorder %v16102_v36, 18  ;;  %v1104_v50 = vadd.f32 %v1096_v32, %v1033_v46  ;;  %2797 = vrot.lane.b32.xlu1 %v6978_v16, %s6261_s23  ;;  %2657 = vrot.lane.b32.xlu2 %v16105_v4, %s6257_s0  ;;  %s6273_s0 = smov 99  }
 0x32b   : > { %v892_v57 = vadd.f32 %v884_v15, %v813_v47  ;;  %vm8319_vm6 = vcmp.eq.s32.totalorder %v999_v43, 1  ;;  %v1070_v56 = vperm.slane %v7964_v0, 4  ;;  %v873_v38 = vsel %vm8222_vm3, %v846_v55, 0.0  ;;  %v16108_v43 = vld [vmem:[#allocation33_spill] sm:$0xff]  ;;  %2718 = vrot.lane.b32.xlu0 %v16110_v21, %s6259_s17  ;;  %vm8354_vm0 = vmand %vm712_vm13, %vm713_vm14 }
 0x32c   : > { %vm16107_vm9 = vcmp.lt.s32.totalorder %v7906_v9, 47  ;;  %vm16109_vm12 = vcmp.lt.s32.totalorder %v7906_v9, 49  ;;  %v1000_v15 = vperm.slane %v7949_v45, 5  ;;  %v814_v46 = vmul.f32 %v6990_v19, %v801_v11  ;;  %v8358_v20 = vpop.permute.xlu1 %2440  ;;  %v8360_v11 = vpop.permute.xlu2 %2388 }
 0x32d   : > { %v1060_v47 = vsel %vm16107_vm9, %v7126_v59, %v16106_v48  ;;  %v917_v32 = vsel %vm16109_vm12, %v7140_v7, %v16108_v43  ;;  %vm16112_vm3 = vcmp.lt.s32.totalorder %v7906_v9, 45  ;;  %v1026_v59 = vmul.f32 %v7024_v26, %v1014_v28  ;;  %16116 = vst [vmem:[#allocation184_spill] sm:$0xff] %v8358_v20  ;;  %v8372_v36 = vpop.permute.xlu0 %2325 }
 0x32e   : > { %v8346_v62 = vsel %vm16112_vm3, %v7130_v63, %v16111_v33  ;;  %v1211_v55 = vperm.slane %v8082_v17, 3  ;;  %v16113_v7 = vmov 0  ;;  %16117 = vst [vmem:[#allocation31_spill] sm:$0xff] %v8360_v11  ;;  %v8362_v42 = vadd.f32 %v1167_v53, %v1104_v50  ;;  %v16124_v11 = vld [vmem:[#allocation32_spill] sm:$0xff] }
 0x32f   : > { %v16114_v7 = vsel %vm8354_vm0, 4294967295, %v16113_v7  ;;  %v963_v63 = vadd.f32 %v955_v30, %v892_v57  ;;  %vm16120_vm9 = vcmp.lt.s32.totalorder %v7906_v9, 50  ;;  %vm8368_vm12 = vcmp.eq.s32.totalorder %v929_v22, 1  ;;  %16123 = vst [vmem:[#allocation29_spill] sm:$0xff] %v8372_v36  ;;  %v16133_v36 = vld [vmem:[#allocation34_spill] sm:$0xff] }
 0x330   : > { %16115 = vst [vmem:[#allocation30_spill] sm:$0xff] %v16114_v7  ;;  %v845_v28 = vsel %vm16120_vm9, %v16098_v52, %v16119_v60  ;;  %v885_v41 = vmul.f32 %v7006_v24, %v873_v38  ;;  %v1085_v20 = vsel %vm8259_vm15, %v1060_v47, 0.0  ;;  %vm16125_vm14 = vcmp.lt.s32.totalorder %v7906_v9, 51  ;;  %vm1277_vm15 = vmand %vm8354_vm0, %vm7824_vm5  ;;  %v16131_v38 = vld [vmem:[#allocation36_spill] sm:$0xff] }
 0x331   : > { %16118 = vst [vmem:[#allocation33_spill] sm:$0xff] %v8362_v42  ;;  %v773_v30 = vsel %vm16125_vm14, %v7142_v13, %v16124_v11  ;;  %v944_v53 = vsel %vm8263_vm8, %v917_v32, 0.0  ;;  %vm8386_vm13 = vcmp.eq.s32.totalorder %v1070_v56, 1  ;;  %vm8390_vm3 = vcmp.eq.s32.totalorder %v1000_v15, 1  ;;  %v16149_v42 = vld [vmem:[#allocation41_spill] sm:$0xff] }
 0x332   : > { %v1141_v2 = vperm.slane %v8018_v58, 4  ;;  %v1034_v13 = vadd.f32 %v1026_v59, %v963_v63  ;;  %v874_v10 = vsel %vm8298_vm7, %v845_v28, 0.0  ;;  %vm16132_vm8 = vcmp.lt.s32.totalorder %v7906_v9, 48  ;;  %2803 = vrot.lane.b32.xlu1 %v7056_v34, %s6261_s23  ;;  %2699 = vperm.xlu2 %6098, %v8428_v14  }
 0x333   : > { %v988_v56 = vsel %vm16132_vm8, %v7151_v27, %v16131_v38  ;;  %v1071_v47 = vperm.slane %v7964_v0, 5  ;;  %v1097_v32 = vmul.f32 %v7034_v29, %v1085_v20  ;;  %v802_v15 = vsel %vm8289_vm10, %v773_v30, 0.0  ;;  %v16141_v30 = vld [vmem:[#allocation39_spill] sm:$0xff]  ;;  %2724 = vrot.lane.b32.xlu0 %v6988_v18, %s6259_s17 }
 0x334   : > { %v956_v52 = vmul.f32 %v7016_v25, %v944_v53  ;;  %vm16134_vm9 = vcmp.lt.s32.totalorder %v7906_v9, 46  ;;  %vm8414_vm7 = vcmp.eq.s32.totalorder %v1211_v55, 1  ;;  %v893_v63 = vadd.f32 %v885_v41, %v814_v46  ;;  %v16139_v46 = vld [vmem:[#allocation38_spill] sm:$0xff]  ;;  %v8457_v7 = vpop.permute.xlu2 %2394 }
 0x335   : > { %v1131_v54 = vsel %vm16134_vm9, %v7138_v6, %v16133_v36  ;;  %v1212_v27 = vperm.slane %v8082_v17, 4  ;;  %v1142_v28 = vperm.slane %v8018_v58, 5  ;;  %v16137_v20 = vmov 0   ;;  %16148 = vst [vmem:[#allocation36_spill] sm:$0xff] %v8457_v7  ;;  %v16289_v7 = vld [vmem:[#allocation26_spill] sm:$0xff] }
 0x336   : > { %v8421_v57 = vsel %vm1277_vm15, 1, %v16137_v20  ;;  %v886_v6 = vmul.f32 %v7006_v24, %v874_v10  ;;  %v1015_v41 = vsel %vm8319_vm6, %v988_v56, 0.0  ;;  %vm16140_vm10 = vcmp.lt.s32.totalorder %v7906_v9, 49 }
 0x337   : > { %16138 = vst [vmem:[#allocation35_spill] sm:$0xff] %v8421_v57  ;;  %v916_v55 = vsel %vm16140_vm10, %v16108_v43, %v16139_v46  ;;  %vm16142_vm14 = vcmp.lt.s32.totalorder %v7906_v9, 47  ;;  %v815_v20 = vmul.f32 %v6990_v19, %v802_v15  ;;  %v1156_v10 = vsel %vm8313_vm4, %v1131_v54, 0.0  ;;  %v8455_v43 = vpop.permute.xlu1 %2507  ;;  %v16150_v15 = vld [vmem:[#allocation42_spill] sm:$0xff]  ;;  %vm16151_vm4 = vmmov %vm16134_vm9 }
 0x338   : > { %v1059_v53 = vsel %vm16142_vm14, %v16106_v48, %v16141_v30  ;;  %vm8447_vm15 = vcmp.eq.s32.totalorder %v1141_v2, 1  ;;  %vm8451_vm6 = vcmp.eq.s32.totalorder %v1071_v47, 1  ;;  %16147 = vst [vmem:[#allocation32_spill] sm:$0xff] %v8455_v43  ;;  %v1105_v48 = vadd.f32 %v1097_v32, %v1034_v13  ;;  %v8467_v47 = vpop.permute.xlu0 %2331 }
 0x339   : > { %v964_v37 = vadd.f32 %v956_v52, %v893_v63  ;;  %v987_v35 = vsel %vm16132_vm8, %v16131_v38, %v16149_v42  ;;  %v1130_v2 = vsel %vm16151_vm4, %v16133_v36, %v16150_v15  ;;  %16152 = vst [vmem:[#allocation34_spill] sm:$0xff] %v8467_v47  ;;  %v1027_v54 = vmul.f32 %v7024_v26, %v1015_v41  ;;  %v16155_v36 = vld [vmem:[#allocation37_spill] sm:$0xff] }
 0x33a   : > { %v945_v43 = vsel %vm8368_vm12, %v916_v55, 0.0  ;;  %v1086_v52 = vsel %vm8386_vm13, %v1059_v53, 0.0  ;;  %vm8474_vm9 = vcmp.eq.s32.totalorder %v1142_v28, 1  ;;  %v1280_v38 = vperm.slane %v8421_v57, 1  ;;  %2862 = vrot.lane.b32.xlu1 %v6861_v23, %s6263_s16  ;;  %2722 = vrot.lane.b32.xlu2 %v6923_v49, %s6259_s17 }
 0x33b   : > { %v1168_v32 = vmul.f32 %v7048_v31, %v1156_v10  ;;  %v894_v63 = vadd.f32 %v886_v6, %v815_v20  ;;  %vm16156_vm10 = vcmp.lt.s32.totalorder %v7906_v9, 45  ;;  %vm8486_vm14 = vcmp.eq.s32.totalorder %v1212_v27, 1  ;;  %2730 = vrot.lane.b32.xlu0 %v7083_v44, %s6259_s17 }
 0x33c   : > { %v8484_v41 = vsel %vm16156_vm10, %v16111_v33, %v16155_v36  ;;  %v787_v22 = vperm.slane %v7877_v12, 6  ;;  %v1016_v28 = vsel %vm8390_vm3, %v987_v35, 0.0  ;;  %v1157_v20 = vsel %vm8447_vm15, %v1130_v2, 0.0  ;;  %v8536_v47 = vpop.permute.xlu2 %2400 }
 0x33d   : > { %v781_v6 = vperm.slane %v7877_v12, 0  ;;  %v957_v55 = vmul.f32 %v7016_v25, %v945_v43  ;;  %v1098_v33 = vmul.f32 %v7034_v29, %v1086_v52  ;;  %v788_v27 = vperm.slane %v7877_v12, 7  ;;  %v16161_v43 = vld [vmem:[#allocation44_spill] sm:$0xff]  ;;  %16168 = vst [vmem:[#allocation39_spill] sm:$0xff] %v8536_v47 }
 0x33e   : > { %v859_v53 = vperm.slane %v7914_v3, 6  ;;  %v1035_v10 = vadd.f32 %v1027_v54, %v964_v37  ;;  %vm8501_vm13 = vcmp.eq.s32.totalorder %v1280_v38, 1  ;;  %v1213_v50 = vperm.slane %v8082_v17, 5  ;;  %v16174_v38 = vld [vmem:[#allocation46_spill] sm:$0xff]  ;;  %v16190_v47 = vld [vmem:[#allocation48_spill] sm:$0xff] }
 0x33f   : > { %v853_v61 = vperm.slane %v7914_v3, 0  ;;  %v860_v35 = vperm.slane %v7914_v3, 7  ;;  %v1028_v12 = vmul.f32 %v7024_v26, %v1016_v28  ;;  %v1169_v37 = vmul.f32 %v7048_v31, %v1157_v20 }
 0x340   : > { %vm16162_vm3 = vcmp.lt.s32.totalorder %v7906_v9, 47  ;;  %v930_v54 = vperm.slane %v7931_v40, 6  ;;  %v6264_v3 = vmov 28   ;;  %v8521_v52 = vadd.f32 %v1168_v32, %v1105_v48 }
 0x341   : > { %v1058_v2 = vsel %vm16162_vm3, %v16141_v30, %v16161_v43  ;;  %6099 = vset.pattern.permute.xlu2 %v6264_v3  ;;  %vm8526_vm15 = vcmp.eq.s32.totalorder %v787_v22, 1  ;;  %vm8530_vm8 = vcmp.eq.s32.totalorder %v781_v6, 1  ;;  %v8534_v30 = vpop.permute.xlu1 %2513  ;;  %v965_v44 = vadd.f32 %v957_v55, %v894_v63  ;;  %v8546_v22 = vpop.permute.xlu0 %2390 }
 0x342   : > { %16167 = vst [vmem:[#allocation38_spill] sm:$0xff] %v8534_v30  ;;  %v1106_v3 = vadd.f32 %v1098_v33, %v1035_v10  ;;  %vm8538_vm4 = vcmp.eq.s32.totalorder %v788_v27, 1  ;;  %vm8542_vm10 = vcmp.eq.s32.totalorder %v859_v53, 1  ;;  %v1087_v6 = vsel %vm8451_vm6, %v1058_v2, 0.0  ;;  %v16182_v53 = vld [vmem:[#allocation45_spill] sm:$0xff]  ;;  %v16188_v2 = vld [vmem:[#allocation50_spill] sm:$0xff]  ;;  %2868 = vrot.lane.b32.xlu1 %v6978_v16, %s6263_s16  ;;  %2728 = vrot.lane.b32.xlu2 %v16105_v4, %s6259_s17 }
 0x343   : > { %16173 = vst [vmem:[#allocation41_spill] sm:$0xff] %v8546_v22  ;;  %vm16175_vm3 = vcmp.lt.s32.totalorder %v7906_v9, 46  ;;  %vm8554_vm12 = vcmp.eq.s32.totalorder %v1213_v50, 1  ;;  %vm8558_vm5 = vcmp.eq.s32.totalorder %v853_v61, 1  ;;  %vm8562_vm0 = vcmp.eq.s32.totalorder %v860_v35, 1  ;;  %v16186_v50 = vld [vmem:[#allocation47_spill] sm:$0xff]  ;;  %2789 = vrot.lane.b32.xlu0 %v16110_v21, %s6261_s23 }
 0x344   : > { %v1129_v30 = vsel %vm16175_vm3, %v16150_v15, %v16174_v38  ;;  %v1036_v27 = vadd.f32 %v1028_v12, %v965_v44  ;;  %v8566_v56 = vadd.f32 %v1169_v37, %v1106_v3  ;;  %vm16183_vm6 = vcmp.lt.s32.totalorder %v7906_v9, 45  ;;  %v16191_v22 = vld [vmem:[#allocation40_spill] sm:$0xff]  ;;  %v16200_v16 = vld [vmem:[#allocation19_spill] sm:$0xff]  ;;  %v8631_v26 = vpop.permute.xlu2 %2486  ;;  %s15765_s17 = smov 111  }
 0x345   : > { %v1201_v15 = vsel %vm16183_vm6, %v16155_v36, %v16182_v53  ;;  %vm8572_vm3 = vcmp.eq.s32.totalorder %v930_v54, 1  ;;  %v772_v61 = vsel %vm16187_vm2, %v16124_v11, %v16186_v50  ;;  %v1281_v35 = vperm.slane %v8421_v57, 2 }
 0x346   : > { %v1282_v44 = vperm.slane %v8421_v57, 3  ;;  %v924_v12 = vperm.slane %v7931_v40, 0  ;;  %v1099_v37 = vmul.f32 %v7034_v29, %v1087_v6  ;;  %v1158_v36 = vsel %vm8474_vm9, %v1129_v30, 0.0  ;;  %v16194_v30 = vld [vmem:[#allocation51_spill] sm:$0xff] }
 0x347   : > { %vm16189_vm6 = vcmp.lt.s32.totalorder %v7906_v9, 50  ;;  %v1001_v3 = vperm.slane %v7949_v45, 6  ;;  %v1228_v11 = vsel %vm8486_vm14, %v1201_v15, 0.0  ;;  %vm16192_vm2 = vcmp.lt.s32.totalorder %v7906_v9, 35 }
 0x348   : > { %v844_v54 = vsel %vm16189_vm6, %v16119_v60, %v16188_v2  ;;  %v8597_v57 = vsel %vm16192_vm2, %v16191_v22, %v16190_v47  ;;  %v931_v6 = vperm.slane %v7931_v40, 7  ;;  %v995_v13 = vperm.slane %v7949_v45, 0  ;;  %v16196_v22 = vld [vmem:[#allocation53_spill] sm:$0xff] }
 0x349   : > { %v803_v60 = vsel %vm8526_vm15, %v772_v61, 0.0  ;;  %vm16195_vm9 = vcmp.lt.s32.totalorder %v7906_v9, 51  ;;  %vm16197_vm14 = vcmp.lt.s32.totalorder %v7906_v9, 49  ;;  %v1072_v29 = vperm.slane %v7964_v0, 6  ;;  %v16198_v61 = vld [vmem:[#allocation54_spill] sm:$0xff]  ;;  %vm16199_vm15 = vmmov %vm16189_vm6  ;;  %v8629_v38 = vpop.permute.xlu1 %2519 }
 0x34a   : > { %v778_v15 = vsel %vm16195_vm9, %v16194_v30, %v16193_v8  ;;  %v915_v40 = vsel %vm16197_vm14, %v16139_v46, %v16196_v22  ;;  %v1170_v4 = vmul.f32 %v7048_v31, %v1158_v36  ;;  %v875_v28 = vsel %vm8542_vm10, %v844_v54, 0.0  ;;  %16201 = vst [vmem:[#allocation42_spill] sm:$0xff] %v8629_v38  ;;  %vm16202_vm10 = vmmov %vm16195_vm9  ;;  %2874 = vrot.lane.b32.xlu1 %v7056_v34, %s6263_s16 }
 0x34b   : > { %v843_v8 = vsel %vm16199_vm15, %v16188_v2, %v16198_v61  ;;  %v850_v46 = vsel %vm16189_vm6, %v16198_v61, %v16200_v16  ;;  %v1107_v21 = vadd.f32 %v1099_v37, %v1036_v27  ;;  %v771_v36 = vsel %vm16202_vm10, %v16186_v50, %v16194_v30  ;;  %v8649_v27 = vpop.permute.xlu0 %2396  ;;  %v16207_v61 = vld [vmem:[#allocation49_spill] sm:$0xff]  ;;  %2770 = vperm.xlu2 %6099, %v8428_v14  }
 0x34c   : > { %vm8640_vm2 = vcmp.eq.s32.totalorder %v924_v12, 1  ;;  %vm8644_vm9 = vcmp.eq.s32.totalorder %v1001_v3, 1  ;;  %v1002_v54 = vperm.slane %v7949_v45, 7  ;;  %v816_v37 = vmul.f32 %v6990_v19, %v803_v60  ;;  %2795 = vrot.lane.b32.xlu0 %v6988_v18, %s6261_s23 }
 0x34d   : > { %vm16208_vm14 = vcmp.lt.s32.totalorder %v7906_v9, 45  ;;  %v797_v50 = vsel %vm8530_vm8, %v778_v15, 0.0  ;;  %v946_v12 = vsel %vm8572_vm3, %v915_v40, 0.0  ;;  %vm8660_vm15 = vcmp.eq.s32.totalorder %v931_v6, 1  ;;  %v16252_v15 = vld [vmem:[#allocation46_spill] sm:$0xff] }
 0x34e   : > { %v1200_v32 = vsel %vm16208_vm14, %v16182_v53, %v16207_v61  ;;  %v887_v45 = vmul.f32 %v7006_v24, %v875_v28  ;;  %v869_v60 = vsel %vm8558_vm5, %v850_v46, 0.0  ;;  %v876_v30 = vsel %vm8562_vm0, %v843_v8, 0.0  ;;  %v16250_v53 = vld [vmem:[#allocation18_spill] sm:$0xff]  ;;  %v16264_v28 = vld [vmem:[#allocation24_spill] sm:$0xff] }
 0x34f   : > { %vm8669_vm6 = vcmp.eq.s32.totalorder %v995_v13, 1  ;;  %v1143_v20 = vperm.slane %v8018_v58, 6  ;;  %v1178_v10 = vadd.f32 %v1170_v4, %v1107_v21  ;;  %v804_v6 = vsel %vm8538_vm4, %v771_v36, 0.0 }
 0x350   : > { %vm8676_vm8 = vcmp.eq.s32.totalorder %v1072_v29, 1  ;;  %v1066_v55 = vperm.slane %v7964_v0, 0  ;;  %v1229_v33 = vsel %vm8554_vm12, %v1200_v32, 0.0  ;;  %v810_v13 = vmul.f32 %v6990_v19, %v797_v50  ;;  %v16219_v29 = vld [vmem:[#allocation52_spill] sm:$0xff] }
 0x351   : > { %v958_v40 = vmul.f32 %v7016_v25, %v946_v12  ;;  %vm8685_vm5 = vcmp.eq.s32.totalorder %v1281_v35, 1  ;;  %vm8689_vm0 = vcmp.eq.s32.totalorder %v1282_v44, 1  ;;  %v1240_v21 = vmul.f32 %v16219_v29, %v1228_v11  ;;  %v8725_v59 = vpop.permute.xlu1 %2578 }
 0x352   : > { %v881_v48 = vmul.f32 %v7006_v24, %v869_v60  ;;  %v888_v8 = vmul.f32 %v7006_v24, %v876_v30  ;;  %vm8696_vm4 = vcmp.eq.s32.totalorder %v1002_v54, 1  ;;  %v1073_v46 = vperm.slane %v7964_v0, 7  ;;  %16226 = vst [vmem:[#allocation37_spill] sm:$0xff] %v8725_v59  ;;  %v16228_v60 = vld [vmem:[#allocation57_spill] sm:$0xff]  ;;  %2933 = vrot.lane.b32.xlu1 %v6861_v23, %s15513_s21  ;;  %v16297_v59 = vld [vmem:[#allocation68_spill] sm:$0xff] }
 0x353   : > { %v1241_v35 = vmul.f32 %v16219_v29, %v1229_v33  ;;  %v817_v44 = vmul.f32 %v6990_v19, %v804_v6  ;;  %v895_v11 = vadd.f32 %v887_v45, %v816_v37  ;;  %vm8706_vm12 = vcmp.eq.s32.totalorder %v1143_v20, 1  ;;  %v16227_v45 = vld [vmem:[#allocation21_spill] sm:$0xff]  ;;  %v16230_v20 = vld [vmem:[#allocation56_spill] sm:$0xff]  ;;  %v8744_v6 = vpop.permute.xlu0 %2402  ;;  %2793 = vrot.lane.b32.xlu2 %v6923_v49, %s6261_s23 }
 0x354   : > { %v16224_v24 = vsel %vm8414_vm7, %v8484_v41, 0.0  ;;  %v1137_v36 = vperm.slane %v8018_v58, 0  ;;  %v1144_v54 = vperm.slane %v8018_v58, 7  ;;  %v1214_v19 = vperm.slane %v8082_v17, 6  ;;  %v8727_v41 = vpop.permute.xlu2 %2509 }
 0x355   : > { %v1239_v0 = vmul.f32 %v16219_v29, %v16224_v24  ;;  %v16225_v37 = vsel %vm8168_vm11, %v8253_v5, 0.0  ;;  %v966_v12 = vadd.f32 %v958_v40, %v895_v11  ;;  %vm16229_vm7 = vcmp.lt.s32.totalorder %v7906_v9, 49 }
 0x356   : > { %v1237_v50 = vmul.f32 %v16219_v29, %v16225_v37  ;;  %v921_v30 = vsel %vm16229_vm7, %v16228_v60, %v16227_v45  ;;  %vm16231_vm3 = vcmp.lt.s32.totalorder %v7906_v9, 48  ;;  %vm8737_vm10 = vcmp.eq.s32.totalorder %v1066_v55, 1  ;;  %vm16234_vm11 = vmmov %vm16229_vm7  ;;  %v16237_v55 = vld [vmem:[#allocation22_spill] sm:$0xff]  ;;  %v16238_v37 = vld [vmem:[#allocation60_spill] sm:$0xff] }
 0x357   : > { %v986_v58 = vsel %vm16231_vm3, %v16149_v42, %v16230_v20  ;;  %v8742_v5 = vadd.f32 %v1240_v21, %v8566_v56  ;;  %v889_v33 = vadd.f32 %v881_v48, %v810_v13  ;;  %v896_v40 = vadd.f32 %v888_v8, %v817_v44  ;;  %vm16239_vm7 = vmmov %vm16231_vm3  ;;  %v16240_v21 = vld [vmem:[#allocation59_spill] sm:$0xff] }
 0x358   : > { %v914_v11 = vsel %vm16234_vm11, %v16196_v22, %v16228_v60  ;;  %vm8750_vm14 = vcmp.eq.s32.totalorder %v1073_v46, 1  ;;  %v8754_v42 = vadd.f32 %v1241_v35, %v1178_v10  ;;  %v992_v56 = vsel %vm16239_vm7, %v16238_v37, %v16237_v55  ;;  %v16243_v44 = vld [vmem:[#allocation43_spill] sm:$0xff]  ;;  %v16251_v60 = vld [vmem:[#allocation62_spill] sm:$0xff] }
 0x359   : > { %vm16241_vm3 = vcmp.lt.s32.totalorder %v7906_v9, 47  ;;  %v8765_v48 = vadd.f32 %v1239_v0, %v8521_v52  ;;  %v16242_v22 = vsel %vm8255_vm1, %v8346_v62, 0.0  ;;  %v940_v8 = vsel %vm8640_vm2, %v921_v30, 0.0  ;;  %vm16247_vm2 = vmmov %vm16239_vm7 }
 0x35a   : > { %v1057_v13 = vsel %vm16241_vm3, %v16161_v43, %v16240_v21  ;;  %v1238_v10 = vmul.f32 %v16219_v29, %v16242_v22  ;;  %v1017_v46 = vsel %vm8644_vm9, %v986_v58, 0.0  ;;  %v8777_v35 = vadd.f32 %v1237_v50, %v8293_v51  ;;  %v16244_v43 = vld [vmem:[#allocation55_spill] sm:$0xff]  ;;  %v8830_v22 = vpop.permute.xlu1 %2584 }
 0x35b   : > { %vm16245_vm11 = vcmp.lt.s32.totalorder %v7906_v9, 35  ;;  %v947_v62 = vsel %vm8660_vm15, %v914_v11, 0.0  ;;  %v1208_v2 = vperm.slane %v8082_v17, 0  ;;  %v985_v51 = vsel %vm16247_vm2, %v16230_v20, %v16238_v37  ;;  %v16258_v20 = vld [vmem:[#allocation35_spill] sm:$0xff]  ;;  %16261 = vst [vmem:[#allocation44_spill] sm:$0xff] %v8830_v22 }
 0x35c   : > { %v1273_v52 = vsel %vm16245_vm11, %v16244_v43, %v16243_v44  ;;  %vm16246_vm1 = vmmov %vm16245_vm11  ;;  %v1011_v16 = vsel %vm8669_vm6, %v992_v56, 0.0  ;;  %v1088_v0 = vsel %vm8676_vm8, %v1057_v13, 0.0  ;;  %vm8798_vm9 = vcmp.eq.s32.totalorder %v1214_v19, 1  ;;  %v16259_v11 = vld [vmem:[#allocation27_spill] sm:$0xff]  ;;  %v16260_v13 = vld [vmem:[#allocation33_spill] sm:$0xff] }
 0x35d   : > { %v1274_v1 = vsel %vm16246_vm1, %v16190_v47, %v16244_v43  ;;  %v1215_v47 = vperm.slane %v8082_v17, 7  ;;  %v952_v3 = vmul.f32 %v7016_v25, %v940_v8  ;;  %v1029_v45 = vmul.f32 %v16250_v53, %v1017_v46  ;;  %2801 = vrot.lane.b32.xlu0 %v16259_v11, %s6261_s23  ;;  %v8832_v8 = vpop.permute.xlu2 %2515 }
 0x35e   : > { %vm16253_vm15 = vcmp.lt.s32.totalorder %v7906_v9, 46  ;;  %vm8813_vm6 = vcmp.eq.s32.totalorder %v1137_v36, 1  ;;  %vm8817_vm8 = vcmp.eq.s32.totalorder %v1144_v54, 1  ;;  %v1285_v58 = vperm.slane %v16258_v20, 6  ;;  %16262 = vst [vmem:[#allocation45_spill] sm:$0xff] %v8832_v8  ;;  %v16298_v8 = vld [vmem:[#allocation58_spill] sm:$0xff] }
 0x35f   : > { %v1128_v19 = vsel %vm16253_vm15, %v16252_v15, %v16251_v60  ;;  %v6266_v55 = vmov 29   ;;  %v1297_v37 = vsel %vm8685_vm5, %v1274_v1, 0.0  ;;  %v1298_v36 = vsel %vm8689_vm0, %v1273_v52, 0.0  ;;  %v16263_v15 = vld [vmem:[#allocation20_spill] sm:$0xff]  ;;  %v16265_v1 = vld [vmem:[#allocation63_spill] sm:$0xff]  ;;  %vm16266_vm5 = vmmov %vm16241_vm3  ;;  %v8842_v52 = vpop.permute.xlu0 %2505 }
 0x360   : > { %6100 = vset.pattern.permute.xlu2 %v6266_v55  ;;  %v959_v56 = vmul.f32 %v7016_v25, %v947_v62  ;;  %v1246_v54 = vadd.f32 %v1238_v10, %v16260_v13  ;;  %v1018_v46 = vsel %vm8696_vm4, %v985_v51, 0.0  ;;  %v1023_v43 = vmul.f32 %v16250_v53, %v1011_v16  ;;  %16267 = vst [vmem:[#allocation47_spill] sm:$0xff] %v8842_v52  ;;  %vm16268_vm0 = vmmov %vm16241_vm3  ;;  %v16543_v52 = vld [vmem:[#allocation132_spill] sm:$0xff] }
 0x361   : > { %v1100_v55 = vmul.f32 %v16263_v15, %v1088_v0  ;;  %v1063_v4 = vsel %vm16266_vm5, %v16265_v1, %v16264_v28  ;;  %v1056_v25 = vsel %vm16268_vm0, %v16240_v21, %v16265_v1  ;;  %v1159_v63 = vsel %vm8706_vm12, %v1128_v19, 0.0  ;;  %v16275_v19 = vld [vmem:[#allocation61_spill] sm:$0xff] }
 0x362   : > { %vm8850_vm4 = vcmp.eq.s32.totalorder %v1208_v2, 1  ;;  %v1283_v62 = vperm.slane %v16258_v20, 4  ;;  %v960_v51 = vadd.f32 %v952_v3, %v889_v33  ;;  %v1037_v16 = vadd.f32 %v1029_v45, %v966_v12  ;;  %v16276_v33 = vld [vmem:[#allocation193_spill] sm:$0xff]  ;;  %v16278_v12 = vld [vmem:[#allocation30_spill] sm:$0xff] }
 0x363   : > { %vm8855_vm7 = vcmp.eq.s32.totalorder %v1285_v58, 1  ;;  %v1284_v13 = vperm.slane %v16258_v20, 5  ;;  %v967_v28 = vadd.f32 %v959_v56, %v896_v40  ;;  %v1030_v21 = vmul.f32 %v16250_v53, %v1018_v46 }
 0x364   : > { %v1082_v32 = vsel %vm8737_vm10, %v1063_v4, 0.0  ;;  %vm8863_vm12 = vcmp.eq.s32.totalorder %v1215_v47, 1  ;;  %v1310_v1 = vmul.f32 %v16275_v19, %v1298_v36  ;;  %vm16277_vm3 = vnez %v16276_v33  ;;  %v16287_v4 = vld [vmem:[#allocation66_spill] sm:$0xff] }
 0x365   : > { %vm16279_vm11 = vnez %v16278_v12  ;;  %v1031_v3 = vadd.f32 %v1023_v43, %v960_v51  ;;  %v1108_v45 = vadd.f32 %v1100_v55, %v1037_v16  ;;  %v1089_v40 = vsel %vm8750_vm14, %v1056_v25, 0.0  ;;  %v16285_v43 = vld [vmem:[#allocation16_spill] sm:$0xff]  ;;  %v16286_v55 = vld [vmem:[#allocation17_spill] sm:$0xff]  ;;  %vm16288_vm14 = vmmov %vm16253_vm15 }
 0x366   : > { %vm1348_vm1 = vmand %vm16279_vm11, %vm16277_vm3  ;;  %v1171_v53 = vmul.f32 %v7048_v31, %v1159_v63  ;;  %vm16281_vm10 = vcmp.lt.s32.totalorder %v7906_v9, 45  ;;  %vm8879_vm2 = vcmp.eq.s32.totalorder %v1283_v62, 1  ;;  %v1279_v36 = vperm.slane %v16258_v20, 0  ;;  %2939 = vrot.lane.b32.xlu1 %v16285_v43, %s15513_s21  ;;  %2799 = vrot.lane.b32.xlu2 %v16286_v55, %s6261_s23  ;;  %v16294_v51 = vld [vmem:[#allocation6_spill] sm:$0xff]  ;;  %s6269_s23 = smov 110  }
 0x367   : > { %v1199_v47 = vsel %vm16281_vm10, %v16207_v61, %v16280_v39  ;;  %v16284_v56 = vsel %vm8501_vm13, %v8597_v57, 0.0  ;;  %v1309_v46 = vmul.f32 %v16275_v19, %v1297_v37  ;;  %v1094_v61 = vmul.f32 %v16263_v15, %v1082_v32  ;;  %vm16290_vm13 = vmmov %vm16288_vm14  ;;  %2860 = vrot.lane.b32.xlu0 %v16294_v51, %s6263_s16  ;;  %v6134_v12 = vld [vmem:[%s15954_s1] ss:$2 sm:$0xff] }
 0x368   : > { %v1308_v24 = vmul.f32 %v16275_v19, %v16284_v56  ;;  %v1127_v25 = vsel %vm16288_vm14, %v16251_v60, %v16287_v4  ;;  %v1134_v57 = vsel %vm16290_vm13, %v16287_v4, %v16289_v7  ;;  %vm8903_vm15 = vcmp.eq.s32.totalorder %v1284_v13, 1  ;;  %v8922_v56 = vpop.permute.xlu1 %2590  ;;  %v8924_v4 = vpop.permute.xlu2 %2557 }
 0x369   : > { %v16293_v63 = vmov 0   ;;  %v1038_v60 = vadd.f32 %v1030_v21, %v967_v28  ;;  %v1101_v16 = vmul.f32 %v16263_v15, %v1089_v40  ;;  %v1286_v32 = vperm.slane %v16258_v20, 7  ;;  %16295 = vst [vmem:[#allocation50_spill] sm:$0xff] %v8922_v56  ;;  %v8933_v15 = vpop.permute.xlu0 %2511  ;;  %v16301_v21 = vld [vmem:[#allocation28_spill] sm:$0xff] }
 0x36a   : > { %v8913_v62 = vsel %vm1348_vm1, 1, %v16293_v63  ;;  %v8920_v13 = vadd.f32 %v1310_v1, %v8765_v48  ;;  %16296 = vst [vmem:[#allocation48_spill] sm:$0xff] %v8924_v4  ;;  %v1179_v7 = vadd.f32 %v1171_v53, %v1108_v45  ;;  %v1230_v22 = vsel %vm8798_vm9, %v1199_v47, 0.0  ;;  %v16302_v1 = vld [vmem:[#allocation69_spill] sm:$0xff]  ;;  %vm16303_vm1 = vmmov %vm16281_vm10  ;;  %v16374_v45 = vld [vmem:[#allocation87_spill] sm:$0xff] }
 0x36b   : > { %vm16299_vm5 = vcmp.lt.s32.totalorder %v7906_v9, 35  ;;  %vm1339_vm0 = vcmp.lt.s32.totalorder %v7906_v9, 34  ;;  %16300 = vst [vmem:[#allocation25_spill] sm:$0xff] %v8933_v15  ;;  %v1153_v48 = vsel %vm8813_vm6, %v1134_v57, 0.0  ;;  %v1160_v20 = vsel %vm8817_vm8, %v1127_v25, 0.0  ;;  %vm16306_vm6 = vmmov %vm16303_vm1 }
 0x36c   : > { %v1270_v28 = vsel %vm16299_vm5, %v16298_v8, %v16297_v59  ;;  %v1205_v50 = vsel %vm16303_vm1, %v16302_v1, %v16301_v21  ;;  %vm8943_vm9 = vcmp.eq.s32.totalorder %v1279_v36, 1  ;;  %v1353_v40 = vperm.slane %v8913_v62, 3 }
 0x36d   : > { %v1102_v53 = vadd.f32 %v1094_v61, %v1031_v3  ;;  %v8949_v47 = vadd.f32 %v1308_v24, %v8777_v35  ;;  %v8951_v30 = vadd.f32 %v1309_v46, %v1246_v54  ;;  %v1351_v17 = vperm.slane %v8913_v62, 1 }
 0x36e   : > { %v1242_v25 = vmul.f32 %v16219_v29, %v1230_v22  ;;  %v1198_v36 = vsel %vm16306_vm6, %v16280_v39, %v16302_v1  ;;  %v1301_v57 = vsel %vm8855_vm7, %v1270_v28, 0.0  ;;  %v1352_v21 = vperm.slane %v8913_v62, 2  ;;  %v16309_v39 = vld [vmem:[#allocation72_spill] sm:$0xff]  ;;  %vm16310_vm7 = vmmov %vm16299_vm5  ;;  %2945 = vrot.lane.b32.xlu1 %v7056_v34, %s15513_s21  ;;  %2841 = vperm.xlu2 %6100, %v8428_v14  }
 0x36f   : > { %v1165_v3 = vmul.f32 %v7048_v31, %v1153_v48  ;;  %v1172_v35 = vmul.f32 %v7048_v31, %v1160_v20  ;;  %v1224_v54 = vsel %vm8850_vm4, %v1205_v50, 0.0  ;;  %vm8966_vm8 = vcmp.eq.s32.totalorder %v1286_v32, 1  ;;  %vm16313_vm4 = vmmov %vm16299_vm5  ;;  %2866 = vrot.lane.b32.xlu0 %v6988_v18, %s6263_s16  ;;  %v16318_v20 = vld [vmem:[#allocation195_spill] sm:$0xff] }
 0x370   : > { %v1356_v22 = vperm.slane %v8913_v62, 6  ;;  %v1109_v46 = vadd.f32 %v1101_v16, %v1038_v60  ;;  %v1272_v0 = vsel %vm16310_vm7, %v16243_v44, %v16309_v39  ;;  %vm8975_vm10 = vcmp.eq.s32.totalorder %v1353_v40, 1  ;;  %v9008_v1 = vpop.permute.xlu2 %2580  ;;  %vm16327_vm6 = vmmov %vm16313_vm4 }
 0x371   : > { %v1354_v31 = vperm.slane %v8913_v62, 4  ;;  %v1231_v10 = vsel %vm8863_vm12, %v1198_v36, 0.0  ;;  %v1313_v60 = vmul.f32 %v16275_v19, %v1301_v57  ;;  %v1271_v44 = vsel %vm16313_vm4, %v16309_v39, %v16298_v8  ;;  %v9006_v8 = vpop.permute.xlu1 %2649  ;;  %16321 = vst [vmem:[#allocation53_spill] sm:$0xff] %v9008_v1 }
 0x372   : > { %v1355_v16 = vperm.slane %v8913_v62, 5  ;;  %v1250_v32 = vadd.f32 %v1242_v25, %v1179_v7  ;;  %v1236_v28 = vmul.f32 %v16219_v29, %v1224_v54  ;;  %vm8994_vm14 = vcmp.eq.s32.totalorder %v1351_v17, 1  ;;  %16320 = vst [vmem:[#allocation51_spill] sm:$0xff] %v9006_v8  ;;  %v9016_v25 = vpop.permute.xlu0 %2517  ;;  %v16326_v54 = vld [vmem:[#allocation75_spill] sm:$0xff]  ;;  %v16335_v8 = vld [vmem:[#allocation78_spill] sm:$0xff]  ;;  %v16350_v17 = vld [vmem:[#allocation188_spill] sm:$0xff] }
 0x373   : > { %vm8998_vm12 = vcmp.eq.s32.totalorder %v1352_v21, 1  ;;  %vm16319_vm13 = vnez %v16318_v20  ;;  %v1173_v7 = vadd.f32 %v1165_v3, %v1102_v53  ;;  %v1180_v50 = vadd.f32 %v1172_v35, %v1109_v46  ;;  %16324 = vst [vmem:[#allocation54_spill] sm:$0xff] %v9016_v25  ;;  %v16325_v21 = vld [vmem:[#allocation40_spill] sm:$0xff]  ;;  %v16328_v3 = vld [vmem:[#allocation74_spill] sm:$0xff] }
 0x374   : > { %vm1419_vm5 = vmand %vm16279_vm11, %vm16319_vm13  ;;  %v1299_v40 = vsel %vm8879_vm2, %v1272_v0, 0.0  ;;  %vm9012_vm1 = vcmp.eq.s32.totalorder %v1356_v22, 1  ;;  %v1243_v36 = vmul.f32 %v16219_v29, %v1231_v10  ;;  %v1300_v57 = vsel %vm8903_vm15, %v1271_v44, 0.0  ;;  %v16329_v35 = vld [vmem:[#allocation64_spill] sm:$0xff] }
 0x375   : > { %v1276_v53 = vsel %vm16327_vm6, %v16326_v54, %v16325_v21  ;;  %v1344_v58 = vsel %vm1339_vm0, %v16329_v35, %v16328_v3  ;;  %vm9029_vm2 = vcmp.eq.s32.totalorder %v1354_v31, 1  ;;  %v9033_v46 = vadd.f32 %v1313_v60, %v1250_v32  ;;  %vm16334_vm15 = vmmov %vm16313_vm4 }
 0x376   : > { %vm9035_vm7 = vcmp.eq.s32.totalorder %v1355_v16, 1  ;;  %v1350_v37 = vperm.slane %v8913_v62, 0  ;;  %v9046_v39 = vsel %vm1419_vm5, 1, %v16293_v63  ;;  %v1244_v0 = vadd.f32 %v1236_v28, %v1173_v7  ;;  %v16336_v28 = vld [vmem:[#allocation71_spill] sm:$0xff]  ;;  %3004 = vrot.lane.b32.xlu1 %v6861_v23, %s15765_s17  ;;  %2864 = vrot.lane.b32.xlu2 %v6923_v49, %s6263_s16 }
 0x377   : > { %v1311_v31 = vmul.f32 %v16275_v19, %v1299_v40  ;;  %v1357_v10 = vperm.slane %v8913_v62, 7  ;;  %v1312_v60 = vmul.f32 %v16275_v19, %v1300_v57  ;;  %v1269_v44 = vsel %vm16334_vm15, %v16297_v59, %v16326_v54  ;;  %v16337_v62 = vld [vmem:[#allocation77_spill] sm:$0xff]  ;;  %v16338_v40 = vld [vmem:[#allocation67_spill] sm:$0xff]  ;;  %2872 = vrot.lane.b32.xlu0 %v16259_v11, %s6263_s16 }
 0x378   : > { %v1295_v16 = vsel %vm8943_vm9, %v1276_v53, 0.0  ;;  %v1369_v32 = vsel %vm8975_vm10, %v1344_v58, 0.0  ;;  %v1251_v21 = vadd.f32 %v1243_v36, %v1180_v50  ;;  %v1346_v7 = vsel %vm1339_vm0, %v16336_v28, %v16335_v8  ;;  %v16341_v58 = vld [vmem:[#allocation70_spill] sm:$0xff] }
 0x379   : > { %v1341_v57 = vsel %vm1339_vm0, %v16338_v40, %v16337_v62  ;;  %v1424_v56 = vperm.slane %v9046_v39, 3  ;;  %v1345_v59 = vsel %vm1339_vm0, %v16335_v8, %v16329_v35  ;;  %vm9076_vm9 = vcmp.eq.s32.totalorder %v1350_v37, 1  ;;  %v9089_v35 = vpop.permute.xlu1 %2655  ;;  %v9091_v37 = vpop.permute.xlu2 %2586 }
 0x37a   : > { %v1422_v61 = vperm.slane %v9046_v39, 1  ;;  %v1423_v50 = vperm.slane %v9046_v39, 2  ;;  %v6268_v36 = vmov 30   ;;  %v1302_v54 = vsel %vm8966_vm8, %v1269_v44, 0.0  ;;  %16342 = vst [vmem:[#allocation19_spill] sm:$0xff] %v9089_v35  ;;  %v16347_v35 = vld [vmem:[#allocation81_spill] sm:$0xff] }
 0x37b   : > { %6101 = vset.pattern.permute.xlu2 %v6268_v36  ;;  %v1307_v53 = vmul.f32 %v16275_v19, %v1295_v16  ;;  %v1381_v8 = vmul.f32 %v16341_v58, %v1369_v32  ;;  %vm1410_vm10 = vcmp.lt.s32.totalorder %v7906_v9, 33  ;;  %16343 = vst [vmem:[#allocation49_spill] sm:$0xff] %v9091_v37  ;;  %v1319_v1 = vadd.f32 %v1311_v31, %v8742_v5  ;;  %v9103_v16 = vpop.permute.xlu0 %2576 }
 0x37c   : > { %v1320_v4 = vadd.f32 %v1312_v60, %v8754_v42  ;;  %v1367_v36 = vsel %vm8994_vm14, %v1346_v7, 0.0  ;;  %v1372_v24 = vsel %vm9012_vm1, %v1341_v57, 0.0  ;;  %vm9099_vm8 = vcmp.eq.s32.totalorder %v1357_v10, 1  ;;  %16346 = vst [vmem:[#allocation52_spill] sm:$0xff] %v9103_v16 }
 0x37d   : > { %v1368_v32 = vsel %vm8998_vm12, %v1345_v59, 0.0  ;;  %v1342_v5 = vsel %vm1339_vm0, %v16347_v35, %v16338_v40  ;;  %v1343_v42 = vsel %vm1339_vm0, %v16328_v3, %v16347_v35  ;;  %vm9115_vm4 = vcmp.eq.s32.totalorder %v1424_v56, 1  ;;  %v16356_v35 = vld [vmem:[#allocation84_spill] sm:$0xff] }
 0x37e   : > { %vm16351_vm14 = vnez %v16350_v17  ;;  %v1314_v2 = vmul.f32 %v16275_v19, %v1302_v54  ;;  %vm9124_vm12 = vcmp.eq.s32.totalorder %v1422_v61, 1  ;;  %vm9128_vm1 = vcmp.eq.s32.totalorder %v1423_v50, 1  ;;  %3010 = vrot.lane.b32.xlu1 %v16285_v43, %s15765_s17  ;;  %2870 = vrot.lane.b32.xlu2 %v16286_v55, %s6263_s16 }
 0x37f   : > { %vm1490_vm5 = vmand %vm16279_vm11, %vm16351_vm14  ;;  %v1427_v56 = vperm.slane %v9046_v39, 6  ;;  %v1425_v3 = vperm.slane %v9046_v39, 4  ;;  %v1426_v60 = vperm.slane %v9046_v39, 5  ;;  %v1315_v7 = vadd.f32 %v1307_v53, %v1244_v0  ;;  %v16357_v0 = vld [vmem:[#allocation83_spill] sm:$0xff]  ;;  %v16358_v53 = vld [vmem:[#allocation73_spill] sm:$0xff]  ;;  %2931 = vrot.lane.b32.xlu0 %v16294_v51, %s15513_s21 }
 0x380   : > { %v1389_v40 = vadd.f32 %v1381_v8, %v8920_v13  ;;  %v1379_v57 = vmul.f32 %v16341_v58, %v1367_v36  ;;  %v1384_v19 = vmul.f32 %v16341_v58, %v1372_v24  ;;  %v1380_v59 = vmul.f32 %v16341_v58, %v1368_v32 }
 0x381   : > { %v1370_v61 = vsel %vm9029_vm2, %v1343_v42, 0.0  ;;  %v1371_v50 = vsel %vm9035_vm7, %v1342_v5, 0.0  ;;  %v9144_v54 = vsel %vm1490_vm5, 1, %v16293_v63  ;;  %v1347_v13 = vsel %vm1339_vm0, %v16356_v35, %v16336_v28 }
 0x382   : > { %v1415_v8 = vsel %vm1410_vm10, %v16358_v53, %v16357_v0  ;;  %v1421_v36 = vperm.slane %v9046_v39, 0  ;;  %v1428_v22 = vperm.slane %v9046_v39, 7  ;;  %v1322_v29 = vadd.f32 %v1314_v2, %v1251_v21  ;;  %v9178_v2 = vpop.permute.xlu1 %2661 }
 0x383   : > { %vm9160_vm6 = vcmp.eq.s32.totalorder %v1427_v56, 1  ;;  %vm9164_vm2 = vcmp.eq.s32.totalorder %v1425_v3, 1  ;;  %vm9168_vm7 = vcmp.eq.s32.totalorder %v1426_v60, 1  ;;  %v1392_v39 = vadd.f32 %v1384_v19, %v9033_v46  ;;  %16365 = vst [vmem:[#allocation21_spill] sm:$0xff] %v9178_v2  ;;  %v9180_v56 = vpop.permute.xlu2 %2628  ;;  %v16367_v19 = vld [vmem:[#allocation86_spill] sm:$0xff]  ;;  %v9194_v37 = vpop.permute.xlu0 %2582 }
 0x384   : > { %v1382_v5 = vmul.f32 %v16341_v58, %v1370_v61  ;;  %v1383_v21 = vmul.f32 %v16341_v58, %v1371_v50  ;;  %v1495_v42 = vperm.slane %v9144_v54, 3  ;;  %16366 = vst [vmem:[#allocation57_spill] sm:$0xff] %v9180_v56  ;;  %v1340_v3 = vsel %vm1339_vm0, %v16337_v62, %v16356_v35  ;;  %v16368_v61 = vld [vmem:[#allocation76_spill] sm:$0xff] }
 0x385   : > { %v1366_v60 = vsel %vm9076_vm9, %v1347_v13, 0.0  ;;  %v1440_v46 = vsel %vm9115_vm4, %v1415_v8, 0.0  ;;  %v1412_v50 = vsel %vm1410_vm10, %v16368_v61, %v16367_v19  ;;  %16369 = vst [vmem:[#allocation56_spill] sm:$0xff] %v9194_v37  ;;  %v1387_v2 = vadd.f32 %v1379_v57, %v8949_v47  ;;  %v16375_v35 = vld [vmem:[#allocation80_spill] sm:$0xff]  ;;  %v16376_v8 = vld [vmem:[#allocation79_spill] sm:$0xff] }
 0x386   : > { %v1388_v56 = vadd.f32 %v1380_v59, %v8951_v30  ;;  %vm9198_vm15 = vcmp.eq.s32.totalorder %v1421_v36, 1  ;;  %vm9202_vm0 = vcmp.eq.s32.totalorder %v1428_v22, 1  ;;  %v1416_v48 = vsel %vm1410_vm10, %v16374_v45, %v16358_v53  ;;  %3016 = vrot.lane.b32.xlu1 %v7056_v34, %s15765_s17  ;;  %2912 = vperm.xlu2 %6101, %v8428_v14  }
 0x387   : > { %v1417_v47 = vsel %vm1410_vm10, %v16375_v35, %v16374_v45  ;;  %v1493_v30 = vperm.slane %v9144_v54, 1  ;;  %v1494_v57 = vperm.slane %v9144_v54, 2  ;;  %v1373_v59 = vsel %vm9099_vm8, %v1340_v3, 0.0  ;;  %2937 = vrot.lane.b32.xlu0 %v6988_v18, %s15513_s21 }
 0x388   : > { %v1378_v13 = vmul.f32 %v16341_v58, %v1366_v60  ;;  %v1452_v36 = vmul.f32 %v16376_v8, %v1440_v46  ;;  %v1443_v22 = vsel %vm9160_vm6, %v1412_v50, 0.0  ;;  %v9222_v53 = vadd.f32 %v1382_v5, %v1319_v1  ;;  %v16379_v60 = vld [vmem:[#allocation90_spill] sm:$0xff] }
 0x389   : > { %v9224_v37 = vadd.f32 %v1383_v21, %v1320_v4  ;;  %vm1481_vm9 = vcmp.lt.s32.totalorder %v7906_v9, 32  ;;  %vm9227_vm4 = vcmp.eq.s32.totalorder %v1495_v42, 1  ;;  %v1438_v44 = vsel %vm9124_vm12, %v1417_v47, 0.0 }
 0x38a   : > { %v1439_v3 = vsel %vm9128_vm1, %v1416_v48, 0.0  ;;  %v1413_v1 = vsel %vm1410_vm10, %v16379_v60, %v16368_v61  ;;  %v1414_v4 = vsel %vm1410_vm10, %v16357_v0, %v16379_v60  ;;  %v1385_v31 = vmul.f32 %v16341_v58, %v1373_v59  ;;  %v16384_v61 = vld [vmem:[#allocation196_spill] sm:$0xff]  ;;  %v9267_v50 = vpop.permute.xlu1 %2720  ;;  %v16389_v59 = vld [vmem:[#allocation93_spill] sm:$0xff] }
 0x38b   : > { %v1455_v10 = vmul.f32 %v16376_v8, %v1443_v22  ;;  %vm9248_vm8 = vcmp.eq.s32.totalorder %v1493_v30, 1  ;;  %vm9252_vm5 = vcmp.eq.s32.totalorder %v1494_v57, 1  ;;  %v1498_v21 = vperm.slane %v9144_v54, 6  ;;  %16386 = vst [vmem:[#allocation22_spill] sm:$0xff] %v9267_v50  ;;  %v9269_v48 = vpop.permute.xlu2 %2651  ;;  %v9277_v57 = vpop.permute.xlu0 %2588  ;;  %v16390_v22 = vld [vmem:[#allocation92_spill] sm:$0xff] }
 0x38c   : > { %v1386_v0 = vadd.f32 %v1378_v13, %v1315_v7  ;;  %v9259_v42 = vadd.f32 %v1452_v36, %v1389_v40  ;;  %v1496_v58 = vperm.slane %v9144_v54, 4  ;;  %v1497_v46 = vperm.slane %v9144_v54, 5  ;;  %16387 = vst [vmem:[#allocation60_spill] sm:$0xff] %v9269_v48 }
 0x38d   : > { %vm16385_vm12 = vnez %v16384_v61  ;;  %v1450_v47 = vmul.f32 %v16376_v8, %v1438_v44  ;;  %v1451_v30 = vmul.f32 %v16376_v8, %v1439_v3  ;;  %v1441_v7 = vsel %vm9164_vm2, %v1414_v4, 0.0  ;;  %16388 = vst [vmem:[#allocation59_spill] sm:$0xff] %v9277_v57  ;;  %v16391_v44 = vld [vmem:[#allocation82_spill] sm:$0xff] }
 0x38e   : > { %vm1561_vm1 = vmand %vm16279_vm11, %vm16385_vm12  ;;  %v1442_v40 = vsel %vm9168_vm7, %v1413_v1, 0.0  ;;  %v1411_v13 = vsel %vm1410_vm10, %v16367_v19, %v16389_v59  ;;  %v1418_v36 = vsel %vm1410_vm10, %v16389_v59, %v16375_v35  ;;  %v1486_v28 = vsel %vm1481_vm9, %v16391_v44, %v16390_v22  ;;  %3075 = vrot.lane.b32.xlu1 %v6861_v23, %s6269_s23  ;;  %2935 = vrot.lane.b32.xlu2 %v6923_v49, %s15513_s21 }
 0x38f   : > { %v1492_v32 = vperm.slane %v9144_v54, 0  ;;  %v1393_v3 = vadd.f32 %v1385_v31, %v1322_v29  ;;  %v1463_v60 = vadd.f32 %v1455_v10, %v1392_v39  ;;  %vm9292_vm6 = vcmp.eq.s32.totalorder %v1498_v21, 1  ;;  %v16394_v31 = vld [vmem:[#allocation95_spill] sm:$0xff]  ;;  %v16395_v10 = vld [vmem:[#allocation85_spill] sm:$0xff]  ;;  %2943 = vrot.lane.b32.xlu0 %v16259_v11, %s15513_s21 }
 0x390   : > { %v9297_v19 = vsel %vm1561_vm1, 1, %v16293_v63  ;;  %v1453_v4 = vmul.f32 %v16376_v8, %v1441_v7  ;;  %v1454_v35 = vmul.f32 %v16376_v8, %v1442_v40  ;;  %v1499_v59 = vperm.slane %v9144_v54, 7 }
 0x391   : > { %v1437_v50 = vsel %vm9198_vm15, %v1418_v36, 0.0  ;;  %v1444_v29 = vsel %vm9202_vm0, %v1411_v13, 0.0  ;;  %v1511_v39 = vsel %vm9227_vm4, %v1486_v28, 0.0  ;;  %v1483_v21 = vsel %vm1481_vm9, %v16395_v10, %v16394_v31 }
 0x392   : > { %vm9312_vm10 = vcmp.eq.s32.totalorder %v1496_v58, 1  ;;  %vm9316_vm2 = vcmp.eq.s32.totalorder %v1497_v46, 1  ;;  %v1458_v16 = vadd.f32 %v1450_v47, %v1387_v2  ;;  %v1459_v40 = vadd.f32 %v1451_v30, %v1388_v56  ;;  %v16402_v58 = vld [vmem:[#allocation96_spill] sm:$0xff]  ;;  %v16403_v2 = vld [vmem:[#allocation89_spill] sm:$0xff]  ;;  %v9346_v57 = vpop.permute.xlu1 %2726 }
 0x393   : > { %vm9320_vm7 = vcmp.eq.s32.totalorder %v1492_v32, 1  ;;  %v1566_v45 = vperm.slane %v9297_v19, 3  ;;  %v1487_v46 = vsel %vm1481_vm9, %v16402_v58, %v16391_v44  ;;  %v1488_v56 = vsel %vm1481_vm9, %v16403_v2, %v16402_v58  ;;  %v16404_v32 = vld [vmem:[#allocation88_spill] sm:$0xff]  ;;  %16405 = vst [vmem:[#allocation43_spill] sm:$0xff] %v9346_v57  ;;  %v9348_v58 = vpop.permute.xlu2 %2657 }
 0x394   : > { %v1564_v47 = vperm.slane %v9297_v19, 1  ;;  %v1565_v30 = vperm.slane %v9297_v19, 2  ;;  %v6270_v13 = vmov 31   ;;  %v1449_v36 = vmul.f32 %v16376_v8, %v1437_v50  ;;  %16406 = vst [vmem:[#allocation55_spill] sm:$0xff] %v9348_v58 }
 0x395   : > { %6102 = vset.pattern.permute.xlu2 %v6270_v13  ;;  %v1456_v28 = vmul.f32 %v16376_v8, %v1444_v29  ;;  %v1523_v44 = vmul.f32 %v16404_v32, %v1511_v39  ;;  %v1514_v48 = vsel %vm9292_vm6, %v1483_v21, 0.0  ;;  %v9351_v25 = vadd.f32 %v1453_v4, %v9222_v53  ;;  %v9361_v8 = vpop.permute.xlu0 %2647 }
 0x396   : > { %v9354_v15 = vadd.f32 %v1454_v35, %v9224_v37  ;;  %vm9356_vm15 = vcmp.eq.s32.totalorder %v1499_v59, 1  ;;  %vm1552_vm0 = vcmp.lt.s32.totalorder %v7906_v9, 31  ;;  %16409 = vst [vmem:[#allocation18_spill] sm:$0xff] %v9361_v8  ;;  %v1509_v50 = vsel %vm9248_vm8, %v1488_v56, 0.0  ;;  %3081 = vrot.lane.b32.xlu1 %v16285_v43, %s6269_s23  ;;  %2941 = vrot.lane.b32.xlu2 %v16286_v55, %s15513_s21  ;;  %v16434_v8 = vld [vmem:[#allocation105_spill] sm:$0xff]  ;;  %s6271_s21 = smov 109  }
 0x397   : > { %v1510_v1 = vsel %vm9252_vm5, %v1487_v46, 0.0  ;;  %vm9367_vm4 = vcmp.eq.s32.totalorder %v1566_v45, 1  ;;  %v1569_v37 = vperm.slane %v9297_v19, 6  ;;  %v1526_v4 = vmul.f32 %v16404_v32, %v1514_v48  ;;  %v16416_v46 = vld [vmem:[#allocation99_spill] sm:$0xff]  ;;  %3002 = vrot.lane.b32.xlu0 %v16294_v51, %s15765_s17 }
 0x398   : > { %vm9373_vm1 = vcmp.eq.s32.totalorder %v1564_v47, 1  ;;  %vm9377_vm6 = vcmp.eq.s32.totalorder %v1565_v30, 1  ;;  %v1567_v24 = vperm.slane %v9297_v19, 4  ;;  %v9382_v5 = vadd.f32 %v1449_v36, %v1386_v0  ;;  %v16420_v30 = vld [vmem:[#allocation101_spill] sm:$0xff]  ;;  %v16421_v36 = vld [vmem:[#allocation91_spill] sm:$0xff] }
 0x399   : > { %v9384_v29 = vadd.f32 %v1456_v28, %v1393_v3  ;;  %v1531_v39 = vadd.f32 %v1523_v44, %v9259_v42  ;;  %v1568_v21 = vperm.slane %v9297_v19, 5  ;;  %v1521_v48 = vmul.f32 %v16404_v32, %v1509_v50  ;;  %v16417_v3 = vld [vmem:[#allocation206_spill] sm:$0xff] }
 0x39a   : > { %v1522_v45 = vmul.f32 %v16404_v32, %v1510_v1  ;;  %v1484_v56 = vsel %vm1481_vm9, %v16416_v46, %v16395_v10  ;;  %v1485_v0 = vsel %vm1481_vm9, %v16390_v22, %v16416_v46  ;;  %vm16418_vm8 = vnez %v16417_v3  ;;  %v16419_v42 = vld [vmem:[#allocation102_spill] sm:$0xff]  ;;  %v9450_v7 = vpop.permute.xlu1 %2732 }
 0x39b   : > { %v1489_v47 = vsel %vm1481_vm9, %v16419_v42, %v16403_v2  ;;  %v1557_v10 = vsel %vm1552_vm0, %v16421_v36, %v16420_v30  ;;  %vm9410_vm12 = vcmp.eq.s32.totalorder %v1569_v37, 1  ;;  %v1563_v22 = vperm.slane %v9297_v19, 0  ;;  %v16427_v46 = vld [vmem:[#allocation94_spill] sm:$0xff]  ;;  %vm16430_vm14 = vmand %vm16279_vm11, %vm16418_vm8  ;;  %16431 = vst [vmem:[#allocation62_spill] sm:$0xff] %v9450_v7  ;;  %v9452_v54 = vpop.permute.xlu2 %2699 }
 0x39c   : > { %v1534_v44 = vadd.f32 %v1526_v4, %v1463_v60  ;;  %v1482_v2 = vsel %vm1481_vm9, %v16394_v31, %v16419_v42  ;;  %vm9423_vm5 = vcmp.eq.s32.totalorder %v1567_v24, 1  ;;  %v1570_v1 = vperm.slane %v9297_v19, 7  ;;  %v16426_v4 = vld [vmem:[#allocation104_spill] sm:$0xff]  ;;  %16432 = vst [vmem:[#allocation46_spill] sm:$0xff] %v9452_v54  ;;  %v16435_v54 = vld [vmem:[#allocation98_spill] sm:$0xff] }
 0x39d   : > { %v1512_v37 = vsel %vm9312_vm10, %v1485_v0, 0.0  ;;  %v1513_v60 = vsel %vm9316_vm2, %v1484_v56, 0.0  ;;  %v1554_v31 = vsel %vm1552_vm0, %v16427_v46, %v16426_v4  ;;  %vm9438_vm9 = vcmp.eq.s32.totalorder %v1568_v21, 1  ;;  %v9458_v57 = vpop.permute.xlu0 %2653 }
 0x39e   : > { %v9448_v19 = vsel %vm16430_vm14, 1, %v16293_v63  ;;  %v1529_v56 = vadd.f32 %v1521_v48, %v1458_v16  ;;  %v1530_v0 = vadd.f32 %v1522_v45, %v1459_v40  ;;  %v1508_v21 = vsel %vm9320_vm7, %v1489_v47, 0.0  ;;  %16433 = vst [vmem:[#allocation35_spill] sm:$0xff] %v9458_v57  ;;  %3087 = vrot.lane.b32.xlu1 %v7056_v34, %s6269_s23  ;;  %2983 = vperm.xlu2 %6102, %v8428_v14   ;;  %v16512_v48 = vld [vmem:[#allocation115_spill] sm:$0xff] }
 0x39f   : > { %v1582_v42 = vsel %vm9367_vm4, %v1557_v10, 0.0  ;;  %v1515_v58 = vsel %vm9356_vm15, %v1482_v2, 0.0  ;;  %v1558_v7 = vsel %vm1552_vm0, %v16434_v8, %v16421_v36  ;;  %v1559_v16 = vsel %vm1552_vm0, %v16435_v54, %v16434_v8  ;;  %v16440_v8 = vld [vmem:[#allocation97_spill] sm:$0xff]  ;;  %3008 = vrot.lane.b32.xlu0 %v6988_v18, %s15765_s17 }
 0x3a0   : > { %vm9470_vm14 = vcmp.eq.s32.totalorder %v1563_v22, 1  ;;  %v1524_v62 = vmul.f32 %v16404_v32, %v1512_v37  ;;  %v1525_v53 = vmul.f32 %v16404_v32, %v1513_v60  ;;  %v1585_v13 = vsel %vm9410_vm12, %v1554_v31, 0.0  ;;  %v16441_v31 = vld [vmem:[#allocation108_spill] sm:$0xff] }
 0x3a1   : > { %vm9478_vm10 = vcmp.eq.s32.totalorder %v1570_v1, 1  ;;  %v1637_v45 = vperm.slane %v9448_v19, 3  ;;  %v1520_v47 = vmul.f32 %v16404_v32, %v1508_v21  ;;  %v1594_v36 = vmul.f32 %v16440_v8, %v1582_v42 }
 0x3a2   : > { %v1635_v10 = vperm.slane %v9448_v19, 1  ;;  %v1636_v22 = vperm.slane %v9448_v19, 2  ;;  %v1527_v2 = vmul.f32 %v16404_v32, %v1515_v58  ;;  %v1580_v28 = vsel %vm9373_vm1, %v1559_v16, 0.0 }
 0x3a3   : > { %v1581_v1 = vsel %vm9377_vm6, %v1558_v7, 0.0  ;;  %v1640_v37 = vperm.slane %v9448_v19, 6  ;;  %v1597_v60 = vmul.f32 %v16440_v8, %v1585_v13  ;;  %v1556_v21 = vsel %vm1552_vm0, %v16420_v30, %v16441_v31 }
 0x3a4   : > { %vm15512_vm12 = vcmp.lt.s32.totalorder %v7906_v9, 30  ;;  %v1638_v42 = vperm.slane %v9448_v19, 4  ;;  %v1532_v32 = vadd.f32 %v1524_v62, %v9351_v25  ;;  %v1533_v58 = vadd.f32 %v1525_v53, %v9354_v15  ;;  %v16444_v15 = vld [vmem:[#allocation211_spill] sm:$0xff]  ;;  %v9524_v25 = vpop.permute.xlu1 %2791  ;;  %v9526_v62 = vpop.permute.xlu2 %2722 }
 0x3a5   : > { %vm9505_vm2 = vcmp.eq.s32.totalorder %v1637_v45, 1  ;;  %v1639_v59 = vperm.slane %v9448_v19, 5  ;;  %v9512_v30 = vadd.f32 %v1594_v36, %v1531_v39  ;;  %v1592_v7 = vmul.f32 %v16440_v8, %v1580_v28  ;;  %16446 = vst [vmem:[#allocation33_spill] sm:$0xff] %v9524_v25  ;;  %v16495_v28 = vld [vmem:[#allocation120_spill] sm:$0xff] }
 0x3a6   : > { %v1593_v16 = vmul.f32 %v16440_v8, %v1581_v1  ;;  %v1555_v14 = vsel %vm1552_vm0, %v16441_v31, %v16427_v46  ;;  %vm16445_vm7 = vnez %v16444_v15  ;;  %16447 = vst [vmem:[#allocation20_spill] sm:$0xff] %v9526_v62  ;;  %v9529_v39 = vadd.f32 %v1520_v47, %v9382_v5  ;;  %v9548_v5 = vpop.permute.xlu0 %2659  ;;  %3146 = vrot.lane.b32.xlu1 %v6861_v23, %s6271_s21 }
 0x3a7   : > { %v9532_v53 = vadd.f32 %v1527_v2, %v9384_v29  ;;  %v1583_v13 = vsel %vm9423_vm5, %v1556_v21, 0.0  ;;  %vm9536_vm4 = vcmp.eq.s32.totalorder %v1635_v10, 1  ;;  %vm9540_vm1 = vcmp.eq.s32.totalorder %v1636_v22, 1  ;;  %16454 = vst [vmem:[#allocation24_spill] sm:$0xff] %v9548_v5  ;;  %v16455_v29 = vld [vmem:[#allocation111_spill] sm:$0xff]  ;;  %v16456_v10 = vld [vmem:[#allocation110_spill] sm:$0xff]  ;;  %3006 = vrot.lane.b32.xlu2 %v6923_v49, %s15765_s17  ;;  %3014 = vrot.lane.b32.xlu0 %v16259_v11, %s15765_s17 }
 0x3a8   : > { %vm9544_vm6 = vcmp.eq.s32.totalorder %v1640_v37, 1  ;;  %v9550_v47 = vadd.f32 %v1597_v60, %v1534_v44  ;;  %v1560_v50 = vsel %vm1552_vm0, %v16455_v29, %v16435_v54  ;;  %v16457_v2 = vld [vmem:[#allocation100_spill] sm:$0xff]  ;;  %vm9560_vm5 = vcmp.eq.s32.totalorder %v1638_v42, 1  ;;  %v16479_v5 = vld [vmem:[#allocation117_spill] sm:$0xff] }
 0x3a9   : > { %v1628_v22 = vsel %vm15512_vm12, %v16457_v2, %v16456_v10  ;;  %v1634_v1 = vperm.slane %v9448_v19, 0  ;;  %v1584_v44 = vsel %vm9438_vm9, %v1555_v14, 0.0  ;;  %v1553_v37 = vsel %vm1552_vm0, %v16426_v4, %v16455_v29  ;;  %vm16462_vm12 = vmand %vm16279_vm11, %vm16445_vm7 }
 0x3aa   : > { %vm9571_vm15 = vcmp.eq.s32.totalorder %v1639_v59, 1  ;;  %v1641_v60 = vperm.slane %v9448_v19, 7  ;;  %v9582_v31 = vsel %vm16462_vm12, 1, %v16293_v63  ;;  %v9584_v24 = vadd.f32 %v1592_v7, %v1529_v56  ;;  %v16464_v7 = vld [vmem:[#allocation103_spill] sm:$0xff] }
 0x3ab   : > { %v9586_v21 = vadd.f32 %v1593_v16, %v1530_v0  ;;  %v1595_v4 = vmul.f32 %v16440_v8, %v1583_v13  ;;  %v1579_v42 = vsel %vm9470_vm14, %v1560_v50, 0.0  ;;  %v1653_v19 = vsel %vm9505_vm2, %v1628_v22, 0.0  ;;  %v16463_v0 = vld [vmem:[#allocation113_spill] sm:$0xff]  ;;  %v16470_v22 = vld [vmem:[#allocation106_spill] sm:$0xff] }
 0x3ac   : > { %vm715_vm0 = vcmp.ge.s32.totalorder %v6134_v12, 1  ;;  %vm716_vm11 = vcmp.lt.s32.totalorder %v6134_v12, 17  ;;  %v1596_v59 = vmul.f32 %v16440_v8, %v1584_v44  ;;  %v1586_v56 = vsel %vm9478_vm10, %v1553_v37, 0.0  ;;  %v9633_v25 = vpop.permute.xlu2 %2728 }
 0x3ad   : > { %vm16465_vm9 = vcmp.lt.s32.totalorder %v7906_v9, 30  ;;  %v1708_v16 = vperm.slane %v9582_v31, 3  ;;  %vm9608_vm14 = vcmp.eq.s32.totalorder %v1634_v1, 1  ;;  %vm9612_vm12 = vcmp.eq.s32.totalorder %v1641_v60, 1  ;;  %vm9627_vm2 = vmand %vm715_vm0, %vm716_vm11  ;;  %v9631_v60 = vpop.permute.xlu1 %2797  ;;  %16474 = vst [vmem:[#allocation61_spill] sm:$0xff] %v9633_v25 }
 0x3ae   : > { %v1625_v40 = vsel %vm16465_vm9, %v16464_v7, %v16463_v0  ;;  %v1706_v14 = vperm.slane %v9582_v31, 1  ;;  %v6272_v13 = vmov 32   ;;  %v9620_v29 = vadd.f32 %v1595_v4, %v1532_v32  ;;  %16473 = vst [vmem:[#allocation63_spill] sm:$0xff] %v9631_v60  ;;  %v16475_v32 = vld [vmem:[#allocation114_spill] sm:$0xff]  ;;  %vm16477_vm10 = vmmov %vm16465_vm9  ;;  %v9646_v62 = vpop.permute.xlu0 %2718  ;;  %3152 = vrot.lane.b32.xlu1 %v16285_v43, %s6271_s21 }
 0x3af   : > { %6103 = vset.pattern.permute.xlu2 %v6272_v13  ;;  %v1591_v50 = vmul.f32 %v16440_v8, %v1579_v42  ;;  %v1665_v1 = vmul.f32 %v16470_v22, %v1653_v19  ;;  %v1707_v44 = vperm.slane %v9582_v31, 2  ;;  %v1598_v13 = vmul.f32 %v16440_v8, %v1586_v56  ;;  %v16476_v42 = vld [vmem:[#allocation107_spill] sm:$0xff]  ;;  %16478 = vst [vmem:[#allocation30_spill] sm:$0xff] %v9646_v62  ;;  %vm16480_vm0 = vmmov %vm16465_vm9 }
 0x3b0   : > { %v1629_v4 = vsel %vm16465_vm9, %v16475_v32, %v16457_v2  ;;  %v1630_v19 = vsel %vm16477_vm10, %v16476_v42, %v16475_v32  ;;  %v1656_v12 = vsel %vm9544_vm6, %v1625_v40, 0.0  ;;  %v1604_v60 = vadd.f32 %v1596_v59, %v1533_v58  ;;  %vm16483_vm10 = vmmov %vm16480_vm0  ;;  %3012 = vrot.lane.b32.xlu2 %v16286_v55, %s15765_s17  ;;  %3073 = vrot.lane.b32.xlu0 %v16294_v51, %s6269_s23  ;;  %s17572_s17 = smov 111  }
 0x3b1   : > { %v1627_v8 = vsel %vm16480_vm0, %v16456_v10, %v16479_v5  ;;  %vm9652_vm11 = vcmp.eq.s32.totalorder %v1708_v16, 1  ;;  %v1711_v2 = vperm.slane %v9582_v31, 6  ;;  %v1626_v36 = vsel %vm16483_vm10, %v16479_v5, %v16464_v7  ;;  %v16486_v10 = vld [vmem:[#allocation194_spill] sm:$0xff] }
 0x3b2   : > { %vm9661_vm6 = vcmp.eq.s32.totalorder %v1706_v14, 1  ;;  %v1709_v58 = vperm.slane %v9582_v31, 4  ;;  %v1710_v59 = vperm.slane %v9582_v31, 5  ;;  %vm16487_vm9 = vnez %v16486_v10 }
 0x3b3   : > { %vm1774_vm0 = vmand %vm9627_vm2, %vm16487_vm9  ;;  %v1651_v16 = vsel %vm9536_vm4, %v1630_v19, 0.0  ;;  %v1652_v32 = vsel %vm9540_vm1, %v1629_v4, 0.0  ;;  %v1668_v5 = vmul.f32 %v16470_v22, %v1656_v12  ;;  %vm9676_vm10 = vcmp.eq.s32.totalorder %v1707_v44, 1  ;;  %v16490_v4 = vld [vmem:[#allocation119_spill] sm:$0xff]  ;;  %v16491_v19 = vld [vmem:[#allocation109_spill] sm:$0xff] }
 0x3b4   : > { %v9681_v14 = vadd.f32 %v1591_v50, %v9529_v39  ;;  %v9684_v25 = vadd.f32 %v1598_v13, %v9532_v53  ;;  %v1673_v62 = vadd.f32 %v1665_v1, %v9512_v30  ;;  %v1654_v46 = vsel %vm9560_vm5, %v1627_v8, 0.0 }
 0x3b5   : > { %v1655_v45 = vsel %vm9571_vm15, %v1626_v36, 0.0  ;;  %vm16492_vm4 = vcmp.lt.s32.totalorder %v7906_v9, 29  ;;  %vm9695_vm1 = vcmp.eq.s32.totalorder %v1711_v2, 1  ;;  %v9700_v39 = vsel %vm1774_vm0, 1, %v16293_v63 }
 0x3b6   : > { %v1699_v44 = vsel %vm16492_vm4, %v16491_v19, %v16490_v4  ;;  %v1663_v30 = vmul.f32 %v16470_v22, %v1651_v16  ;;  %v1664_v53 = vmul.f32 %v16470_v22, %v1652_v32  ;;  %vm16496_vm15 = vcmp.lt.s32.totalorder %v7906_v9, 30  ;;  %v16504_v32 = vld [vmem:[#allocation122_spill] sm:$0xff]  ;;  %3158 = vrot.lane.b32.xlu1 %v7056_v34, %s6271_s21 }
 0x3b7   : > { %v1624_v54 = vsel %vm16496_vm15, %v16463_v0, %v16495_v28  ;;  %vm16497_vm5 = vmmov %vm16496_vm15  ;;  %vm9716_vm0 = vcmp.eq.s32.totalorder %v1709_v58, 1  ;;  %vm9720_vm4 = vcmp.eq.s32.totalorder %v1710_v59, 1  ;;  %v1676_v8 = vadd.f32 %v1668_v5, %v9550_v47  ;;  %v9732_v58 = vpop.permute.xlu2 %2770 }
 0x3b8   : > { %v1631_v50 = vsel %vm16497_vm5, %v16495_v28, %v16476_v42  ;;  %v1666_v0 = vmul.f32 %v16470_v22, %v1654_v46  ;;  %v1705_v2 = vperm.slane %v9582_v31, 0  ;;  %v1712_v36 = vperm.slane %v9582_v31, 7  ;;  %v9730_v42 = vpop.permute.xlu1 %2803  ;;  %16503 = vst [vmem:[#allocation17_spill] sm:$0xff] %v9732_v58  ;;  %v16505_v28 = vld [vmem:[#allocation112_spill] sm:$0xff]  ;;  %v9742_v46 = vpop.permute.xlu0 %2724  ;;  %3079 = vrot.lane.b32.xlu0 %v6988_v18, %s6269_s23 }
 0x3b9   : > { %16502 = vst [vmem:[#allocation65_spill] sm:$0xff] %v9730_v42  ;;  %v1667_v59 = vmul.f32 %v16470_v22, %v1655_v45  ;;  %v1724_v16 = vsel %vm9652_vm11, %v1699_v44, 0.0  ;;  %vm16506_vm15 = vcmp.lt.s32.totalorder %v7906_v9, 29  ;;  %v1779_v5 = vperm.slane %v9700_v39, 3  ;;  %v16508_v45 = vld [vmem:[#allocation123_spill] sm:$0xff]  ;;  %v16510_v44 = vld [vmem:[#allocation116_spill] sm:$0xff] }
 0x3ba   : > { %v1696_v47 = vsel %vm16506_vm15, %v16505_v28, %v16504_v32  ;;  %16507 = vst [vmem:[#allocation66_spill] sm:$0xff] %v9742_v46  ;;  %v1650_v31 = vsel %vm9608_vm14, %v1631_v50, 0.0  ;;  %v1657_v42 = vsel %vm9612_vm12, %v1624_v54, 0.0  ;;  %vm16509_vm5 = vmmov %vm16506_vm15  ;;  %v1671_v57 = vadd.f32 %v1663_v30, %v9584_v24 }
 0x3bb   : > { %v1700_v56 = vsel %vm16509_vm5, %v16508_v45, %v16491_v19  ;;  %vm16511_vm11 = vmmov %vm16509_vm5  ;;  %v1672_v46 = vadd.f32 %v1664_v53, %v9586_v21  ;;  %v1777_v35 = vperm.slane %v9700_v39, 1  ;;  %v1778_v50 = vperm.slane %v9700_v39, 2 }
 0x3bc   : > { %v1701_v58 = vsel %vm16511_vm11, %v16510_v44, %v16508_v45  ;;  %v1736_v54 = vmul.f32 %v16512_v48, %v1724_v16  ;;  %v1727_v38 = vsel %vm9695_vm1, %v1696_v47, 0.0  ;;  %vm9763_vm14 = vcmp.eq.s32.totalorder %v1705_v2, 1 }
 0x3bd   : > { %vm9767_vm12 = vcmp.eq.s32.totalorder %v1712_v36, 1  ;;  %v1662_v24 = vmul.f32 %v16470_v22, %v1650_v31  ;;  %v1669_v21 = vmul.f32 %v16470_v22, %v1657_v42  ;;  %v1722_v30 = vsel %vm9661_vm6, %v1701_v58, 0.0  ;;  %v9792_v22 = vld [vmem:[%s15176_s4] sm:$0xff]  ;;  %vm16520_vm6 = vmmov %vm16509_vm5 }
 0x3be   : > { %v1723_v53 = vsel %vm9676_vm10, %v1700_v56, 0.0  ;;  %v9778_v12 = vadd.f32 %v1666_v0, %v9620_v29  ;;  %v9780_v2 = vadd.f32 %v1667_v59, %v1604_v60  ;;  %vm1765_vm1 = vcmp.lt.s32.totalorder %v7906_v9, 19  ;;  %3054 = vperm.xlu2 %6103, %v9792_v22   ;;  %v16519_v60 = vld [vmem:[#allocation126_spill] sm:$0xff]  ;;  %vm16521_vm10 = vmmov %vm16509_vm5  ;;  %3217 = vrot.lane.b32.xlu1 %v6861_v23, %s6273_s0 }
 0x3bf   : > { %vm9783_vm15 = vcmp.eq.s32.totalorder %v1779_v5, 1  ;;  %v1739_v29 = vmul.f32 %v16512_v48, %v1727_v38  ;;  %v1697_v40 = vsel %vm16520_vm6, %v16519_v60, %v16505_v28  ;;  %v1698_v7 = vsel %vm16521_vm10, %v16490_v4, %v16519_v60  ;;  %vm1845_vm6 = vmand %vm9627_vm2, %vm16277_vm3  ;;  %v9826_v47 = vpop.permute.xlu2 %2793 }
 0x3c0   : > { %vm9804_vm5 = vcmp.eq.s32.totalorder %v1777_v35, 1  ;;  %vm9808_vm11 = vcmp.eq.s32.totalorder %v1778_v50, 1  ;;  %v1782_v38 = vperm.slane %v9700_v39, 6  ;;  %v9815_v58 = vadd.f32 %v1736_v54, %v1673_v62  ;;  %v9824_v28 = vpop.permute.xlu1 %2862  ;;  %16527 = vst [vmem:[#allocation68_spill] sm:$0xff] %v9826_v47  ;;  %v9832_v56 = vpop.permute.xlu0 %2730  ;;  %v16529_v54 = vld [vmem:[#allocation129_spill] sm:$0xff]  ;;  %vm16532_vm3 = vmmov %vm16521_vm10  ;;  %3085 = vrot.lane.b32.xlu0 %v16259_v11, %s6269_s23 }
 0x3c1   : > { %v1734_v59 = vmul.f32 %v16512_v48, %v1722_v30  ;;  %v1735_v16 = vmul.f32 %v16512_v48, %v1723_v53  ;;  %v1780_v4 = vperm.slane %v9700_v39, 4  ;;  %16526 = vst [vmem:[#allocation26_spill] sm:$0xff] %v9824_v28  ;;  %v1670_v5 = vadd.f32 %v1662_v24, %v9681_v14  ;;  %v16530_v14 = vld [vmem:[#allocation128_spill] sm:$0xff]  ;;  %v16531_v24 = vld [vmem:[#allocation118_spill] sm:$0xff] }
 0x3c2   : > { %v1677_v62 = vadd.f32 %v1669_v21, %v9684_v25  ;;  %v1781_v31 = vperm.slane %v9700_v39, 5  ;;  %v1776_v45 = vperm.slane %v9700_v39, 0  ;;  %16528 = vst [vmem:[#allocation58_spill] sm:$0xff] %v9832_v56  ;;  %v1725_v35 = vsel %vm9716_vm0, %v1698_v7, 0.0 }
 0x3c3   : > { %v1726_v50 = vsel %vm9720_vm4, %v1697_v40, 0.0  ;;  %v1702_v30 = vsel %vm16521_vm10, %v16529_v54, %v16510_v44  ;;  %v1770_v25 = vsel %vm1765_vm1, %v16531_v24, %v16530_v14  ;;  %v9846_v21 = vadd.f32 %v1739_v29, %v1676_v8 }
 0x3c4   : > { %v1695_v1 = vsel %vm16532_vm3, %v16504_v32, %v16529_v54  ;;  %vm9852_vm0 = vcmp.eq.s32.totalorder %v1782_v38, 1  ;;  %v9857_v53 = vsel %vm1845_vm6, 1, %v16293_v63  ;;  %v9859_v44 = vadd.f32 %v1734_v59, %v1671_v57  ;;  %v16539_v59 = vld [vmem:[#allocation131_spill] sm:$0xff] }
 0x3c5   : > { %v9861_v60 = vadd.f32 %v1735_v16, %v1672_v46  ;;  %vm9863_vm4 = vcmp.eq.s32.totalorder %v1780_v4, 1  ;;  %v1783_v8 = vperm.slane %v9700_v39, 7  ;;  %v1737_v29 = vmul.f32 %v16512_v48, %v1725_v35  ;;  %v16540_v16 = vld [vmem:[#allocation121_spill] sm:$0xff]  ;;  %v16576_v4 = vld [vmem:[#allocation130_spill] sm:$0xff] }
 0x3c6   : > { %v1738_v32 = vmul.f32 %v16512_v48, %v1726_v50  ;;  %v1721_v7 = vsel %vm9763_vm14, %v1702_v30, 0.0  ;;  %v1795_v38 = vsel %vm9783_vm15, %v1770_v25, 0.0  ;;  %vm9874_vm3 = vcmp.eq.s32.totalorder %v1781_v31, 1  ;;  %3077 = vrot.lane.b32.xlu2 %v6923_v49, %s6269_s23  ;;  %v16544_v31 = vld [vmem:[#allocation125_spill] sm:$0xff]  ;;  %v16545_v25 = vld [vmem:[#allocation124_spill] sm:$0xff]  ;;  %3223 = vrot.lane.b32.xlu1 %v16285_v43, %s6273_s0 }
 0x3c7   : > { %v1728_v46 = vsel %vm9767_vm12, %v1695_v1, 0.0  ;;  %v1767_v39 = vsel %vm1765_vm1, %v16540_v16, %v16539_v59  ;;  %vm9884_vm6 = vcmp.eq.s32.totalorder %v1776_v45, 1  ;;  %v1850_v19 = vperm.slane %v9857_v53, 3  ;;  %v9914_v28 = vpop.permute.xlu2 %2799 }
 0x3c8   : > { %v1771_v36 = vsel %vm1765_vm1, %v16543_v52, %v16531_v24  ;;  %v1772_v45 = vsel %vm1765_vm1, %v16544_v31, %v16543_v52  ;;  %v1848_v35 = vperm.slane %v9857_v53, 1  ;;  %v1849_v50 = vperm.slane %v9857_v53, 2  ;;  %v9912_v52 = vpop.permute.xlu1 %2868  ;;  %16549 = vst [vmem:[#allocation69_spill] sm:$0xff] %v9914_v28  ;;  %3144 = vrot.lane.b32.xlu0 %v16294_v51, %s6271_s21 }
 0x3c9   : > { %v6274_v54 = vmov 33   ;;  %v1733_v30 = vmul.f32 %v16512_v48, %v1721_v7  ;;  %v1807_v1 = vmul.f32 %v16545_v25, %v1795_v38  ;;  %vm9907_vm14 = vcmp.eq.s32.totalorder %v1783_v8, 1  ;;  %16548 = vst [vmem:[#allocation28_spill] sm:$0xff] %v9912_v52  ;;  %v9923_v8 = vpop.permute.xlu0 %2789 }
 0x3ca   : > { %6104 = vset.pattern.permute.xlu2 %v6274_v54  ;;  %v1745_v47 = vadd.f32 %v1737_v29, %v9778_v12  ;;  %v9918_v56 = vadd.f32 %v1738_v32, %v9780_v2  ;;  %v1740_v54 = vmul.f32 %v16512_v48, %v1728_v46  ;;  %v1798_v7 = vsel %vm9852_vm0, %v1767_v39, 0.0  ;;  %16550 = vst [vmem:[#allocation72_spill] sm:$0xff] %v9923_v8  ;;  %v16557_v46 = vld [vmem:[#allocation135_spill] sm:$0xff] }
 0x3cb   : > { %v1793_v38 = vsel %vm9804_vm5, %v1772_v45, 0.0  ;;  %v1794_v52 = vsel %vm9808_vm11, %v1771_v36, 0.0  ;;  %vm9929_vm15 = vcmp.eq.s32.totalorder %v1850_v19, 1  ;;  %v1853_v12 = vperm.slane %v9857_v53, 6 }
 0x3cc   : > { %vm9934_vm10 = vcmp.eq.s32.totalorder %v1848_v35, 1  ;;  %vm9938_vm12 = vcmp.eq.s32.totalorder %v1849_v50, 1  ;;  %v1851_v0 = vperm.slane %v9857_v53, 4  ;;  %v1852_v13 = vperm.slane %v9857_v53, 5  ;;  %v16560_v50 = vld [vmem:[#allocation127_spill] sm:$0xff] }
 0x3cd   : > { %v1741_v42 = vadd.f32 %v1733_v30, %v1670_v5  ;;  %v1815_v29 = vadd.f32 %v1807_v1, %v9815_v58  ;;  %v1810_v32 = vmul.f32 %v16545_v25, %v1798_v7  ;;  %v1769_v39 = vsel %vm1765_vm1, %v16530_v14, %v16557_v46  ;;  %v16558_v58 = vld [vmem:[#allocation138_spill] sm:$0xff]  ;;  %v16559_v14 = vld [vmem:[#allocation137_spill] sm:$0xff] }
 0x3ce   : > { %v1748_v19 = vadd.f32 %v1740_v54, %v1677_v62  ;;  %v1805_v36 = vmul.f32 %v16545_v25, %v1793_v38  ;;  %v1806_v45 = vmul.f32 %v16545_v25, %v1794_v52  ;;  %v1768_v35 = vsel %vm1765_vm1, %v16557_v46, %v16540_v16  ;;  %3083 = vrot.lane.b32.xlu2 %v16286_v55, %s6269_s23  ;;  %s6275_s23 = smov 98  }
 0x3cf   : > { %v1766_v5 = vsel %vm1765_vm1, %v16539_v59, %v16558_v58  ;;  %v1773_v62 = vsel %vm1765_vm1, %v16558_v58, %v16544_v31  ;;  %vm16561_vm11 = vcmp.lt.s32.totalorder %v7906_v9, 18  ;;  %vm9972_vm0 = vcmp.eq.s32.totalorder %v1853_v12, 1  ;;  %v9999_v12 = vpop.permute.xlu2 %2841  ;;  %v16573_v58 = vld [vmem:[#allocation134_spill] sm:$0xff]  ;;  %3229 = vrot.lane.b32.xlu1 %v7056_v34, %s6273_s0 }
 0x3d0   : > { %v1841_v16 = vsel %vm16561_vm11, %v16560_v50, %v16559_v14  ;;  %v1796_v59 = vsel %vm9863_vm4, %v1769_v39, 0.0  ;;  %vm9982_vm5 = vcmp.eq.s32.totalorder %v1851_v0, 1  ;;  %vm9986_vm1 = vcmp.eq.s32.totalorder %v1852_v13, 1  ;;  %v9997_v38 = vpop.permute.xlu1 %2874  ;;  %16569 = vst [vmem:[#allocation75_spill] sm:$0xff] %v9999_v12  ;;  %vm16570_vm4 = vmand %vm9627_vm2, %vm16319_vm13  ;;  %3150 = vrot.lane.b32.xlu0 %v6988_v18, %s6271_s21 }
 0x3d1   : > { %v1847_v52 = vperm.slane %v9857_v53, 0  ;;  %v1818_v54 = vadd.f32 %v1810_v32, %v9846_v21  ;;  %v1797_v7 = vsel %vm9874_vm3, %v1768_v35, 0.0  ;;  %v1854_v40 = vperm.slane %v9857_v53, 7  ;;  %16568 = vst [vmem:[#allocation40_spill] sm:$0xff] %v9997_v38  ;;  %v10016_v32 = vpop.permute.xlu0 %2795  ;;  %v16572_v35 = vld [vmem:[#allocation141_spill] sm:$0xff]  ;;  %vm16574_vm3 = vmmov %vm16561_vm11 }
 0x3d2   : > { %v10007_v0 = vsel %vm16570_vm4, 1, %v16293_v63  ;;  %v1813_v13 = vadd.f32 %v1805_v36, %v9859_v44  ;;  %v1792_v21 = vsel %vm9884_vm6, %v1773_v62, 0.0  ;;  %v1799_v53 = vsel %vm9907_vm14, %v1766_v5, 0.0  ;;  %16571 = vst [vmem:[#allocation74_spill] sm:$0xff] %v10016_v32  ;;  %v16575_v36 = vld [vmem:[#allocation140_spill] sm:$0xff]  ;;  %vm16577_vm6 = vmmov %vm16574_vm3 }
 0x3d3   : > { %v1866_v57 = vsel %vm9929_vm15, %v1841_v16, 0.0  ;;  %v1814_v46 = vadd.f32 %v1806_v45, %v9861_v60  ;;  %v1808_v39 = vmul.f32 %v16545_v25, %v1796_v59  ;;  %v1843_v44 = vsel %vm16574_vm3, %v16573_v58, %v16572_v35  ;;  %vm16578_vm14 = vmmov %vm16574_vm3  ;;  %v16581_v59 = vld [vmem:[#allocation133_spill] sm:$0xff]  ;;  %v16610_v60 = vld [vmem:[#allocation150_spill] sm:$0xff] }
 0x3d4   : > { %v1838_v24 = vsel %vm16577_vm6, %v16576_v4, %v16575_v36  ;;  %v1809_v5 = vmul.f32 %v16545_v25, %v1797_v7  ;;  %v1842_v28 = vsel %vm16578_vm14, %v16572_v35, %v16560_v50  ;;  %vm10033_vm15 = vcmp.eq.s32.totalorder %v1847_v52, 1 }
 0x3d5   : > { %v1921_v45 = vperm.slane %v10007_v0, 3  ;;  %v1804_v62 = vmul.f32 %v16545_v25, %v1792_v21  ;;  %v1811_v16 = vmul.f32 %v16545_v25, %v1799_v53  ;;  %v1878_v38 = vmul.f32 %v16581_v59, %v1866_v57 }
 0x3d6   : > { %vm10041_vm11 = vcmp.eq.s32.totalorder %v1854_v40, 1  ;;  %v1864_v7 = vsel %vm9934_vm10, %v1843_v44, 0.0  ;;  %v1869_v50 = vsel %vm9972_vm0, %v1838_v24, 0.0  ;;  %v1919_v52 = vperm.slane %v10007_v0, 1  ;;  %3125 = vperm.xlu2 %6104, %v9792_v22   ;;  %v16584_v40 = vld [vmem:[#allocation144_spill] sm:$0xff]  ;;  %vm16585_vm10 = vmmov %vm16574_vm3 }
 0x3d7   : > { %v1920_v35 = vperm.slane %v10007_v0, 2  ;;  %v1816_v8 = vadd.f32 %v1808_v39, %v1745_v47  ;;  %v1865_v25 = vsel %vm9938_vm12, %v1842_v28, 0.0  ;;  %vm15545_vm4 = vcmp.lt.s32.totalorder %v7906_v9, 17  ;;  %vm16586_vm12 = vmmov %vm16574_vm3  ;;  %3288 = vrot.lane.b32.xlu1 %v6861_v23, %s6275_s23 }
 0x3d8   : > { %v1924_v2 = vperm.slane %v10007_v0, 6  ;;  %v1817_v30 = vadd.f32 %v1809_v5, %v9918_v56  ;;  %v1839_v21 = vsel %vm16585_vm10, %v16584_v40, %v16576_v4  ;;  %v1840_v47 = vsel %vm16586_vm12, %v16559_v14, %v16584_v40  ;;  %v10077_v44 = vpop.permute.xlu1 %2933  ;;  %v10079_v4 = vpop.permute.xlu2 %2864  ;;  %3156 = vrot.lane.b32.xlu0 %v16259_v11, %s6271_s21 }
 0x3d9   : > { %vm10069_vm0 = vcmp.eq.s32.totalorder %v1921_v45, 1  ;;  %v16587_v48 = vmov 0  ;;  %v10073_v53 = vadd.f32 %v1804_v62, %v1741_v42  ;;  %v1886_v56 = vadd.f32 %v1878_v38, %v1815_v29  ;;  %16590 = vst [vmem:[#allocation78_spill] sm:$0xff] %v10077_v44  ;;  %v10084_v5 = vpop.permute.xlu0 %2801  ;;  %v16600_v38 = vld [vmem:[#allocation146_spill] sm:$0xff]  ;;  %v16601_v45 = vld [vmem:[#allocation136_spill] sm:$0xff] }
 0x3da   : > { %v16588_v48 = vsel %vm10069_vm0, 4294967295, %v16587_v48  ;;  %v1876_v57 = vmul.f32 %v16581_v59, %v1864_v7  ;;  %v1881_v39 = vmul.f32 %v16581_v59, %v1869_v50  ;;  %16591 = vst [vmem:[#allocation71_spill] sm:$0xff] %v10079_v4  ;;  %v10081_v24 = vadd.f32 %v1811_v16, %v1748_v19  ;;  %v16605_v7 = vld [vmem:[#allocation147_spill] sm:$0xff] }
 0x3db   : > { %16589 = vst [vmem:[#allocation64_spill] sm:$0xff] %v16588_v48  ;;  %v1877_v14 = vmul.f32 %v16581_v59, %v1865_v25  ;;  %vm10086_vm3 = vcmp.eq.s32.totalorder %v1919_v52, 1  ;;  %v16593_v28 = vmov 0  ;;  %vm16596_vm6 = vnez %v16350_v17 }
 0x3dc   : > { %16592 = vst [vmem:[#allocation77_spill] sm:$0xff] %v10084_v5  ;;  %v16594_v28 = vsel %vm10086_vm3, 4294967295, %v16593_v28  ;;  %vm1987_vm14 = vmand %vm9627_vm2, %vm16596_vm6  ;;  %vm10094_vm10 = vcmp.eq.s32.totalorder %v1920_v35, 1  ;;  %v16597_v42 = vmov 0  ;;  %v1867_v29 = vsel %vm9982_vm5, %v1840_v47, 0.0 }
 0x3dd   : > { %16595 = vst [vmem:[#allocation67_spill] sm:$0xff] %v16594_v28  ;;  %v16598_v42 = vsel %vm10094_vm10, 4294967295, %v16597_v42  ;;  %v1868_v19 = vsel %vm9986_vm1, %v1839_v21, 0.0  ;;  %v1912_v62 = vsel %vm15545_vm4, %v16601_v45, %v16600_v38  ;;  %vm10106_vm12 = vcmp.eq.s32.totalorder %v1924_v2, 1 }
 0x3de   : > { %16599 = vst [vmem:[#allocation70_spill] sm:$0xff] %v16598_v42  ;;  %v16602_v16 = vmov 0  ;;  %vm16606_vm6 = vcmp.lt.s32.totalorder %v7906_v9, 18  ;;  %v1922_v1 = vperm.slane %v10007_v0, 4  ;;  %v1923_v52 = vperm.slane %v10007_v0, 5  ;;  %3148 = vrot.lane.b32.xlu2 %v6923_v49, %s6271_s21  ;;  %v16633_v42 = vld [vmem:[#allocation155_spill] sm:$0xff] }
 0x3df   : > { %v16603_v16 = vsel %vm10106_vm12, 4294967295, %v16602_v16  ;;  %v1837_v50 = vsel %vm16606_vm6, %v16575_v36, %v16605_v7  ;;  %vm16607_vm5 = vmmov %vm16606_vm6  ;;  %v10120_v35 = vadd.f32 %v1876_v57, %v1813_v13  ;;  %v10122_v25 = vadd.f32 %v1881_v39, %v1818_v54  ;;  %v16608_v54 = vld [vmem:[#allocation149_spill] sm:$0xff]  ;;  %v16609_v57 = vld [vmem:[#allocation139_spill] sm:$0xff]  ;;  %3294 = vrot.lane.b32.xlu1 %v16285_v43, %s6275_s23 }
 0x3e0   : > { %16604 = vst [vmem:[#allocation81_spill] sm:$0xff] %v16603_v16  ;;  %v1844_v31 = vsel %vm16607_vm5, %v16605_v7, %v16573_v58  ;;  %v10125_v2 = vsel %vm1987_vm14, 1, %v16293_v63  ;;  %v10127_v40 = vadd.f32 %v1877_v14, %v1814_v46  ;;  %v1879_v36 = vmul.f32 %v16581_v59, %v1867_v29  ;;  %v16611_v14 = vld [vmem:[#allocation143_spill] sm:$0xff]  ;;  %3215 = vrot.lane.b32.xlu0 %v16294_v51, %s6273_s0 }
 0x3e1   : > { %v1880_v21 = vmul.f32 %v16581_v59, %v1868_v19  ;;  %v1937_v58 = vsel %vm10069_vm0, %v1912_v62, 0.0  ;;  %v1863_v47 = vsel %vm10033_vm15, %v1844_v31, 0.0  ;;  %v1870_v13 = vsel %vm10041_vm11, %v1837_v50, 0.0  ;;  %v10159_v50 = vpop.permute.xlu1 %2939  ;;  %v10161_v31 = vpop.permute.xlu2 %2870 }
 0x3e2   : > { %v1909_v39 = vsel %vm15545_vm4, %v16609_v57, %v16608_v54  ;;  %v1918_v46 = vperm.slane %v10007_v0, 0  ;;  %v1913_v12 = vsel %vm15545_vm4, %v16610_v60, %v16601_v45  ;;  %v1914_v29 = vsel %vm15545_vm4, %v16611_v14, %v16610_v60  ;;  %16612 = vst [vmem:[#allocation84_spill] sm:$0xff] %v10159_v50  ;;  %v16614_v45 = vld [vmem:[#allocation142_spill] sm:$0xff]  ;;  %v10176_v5 = vpop.permute.xlu0 %2860 }
 0x3e3   : > { %v6276_v19 = vmov 34   ;;  %v1992_v62 = vperm.slane %v10125_v2, 3  ;;  %v1925_v7 = vperm.slane %v10007_v0, 7  ;;  %16613 = vst [vmem:[#allocation83_spill] sm:$0xff] %v10161_v31  ;;  %v1949_v48 = vmul.f32 %v16614_v45, %v1937_v58  ;;  %v16652_v31 = vld [vmem:[#allocation158_spill] sm:$0xff] }
 0x3e4   : > { %6105 = vset.pattern.permute.xlu2 %v6276_v19  ;;  %vm10164_vm15 = vcmp.eq.s32.totalorder %v1922_v1, 1  ;;  %v16615_v44 = vmov 0  ;;  %vm10168_vm11 = vcmp.eq.s32.totalorder %v1923_v52, 1  ;;  %v16618_v60 = vmov 0  ;;  %16621 = vst [vmem:[#allocation76_spill] sm:$0xff] %v10176_v5 }
 0x3e5   : > { %v16616_v44 = vsel %vm10164_vm15, 4294967295, %v16615_v44  ;;  %v16619_v60 = vsel %vm10168_vm11, 4294967295, %v16618_v60  ;;  %v10172_v19 = vadd.f32 %v1879_v36, %v1816_v8  ;;  %v1875_v0 = vmul.f32 %v16581_v59, %v1863_v47 }
 0x3e6   : > { %16617 = vst [vmem:[#allocation73_spill] sm:$0xff] %v16616_v44  ;;  %v1882_v4 = vmul.f32 %v16581_v59, %v1870_v13  ;;  %v1940_v50 = vsel %vm10106_vm12, %v1909_v39, 0.0  ;;  %v1935_v1 = vsel %vm10086_vm3, %v1914_v29, 0.0  ;;  %v1990_v58 = vperm.slane %v10125_v2, 1  ;;  %v16631_v39 = vld [vmem:[#allocation153_spill] sm:$0xff]  ;;  %3154 = vrot.lane.b32.xlu2 %v16286_v55, %s6271_s21  ;;  %s6277_s21 = smov 97  }
 0x3e7   : > { %16620 = vst [vmem:[#allocation86_spill] sm:$0xff] %v16619_v60  ;;  %v1936_v52 = vsel %vm10094_vm10, %v1913_v12, 0.0  ;;  %v1991_v8 = vperm.slane %v10125_v2, 2  ;;  %v1888_v36 = vadd.f32 %v1880_v21, %v1817_v30  ;;  %vm10186_vm6 = vcmp.eq.s32.totalorder %v1918_v46, 1  ;;  %3300 = vrot.lane.b32.xlu1 %v7056_v34, %s6275_s23 }
 0x3e8   : > { %v16622_v47 = vmov 0  ;;  %vm10190_vm14 = vcmp.eq.s32.totalorder %v1992_v62, 1  ;;  %v16625_v59 = vmov 0  ;;  %vm10194_vm5 = vcmp.eq.s32.totalorder %v1925_v7, 1  ;;  %3221 = vrot.lane.b32.xlu0 %v6988_v18, %s6273_s0 }
 0x3e9   : > { %v16623_v47 = vsel %vm10186_vm6, 4294967295, %v16622_v47  ;;  %v16626_v59 = vsel %vm10190_vm14, 4294967295, %v16625_v59  ;;  %v16628_v13 = vmov 0  ;;  %v1910_v12 = vsel %vm15545_vm4, %v16631_v39, %v16609_v57 }
 0x3ea   : > { %16624 = vst [vmem:[#allocation87_spill] sm:$0xff] %v16623_v47  ;;  %v16629_v13 = vsel %vm10194_vm5, 4294967295, %v16628_v13  ;;  %vm16632_vm1 = vnez %v16384_v61  ;;  %v1957_v30 = vadd.f32 %v1949_v48, %v1886_v56  ;;  %v1952_v21 = vmul.f32 %v16614_v45, %v1940_v50  ;;  %v16634_v48 = vld [vmem:[#allocation145_spill] sm:$0xff]  ;;  %v10267_v60 = vpop.permute.xlu0 %2866 }
 0x3eb   : > { %16627 = vst [vmem:[#allocation80_spill] sm:$0xff] %v16626_v59  ;;  %v1995_v46 = vperm.slane %v10125_v2, 6  ;;  %v1883_v29 = vadd.f32 %v1875_v0, %v10073_v53  ;;  %v1911_v62 = vsel %vm15545_vm4, %v16600_v38, %v16631_v39  ;;  %v1947_v7 = vmul.f32 %v16614_v45, %v1935_v1  ;;  %v16662_v59 = vld [vmem:[#allocation151_spill] sm:$0xff] }
 0x3ec   : > { %16630 = vst [vmem:[#allocation79_spill] sm:$0xff] %v16629_v13  ;;  %v1948_v57 = vmul.f32 %v16614_v45, %v1936_v52  ;;  %v10216_v16 = vadd.f32 %v1882_v4, %v10081_v24  ;;  %vm16635_vm12 = vcmp.lt.s32.totalorder %v7906_v9, 16  ;;  %vm10226_vm0 = vcmp.eq.s32.totalorder %v1990_v58, 1  ;;  %v16642_v4 = vld [vmem:[#allocation156_spill] sm:$0xff]  ;;  %v10251_v58 = vpop.permute.xlu1 %2945  ;;  %v10253_v52 = vpop.permute.xlu2 %2912 }
 0x3ed   : > { %v1983_v56 = vsel %vm16635_vm12, %v16634_v48, %v16633_v42  ;;  %v16636_v53 = vmov 0  ;;  %vm10230_vm4 = vcmp.eq.s32.totalorder %v1991_v8, 1  ;;  %v16639_v38 = vmov 0  ;;  %vm16644_vm12 = vmand %vm9627_vm2, %vm16632_vm1  ;;  %16645 = vst [vmem:[#allocation92_spill] sm:$0xff] %v10251_v58 }
 0x3ee   : > { %v16637_v53 = vsel %vm10226_vm0, 4294967295, %v16636_v53  ;;  %v16640_v38 = vsel %vm10230_vm4, 4294967295, %v16639_v38  ;;  %vm16643_vm10 = vcmp.lt.s32.totalorder %v7906_v9, 17  ;;  %v10246_v50 = vsel %vm16644_vm12, 1, %v16293_v63  ;;  %16646 = vst [vmem:[#allocation82_spill] sm:$0xff] %v10253_v52  ;;  %3196 = vperm.xlu2 %6105, %v9792_v22  }
 0x3ef   : > { %16638 = vst [vmem:[#allocation90_spill] sm:$0xff] %v16637_v53  ;;  %v1915_v24 = vsel %vm16643_vm10, %v16642_v4, %v16611_v14  ;;  %v1939_v0 = vsel %vm10168_vm11, %v1910_v12, 0.0  ;;  %v1993_v1 = vperm.slane %v10125_v2, 4  ;;  %v1938_v14 = vsel %vm10164_vm15, %v1911_v62, 0.0  ;;  %3359 = vrot.lane.b32.xlu1 %v6861_v23, %s6277_s21 }
 0x3f0   : > { %16641 = vst [vmem:[#allocation93_spill] sm:$0xff] %v16640_v38  ;;  %v1994_v8 = vperm.slane %v10125_v2, 5  ;;  %v1960_v39 = vadd.f32 %v1952_v21, %v10122_v25  ;;  %vm10259_vm10 = vcmp.eq.s32.totalorder %v1995_v46, 1  ;;  %v16647_v28 = vmov 0  ;;  %v16693_v38 = vld [vmem:[#allocation154_spill] sm:$0xff]  ;;  %3227 = vrot.lane.b32.xlu0 %v16259_v11, %s6273_s0 }
 0x3f1   : > { %v16648_v28 = vsel %vm10259_vm10, 4294967295, %v16647_v28  ;;  %vm16650_vm12 = vcmp.lt.s32.totalorder %v7906_v9, 17  ;;  %16651 = vst [vmem:[#allocation85_spill] sm:$0xff] %v10267_v60  ;;  %v1955_v58 = vadd.f32 %v1947_v7, %v10120_v35  ;;  %v1956_v44 = vadd.f32 %v1948_v57, %v10127_v40  ;;  %v16658_v57 = vld [vmem:[#allocation159_spill] sm:$0xff] }
 0x3f2   : > { %16649 = vst [vmem:[#allocation95_spill] sm:$0xff] %v16648_v28  ;;  %v1908_v12 = vsel %vm16650_vm12, %v16608_v54, %v16642_v4  ;;  %v2008_v62 = vsel %vm10190_vm14, %v1983_v56, 0.0  ;;  %v1934_v25 = vsel %vm10186_vm6, %v1915_v24, 0.0  ;;  %v1989_v21 = vperm.slane %v10125_v2, 0  ;;  %v16653_v54 = vld [vmem:[#allocation148_spill] sm:$0xff] }
 0x3f3   : > { %v2063_v46 = vperm.slane %v10246_v50, 3  ;;  %v1951_v52 = vmul.f32 %v16614_v45, %v1939_v0  ;;  %vm16654_vm12 = vcmp.lt.s32.totalorder %v7906_v9, 16  ;;  %v1950_v35 = vmul.f32 %v16614_v45, %v1938_v14  ;;  %v16660_v24 = vld [vmem:[#allocation152_spill] sm:$0xff] }
 0x3f4   : > { %v1980_v4 = vsel %vm16654_vm12, %v16653_v54, %v16652_v31  ;;  %vm10283_vm11 = vcmp.eq.s32.totalorder %v1993_v1, 1  ;;  %v16655_v40 = vmov 0  ;;  %v1996_v7 = vperm.slane %v10125_v2, 7  ;;  %vm16659_vm15 = vmmov %vm16654_vm12 }
 0x3f5   : > { %v16656_v40 = vsel %vm10283_vm11, 4294967295, %v16655_v40  ;;  %v1984_v56 = vsel %vm16659_vm15, %v16658_v57, %v16634_v48  ;;  %vm16661_vm14 = vmmov %vm16654_vm12  ;;  %v2020_v47 = vmul.f32 %v16662_v59, %v2008_v62  ;;  %v1941_v1 = vsel %vm10194_vm5, %v1908_v12, 0.0 }
 0x3f6   : > { %16657 = vst [vmem:[#allocation96_spill] sm:$0xff] %v16656_v40  ;;  %v1985_v0 = vsel %vm16661_vm14, %v16660_v24, %v16658_v57  ;;  %v1946_v14 = vmul.f32 %v16614_v45, %v1934_v25  ;;  %v2061_v2 = vperm.slane %v10246_v50, 1  ;;  %vm10302_vm3 = vcmp.eq.s32.totalorder %v1994_v8, 1  ;;  %3219 = vrot.lane.b32.xlu2 %v6923_v49, %s6273_s0 }
 0x3f7   : > { %v16663_v5 = vmov 0  ;;  %vm10309_vm15 = vcmp.eq.s32.totalorder %v1989_v21, 1  ;;  %v16666_v48 = vmov 0  ;;  %vm10313_vm14 = vcmp.eq.s32.totalorder %v2063_v46, 1  ;;  %v10333_v46 = vpop.permute.xlu1 %3004  ;;  %3365 = vrot.lane.b32.xlu1 %v16285_v43, %s6277_s21 }
 0x3f8   : > { %v16664_v5 = vsel %vm10302_vm3, 4294967295, %v16663_v5  ;;  %v16667_v48 = vsel %vm10309_vm15, 4294967295, %v16666_v48  ;;  %v16669_v12 = vmov 0  ;;  %v10317_v62 = vadd.f32 %v1951_v52, %v1888_v36  ;;  %16672 = vst [vmem:[#allocation102_spill] sm:$0xff] %v10333_v46  ;;  %3286 = vrot.lane.b32.xlu0 %v16294_v51, %s6275_s23 }
 0x3f9   : > { %16665 = vst [vmem:[#allocation89_spill] sm:$0xff] %v16664_v5  ;;  %v16670_v12 = vsel %vm10313_vm14, 4294967295, %v16669_v12  ;;  %v2011_v8 = vsel %vm10259_vm10, %v1980_v4, 0.0  ;;  %v2006_v25 = vsel %vm10226_vm0, %v1985_v0, 0.0  ;;  %v2007_v21 = vsel %vm10230_vm4, %v1984_v56, 0.0  ;;  %v10335_v4 = vpop.permute.xlu2 %2935  ;;  %v16677_v0 = vld [vmem:[#allocation162_spill] sm:$0xff] }
 0x3fa   : > { %16668 = vst [vmem:[#allocation88_spill] sm:$0xff] %v16667_v48  ;;  %v2062_v36 = vperm.slane %v10246_v50, 2  ;;  %v1953_v52 = vmul.f32 %v16614_v45, %v1941_v1  ;;  %v10337_v57 = vadd.f32 %v2020_v47, %v1957_v30  ;;  %v1958_v13 = vadd.f32 %v1950_v35, %v10172_v19  ;;  %v10349_v45 = vpop.permute.xlu0 %2872 }
 0x3fb   : > { %16671 = vst [vmem:[#allocation99_spill] sm:$0xff] %v16670_v12  ;;  %v2066_v28 = vperm.slane %v10246_v50, 6  ;;  %vm10341_vm12 = vcmp.eq.s32.totalorder %v1996_v7, 1  ;;  %v16674_v53 = vmov 0  ;;  %vm16678_vm5 = vcmp.lt.s32.totalorder %v7906_v9, 16 }
 0x3fc   : > { %16673 = vst [vmem:[#allocation101_spill] sm:$0xff] %v10335_v4  ;;  %v16675_v53 = vsel %vm10341_vm12, 4294967295, %v16674_v53  ;;  %v1982_v56 = vsel %vm16678_vm5, %v16633_v42, %v16677_v0  ;;  %v10351_v1 = vadd.f32 %v1946_v14, %v1883_v29  ;;  %vm10353_vm10 = vcmp.eq.s32.totalorder %v2061_v2, 1  ;;  %vm16683_vm4 = vmmov %vm16678_vm5 }
 0x3fd   : > { %16676 = vst [vmem:[#allocation91_spill] sm:$0xff] %v16675_v53  ;;  %v16680_v47 = vmov 0  ;;  %v2023_v19 = vmul.f32 %v16662_v59, %v2011_v8  ;;  %v1981_v30 = vsel %vm16683_vm4, %v16677_v0, %v16653_v54  ;;  %vm16684_vm5 = vmand %vm9627_vm2, %vm16418_vm8  ;;  %v2018_v29 = vmul.f32 %v16662_v59, %v2006_v25  ;;  %v16688_v8 = vld [vmem:[#allocation165_spill] sm:$0xff] }
 0x3fe   : > { %16679 = vst [vmem:[#allocation104_spill] sm:$0xff] %v10349_v45  ;;  %v16681_v47 = vsel %vm10353_vm10, 4294967295, %v16680_v47  ;;  %v10368_v42 = vsel %vm16684_vm5, 1, %v16293_v63  ;;  %v2019_v35 = vmul.f32 %v16662_v59, %v2007_v21  ;;  %vm10372_vm0 = vcmp.eq.s32.totalorder %v2062_v36, 1  ;;  %v16692_v36 = vld [vmem:[#allocation164_spill] sm:$0xff]  ;;  %3225 = vrot.lane.b32.xlu2 %v16286_v55, %s6273_s0  ;;  %s6281_s0 = smov 95  }
 0x3ff   : > { %16682 = vst [vmem:[#allocation94_spill] sm:$0xff] %v16681_v47  ;;  %v16685_v7 = vmov 0  ;;  %v2064_v14 = vperm.slane %v10246_v50, 4  ;;  %v2065_v54 = vperm.slane %v10246_v50, 5  ;;  %v10379_v2 = vadd.f32 %v1953_v52, %v10216_v16  ;;  %v16716_v45 = vld [vmem:[#allocation160_spill] sm:$0xff]  ;;  %v16745_v47 = vld [vmem:[#allocation166_spill] sm:$0xff]  ;;  %3371 = vrot.lane.b32.xlu1 %v7056_v34, %s6277_s21 }
 0x400   : > { %v16686_v7 = vsel %vm10372_vm0, 4294967295, %v16685_v7  ;;  %v1986_v0 = vsel %vm16683_vm4, %v16688_v8, %v16660_v24  ;;  %v2009_v25 = vsel %vm10283_vm11, %v1982_v56, 0.0  ;;  %vm10387_vm5 = vcmp.eq.s32.totalorder %v2066_v28, 1  ;;  %3292 = vrot.lane.b32.xlu0 %v6988_v18, %s6275_s23 }
 0x401   : > { %16687 = vst [vmem:[#allocation105_spill] sm:$0xff] %v16686_v7  ;;  %v16689_v21 = vmov 0  ;;  %vm16694_vm6 = vcmp.lt.s32.totalorder %v7906_v9, 15  ;;  %v2134_v16 = vperm.slane %v10368_v42, 3  ;;  %v2010_v52 = vsel %vm10302_vm3, %v1981_v30, 0.0 }
 0x402   : > { %v16690_v21 = vsel %vm10387_vm5, 4294967295, %v16689_v21  ;;  %v2054_v46 = vsel %vm16694_vm6, %v16693_v38, %v16692_v36  ;;  %v10398_v4 = vadd.f32 %v2023_v19, %v1960_v39  ;;  %v1979_v28 = vsel %vm16683_vm4, %v16652_v31, %v16688_v8  ;;  %v10444_v48 = vpop.permute.xlu0 %2931 }
 0x403   : > { %16691 = vst [vmem:[#allocation98_spill] sm:$0xff] %v16690_v21  ;;  %v2060_v24 = vperm.slane %v10246_v50, 0  ;;  %v10409_v56 = vadd.f32 %v2018_v29, %v1955_v58  ;;  %v10411_v5 = vadd.f32 %v2019_v35, %v1956_v44  ;;  %v6278_v39 = vmov 35   ;;  %v16701_v44 = vld [vmem:[#allocation168_spill] sm:$0xff]  ;;  %v16702_v58 = vld [vmem:[#allocation161_spill] sm:$0xff]  ;;  %v10430_v35 = vpop.permute.xlu1 %3010 }
 0x404   : > { %6106 = vset.pattern.permute.xlu2 %v6278_v39  ;;  %v2005_v31 = vsel %vm10309_vm15, %v1986_v0, 0.0  ;;  %vm10417_vm6 = vcmp.eq.s32.totalorder %v2064_v14, 1  ;;  %v16695_v19 = vmov 0  ;;  %v2021_v30 = vmul.f32 %v16662_v59, %v2009_v25  ;;  %16704 = vst [vmem:[#allocation111_spill] sm:$0xff] %v10430_v35  ;;  %v10432_v39 = vpop.permute.xlu2 %2941 }
 0x405   : > { %v16696_v19 = vsel %vm10417_vm6, 4294967295, %v16695_v19  ;;  %vm10422_vm4 = vcmp.eq.s32.totalorder %v2065_v54, 1  ;;  %v16698_v8 = vmov 0  ;;  %vm16703_vm3 = vcmp.lt.s32.totalorder %v7906_v9, 15  ;;  %16705 = vst [vmem:[#allocation110_spill] sm:$0xff] %v10432_v39  ;;  %v16713_v39 = vld [vmem:[#allocation167_spill] sm:$0xff] }
 0x406   : > { %16697 = vst [vmem:[#allocation97_spill] sm:$0xff] %v16696_v19  ;;  %v16699_v8 = vsel %vm10422_vm4, 4294967295, %v16698_v8  ;;  %v2056_v29 = vsel %vm16703_vm3, %v16702_v58, %v16701_v44  ;;  %v2079_v14 = vsel %vm10313_vm14, %v2054_v46, 0.0  ;;  %v2022_v0 = vmul.f32 %v16662_v59, %v2010_v52  ;;  %v16744_v19 = vld [vmem:[#allocation176_spill] sm:$0xff]  ;;  %3267 = vperm.xlu2 %6106, %v9792_v22  }
 0x407   : > { %16700 = vst [vmem:[#allocation108_spill] sm:$0xff] %v16699_v8  ;;  %v2067_v25 = vperm.slane %v10246_v50, 7  ;;  %vm10439_vm15 = vcmp.eq.s32.totalorder %v2134_v16, 1  ;;  %v2132_v40 = vperm.slane %v10368_v42, 1  ;;  %v2012_v35 = vsel %vm10341_vm12, %v1979_v28, 0.0  ;;  %3430 = vrot.lane.b32.xlu1 %v6861_v23, %s6279_s30 }
 0x408   : > { %16708 = vst [vmem:[#allocation100_spill] sm:$0xff] %v10444_v48  ;;  %v2133_v12 = vperm.slane %v10368_v42, 2  ;;  %v2137_v46 = vperm.slane %v10368_v42, 6  ;;  %vm10450_vm3 = vcmp.eq.s32.totalorder %v2060_v24, 1  ;;  %v16709_v52 = vmov 0  ;;  %v16714_v48 = vld [vmem:[#allocation157_spill] sm:$0xff]  ;;  %3298 = vrot.lane.b32.xlu0 %v16259_v11, %s6275_s23 }
 0x409   : > { %v16710_v52 = vsel %vm10450_vm3, 4294967295, %v16709_v52  ;;  %v2017_v50 = vmul.f32 %v16662_v59, %v2005_v31  ;;  %vm16712_vm11 = vcmp.lt.s32.totalorder %v7906_v9, 15  ;;  %v2077_v53 = vsel %vm10353_vm10, %v2056_v29, 0.0  ;;  %vm2200_vm10 = vmand %vm9627_vm2, %vm16445_vm7 }
 0x40a   : > { %16711 = vst [vmem:[#allocation113_spill] sm:$0xff] %v16710_v52  ;;  %v2055_v16 = vsel %vm16712_vm11, %v16701_v44, %v16693_v38  ;;  %vm16715_vm14 = vmmov %vm16712_vm11  ;;  %v2091_v24 = vmul.f32 %v16716_v45, %v2079_v14  ;;  %v10466_v60 = vadd.f32 %v2021_v30, %v1958_v13  ;;  %v10469_v17 = vadd.f32 %v2022_v0, %v10317_v62  ;;  %v16720_v44 = vld [vmem:[#allocation171_spill] sm:$0xff]  ;;  %v16728_v14 = vld [vmem:[#allocation173_spill] sm:$0xff] }
 0x40b   : > { %v2051_v28 = vsel %vm16715_vm14, %v16714_v48, %v16713_v39  ;;  %vm10471_vm12 = vcmp.eq.s32.totalorder %v2067_v25, 1  ;;  %v16717_v31 = vmov 0  ;;  %v2024_v38 = vmul.f32 %v16662_v59, %v2012_v35  ;;  %vm16723_vm8 = vmmov %vm16712_vm11  ;;  %v16729_v0 = vld [vmem:[#allocation163_spill] sm:$0xff] }
 0x40c   : > { %v16718_v31 = vsel %vm10471_vm12, 4294967295, %v16717_v31  ;;  %v2053_v32 = vsel %vm16712_vm11, %v16692_v36, %v16720_v44  ;;  %vm10480_vm14 = vcmp.eq.s32.totalorder %v2132_v40, 1  ;;  %v2135_v13 = vperm.slane %v10368_v42, 4 }
 0x40d   : > { %16719 = vst [vmem:[#allocation103_spill] sm:$0xff] %v16718_v31  ;;  %v2136_v62 = vperm.slane %v10368_v42, 5  ;;  %v2052_v59 = vsel %vm16723_vm8, %v16720_v44, %v16714_v48  ;;  %v2089_v40 = vmul.f32 %v16716_v45, %v2077_v53  ;;  %v2078_v36 = vsel %vm10372_vm0, %v2055_v16, 0.0  ;;  %v10522_v16 = vpop.permute.xlu1 %3016 }
 0x40e   : > { %v2082_v37 = vsel %vm10387_vm5, %v2051_v28, 0.0  ;;  %vm10503_vm2 = vcmp.eq.s32.totalorder %v2133_v12, 1  ;;  %vm10507_vm11 = vcmp.eq.s32.totalorder %v2137_v46, 1  ;;  %v2025_v35 = vadd.f32 %v2017_v50, %v10351_v1  ;;  %16731 = vst [vmem:[#allocation106_spill] sm:$0xff] %v10522_v16  ;;  %v10524_v46 = vpop.permute.xlu2 %2983  ;;  %v16733_v1 = vld [vmem:[#allocation174_spill] sm:$0xff]  ;;  %v10533_v50 = vpop.permute.xlu0 %2937  ;;  %3290 = vrot.lane.b32.xlu2 %v6923_v49, %s6275_s23 }
 0x40f   : > { %v2099_v53 = vadd.f32 %v2091_v24, %v10337_v57  ;;  %vm16730_vm8 = vcmp.lt.s32.totalorder %v7906_v9, 14  ;;  %v10520_v12 = vsel %vm2200_vm10, 1, %v16293_v63  ;;  %16732 = vst [vmem:[#allocation114_spill] sm:$0xff] %v10524_v46  ;;  %v2080_v28 = vsel %vm10417_vm6, %v2053_v32, 0.0  ;;  %v16747_v46 = vld [vmem:[#allocation169_spill] sm:$0xff]  ;;  %3436 = vrot.lane.b32.xlu1 %v16285_v43, %s6279_s30 }
 0x410   : > { %v2125_v25 = vsel %vm16730_vm8, %v16729_v0, %v16728_v14  ;;  %v2032_v44 = vadd.f32 %v2024_v38, %v10379_v2  ;;  %vm16734_vm5 = vcmp.lt.s32.totalorder %v7906_v9, 15  ;;  %16735 = vst [vmem:[#allocation107_spill] sm:$0xff] %v10533_v50  ;;  %v2090_v24 = vmul.f32 %v16716_v45, %v2078_v36  ;;  %3357 = vrot.lane.b32.xlu0 %v16294_v51, %s6277_s21 }
 0x411   : > { %v2057_v57 = vsel %vm16734_vm5, %v16733_v1, %v16702_v58  ;;  %v2081_v21 = vsel %vm10422_vm4, %v2052_v59, 0.0  ;;  %v2094_v7 = vmul.f32 %v16716_v45, %v2082_v37  ;;  %vm16736_vm10 = vmmov %vm16734_vm5  ;;  %vm10543_vm8 = vcmp.eq.s32.totalorder %v2135_v13, 1  ;;  %v16741_v13 = vld [vmem:[#allocation177_spill] sm:$0xff] }
 0x412   : > { %v2050_v32 = vsel %vm16736_vm10, %v16713_v39, %v16733_v1  ;;  %vm10547_vm6 = vcmp.eq.s32.totalorder %v2136_v62, 1  ;;  %v2131_v38 = vperm.slane %v10368_v42, 0  ;;  %v2097_v36 = vadd.f32 %v2089_v40, %v10409_v56  ;;  %v16742_v1 = vld [vmem:[#allocation170_spill] sm:$0xff] }
 0x413   : > { %v2150_v59 = vsel %vm10439_vm15, %v2125_v25, 0.0  ;;  %v2138_v37 = vperm.slane %v10368_v42, 7  ;;  %v2205_v8 = vperm.slane %v10520_v12, 3  ;;  %v2092_v39 = vmul.f32 %v16716_v45, %v2080_v28 }
 0x414   : > { %vm16743_vm5 = vcmp.lt.s32.totalorder %v7906_v9, 14  ;;  %v2076_v56 = vsel %vm10450_vm3, %v2057_v57, 0.0  ;;  %v2093_v54 = vmul.f32 %v16716_v45, %v2081_v21  ;;  %v2203_v42 = vperm.slane %v10520_v12, 1 }
 0x415   : > { %v2127_v62 = vsel %vm16743_vm5, %v16742_v1, %v16741_v13  ;;  %vm16746_vm10 = vmmov %vm16743_vm5  ;;  %v10571_v40 = vadd.f32 %v2090_v24, %v10411_v5  ;;  %v2083_v25 = vsel %vm10471_vm12, %v2050_v32, 0.0  ;;  %v2102_v28 = vadd.f32 %v2094_v7, %v10398_v4  ;;  %v10606_v48 = vpop.permute.xlu1 %3075 }
 0x416   : > { %v2122_v16 = vsel %vm16746_vm10, %v16745_v47, %v16744_v19  ;;  %v2162_v50 = vmul.f32 %v16747_v46, %v2150_v59  ;;  %vm16748_vm15 = vmmov %vm16743_vm5  ;;  %v2204_v21 = vperm.slane %v10520_v12, 2  ;;  %v2148_v5 = vsel %vm10480_vm14, %v2127_v62, 0.0  ;;  %16755 = vst [vmem:[#allocation117_spill] sm:$0xff] %v10606_v48  ;;  %3296 = vrot.lane.b32.xlu2 %v16286_v55, %s6275_s23  ;;  %s6283_s23 = smov 94  }
 0x417   : > { %v2126_v52 = vsel %vm16748_vm15, %v16741_v13, %v16729_v0  ;;  %v2153_v4 = vsel %vm10507_vm11, %v2122_v16, 0.0  ;;  %vm10590_vm10 = vcmp.eq.s32.totalorder %v2131_v38, 1  ;;  %vm10594_vm15 = vcmp.eq.s32.totalorder %v2138_v37, 1  ;;  %v10608_v16 = vpop.permute.xlu2 %3006  ;;  %3442 = vrot.lane.b32.xlu1 %v7056_v34, %s6279_s30 }
 0x418   : > { %v2208_v57 = vperm.slane %v10520_v12, 6  ;;  %v2088_v24 = vmul.f32 %v16716_v45, %v2076_v56  ;;  %vm10602_vm5 = vcmp.eq.s32.totalorder %v2205_v8, 1  ;;  %16756 = vst [vmem:[#allocation119_spill] sm:$0xff] %v10608_v16  ;;  %v2100_v32 = vadd.f32 %v2092_v39, %v10466_v60  ;;  %v16759_v56 = vld [vmem:[#allocation189_spill] sm:$0xff]  ;;  %v10625_v60 = vpop.permute.xlu0 %2943  ;;  %3363 = vrot.lane.b32.xlu0 %v6988_v18, %s6277_s21 }
 0x419   : > { %v2101_v38 = vadd.f32 %v2093_v54, %v10469_v17  ;;  %v2095_v59 = vmul.f32 %v16716_v45, %v2083_v25  ;;  %v2149_v37 = vsel %vm10503_vm2, %v2126_v52, 0.0  ;;  %vm10615_vm14 = vcmp.eq.s32.totalorder %v2203_v42, 1  ;;  %16761 = vst [vmem:[#allocation109_spill] sm:$0xff] %v10625_v60  ;;  %v16762_v52 = vld [vmem:[#allocation180_spill] sm:$0xff] }
 0x41a   : > { %v2206_v8 = vperm.slane %v10520_v12, 4  ;;  %v2207_v62 = vperm.slane %v10520_v12, 5  ;;  %vm16760_vm11 = vnez %v16759_v56  ;;  %v2160_v17 = vmul.f32 %v16747_v46, %v2148_v5 }
 0x41b   : > { %vm2271_vm12 = vmand %vm16760_vm11, %vm16487_vm9  ;;  %v2165_v45 = vmul.f32 %v16747_v46, %v2153_v4  ;;  %vm16763_vm2 = vcmp.lt.s32.totalorder %v7906_v9, 14  ;;  %vm10637_vm0 = vcmp.eq.s32.totalorder %v2204_v21, 1  ;;  %vm10641_vm3 = vcmp.eq.s32.totalorder %v2208_v57, 1  ;;  %v16769_v57 = vld [vmem:[#allocation182_spill] sm:$0xff] }
 0x41c   : > { %v2123_v30 = vsel %vm16763_vm2, %v16762_v52, %v16745_v47  ;;  %vm16764_vm4 = vmmov %vm16763_vm2  ;;  %v10645_v25 = vadd.f32 %v2088_v24, %v2025_v35  ;;  %v10647_v5 = vadd.f32 %v2162_v50, %v2099_v53  ;;  %v2161_v4 = vmul.f32 %v16747_v46, %v2149_v37  ;;  %v16879_v50 = vld [vmem:[#allocation216_spill] sm:$0xff] }
 0x41d   : > { %v2124_v39 = vsel %vm16764_vm4, %v16728_v14, %v16762_v52  ;;  %v10651_v47 = vsel %vm2271_vm12, 1, %v16293_v63  ;;  %v10653_v31 = vadd.f32 %v2095_v59, %v2032_v44  ;;  %v2152_v21 = vsel %vm10547_vm6, %v2123_v30, 0.0  ;;  %v16770_v52 = vld [vmem:[#allocation172_spill] sm:$0xff]  ;;  %v16776_v59 = vld [vmem:[#allocation183_spill] sm:$0xff]  ;;  %v10704_v48 = vpop.permute.xlu1 %3081 }
 0x41e   : > { %v2151_v14 = vsel %vm10543_vm8, %v2124_v39, 0.0  ;;  %vm16771_vm4 = vcmp.lt.s32.totalorder %v7906_v9, 13  ;;  %v2202_v53 = vperm.slane %v10520_v12, 0  ;;  %vm10664_vm2 = vcmp.eq.s32.totalorder %v2206_v8, 1  ;;  %v16779_v8 = vld [vmem:[#allocation186_spill] sm:$0xff]  ;;  %v16782_v39 = vld [vmem:[#allocation179_spill] sm:$0xff] }
 0x41f   : > { %v2196_v35 = vsel %vm16771_vm4, %v16770_v52, %v16769_v57  ;;  %vm10668_vm12 = vcmp.eq.s32.totalorder %v2207_v62, 1  ;;  %v2209_v2 = vperm.slane %v10520_v12, 7  ;;  %v10677_v58 = vadd.f32 %v2160_v17, %v2097_v36  ;;  %v16780_v62 = vld [vmem:[#allocation175_spill] sm:$0xff]  ;;  %16784 = vst [vmem:[#allocation120_spill] sm:$0xff] %v10704_v48  ;;  %v10706_v16 = vpop.permute.xlu2 %3012  ;;  %3501 = vrot.lane.b32.xlu1 %v6861_v23, %s6281_s0 }
 0x420   : > { %v10679_v24 = vadd.f32 %v2165_v45, %v2102_v28  ;;  %vm16777_vm6 = vcmp.lt.s32.totalorder %v7906_v9, 14  ;;  %v2193_v30 = vsel %vm16771_vm4, %v16780_v62, %v16779_v8  ;;  %v2276_v36 = vperm.slane %v10651_v47, 3  ;;  %16785 = vst [vmem:[#allocation122_spill] sm:$0xff] %v10706_v16  ;;  %3369 = vrot.lane.b32.xlu0 %v16259_v11, %s6277_s21 }
 0x421   : > { %v2121_v37 = vsel %vm16777_vm6, %v16744_v19, %v16776_v59  ;;  %vm16778_vm8 = vmmov %vm16777_vm6  ;;  %v6280_v28 = vmov 36   ;;  %v2163_v17 = vmul.f32 %v16747_v46, %v2151_v14  ;;  %v2164_v19 = vmul.f32 %v16747_v46, %v2152_v21  ;;  %v10717_v21 = vpop.permute.xlu0 %3002 }
 0x422   : > { %v2128_v12 = vsel %vm16778_vm8, %v16776_v59, %v16742_v1  ;;  %6107 = vset.pattern.permute.xlu2 %v6280_v28  ;;  %v2221_v45 = vsel %vm10602_vm5, %v2196_v35, 0.0  ;;  %v16781_v1 = vld [vmem:[#allocation187_spill] sm:$0xff]  ;;  %vm16783_vm6 = vmmov %vm16771_vm4  ;;  %v2274_v29 = vperm.slane %v10651_v47, 1  ;;  %16789 = vst [vmem:[#allocation112_spill] sm:$0xff] %v10717_v21  ;;  %v2169_v35 = vadd.f32 %v2161_v4, %v10571_v40 }
 0x423   : > { %v2198_v59 = vsel %vm16783_vm6, %v16782_v39, %v16781_v1  ;;  %vm16786_vm8 = vmmov %vm16771_vm4  ;;  %vm10712_vm4 = vcmp.eq.s32.totalorder %v2202_v53, 1  ;;  %v2147_v48 = vsel %vm10590_vm10, %v2128_v12, 0.0  ;;  %v2154_v16 = vsel %vm10594_vm15, %v2121_v37, 0.0  ;;  %3338 = vperm.xlu2 %6107, %v9792_v22  }
 0x424   : > { %v2197_v28 = vsel %vm16786_vm8, %v16781_v1, %v16770_v52  ;;  %v2224_v60 = vsel %vm10641_vm3, %v2193_v30, 0.0  ;;  %vm10726_vm5 = vcmp.eq.s32.totalorder %v2209_v2, 1  ;;  %v2275_v53 = vperm.slane %v10651_v47, 2  ;;  %v16792_v1 = vld [vmem:[#allocation178_spill] sm:$0xff]  ;;  %vm16800_vm8 = vmmov %vm16783_vm6 }
 0x425   : > { %v2233_v10 = vmul.f32 %v16792_v1, %v2221_v45  ;;  %v2219_v40 = vsel %vm10615_vm14, %v2198_v59, 0.0  ;;  %vm10735_vm10 = vcmp.eq.s32.totalorder %v2276_v36, 1  ;;  %v2220_v0 = vsel %vm10637_vm0, %v2197_v28, 0.0  ;;  %vm16799_vm14 = vmmov %vm16783_vm6  ;;  %v16804_v36 = vld [vmem:[#allocation181_spill] sm:$0xff] }
 0x426   : > { %v2279_v42 = vperm.slane %v10651_v47, 6  ;;  %v10742_v4 = vadd.f32 %v2163_v17, %v2100_v32  ;;  %v10744_v2 = vadd.f32 %v2164_v19, %v2101_v38  ;;  %v2159_v37 = vmul.f32 %v16747_v46, %v2147_v48  ;;  %v16798_v38 = vld [vmem:[#allocation192_spill] sm:$0xff]  ;;  %v16806_v45 = vld [vmem:[#allocation201_spill] sm:$0xff] }
 0x427   : > { %v2166_v13 = vmul.f32 %v16747_v46, %v2154_v16  ;;  %v2236_v12 = vmul.f32 %v16792_v1, %v2224_v60  ;;  %vm10749_vm3 = vcmp.eq.s32.totalorder %v2274_v29, 1  ;;  %vm16797_vm15 = vnez %v16276_v33  ;;  %3507 = vrot.lane.b32.xlu1 %v16285_v43, %s6281_s0 }
 0x428   : > { %v2231_v32 = vmul.f32 %v16792_v1, %v2219_v40  ;;  %v2194_v48 = vsel %vm16799_vm14, %v16798_v38, %v16780_v62  ;;  %v2195_v46 = vsel %vm16800_vm8, %v16769_v57, %v16798_v38  ;;  %vm10766_vm6 = vcmp.eq.s32.totalorder %v2275_v53, 1  ;;  %v16803_v62 = vld [vmem:[#allocation198_spill] sm:$0xff]  ;;  %3428 = vrot.lane.b32.xlu0 %v16294_v51, %s6279_s30 }
 0x429   : > { %v2277_v60 = vperm.slane %v10651_v47, 4  ;;  %v2232_v54 = vmul.f32 %v16792_v1, %v2220_v0  ;;  %vm16805_vm14 = vcmp.lt.s32.totalorder %v7906_v9, 3  ;;  %v2278_v57 = vperm.slane %v10651_v47, 5  ;;  %v10809_v0 = vpop.permute.xlu0 %3008 }
 0x42a   : > { %v2267_v17 = vsel %vm16805_vm14, %v16804_v36, %v16803_v62  ;;  %v2241_v19 = vadd.f32 %v2233_v10, %v10647_v5  ;;  %v2199_v59 = vsel %vm16800_vm8, %v16806_v45, %v16782_v39  ;;  %vm10788_vm0 = vcmp.eq.s32.totalorder %v2279_v42, 1  ;;  %vm16809_vm14 = vmand %vm16760_vm11, %vm16797_vm15  ;;  %v10801_v10 = vpop.permute.xlu1 %3087  ;;  %v10803_v5 = vpop.permute.xlu2 %3054 }
 0x42b   : > { %v2273_v29 = vperm.slane %v10651_v47, 0  ;;  %v10799_v53 = vsel %vm16809_vm14, 1, %v16293_v63  ;;  %16810 = vst [vmem:[#allocation123_spill] sm:$0xff] %v10801_v10  ;;  %v2222_v39 = vsel %vm10664_vm2, %v2195_v46, 0.0  ;;  %v2223_v40 = vsel %vm10668_vm12, %v2194_v48, 0.0  ;;  %v16820_v46 = vld [vmem:[#allocation190_spill] sm:$0xff]  ;;  %3361 = vrot.lane.b32.xlu2 %v6923_v49, %s6277_s21 }
 0x42c   : > { %v2167_v42 = vadd.f32 %v2159_v37, %v10645_v25  ;;  %v2174_v38 = vadd.f32 %v2166_v13, %v10653_v31  ;;  %v2192_v21 = vsel %vm16800_vm8, %v16779_v8, %v16806_v45  ;;  %v2292_v10 = vsel %vm10735_vm10, %v2267_v17, 0.0  ;;  %v16850_v25 = vld [vmem:[#allocation209_spill] sm:$0xff] }
 0x42d   : > { %vm10819_vm14 = vcmp.eq.s32.totalorder %v2277_v60, 1  ;;  %v10824_v44 = vadd.f32 %v2231_v32, %v10677_v58  ;;  %v10827_v48 = vadd.f32 %v2236_v12, %v10679_v24  ;;  %v2218_v31 = vsel %vm10712_vm4, %v2199_v59, 0.0  ;;  %v16815_v32 = vld [vmem:[#allocation210_spill] sm:$0xff]  ;;  %v16816_v24 = vld [vmem:[#allocation185_spill] sm:$0xff] }
 0x42e   : > { %vm10831_vm2 = vcmp.eq.s32.totalorder %v2278_v57, 1  ;;  %v2280_v8 = vperm.slane %v10651_v47, 7  ;;  %v2347_v7 = vperm.slane %v10799_v53, 3  ;;  %v10837_v37 = vadd.f32 %v2232_v54, %v2169_v35  ;;  %v16821_v35 = vld [vmem:[#allocation212_spill] sm:$0xff]  ;;  %v16822_v54 = vld [vmem:[#allocation191_spill] sm:$0xff] }
 0x42f   : > { %v2234_v13 = vmul.f32 %v16792_v1, %v2222_v39  ;;  %v2235_v58 = vmul.f32 %v16792_v1, %v2223_v40  ;;  %vm16817_vm12 = vcmp.lt.s32.totalorder %v7906_v9, 3  ;;  %vm10845_vm4 = vcmp.eq.s32.totalorder %v2273_v29, 1  ;;  %3513 = vrot.lane.b32.xlu1 %v7056_v34, %s6281_s0 }
 0x430   : > { %v2264_v14 = vsel %vm16817_vm12, %v16816_v24, %v16815_v32  ;;  %v2225_v47 = vsel %vm10726_vm5, %v2192_v21, 0.0  ;;  %v2304_v60 = vmul.f32 %v16820_v46, %v2292_v10  ;;  %vm16823_vm10 = vmmov %vm16817_vm12  ;;  %v2350_v57 = vperm.slane %v10799_v53, 6  ;;  %3434 = vrot.lane.b32.xlu0 %v6988_v18, %s6279_s30 }
 0x431   : > { %v2269_v17 = vsel %vm16823_vm10, %v16822_v54, %v16821_v35  ;;  %v2230_v45 = vmul.f32 %v16792_v1, %v2218_v31  ;;  %vm16824_vm8 = vmmov %vm16823_vm10  ;;  %v2345_v29 = vperm.slane %v10799_v53, 1  ;;  %v2346_v21 = vperm.slane %v10799_v53, 2 }
 0x432   : > { %v2268_v59 = vsel %vm16824_vm8, %v16821_v35, %v16804_v36  ;;  %v2295_v52 = vsel %vm10788_vm0, %v2264_v14, 0.0  ;;  %vm10869_vm5 = vcmp.eq.s32.totalorder %v2280_v8, 1  ;;  %vm10874_vm10 = vcmp.eq.s32.totalorder %v2347_v7, 1  ;;  %v10884_v40 = vpop.permute.xlu1 %3146  ;;  %v10886_v31 = vpop.permute.xlu2 %3077  ;;  %vm2413_vm12 = vmand %vm16760_vm11, %vm16319_vm13 }
 0x433   : > { %v2237_v39 = vmul.f32 %v16792_v1, %v2225_v47  ;;  %v2290_v22 = vsel %vm10749_vm3, %v2269_v17, 0.0  ;;  %v2348_v28 = vperm.slane %v10799_v53, 4  ;;  %16829 = vst [vmem:[#allocation116_spill] sm:$0xff] %v10884_v40  ;;  %v2242_v8 = vadd.f32 %v2234_v13, %v10742_v4  ;;  %v10895_v35 = vpop.permute.xlu0 %3014  ;;  %v16834_v17 = vld [vmem:[#allocation215_spill] sm:$0xff]  ;;  %vm16835_vm3 = vmmov %vm16824_vm8  ;;  %3367 = vrot.lane.b32.xlu2 %v16286_v55, %s6277_s21  ;;  %s6291_s21 = smov 81  }
 0x434   : > { %16830 = vst [vmem:[#allocation115_spill] sm:$0xff] %v10886_v31  ;;  %v2291_v7 = vsel %vm10766_vm6, %v2268_v59, 0.0  ;;  %vm10891_vm0 = vcmp.eq.s32.totalorder %v2350_v57, 1  ;;  %v10897_v1 = vadd.f32 %v2304_v60, %v2241_v19  ;;  %v10900_v30 = vadd.f32 %v2235_v58, %v10744_v2  ;;  %v16840_v60 = vld [vmem:[#allocation218_spill] sm:$0xff]  ;;  %vm16841_vm15 = vmmov %vm16835_vm3  ;;  %v16842_v59 = vld [vmem:[#allocation217_spill] sm:$0xff] }
 0x435   : > { %16833 = vst [vmem:[#allocation126_spill] sm:$0xff] %v10895_v35  ;;  %v2307_v47 = vmul.f32 %v16820_v46, %v2295_v52  ;;  %v2266_v4 = vsel %vm16835_vm3, %v16803_v62, %v16834_v17  ;;  %vm10907_vm8 = vcmp.eq.s32.totalorder %v2345_v29, 1  ;;  %vm10911_vm6 = vcmp.eq.s32.totalorder %v2346_v21, 1  ;;  %v16843_v29 = vld [vmem:[#allocation197_spill] sm:$0xff] }
 0x436   : > { %v2349_v19 = vperm.slane %v10799_v53, 5  ;;  %v2238_v2 = vadd.f32 %v2230_v45, %v2167_v42  ;;  %v2302_v58 = vmul.f32 %v16820_v46, %v2290_v22  ;;  %v2265_v62 = vsel %vm16835_vm3, %v16834_v17, %v16816_v24  ;;  %v16878_v42 = vld [vmem:[#allocation36_spill] sm:$0xff] }
 0x437   : > { %v2270_v57 = vsel %vm16841_vm15, %v16840_v60, %v16822_v54  ;;  %vm16844_vm9 = vcmp.lt.s32.totalorder %v7906_v9, 2  ;;  %v2303_v52 = vmul.f32 %v16820_v46, %v2291_v7  ;;  %vm10934_vm13 = vcmp.eq.s32.totalorder %v2348_v28, 1  ;;  %3572 = vrot.lane.b32.xlu1 %v6861_v23, %s6283_s23 }
 0x438   : > { %v2338_v21 = vsel %vm16844_vm9, %v16843_v29, %v16842_v59  ;;  %v2245_v45 = vadd.f32 %v2237_v39, %v2174_v38  ;;  %v2293_v24 = vsel %vm10819_vm14, %v2266_v4, 0.0  ;;  %v2263_v54 = vsel %vm16835_vm3, %v16815_v32, %v16840_v60  ;;  %v16849_v32 = vld [vmem:[#allocation220_spill] sm:$0xff]  ;;  %3440 = vrot.lane.b32.xlu0 %v16259_v11, %s6279_s30 }
 0x439   : > { %v2344_v22 = vperm.slane %v10799_v53, 0  ;;  %v10946_v17 = vsel %vm2413_vm12, 1, %v16293_v63  ;;  %v2294_v28 = vsel %vm10831_vm2, %v2265_v62, 0.0  ;;  %v2289_v7 = vsel %vm10845_vm4, %v2270_v57, 0.0 }
 0x43a   : > { %v2363_v38 = vsel %vm10874_vm10, %v2338_v21, 0.0  ;;  %vm10954_vm9 = vcmp.eq.s32.totalorder %v2349_v19, 1  ;;  %vm16851_vm15 = vcmp.lt.s32.totalorder %v7906_v9, 2  ;;  %v2351_v39 = vperm.slane %v10799_v53, 7  ;;  %v10974_v57 = vpop.permute.xlu1 %3152  ;;  %v10976_v21 = vpop.permute.xlu2 %3083 }
 0x43b   : > { %v2335_v12 = vsel %vm16851_vm15, %v16850_v25, %v16849_v32  ;;  %v6282_v36 = vmov 37   ;;  %v2310_v4 = vadd.f32 %v2302_v58, %v10824_v44  ;;  %v2315_v19 = vadd.f32 %v2307_v47, %v10827_v48  ;;  %16852 = vst [vmem:[#allocation129_spill] sm:$0xff] %v10974_v57  ;;  %v16854_v44 = vld [vmem:[#allocation213_spill] sm:$0xff]  ;;  %v10987_v10 = vpop.permute.xlu0 %3073  ;;  %vm16859_vm2 = vmmov %vm16851_vm15 }
 0x43c   : > { %6108 = vset.pattern.permute.xlu2 %v6282_v36  ;;  %v2305_v62 = vmul.f32 %v16820_v46, %v2293_v24  ;;  %v2296_v60 = vsel %vm10869_vm5, %v2263_v54, 0.0  ;;  %16853 = vst [vmem:[#allocation128_spill] sm:$0xff] %v10976_v21  ;;  %v2311_v53 = vadd.f32 %v2303_v52, %v10837_v37  ;;  %v2418_v40 = vperm.slane %v10946_v17, 3  ;;  %v16858_v47 = vld [vmem:[#allocation221_spill] sm:$0xff]  ;;  %v16860_v37 = vld [vmem:[#allocation214_spill] sm:$0xff]  ;;  %vm16861_vm4 = vmmov %vm16859_vm2 }
 0x43d   : > { %v2306_v31 = vmul.f32 %v16820_v46, %v2294_v28  ;;  %v2301_v36 = vmul.f32 %v16820_v46, %v2289_v7  ;;  %v2375_v58 = vmul.f32 %v16854_v44, %v2363_v38  ;;  %vm10983_vm14 = vcmp.eq.s32.totalorder %v2344_v22, 1  ;;  %16857 = vst [vmem:[#allocation118_spill] sm:$0xff] %v10987_v10  ;;  %v16864_v38 = vld [vmem:[#allocation29_spill] sm:$0xff]  ;;  %vm16865_vm10 = vmmov %vm16859_vm2 }
 0x43e   : > { %v2339_v24 = vsel %vm16859_vm2, %v16858_v47, %v16843_v29  ;;  %v2340_v52 = vsel %vm16861_vm4, %v16860_v37, %v16858_v47  ;;  %v2366_v54 = vsel %vm10891_vm0, %v2335_v12, 0.0  ;;  %v2416_v22 = vperm.slane %v10946_v17, 1  ;;  %vm16866_vm0 = vmmov %vm16859_vm2 }
 0x43f   : > { %v2308_v28 = vmul.f32 %v16820_v46, %v2296_v60  ;;  %vm11001_vm5 = vcmp.eq.s32.totalorder %v2351_v39, 1  ;;  %vm15625_vm12 = vcmp.lt.s32.totalorder %v7906_v9, 1  ;;  %v2417_v29 = vperm.slane %v10946_v17, 2  ;;  %vm16886_vm2 = vmmov %vm16866_vm0  ;;  %3578 = vrot.lane.b32.xlu1 %v16285_v43, %s6283_s23 }
 0x440   : > { %v2336_v47 = vsel %vm16865_vm10, %v16864_v38, %v16850_v25  ;;  %v2337_v14 = vsel %vm16866_vm0, %v16842_v59, %v16864_v38  ;;  %vm11015_vm3 = vcmp.eq.s32.totalorder %v2418_v40, 1  ;;  %v16867_v46 = vmov 0  ;;  %3499 = vrot.lane.b32.xlu0 %v16294_v51, %s6281_s0 }
 0x441   : > { %v16868_v46 = vsel %vm11015_vm3, 4294967295, %v16867_v46  ;;  %v2313_v12 = vadd.f32 %v2305_v62, %v2242_v8  ;;  %v2361_v39 = vsel %vm10907_vm8, %v2340_v52, 0.0  ;;  %v2362_v60 = vsel %vm10911_vm6, %v2339_v24, 0.0  ;;  %vm2530_vm6 = vmand %vm16760_vm11, %vm16632_vm1 }
 0x442   : > { %16869 = vst [vmem:[#allocation131_spill] sm:$0xff] %v16868_v46  ;;  %v2378_v57 = vmul.f32 %v16854_v44, %v2366_v54  ;;  %v2421_v25 = vperm.slane %v10946_v17, 6  ;;  %vm11029_vm15 = vcmp.eq.s32.totalorder %v2416_v22, 1  ;;  %v16870_v40 = vmov 0  ;;  %v11059_v54 = vpop.permute.xlu2 %3125  ;;  %v16942_v46 = vld [vmem:[#allocation204_spill] sm:$0xff] }
 0x443   : > { %v16871_v40 = vsel %vm11029_vm15, 4294967295, %v16870_v40  ;;  %v2309_v8 = vadd.f32 %v2301_v36, %v2238_v2  ;;  %v2383_v16 = vadd.f32 %v2375_v58, %v10897_v1  ;;  %v2314_v13 = vadd.f32 %v2306_v31, %v10900_v30  ;;  %v16876_v31 = vld [vmem:[#allocation34_spill] sm:$0xff]  ;;  %v11057_v58 = vpop.permute.xlu1 %3158  ;;  %16881 = vst [vmem:[#allocation124_spill] sm:$0xff] %v11059_v54 }
 0x444   : > { %16872 = vst [vmem:[#allocation121_spill] sm:$0xff] %v16871_v40  ;;  %v2364_v59 = vsel %vm10934_vm13, %v2337_v14, 0.0  ;;  %v2365_v62 = vsel %vm10954_vm9, %v2336_v47, 0.0  ;;  %vm11041_vm8 = vcmp.eq.s32.totalorder %v2417_v29, 1  ;;  %v16873_v24 = vmov 0  ;;  %vm16877_vm13 = vmmov %vm16866_vm0  ;;  %v16945_v40 = vld [vmem:[#allocation207_spill] sm:$0xff] }
 0x445   : > { %v16874_v24 = vsel %vm11041_vm8, 4294967295, %v16873_v24  ;;  %v11045_v52 = vadd.f32 %v2308_v28, %v2245_v45  ;;  %v2373_v2 = vmul.f32 %v16854_v44, %v2361_v39  ;;  %v2374_v1 = vmul.f32 %v16854_v44, %v2362_v60  ;;  %16880 = vst [vmem:[#allocation125_spill] sm:$0xff] %v11057_v58  ;;  %v11061_v45 = vpop.permute.xlu0 %3079  ;;  %v16887_v58 = vld [vmem:[#allocation41_spill] sm:$0xff] }
 0x446   : > { %16875 = vst [vmem:[#allocation132_spill] sm:$0xff] %v16874_v24  ;;  %v2341_v30 = vsel %vm16877_vm13, %v16876_v31, %v16860_v37  ;;  %v2409_v36 = vsel %vm15625_vm12, %v16879_v50, %v16878_v42  ;;  %v2419_v22 = vperm.slane %v10946_v17, 4  ;;  %v2420_v37 = vperm.slane %v10946_v17, 5 }
 0x447   : > { %16882 = vst [vmem:[#allocation135_spill] sm:$0xff] %v11061_v45  ;;  %vm11069_vm9 = vcmp.eq.s32.totalorder %v2421_v25, 1  ;;  %v16883_v28 = vmov 0  ;;  %v2386_v29 = vadd.f32 %v2378_v57, %v2315_v19  ;;  %v2376_v38 = vmul.f32 %v16854_v44, %v2364_v59  ;;  %v16888_v25 = vld [vmem:[#allocation31_spill] sm:$0xff]  ;;  %3584 = vrot.lane.b32.xlu1 %v7056_v34, %s6283_s23 }
 0x448   : > { %v16884_v28 = vsel %vm11069_vm9, 4294967295, %v16883_v28  ;;  %v2377_v47 = vmul.f32 %v16854_v44, %v2365_v62  ;;  %v2334_v14 = vsel %vm16886_vm2, %v16849_v32, %v16876_v31  ;;  %v2415_v39 = vperm.slane %v10946_v17, 0  ;;  %v16889_v19 = vld [vmem:[#allocation39_spill] sm:$0xff]  ;;  %3505 = vrot.lane.b32.xlu0 %v6988_v18, %s6281_s0 }
 0x449   : > { %16885 = vst [vmem:[#allocation138_spill] sm:$0xff] %v16884_v28  ;;  %v2360_v60 = vsel %vm10983_vm14, %v2341_v30, 0.0  ;;  %v2411_v54 = vsel %vm15625_vm12, %v16888_v25, %v16887_v58  ;;  %v16890_v57 = vld [vmem:[#allocation219_spill] sm:$0xff]  ;;  %v2434_v62 = vsel %vm11015_vm3, %v2409_v36, 0.0  ;;  %v2381_v21 = vadd.f32 %v2373_v2, %v2310_v4  ;;  %v16897_v2 = vld [vmem:[#allocation184_spill] sm:$0xff] }
 0x44a   : > { %v2406_v59 = vsel %vm15625_vm12, %v16890_v57, %v16889_v19  ;;  %v11093_v32 = vsel %vm2530_vm6, 1, %v16293_v63  ;;  %v2382_v31 = vadd.f32 %v2374_v1, %v2311_v53  ;;  %v2422_v48 = vperm.slane %v10946_v17, 7  ;;  %v11116_v17 = vld [vmem:[%s15176_s4] sm:$0xff] }
 0x44b   : > { %v2367_v30 = vsel %vm11001_vm5, %v2334_v14, 0.0  ;;  %v2410_v45 = vsel %vm15625_vm12, %v16887_v58, %v16879_v50  ;;  %vm11102_vm14 = vcmp.eq.s32.totalorder %v2419_v22, 1  ;;  %v16891_v10 = vmov 0  ;;  %3409 = vperm.xlu2 %6108, %v11116_v17  }
 0x44c   : > { %v16892_v10 = vsel %vm11102_vm14, 4294967295, %v16891_v10  ;;  %vm11106_vm4 = vcmp.eq.s32.totalorder %v2420_v37, 1  ;;  %v16894_v4 = vmov 0  ;;  %v2372_v53 = vmul.f32 %v16854_v44, %v2360_v60  ;;  %v11138_v60 = vpop.permute.xlu1 %3217 }
 0x44d   : > { %16893 = vst [vmem:[#allocation137_spill] sm:$0xff] %v16892_v10  ;;  %v16895_v4 = vsel %vm11106_vm4, 4294967295, %v16894_v4  ;;  %v2432_v7 = vsel %vm11029_vm15, %v2411_v54, 0.0  ;;  %v2446_v1 = vmul.f32 %v16897_v2, %v2434_v62  ;;  %v2437_v50 = vsel %vm11069_vm9, %v2406_v59, 0.0  ;;  %v11140_v59 = vpop.permute.xlu2 %3148 }
 0x44e   : > { %16896 = vst [vmem:[#allocation127_spill] sm:$0xff] %v16895_v4  ;;  %vm11126_vm5 = vcmp.eq.s32.totalorder %v2415_v39, 1  ;;  %v16898_v36 = vmov 0  ;;  %v2533_v58 = vperm.slane %v11093_v32, 1  ;;  %v2384_v22 = vadd.f32 %v2376_v38, %v2313_v12  ;;  %v11152_v12 = vpop.permute.xlu0 %3085 }
 0x44f   : > { %v16899_v36 = vsel %vm11126_vm5, 4294967295, %v16898_v36  ;;  %v11131_v37 = vadd.f32 %v2377_v47, %v2314_v13  ;;  %v2379_v14 = vmul.f32 %v16854_v44, %v2367_v30  ;;  %v2408_v54 = vsel %vm15625_vm12, %v16878_v42, %v8649_v27  ;;  %16901 = vst [vmem:[#allocation134_spill] sm:$0xff] %v11138_v60 }
 0x450   : > { %16900 = vst [vmem:[#allocation141_spill] sm:$0xff] %v16899_v36  ;;  %v2433_v39 = vsel %vm11041_vm8, %v2410_v45, 0.0  ;;  %vm11144_vm10 = vcmp.eq.s32.totalorder %v2422_v48, 1  ;;  %v16903_v62 = vmov 0  ;;  %v2407_v44 = vsel %vm15625_vm12, %v8649_v27, %v16890_v57  ;;  %3511 = vrot.lane.b32.xlu0 %v16259_v11, %s6281_s0 }
 0x451   : > { %16902 = vst [vmem:[#allocation140_spill] sm:$0xff] %v11140_v59  ;;  %v16904_v62 = vsel %vm11144_vm10, 4294967295, %v16903_v62  ;;  %v2444_v13 = vmul.f32 %v16897_v2, %v2432_v7  ;;  %v2532_v42 = vperm.slane %v11093_v32, 0  ;;  %v2449_v38 = vmul.f32 %v16897_v2, %v2437_v50 }
 0x452   : > { %16905 = vst [vmem:[#allocation130_spill] sm:$0xff] %v16904_v62  ;;  %v2380_v45 = vadd.f32 %v2372_v53, %v2309_v8  ;;  %v2454_v47 = vadd.f32 %v2446_v1, %v2383_v16  ;;  %v2536_v48 = vperm.slane %v11093_v32, 4  ;;  %v2539_v30 = vperm.slane %v11093_v32, 7 }
 0x453   : > { %16906 = vst [vmem:[#allocation133_spill] sm:$0xff] %v11152_v12  ;;  %v2405_v27 = vsel %vm15625_vm12, %v16889_v19, %v8744_v6  ;;  %v2412_v57 = vsel %vm15625_vm12, %v8744_v6, %v16888_v25  ;;  %v2445_v7 = vmul.f32 %v16897_v2, %v2433_v39  ;;  %v2435_v8 = vsel %vm11102_vm14, %v2408_v54, 0.0  ;;  %v16911_v25 = vld [vmem:[#allocation199_spill] sm:$0xff]  ;;  %3432 = vrot.lane.b32.xlu2 %v6923_v49, %s6279_s30 }
 0x454   : > { %v2534_v16 = vperm.slane %v11093_v32, 2  ;;  %v2535_v53 = vperm.slane %v11093_v32, 3  ;;  %v2436_v1 = vsel %vm11106_vm4, %v2407_v44, 0.0  ;;  %vm16907_vm13 = vnez %v16417_v3  ;;  %v16917_v44 = vld [vmem:[#allocation202_spill] sm:$0xff] }
 0x455   : > { %v2452_v19 = vadd.f32 %v2444_v13, %v2381_v21  ;;  %vm11179_vm2 = vcmp.eq.s32.totalorder %v2533_v58, 1  ;;  %v16908_v6 = vmov 0  ;;  %vm16912_vm12 = vnez %v16911_v25 }
 0x456   : > { %v16909_v6 = vsel %vm11179_vm2, 4294967295, %v16908_v6  ;;  %v16913_v50 = vsel %vm16912_vm12, %v6861_v23, 0.0  ;;  %v2387_v39 = vadd.f32 %v2379_v14, %v11045_v52  ;;  %v2457_v4 = vadd.f32 %v2449_v38, %v2386_v29 }
 0x457   : > { %16910 = vst [vmem:[#allocation144_spill] sm:$0xff] %v16909_v6  ;;  %v2490_v54 = vmul.f32 %v8631_v26, %v16913_v50  ;;  %v2431_v21 = vsel %vm11126_vm5, %v2412_v57, 0.0  ;;  %vm11195_vm0 = vcmp.eq.s32.totalorder %v2532_v42, 1  ;;  %v16914_v58 = vmov 0  ;;  %v16920_v57 = vld [vmem:[#allocation203_spill] sm:$0xff] }
 0x458   : > { %v16915_v58 = vsel %vm11195_vm0, 4294967295, %v16914_v58  ;;  %vm16918_vm6 = vnez %v16917_v44  ;;  %v2447_v29 = vmul.f32 %v16897_v2, %v2435_v8  ;;  %v2438_v14 = vsel %vm11144_vm10, %v2405_v27, 0.0  ;;  %vm16929_vm10 = vmand %vm16760_vm11, %vm16907_vm13  ;;  %v11233_v8 = vpop.permute.xlu2 %3154  ;;  %3570 = vrot.lane.b32.xlu0 %v16294_v51, %s6283_s23 }
 0x459   : > { %16916 = vst [vmem:[#allocation146_spill] sm:$0xff] %v16915_v58  ;;  %v16919_v13 = vsel %vm16918_vm6, %v6923_v49, 0.0  ;;  %v6284_v38 = vmov 38   ;;  %v2453_v42 = vadd.f32 %v2445_v7, %v2382_v31  ;;  %vm16921_vm4 = vnez %v16920_v57  ;;  %v11231_v7 = vpop.permute.xlu1 %3223  ;;  %v11249_v57 = vpop.permute.xlu0 %3144 }
 0x45a   : > { %v2491_v52 = vmul.f32 %v8631_v26, %v16919_v13  ;;  %6109 = vset.pattern.permute.xlu2 %v6284_v38  ;;  %v16922_v50 = vsel %vm16921_vm4, %v6988_v18, 0.0  ;;  %v2448_v10 = vmul.f32 %v16897_v2, %v2436_v1  ;;  %vm11215_vm9 = vcmp.eq.s32.totalorder %v2536_v48, 1  ;;  %16930 = vst [vmem:[#allocation149_spill] sm:$0xff] %v11231_v7  ;;  %v16932_v48 = vld [vmem:[#allocation200_spill] sm:$0xff] }
 0x45b   : > { %v2492_v28 = vmul.f32 %v8631_v26, %v16922_v50  ;;  %v16923_v13 = vmov 0  ;;  %vm11219_vm14 = vcmp.eq.s32.totalorder %v2539_v30, 1  ;;  %v16926_v27 = vmov 0  ;;  %16931 = vst [vmem:[#allocation139_spill] sm:$0xff] %v11233_v8  ;;  %3438 = vrot.lane.b32.xlu2 %v16286_v55, %s6279_s30  ;;  %s6285_s30 = smov 93  }
 0x45c   : > { %v16924_v13 = vsel %vm11215_vm9, 4294967295, %v16923_v13  ;;  %v16927_v27 = vsel %vm11219_vm14, 4294967295, %v16926_v27  ;;  %v11229_v31 = vsel %vm16929_vm10, 1, %v16293_v63  ;;  %vm16933_vm4 = vnez %v16932_v48  ;;  %16941 = vst [vmem:[#allocation142_spill] sm:$0xff] %v11249_v57  ;;  %3643 = vrot.lane.b32.xlu1 %v6861_v23, %s6285_s30 }
 0x45d   : > { %16925 = vst [vmem:[#allocation136_spill] sm:$0xff] %v16924_v13  ;;  %v16934_v1 = vsel %vm16933_vm4, %v16294_v51, 0.0  ;;  %vm11240_vm6 = vcmp.eq.s32.totalorder %v2534_v16, 1  ;;  %v16935_v38 = vmov 0  ;;  %vm11244_vm3 = vcmp.eq.s32.totalorder %v2535_v53, 1 }
 0x45e   : > { %16928 = vst [vmem:[#allocation147_spill] sm:$0xff] %v16927_v27  ;;  %v2489_v30 = vmul.f32 %v8631_v26, %v16934_v1  ;;  %v16936_v38 = vsel %vm11240_vm6, 4294967295, %v16935_v38  ;;  %v16938_v50 = vmov 0  ;;  %v2537_v62 = vperm.slane %v11093_v32, 5 }
 0x45f   : > { %16937 = vst [vmem:[#allocation150_spill] sm:$0xff] %v16936_v38  ;;  %v16939_v50 = vsel %vm11244_vm3, 4294967295, %v16938_v50  ;;  %v2443_v44 = vmul.f32 %v16897_v2, %v2431_v21  ;;  %vm16943_vm10 = vnez %v16942_v46  ;;  %v2450_v16 = vmul.f32 %v16897_v2, %v2438_v14  ;;  %v16948_v2 = vld [vmem:[#allocation205_spill] sm:$0xff] }
 0x460   : > { %16940 = vst [vmem:[#allocation143_spill] sm:$0xff] %v16939_v50  ;;  %v16944_v24 = vsel %vm16943_vm10, %v16285_v43, 0.0  ;;  %v2538_v48 = vperm.slane %v11093_v32, 6  ;;  %v11259_v53 = vadd.f32 %v2490_v54, %v2452_v19  ;;  %v11261_v36 = vadd.f32 %v2491_v52, %v2453_v42  ;;  %v17005_v38 = vld [vmem:[#allocation49_spill] sm:$0xff]  ;;  %3576 = vrot.lane.b32.xlu0 %v6988_v18, %s6283_s23 }
 0x461   : > { %v2493_v1 = vmul.f32 %v8631_v26, %v16944_v24  ;;  %v2455_v25 = vadd.f32 %v2447_v29, %v2384_v22  ;;  %vm16946_vm8 = vnez %v16945_v40  ;;  %v2604_v46 = vperm.slane %v11229_v31, 1 }
 0x462   : > { %v16947_v7 = vsel %vm16946_vm8, %v16259_v11, 0.0  ;;  %v11269_v60 = vadd.f32 %v2492_v28, %v2454_v47  ;;  %v2456_v24 = vadd.f32 %v2448_v10, %v11131_v37  ;;  %vm16949_vm10 = vnez %v16948_v2  ;;  %v16954_v28 = vld [vmem:[#allocation208_spill] sm:$0xff] }
 0x463   : > { %v2495_v21 = vmul.f32 %v8631_v26, %v16947_v7  ;;  %v16950_v32 = vsel %vm16949_vm10, %v16286_v55, 0.0  ;;  %v2603_v22 = vperm.slane %v11229_v31, 0  ;;  %v2610_v54 = vperm.slane %v11229_v31, 7  ;;  %v16957_v47 = vld [vmem:[#allocation32_spill] sm:$0xff]  ;;  %3480 = vperm.xlu2 %6109, %v11116_v17  }
 0x464   : > { %v2494_v19 = vmul.f32 %v8631_v26, %v16950_v32  ;;  %vm11280_vm8 = vcmp.eq.s32.totalorder %v2537_v62, 1  ;;  %v16951_v52 = vmov 0  ;;  %vm16955_vm5 = vnez %v16954_v28  ;;  %v16962_v62 = vld [vmem:[#allocation47_spill] sm:$0xff]  ;;  %3649 = vrot.lane.b32.xlu1 %v16285_v43, %s6285_s30 }
 0x465   : > { %v16952_v52 = vsel %vm11280_vm8, 4294967295, %v16951_v52  ;;  %v16956_v10 = vsel %vm16955_vm5, %v7056_v34, 0.0  ;;  %vm16958_vm10 = vcmp.lt.s32.totalorder %v7906_v9, 127  ;;  %v2451_v14 = vadd.f32 %v2443_v44, %v2380_v45 }
 0x466   : > { %16953 = vst [vmem:[#allocation153_spill] sm:$0xff] %v16952_v52  ;;  %v2496_v37 = vmul.f32 %v8631_v26, %v16956_v10  ;;  %v2527_v29 = vsel %vm16958_vm10, %v16957_v47, %v8727_v41  ;;  %v2458_v42 = vadd.f32 %v2450_v16, %v2387_v39  ;;  %vm11293_vm4 = vcmp.eq.s32.totalorder %v2538_v48, 1  ;;  %vm16963_vm12 = vmmov %vm16958_vm10  ;;  %v16964_v39 = vld [vmem:[#allocation42_spill] sm:$0xff]  ;;  %v16965_v48 = vld [vmem:[#allocation45_spill] sm:$0xff] }
 0x467   : > { %v16959_v7 = vmov 0  ;;  %v2528_v32 = vsel %vm16963_vm12, %v16962_v62, %v16957_v47  ;;  %v2607_v28 = vperm.slane %v11229_v31, 4  ;;  %v2501_v26 = vadd.f32 %v2493_v1, %v2455_v25  ;;  %v16966_v16 = vld [vmem:[#allocation38_spill] sm:$0xff]  ;;  %vm16967_vm12 = vmmov %vm16958_vm10  ;;  %v16970_v25 = vld [vmem:[#allocation25_spill] sm:$0xff] }
 0x468   : > { %v16960_v7 = vsel %vm11293_vm4, 4294967295, %v16959_v7  ;;  %v11306_v45 = vadd.f32 %v2495_v21, %v2457_v4  ;;  %v2529_v44 = vsel %vm16958_vm10, %v16964_v39, %v16962_v62  ;;  %v2524_v10 = vsel %vm16967_vm12, %v16966_v16, %v16965_v48  ;;  %vm16971_vm12 = vmmov %vm16958_vm10  ;;  %v11338_v62 = vpop.permute.xlu1 %3229  ;;  %3582 = vrot.lane.b32.xlu0 %v16259_v11, %s6283_s23 }
 0x469   : > { %16961 = vst [vmem:[#allocation155_spill] sm:$0xff] %v16960_v7  ;;  %vm11316_vm5 = vcmp.eq.s32.totalorder %v2604_v46, 1  ;;  %v2605_v2 = vperm.slane %v11229_v31, 2  ;;  %v11323_v4 = vadd.f32 %v2494_v19, %v2456_v24  ;;  %v2525_v1 = vsel %vm16958_vm10, %v16970_v25, %v16966_v16  ;;  %v11340_v24 = vpop.permute.xlu2 %3196  ;;  %v16974_v16 = vld [vmem:[#allocation54_spill] sm:$0xff] }
 0x46a   : > { %v2526_v46 = vsel %vm16971_vm12, %v8727_v41, %v16970_v25  ;;  %v2606_v21 = vperm.slane %v11229_v31, 3  ;;  %16972 = vst [vmem:[#allocation145_spill] sm:$0xff] %v11338_v62  ;;  %v2549_v19 = vsel %vm11179_vm2, %v2527_v29, 0.0  ;;  %v2523_v40 = vsel %vm16958_vm10, %v16965_v48, %v16974_v16  ;;  %v11352_v25 = vpop.permute.xlu0 %3150  ;;  %v16980_v29 = vld [vmem:[#allocation48_spill] sm:$0xff]  ;;  %vm16983_vm2 = vmand %vm16760_vm11, %vm16445_vm7 }
 0x46b   : > { %16973 = vst [vmem:[#allocation156_spill] sm:$0xff] %v11340_v24  ;;  %vm11348_vm12 = vcmp.eq.s32.totalorder %v2603_v22, 1  ;;  %v2497_v8 = vadd.f32 %v2489_v30, %v2451_v14  ;;  %v2548_v62 = vsel %vm11195_vm0, %v2528_v32, 0.0  ;;  %v2504_v57 = vadd.f32 %v2496_v37, %v2458_v42  ;;  %3503 = vrot.lane.b32.xlu2 %v6923_v49, %s6281_s0 }
 0x46c   : > { %16977 = vst [vmem:[#allocation158_spill] sm:$0xff] %v11352_v25  ;;  %vm11356_vm15 = vcmp.eq.s32.totalorder %v2607_v28, 1  ;;  %v2561_v6 = vmul.f32 %v16980_v29, %v2549_v19  ;;  %v2560_v59 = vmul.f32 %v16980_v29, %v2548_v62  ;;  %v2552_v22 = vsel %vm11215_vm9, %v2524_v10, 0.0  ;;  %v16989_v62 = vld [vmem:[#allocation53_spill] sm:$0xff]  ;;  %3655 = vrot.lane.b32.xlu1 %v7056_v34, %s6285_s30 }
 0x46d   : > { %v2555_v48 = vsel %vm11219_vm14, %v2529_v44, 0.0  ;;  %v2522_v30 = vsel %vm16958_vm10, %v16974_v16, %v16964_v39  ;;  %vm11370_vm0 = vcmp.eq.s32.totalorder %v2605_v2, 1  ;;  %v11380_v37 = vsel %vm16983_vm2, 1, %v16293_v63  ;;  %v16990_v19 = vld [vmem:[#allocation37_spill] sm:$0xff] }
 0x46e   : > { %v2551_v14 = vsel %vm11244_vm3, %v2525_v1, 0.0  ;;  %v2550_v42 = vsel %vm11240_vm6, %v2526_v46, 0.0  ;;  %vm11386_vm14 = vcmp.eq.s32.totalorder %v2610_v54, 1  ;;  %v2608_v2 = vperm.slane %v11229_v31, 5  ;;  %v11402_v54 = vld [vmem:[%s15954_s1] ss:$2 sm:$0xff] }
 0x46f   : > { %v2609_v39 = vperm.slane %v11229_v31, 6  ;;  %v2564_v56 = vmul.f32 %v16980_v29, %v2552_v22  ;;  %v2553_v44 = vsel %vm11280_vm8, %v2523_v40, 0.0  ;;  %vm11395_vm11 = vcmp.eq.s32.totalorder %v2606_v21, 1  ;;  %16988 = vst [vmem:[#allocation148_spill] sm:$0xff] %v11402_v54 }
 0x470   : > { %v2567_v31 = vmul.f32 %v16980_v29, %v2555_v48  ;;  %v2675_v1 = vperm.slane %v11380_v37, 1  ;;  %v2562_v40 = vmul.f32 %v16980_v29, %v2550_v42  ;;  %v2563_v46 = vmul.f32 %v16980_v29, %v2551_v14  ;;  %3641 = vrot.lane.b32.xlu0 %v16294_v51, %s6285_s30 }
 0x471   : > { %v2554_v21 = vsel %vm11293_vm4, %v2522_v30, 0.0  ;;  %vm16991_vm2 = vcmp.lt.s32.totalorder %v7906_v9, 126  ;;  %v2569_v22 = vadd.f32 %v2561_v6, %v11259_v53  ;;  %v11422_v48 = vadd.f32 %v2560_v59, %v2497_v8  ;;  %v11444_v6 = vpop.permute.xlu1 %3288  ;;  %v11446_v8 = vpop.permute.xlu2 %3219  ;;  %v17043_v30 = vld [vmem:[#allocation19_spill] sm:$0xff] }
 0x472   : > { %v2598_v16 = vsel %vm16991_vm2, %v16990_v19, %v16989_v62  ;;  %v2565_v27 = vmul.f32 %v16980_v29, %v2553_v44  ;;  %vm11425_vm10 = vcmp.eq.s32.totalorder %v2608_v2, 1  ;;  %vm11429_vm8 = vcmp.eq.s32.totalorder %v2609_v39, 1  ;;  %17000 = vst [vmem:[#allocation159_spill] sm:$0xff] %v11444_v6  ;;  %v17002_v2 = vld [vmem:[#allocation52_spill] sm:$0xff]  ;;  %v11453_v52 = vpop.permute.xlu0 %3156 }
 0x473   : > { %v2674_v14 = vperm.slane %v11380_v37, 0  ;;  %v2678_v7 = vperm.slane %v11380_v37, 4  ;;  %vm16996_vm2 = vcmp.lt.s32.totalorder %v11402_v54, 15  ;;  %vm16997_vm9 = vcmp.ge.s32.totalorder %v11402_v54, 4294967295  ;;  %17001 = vst [vmem:[#allocation152_spill] sm:$0xff] %v11446_v8  ;;  %v17006_v6 = vld [vmem:[#allocation44_spill] sm:$0xff]  ;;  %3509 = vrot.lane.b32.xlu2 %v16286_v55, %s6281_s0 }
 0x474   : > { %vm11440_vm3 = vmand %vm16997_vm9, %vm16996_vm2  ;;  %v2572_v53 = vadd.f32 %v2564_v56, %v2501_v26  ;;  %vm17003_vm4 = vcmp.lt.s32.totalorder %v7906_v9, 126  ;;  %v2681_v44 = vperm.slane %v11380_v37, 7  ;;  %17004 = vst [vmem:[#allocation151_spill] sm:$0xff] %v11453_v52  ;;  %v2566_v13 = vmul.f32 %v16980_v29, %v2554_v21  ;;  %v17010_v52 = vld [vmem:[#allocation56_spill] sm:$0xff]  ;;  %s6287_s0 = smov 83  }
 0x475   : > { %v2599_v39 = vsel %vm17003_vm4, %v17002_v2, %v16990_v19  ;;  %v2575_v50 = vadd.f32 %v2567_v31, %v2504_v57  ;;  %v2620_v58 = vsel %vm11316_vm5, %v2598_v16, 0.0  ;;  %vm17007_vm9 = vmmov %vm17003_vm4  ;;  %vm11462_vm2 = vcmp.eq.s32.totalorder %v2675_v1, 1  ;;  %v17012_v31 = vld [vmem:[#allocation194_spill] sm:$0xff]  ;;  %3714 = vrot.lane.b32.xlu1 %v6861_v23, %s6287_s0 }
 0x476   : > { %v2595_v26 = vsel %vm17007_vm9, %v17006_v6, %v17005_v38  ;;  %v2570_v19 = vadd.f32 %v2562_v40, %v11261_v36  ;;  %v2571_v8 = vadd.f32 %v2563_v46, %v11269_v60  ;;  %v2596_v57 = vsel %vm17003_vm4, %v17010_v52, %v17006_v6  ;;  %vm17011_vm5 = vmmov %vm17003_vm4  ;;  %v17014_v60 = vld [vmem:[#allocation50_spill] sm:$0xff] }
 0x477   : > { %v2597_v47 = vsel %vm17011_vm5, %v16989_v62, %v17010_v52  ;;  %v2676_v29 = vperm.slane %v11380_v37, 2  ;;  %vm17013_vm9 = vnez %v17012_v31  ;;  %v11482_v36 = vadd.f32 %v2565_v27, %v11323_v4  ;;  %vm17015_vm7 = vmmov %vm17003_vm4  ;;  %v17022_v62 = vld [vmem:[#allocation57_spill] sm:$0xff] }
 0x478   : > { %vm2743_vm6 = vmand %vm11440_vm3, %vm17013_vm9  ;;  %v2600_v1 = vsel %vm17015_vm7, %v17014_v60, %v17002_v2  ;;  %v2619_v40 = vsel %vm11348_vm12, %v2599_v39, 0.0  ;;  %vm11490_vm4 = vcmp.eq.s32.totalorder %v2674_v14, 1  ;;  %vm11494_vm5 = vcmp.eq.s32.totalorder %v2678_v7, 1  ;;  %v17025_v39 = vld [vmem:[#allocation59_spill] sm:$0xff]  ;;  %3647 = vrot.lane.b32.xlu0 %v6988_v18, %s6285_s30 }
 0x479   : > { %v2677_v21 = vperm.slane %v11380_v37, 3  ;;  %v2623_v27 = vsel %vm11356_vm15, %v2595_v26, 0.0  ;;  %vm11501_vm9 = vcmp.eq.s32.totalorder %v2681_v44, 1  ;;  %v2632_v41 = vmul.f32 %v17022_v62, %v2620_v58 }
 0x47a   : > { %v2631_v16 = vmul.f32 %v17022_v62, %v2619_v40  ;;  %v11508_v14 = vadd.f32 %v2566_v13, %v11306_v45  ;;  %v2621_v7 = vsel %vm11370_vm0, %v2597_v47, 0.0  ;;  %v2622_v6 = vsel %vm11395_vm11, %v2596_v57, 0.0  ;;  %v11546_v57 = vpop.permute.xlu2 %3225 }
 0x47b   : > { %v11515_v24 = vsel %vm2743_vm6, 1, %v16293_v63  ;;  %v2635_v58 = vmul.f32 %v17022_v62, %v2623_v27  ;;  %v2626_v13 = vsel %vm11386_vm14, %v2600_v1, 0.0  ;;  %vm11524_vm7 = vcmp.eq.s32.totalorder %v2676_v29, 1  ;;  %17031 = vst [vmem:[#allocation165_spill] sm:$0xff] %v11546_v57  ;;  %v11550_v1 = vpop.permute.xlu0 %3215 }
 0x47c   : > { %v2679_v28 = vperm.slane %v11380_v37, 5  ;;  %v2680_v10 = vperm.slane %v11380_v37, 6  ;;  %v6286_v2 = vmov 39   ;;  %vm17026_vm15 = vcmp.lt.s32.totalorder %v7906_v9, 126  ;;  %v11544_v37 = vpop.permute.xlu1 %3294  ;;  %17032 = vst [vmem:[#allocation164_spill] sm:$0xff] %v11550_v1 }
 0x47d   : > { %6110 = vset.pattern.permute.xlu2 %v6286_v2  ;;  %v2593_v44 = vsel %vm17026_vm15, %v17025_v39, %v17014_v60  ;;  %vm17027_vm14 = vmmov %vm17026_vm15  ;;  %vm11540_vm0 = vcmp.eq.s32.totalorder %v2677_v21, 1  ;;  %17030 = vst [vmem:[#allocation162_spill] sm:$0xff] %v11544_v37  ;;  %v2638_v47 = vmul.f32 %v17022_v62, %v2626_v13  ;;  %v2746_v29 = vperm.slane %v11515_v24, 1  ;;  %v17034_v21 = vld [vmem:[#allocation51_spill] sm:$0xff]  ;;  %3720 = vrot.lane.b32.xlu1 %v16285_v43, %s6287_s0 }
 0x47e   : > { %v2594_v32 = vsel %vm17027_vm14, %v17005_v38, %v17025_v39  ;;  %v2640_v60 = vadd.f32 %v2632_v41, %v2569_v22  ;;  %v2633_v40 = vmul.f32 %v17022_v62, %v2621_v7  ;;  %v2634_v27 = vmul.f32 %v17022_v62, %v2622_v6  ;;  %v17033_v38 = vld [vmem:[#allocation60_spill] sm:$0xff]  ;;  %3551 = vperm.xlu2 %6110, %v11116_v17   ;;  %v17076_v7 = vld [vmem:[#allocation62_spill] sm:$0xff] }
 0x47f   : > { %vm17035_vm6 = vcmp.lt.s32.totalorder %v7906_v9, 125  ;;  %v2745_v39 = vperm.slane %v11515_v24, 0  ;;  %v2639_v13 = vadd.f32 %v2631_v16, %v11422_v48  ;;  %v2643_v37 = vadd.f32 %v2635_v58, %v2572_v53  ;;  %v17040_v48 = vld [vmem:[#allocation18_spill] sm:$0xff]  ;;  %v17042_v53 = vld [vmem:[#allocation55_spill] sm:$0xff] }
 0x480   : > { %v2669_v2 = vsel %vm17035_vm6, %v17034_v21, %v17033_v38  ;;  %v2624_v1 = vsel %vm11425_vm10, %v2594_v32, 0.0  ;;  %v2625_v22 = vsel %vm11429_vm8, %v2593_v44, 0.0  ;;  %vm11565_vm11 = vcmp.eq.s32.totalorder %v2679_v28, 1  ;;  %vm17041_vm14 = vmmov %vm17035_vm6  ;;  %v17045_v58 = vld [vmem:[#allocation35_spill] sm:$0xff]  ;;  %v17047_v32 = vld [vmem:[#allocation21_spill] sm:$0xff]  ;;  %3653 = vrot.lane.b32.xlu0 %v16259_v11, %s6285_s30 }
 0x481   : > { %vm11569_vm15 = vcmp.eq.s32.totalorder %v2680_v10, 1  ;;  %v2752_v6 = vperm.slane %v11515_v24, 7  ;;  %v2749_v57 = vperm.slane %v11515_v24, 4  ;;  %v2670_v42 = vsel %vm17041_vm14, %v17040_v48, %v17034_v21  ;;  %vm17044_vm8 = vmmov %vm17035_vm6 }
 0x482   : > { %v2666_v16 = vsel %vm17044_vm8, %v17043_v30, %v17042_v53  ;;  %vm17046_vm10 = vmmov %vm17035_vm6  ;;  %v2646_v10 = vadd.f32 %v2638_v47, %v2575_v50  ;;  %v2691_v44 = vsel %vm11462_vm2, %v2669_v2, 0.0  ;;  %v2671_v25 = vsel %vm17035_vm6, %v17047_v32, %v17040_v48 }
 0x483   : > { %v2668_v28 = vsel %vm17046_vm10, %v17033_v38, %v17045_v58  ;;  %vm11593_vm14 = vcmp.eq.s32.totalorder %v2746_v29, 1  ;;  %v2641_v12 = vadd.f32 %v2633_v40, %v2570_v19  ;;  %v2642_v31 = vadd.f32 %v2634_v27, %v2571_v8  ;;  %vm17050_vm8 = vmmov %vm17035_vm6  ;;  %v11638_v27 = vpop.permute.xlu2 %3267  ;;  %v17059_v38 = vld [vmem:[#allocation46_spill] sm:$0xff]  ;;  %v11652_v4 = vpop.permute.xlu0 %3221 }
 0x484   : > { %v2636_v54 = vmul.f32 %v17022_v62, %v2624_v1  ;;  %v2637_v35 = vmul.f32 %v17022_v62, %v2625_v22  ;;  %v2667_v50 = vsel %vm17050_vm8, %v17045_v58, %v17043_v30  ;;  %v2747_v56 = vperm.slane %v11515_v24, 2  ;;  %v11636_v40 = vpop.permute.xlu1 %3300 }
 0x485   : > { %vm17051_vm2 = vnez %v16276_v33  ;;  %v2690_v8 = vsel %vm11490_vm4, %v2670_v42, 0.0  ;;  %v2694_v19 = vsel %vm11494_vm5, %v2666_v16, 0.0  ;;  %v2692_v62 = vsel %vm11524_vm7, %v2668_v28, 0.0  ;;  %17058 = vst [vmem:[#allocation154_spill] sm:$0xff] %v11636_v40  ;;  %v17060_v16 = vld [vmem:[#allocation24_spill] sm:$0xff]  ;;  %3726 = vrot.lane.b32.xlu1 %v7056_v34, %s6287_s0 }
 0x486   : > { %vm2814_vm10 = vmand %vm11440_vm3, %vm17051_vm2  ;;  %vm11618_vm6 = vcmp.eq.s32.totalorder %v2745_v39, 1  ;;  %vm11622_vm8 = vcmp.eq.s32.totalorder %v2752_v6, 1  ;;  %vm11626_vm12 = vcmp.eq.s32.totalorder %v2749_v57, 1  ;;  %v2748_v52 = vperm.slane %v11515_v24, 3  ;;  %3574 = vrot.lane.b32.xlu2 %v6923_v49, %s6283_s23 }
 0x487   : > { %v2697_v46 = vsel %vm11501_vm9, %v2671_v25, 0.0  ;;  %v2750_v45 = vperm.slane %v11515_v24, 5  ;;  %v2703_v2 = vmul.f32 %v17059_v38, %v2691_v44  ;;  %v2702_v57 = vmul.f32 %v17059_v38, %v2690_v8 }
 0x488   : > { %v2693_v39 = vsel %vm11540_vm0, %v2667_v50, 0.0  ;;  %v11650_v25 = vsel %vm2814_vm10, 1, %v16293_v63  ;;  %v2706_v22 = vmul.f32 %v17059_v38, %v2694_v19  ;;  %v2709_v6 = vmul.f32 %v17059_v38, %v2697_v46  ;;  %3712 = vrot.lane.b32.xlu0 %v16294_v51, %s6287_s0 }
 0x489   : > { %v2751_v48 = vperm.slane %v11515_v24, 6  ;;  %v2704_v42 = vmul.f32 %v17059_v38, %v2692_v62  ;;  %v2644_v26 = vadd.f32 %v2636_v54, %v11482_v36  ;;  %v2645_v30 = vadd.f32 %v2637_v35, %v11508_v14 }
 0x48a   : > { %vm17061_vm9 = vcmp.lt.s32.totalorder %v7906_v9, 125  ;;  %vm11668_vm5 = vcmp.eq.s32.totalorder %v2747_v56, 1  ;;  %vm11672_vm7 = vcmp.eq.s32.totalorder %v2748_v52, 1  ;;  %vm11676_vm0 = vcmp.eq.s32.totalorder %v2750_v45, 1  ;;  %v17078_v45 = vld [vmem:[#allocation61_spill] sm:$0xff]  ;;  %v17109_v52 = vld [vmem:[#allocation74_spill] sm:$0xff] }
 0x48b   : > { %v2664_v58 = vsel %vm17061_vm9, %v17060_v16, %v17047_v32  ;;  %vm17062_vm4 = vmmov %vm17061_vm9  ;;  %v2817_v54 = vperm.slane %v11650_v25, 1  ;;  %v11681_v36 = vadd.f32 %v2703_v2, %v2640_v60  ;;  %v2705_v14 = vmul.f32 %v17059_v38, %v2693_v39  ;;  %v17069_v32 = vld [vmem:[#allocation20_spill] sm:$0xff]  ;;  %v17079_v2 = vld [vmem:[#allocation43_spill] sm:$0xff] }
 0x48c   : > { %v2665_v28 = vsel %vm17062_vm4, %v17042_v53, %v17060_v16  ;;  %v17070_v53 = vld [vmem:[#allocation22_spill] sm:$0xff]  ;;  %vm17071_vm10 = vcmp.lt.s32.totalorder %v7906_v9, 115  ;;  %v11688_v56 = vadd.f32 %v2702_v57, %v2639_v13  ;;  %v11690_v8 = vadd.f32 %v2706_v22, %v2643_v37  ;;  %v11733_v16 = vpop.permute.xlu2 %3290 }
 0x48d   : > { %v2740_v50 = vsel %vm17071_vm10, %v17070_v53, %v17069_v32  ;;  %v11692_v19 = vadd.f32 %v2709_v6, %v2646_v10  ;;  %v2695_v62 = vsel %vm11565_vm11, %v2665_v28, 0.0  ;;  %v2696_v60 = vsel %vm11569_vm15, %v2664_v58, 0.0  ;;  %v17074_v13 = vld [vmem:[#allocation30_spill] sm:$0xff]  ;;  %vm17075_vm11 = vmmov %vm17071_vm10 }
 0x48e   : > { %vm11698_vm9 = vcmp.eq.s32.totalorder %v2751_v48, 1  ;;  %vm2805_vm4 = vcmp.lt.s32.totalorder %v7906_v9, 114  ;;  %v2820_v46 = vperm.slane %v11650_v25, 4  ;;  %v11707_v37 = vadd.f32 %v2704_v42, %v2641_v12  ;;  %vm17077_vm15 = vmmov %vm17071_vm10  ;;  %v17080_v22 = vld [vmem:[#allocation66_spill] sm:$0xff]  ;;  %v11731_v42 = vpop.permute.xlu1 %3359  ;;  %3580 = vrot.lane.b32.xlu2 %v16286_v55, %s6283_s23  ;;  %s6289_s23 = smov 82  }
 0x48f   : > { %v2741_v41 = vsel %vm17075_vm11, %v17074_v13, %v17070_v53  ;;  %v2742_v10 = vsel %vm17077_vm15, %v17076_v7, %v17074_v13  ;;  %v2737_v57 = vsel %vm17071_vm10, %v17079_v2, %v17078_v45  ;;  %v2816_v39 = vperm.slane %v11650_v25, 0  ;;  %vm17081_vm11 = vmmov %vm17071_vm10  ;;  %17082 = vst [vmem:[#allocation168_spill] sm:$0xff] %v11731_v42  ;;  %v11746_v13 = vpop.permute.xlu0 %3227  ;;  %3785 = vrot.lane.b32.xlu1 %v6861_v23, %s6289_s23 }
 0x490   : > { %v2762_v12 = vsel %vm11593_vm14, %v2740_v50, 0.0  ;;  %v2739_v6 = vsel %vm17081_vm11, %v17069_v32, %v17080_v22  ;;  %v2823_v48 = vperm.slane %v11650_v25, 7  ;;  %v2713_v58 = vadd.f32 %v2705_v14, %v2642_v31  ;;  %vm17083_vm14 = vmmov %vm17071_vm10  ;;  %3718 = vrot.lane.b32.xlu0 %v6988_v18, %s6287_s0 }
 0x491   : > { %v2707_v28 = vmul.f32 %v17059_v38, %v2695_v62  ;;  %v2708_v53 = vmul.f32 %v17059_v38, %v2696_v60  ;;  %v2738_v21 = vsel %vm17083_vm14, %v17080_v22, %v17079_v2  ;;  %vm11741_vm15 = vcmp.eq.s32.totalorder %v2817_v54, 1  ;;  %v17089_v60 = vld [vmem:[#allocation58_spill] sm:$0xff] }
 0x492   : > { %v2818_v32 = vperm.slane %v11650_v25, 2  ;;  %v2761_v31 = vsel %vm11618_vm6, %v2741_v41, 0.0  ;;  %v2768_v14 = vsel %vm11622_vm8, %v2742_v10, 0.0  ;;  %v2765_v38 = vsel %vm11626_vm12, %v2737_v57, 0.0  ;;  %v17093_v41 = vld [vmem:[#allocation17_spill] sm:$0xff] }
 0x493   : > { %vm11754_vm10 = vcmp.eq.s32.totalorder %v2820_v46, 1  ;;  %v2819_v54 = vperm.slane %v11650_v25, 3  ;;  %vm17088_vm11 = vnez %v16318_v20  ;;  %v2763_v47 = vsel %vm11668_vm5, %v2739_v6, 0.0 }
 0x494   : > { %vm2885_vm14 = vmand %vm11440_vm3, %vm17088_vm11  ;;  %vm17090_vm6 = vcmp.lt.s32.totalorder %v7906_v9, 115  ;;  %vm11769_vm12 = vcmp.eq.s32.totalorder %v2816_v39, 1  ;;  %v2821_v46 = vperm.slane %v11650_v25, 5  ;;  %v2774_v10 = vmul.f32 %v17093_v41, %v2762_v12 }
 0x495   : > { %v2736_v29 = vsel %vm17090_vm6, %v17078_v45, %v17089_v60  ;;  %v2764_v2 = vsel %vm11672_vm7, %v2738_v21, 0.0  ;;  %vm11777_vm8 = vcmp.eq.s32.totalorder %v2823_v48, 1  ;;  %v2773_v44 = vmul.f32 %v17093_v41, %v2761_v31  ;;  %vm17096_vm5 = vmmov %vm17090_vm6  ;;  %v11818_v21 = vpop.permute.xlu2 %3296 }
 0x496   : > { %v2777_v22 = vmul.f32 %v17093_v41, %v2765_v38  ;;  %v11784_v45 = vsel %vm2885_vm14, 1, %v16293_v63  ;;  %v2715_v39 = vadd.f32 %v2707_v28, %v2644_v26  ;;  %v11786_v6 = vadd.f32 %v2708_v53, %v2645_v30  ;;  %v11816_v53 = vpop.permute.xlu1 %3365 }
 0x497   : > { %v2780_v42 = vmul.f32 %v17093_v41, %v2768_v14  ;;  %v2735_v24 = vsel %vm17096_vm5, %v17089_v60, %v17076_v7  ;;  %v2766_v12 = vsel %vm11676_vm0, %v2736_v29, 0.0  ;;  %v2822_v48 = vperm.slane %v11650_v25, 6  ;;  %17103 = vst [vmem:[#allocation161_spill] sm:$0xff] %v11816_v53  ;;  %v17104_v60 = vld [vmem:[#allocation68_spill] sm:$0xff]  ;;  %v17105_v29 = vld [vmem:[#allocation33_spill] sm:$0xff]  ;;  %v17123_v7 = vld [vmem:[#allocation75_spill] sm:$0xff]  ;;  %3791 = vrot.lane.b32.xlu1 %v16285_v43, %s6289_s23 }
 0x498   : > { %v2775_v26 = vmul.f32 %v17093_v41, %v2763_v47  ;;  %vm11801_vm7 = vcmp.eq.s32.totalorder %v2818_v32, 1  ;;  %vm11805_vm14 = vcmp.eq.s32.totalorder %v2819_v54, 1  ;;  %vm11809_vm0 = vcmp.eq.s32.totalorder %v2821_v46, 1  ;;  %3724 = vrot.lane.b32.xlu0 %v16259_v11, %s6287_s0 }
 0x499   : > { %v6288_v25 = vmov 40   ;;  %v2776_v28 = vmul.f32 %v17093_v41, %v2764_v2  ;;  %v2888_v32 = vperm.slane %v11784_v45, 1  ;;  %v2782_v31 = vadd.f32 %v2774_v10, %v11681_v36  ;;  %v11832_v2 = vpop.permute.xlu0 %3286  ;;  %v17107_v10 = vld [vmem:[#allocation69_spill] sm:$0xff] }
 0x49a   : > { %6111 = vset.pattern.permute.xlu2 %v6288_v25  ;;  %v2781_v14 = vadd.f32 %v2773_v44, %v11688_v56  ;;  %v2785_v38 = vadd.f32 %v2777_v22, %v11690_v8  ;;  %v2767_v54 = vsel %vm11698_vm9, %v2735_v24, 0.0  ;;  %v2778_v47 = vmul.f32 %v17093_v41, %v2766_v12  ;;  %17106 = vst [vmem:[#allocation167_spill] sm:$0xff] %v11832_v2  ;;  %v17108_v56 = vld [vmem:[#allocation63_spill] sm:$0xff] }
 0x49b   : > { %v2811_v46 = vsel %vm2805_vm4, %v17105_v29, %v17104_v60  ;;  %v2788_v36 = vadd.f32 %v2780_v42, %v11692_v19  ;;  %v2808_v8 = vsel %vm2805_vm4, %v17108_v56, %v17107_v10  ;;  %v2810_v44 = vsel %vm2805_vm4, %v17104_v60, %v17109_v52  ;;  %v17112_v19 = vld [vmem:[#allocation72_spill] sm:$0xff]  ;;  %3622 = vperm.xlu2 %6111, %v11116_v17  }
 0x49c   : > { %vm11843_vm9 = vcmp.eq.s32.totalorder %v2822_v48, 1  ;;  %v2887_v24 = vperm.slane %v11784_v45, 0  ;;  %v2783_v12 = vadd.f32 %v2775_v26, %v11707_v37  ;;  %v2812_v42 = vsel %vm2805_vm4, %v17112_v19, %v17105_v29  ;;  %v17113_v37 = vld [vmem:[#allocation65_spill] sm:$0xff] }
 0x49d   : > { %v2809_v25 = vsel %vm2805_vm4, %v17109_v52, %v17108_v56  ;;  %v2784_v53 = vadd.f32 %v2776_v28, %v2713_v58  ;;  %v2891_v48 = vperm.slane %v11784_v45, 4  ;;  %v2779_v60 = vmul.f32 %v17093_v41, %v2767_v54  ;;  %v17117_v28 = vld [vmem:[#allocation188_spill] sm:$0xff]  ;;  %v17119_v56 = vld [vmem:[#allocation77_spill] sm:$0xff] }
 0x49e   : > { %v2833_v40 = vsel %vm11741_vm15, %v2811_v46, 0.0  ;;  %v2813_v26 = vsel %vm2805_vm4, %v17113_v37, %v17112_v19  ;;  %vm11865_vm5 = vcmp.eq.s32.totalorder %v2888_v32, 1  ;;  %v17114_v29 = vmov 0 }
 0x49f   : > { %v17115_v29 = vsel %vm11865_vm5, 4294967295, %v17114_v29  ;;  %v2894_v2 = vperm.slane %v11784_v45, 7  ;;  %v2836_v58 = vsel %vm11754_vm10, %v2808_v8, 0.0  ;;  %v2834_v41 = vsel %vm11801_vm7, %v2810_v44, 0.0  ;;  %v11907_v44 = vpop.permute.xlu1 %3371  ;;  %3797 = vrot.lane.b32.xlu1 %v7056_v34, %s6289_s23 }
 0x4a0   : > { %17116 = vst [vmem:[#allocation157_spill] sm:$0xff] %v17115_v29  ;;  %vm17118_vm6 = vnez %v17117_v28  ;;  %v2889_v50 = vperm.slane %v11784_v45, 2  ;;  %v2786_v54 = vadd.f32 %v2778_v47, %v2715_v39  ;;  %v2832_v32 = vsel %vm11769_vm12, %v2812_v42, 0.0  ;;  %3783 = vrot.lane.b32.xlu0 %v16294_v51, %s6289_s23 }
 0x4a1   : > { %vm2956_vm15 = vmand %vm11440_vm3, %vm17118_vm6  ;;  %v2835_v46 = vsel %vm11805_vm14, %v2809_v25, 0.0  ;;  %v2807_v62 = vsel %vm2805_vm4, %v17107_v10, %v17119_v56  ;;  %vm11891_vm10 = vcmp.eq.s32.totalorder %v2887_v24, 1  ;;  %v17120_v30 = vmov 0  ;;  %17127 = vst [vmem:[#allocation173_spill] sm:$0xff] %v11907_v44  ;;  %v11909_v24 = vpop.permute.xlu2 %3338  ;;  %v17139_v44 = vld [vmem:[#allocation71_spill] sm:$0xff] }
 0x4a2   : > { %v17121_v30 = vsel %vm11891_vm10, 4294967295, %v17120_v30  ;;  %v2890_v1 = vperm.slane %v11784_v45, 3  ;;  %v2839_v39 = vsel %vm11777_vm8, %v2813_v26, 0.0  ;;  %v2845_v47 = vmul.f32 %v17123_v7, %v2833_v40  ;;  %17128 = vst [vmem:[#allocation163_spill] sm:$0xff] %v11909_v24  ;;  %v17140_v24 = vld [vmem:[#allocation26_spill] sm:$0xff] }
 0x4a3   : > { %17122 = vst [vmem:[#allocation160_spill] sm:$0xff] %v17121_v30  ;;  %v2844_v10 = vmul.f32 %v17123_v7, %v2832_v32  ;;  %vm11902_vm12 = vcmp.eq.s32.totalorder %v2891_v48, 1  ;;  %v17124_v8 = vmov 0  ;;  %v2848_v52 = vmul.f32 %v17123_v7, %v2836_v58  ;;  %v11926_v48 = vpop.permute.xlu0 %3292  ;;  %3645 = vrot.lane.b32.xlu2 %v6923_v49, %s6285_s30 }
 0x4a4   : > { %v17125_v8 = vsel %vm11902_vm12, 4294967295, %v17124_v8  ;;  %v11917_v57 = vsel %vm2956_vm15, 1, %v16293_v63  ;;  %v2846_v40 = vmul.f32 %v17123_v7, %v2834_v41  ;;  %v2851_v19 = vmul.f32 %v17123_v7, %v2839_v39  ;;  %17129 = vst [vmem:[#allocation174_spill] sm:$0xff] %v11926_v48  ;;  %v17142_v48 = vld [vmem:[#allocation85_spill] sm:$0xff] }
 0x4a5   : > { %17126 = vst [vmem:[#allocation171_spill] sm:$0xff] %v17125_v8  ;;  %v11922_v42 = vadd.f32 %v2779_v60, %v11786_v6  ;;  %v2837_v25 = vsel %vm11809_vm0, %v2807_v62, 0.0  ;;  %vm11928_vm8 = vcmp.eq.s32.totalorder %v2889_v50, 1  ;;  %v17130_v26 = vmov 0 }
 0x4a6   : > { %v17131_v26 = vsel %vm11928_vm8, 4294967295, %v17130_v26  ;;  %v2847_v58 = vmul.f32 %v17123_v7, %v2835_v46  ;;  %vm11933_vm7 = vcmp.eq.s32.totalorder %v2894_v2, 1  ;;  %v17133_v32 = vmov 0 }
 0x4a7   : > { %17132 = vst [vmem:[#allocation177_spill] sm:$0xff] %v17131_v26  ;;  %v17134_v32 = vsel %vm11933_vm7, 4294967295, %v17133_v32  ;;  %v2806_v6 = vsel %vm2805_vm4, %v17119_v56, %v17113_v37  ;;  %vm11941_vm14 = vcmp.eq.s32.totalorder %v2890_v1, 1  ;;  %v17136_v35 = vmov 0  ;;  %v17179_v26 = vld [vmem:[#allocation78_spill] sm:$0xff]  ;;  %3856 = vrot.lane.b32.xlu1 %v6861_v23, %s6291_s21 }
 0x4a8   : > { %17135 = vst [vmem:[#allocation170_spill] sm:$0xff] %v17134_v32  ;;  %v17137_v35 = vsel %vm11941_vm14, 4294967295, %v17136_v35  ;;  %v2892_v60 = vperm.slane %v11784_v45, 5  ;;  %v2893_v41 = vperm.slane %v11784_v45, 6  ;;  %v2853_v50 = vadd.f32 %v2845_v47, %v2782_v31  ;;  %v17145_v47 = vld [vmem:[#allocation28_spill] sm:$0xff]  ;;  %3789 = vrot.lane.b32.xlu0 %v6988_v18, %s6289_s23 }
 0x4a9   : > { %17138 = vst [vmem:[#allocation176_spill] sm:$0xff] %v17137_v35  ;;  %v2852_v62 = vadd.f32 %v2844_v10, %v2781_v14  ;;  %v2959_v2 = vperm.slane %v11917_v57, 1  ;;  %v2856_v46 = vadd.f32 %v2848_v52, %v2785_v38  ;;  %v2849_v39 = vmul.f32 %v17123_v7, %v2837_v25  ;;  %v17144_v38 = vld [vmem:[#allocation76_spill] sm:$0xff]  ;;  %v11996_v25 = vpop.permute.xlu1 %3430 }
 0x4aa   : > { %vm17141_vm0 = vcmp.lt.s32.totalorder %v7906_v9, 113  ;;  %v11953_v56 = vadd.f32 %v2846_v40, %v2783_v12  ;;  %v2859_v1 = vadd.f32 %v2851_v19, %v2788_v36  ;;  %v2838_v28 = vsel %vm11843_vm9, %v2806_v6, 0.0  ;;  %v17153_v10 = vld [vmem:[#allocation40_spill] sm:$0xff]  ;;  %17156 = vst [vmem:[#allocation189_spill] sm:$0xff] %v11996_v25 }
 0x4ab   : > { %v2882_v37 = vsel %vm17141_vm0, %v17140_v24, %v17139_v44  ;;  %vm17143_vm4 = vmmov %vm17141_vm0  ;;  %v2958_v31 = vperm.slane %v11917_v57, 0  ;;  %v2855_v14 = vadd.f32 %v2847_v58, %v2784_v53  ;;  %v2883_v12 = vsel %vm17141_vm0, %v17144_v38, %v17140_v24  ;;  %3651 = vrot.lane.b32.xlu2 %v16286_v55, %s6285_s30  ;;  %s6301_s30 = smov 77  }
 0x4ac   : > { %v2881_v45 = vsel %vm17143_vm4, %v17139_v44, %v17142_v48  ;;  %vm17146_vm6 = vmmov %vm17141_vm0  ;;  %vm11974_vm9 = vcmp.eq.s32.totalorder %v2892_v60, 1  ;;  %v17147_v22 = vmov 0  ;;  %vm11978_vm4 = vcmp.eq.s32.totalorder %v2893_v41, 1  ;;  %v17154_v44 = vld [vmem:[#allocation83_spill] sm:$0xff] }
 0x4ad   : > { %v2880_v36 = vsel %vm17146_vm6, %v17142_v48, %v17145_v47  ;;  %v17148_v22 = vsel %vm11974_vm9, 4294967295, %v17147_v22  ;;  %v17150_v53 = vmov 0  ;;  %v2884_v52 = vsel %vm17141_vm0, %v17153_v10, %v17144_v38  ;;  %vm17155_vm6 = vmmov %vm17141_vm0  ;;  %v11998_v48 = vpop.permute.xlu2 %3361 }
 0x4ae   : > { %17149 = vst [vmem:[#allocation166_spill] sm:$0xff] %v17148_v22  ;;  %v17151_v53 = vsel %vm11978_vm4, 4294967295, %v17150_v53  ;;  %v2879_v24 = vsel %vm17155_vm6, %v17145_v47, %v17154_v44  ;;  %v2904_v17 = vsel %vm11865_vm5, %v2882_v37, 0.0  ;;  %v2962_v40 = vperm.slane %v11917_v57, 4  ;;  %vm3027_vm6 = vmand %vm11440_vm3, %vm16632_vm1  ;;  %v17196_v22 = vld [vmem:[#allocation92_spill] sm:$0xff] }
 0x4af   : > { %17152 = vst [vmem:[#allocation169_spill] sm:$0xff] %v17151_v53  ;;  %v2850_v19 = vmul.f32 %v17123_v7, %v2838_v28  ;;  %vm12000_vm0 = vcmp.eq.s32.totalorder %v2959_v2, 1  ;;  %v17157_v58 = vmov 0  ;;  %v2905_v6 = vsel %vm11928_vm8, %v2881_v45, 0.0  ;;  %v12013_v7 = vpop.permute.xlu0 %3298  ;;  %v17198_v53 = vld [vmem:[#allocation110_spill] sm:$0xff]  ;;  %3862 = vrot.lane.b32.xlu1 %v16285_v43, %s6291_s21 }
 0x4b0   : > { %v17158_v58 = vsel %vm12000_vm0, 4294967295, %v17157_v58  ;;  %v12010_v60 = vadd.f32 %v2849_v39, %v2786_v54  ;;  %v2965_v28 = vperm.slane %v11917_v57, 7  ;;  %v2903_v41 = vsel %vm11891_vm10, %v2883_v12, 0.0  ;;  %v17163_v54 = vld [vmem:[#allocation82_spill] sm:$0xff]  ;;  %3795 = vrot.lane.b32.xlu0 %v16259_v11, %s6289_s23 }
 0x4b1   : > { %17159 = vst [vmem:[#allocation180_spill] sm:$0xff] %v17158_v58  ;;  %vm12017_vm15 = vcmp.eq.s32.totalorder %v2958_v31, 1  ;;  %v17160_v2 = vmov 0  ;;  %v2960_v37 = vperm.slane %v11917_v57, 2  ;;  %v2906_v38 = vsel %vm11941_vm14, %v2880_v36, 0.0  ;;  %v17203_v58 = vld [vmem:[#allocation109_spill] sm:$0xff] }
 0x4b2   : > { %v17161_v2 = vsel %vm12017_vm15, 4294967295, %v17160_v2  ;;  %v2961_v45 = vperm.slane %v11917_v57, 3  ;;  %v2916_v39 = vmul.f32 %v17163_v54, %v2904_v17  ;;  %v2915_v47 = vmul.f32 %v17163_v54, %v2903_v41  ;;  %v17167_v41 = vld [vmem:[#allocation104_spill] sm:$0xff] }
 0x4b3   : > { %17162 = vst [vmem:[#allocation182_spill] sm:$0xff] %v17161_v2  ;;  %v2907_v29 = vsel %vm11902_vm12, %v2879_v24, 0.0  ;;  %v2910_v31 = vsel %vm11933_vm7, %v2884_v52, 0.0  ;;  %v12032_v12 = vsel %vm3027_vm6, 1, %v16293_v63  ;;  %v2917_v30 = vmul.f32 %v17163_v54, %v2905_v6 }
 0x4b4   : > { %v2919_v35 = vmul.f32 %v17163_v54, %v2907_v29  ;;  %vm12036_vm14 = vcmp.eq.s32.totalorder %v2962_v40, 1  ;;  %v17164_v36 = vmov 0  ;;  %v2922_v17 = vmul.f32 %v17163_v54, %v2910_v31 }
 0x4b5   : > { %v17165_v36 = vsel %vm12036_vm14, 4294967295, %v17164_v36  ;;  %vm17168_vm12 = vcmp.lt.s32.totalorder %v7906_v9, 113  ;;  %v2918_v52 = vmul.f32 %v17163_v54, %v2906_v38  ;;  %v2963_v32 = vperm.slane %v11917_v57, 5 }
 0x4b6   : > { %17166 = vst [vmem:[#allocation172_spill] sm:$0xff] %v17165_v36  ;;  %v2878_v24 = vsel %vm17168_vm12, %v17154_v44, %v17167_v41  ;;  %vm12047_vm6 = vcmp.eq.s32.totalorder %v2960_v37, 1  ;;  %v17169_v8 = vmov 0  ;;  %vm12051_vm7 = vcmp.eq.s32.totalorder %v2961_v45, 1 }
 0x4b7   : > { %v17170_v8 = vsel %vm12047_vm6, 4294967295, %v17169_v8  ;;  %v17172_v29 = vmov 0  ;;  %vm12055_vm10 = vcmp.eq.s32.totalorder %v2965_v28, 1  ;;  %v17175_v40 = vmov 0  ;;  %3866 = vrot.lane.b32.xlu1 %v16259_v11, %s6291_s21  ;;  %v17336_v11 = vld [vmem:[#allocation145_spill] sm:$0xff] }
 0x4b8   : > { %17171 = vst [vmem:[#allocation183_spill] sm:$0xff] %v17170_v8  ;;  %v17173_v29 = vsel %vm12051_vm7, 4294967295, %v17172_v29  ;;  %v17176_v40 = vsel %vm12055_vm10, 4294967295, %v17175_v40  ;;  %v12060_v6 = vadd.f32 %v2850_v19, %v11922_v42  ;;  %v2877_v44 = vsel %vm17168_vm12, %v17167_v41, %v17153_v10  ;;  %v17178_v41 = vld [vmem:[#allocation101_spill] sm:$0xff]  ;;  %3854 = vrot.lane.b32.xlu0 %v16294_v51, %s6291_s21 }
 0x4b9   : > { %17174 = vst [vmem:[#allocation186_spill] sm:$0xff] %v17173_v29  ;;  %v12070_v37 = vadd.f32 %v2916_v39, %v2853_v50  ;;  %v2923_v28 = vadd.f32 %v2915_v47, %v2852_v62  ;;  %v2964_v38 = vperm.slane %v11917_v57, 6  ;;  %v6290_v42 = vmov 41   ;;  %v12084_v62 = vpop.permute.xlu1 %3436  ;;  %v12086_v57 = vpop.permute.xlu2 %3367 }
 0x4ba   : > { %17177 = vst [vmem:[#allocation175_spill] sm:$0xff] %v17176_v40  ;;  %6112 = vset.pattern.permute.xlu2 %v6290_v42  ;;  %v3030_v19 = vperm.slane %v12032_v12, 1  ;;  %v12076_v10 = vadd.f32 %v2919_v35, %v2856_v46  ;;  %v2908_v45 = vsel %vm11974_vm9, %v2878_v24, 0.0  ;;  %v2930_v31 = vadd.f32 %v2922_v17, %v2859_v1  ;;  %v17186_v35 = vld [vmem:[#allocation100_spill] sm:$0xff]  ;;  %v17188_v1 = vld [vmem:[#allocation107_spill] sm:$0xff]  ;;  %v12102_v24 = vpop.permute.xlu0 %3357 }
 0x4bb   : > { %vm17180_vm12 = vcmp.lt.s32.totalorder %v7906_v9, 112  ;;  %17181 = vst [vmem:[#allocation187_spill] sm:$0xff] %v12084_v62  ;;  %v2925_v39 = vadd.f32 %v2917_v30, %v11953_v56  ;;  %v2926_v47 = vadd.f32 %v2918_v52, %v2855_v14  ;;  %vm12089_vm5 = vcmp.eq.s32.totalorder %v2963_v32, 1  ;;  %v17191_v56 = vld [vmem:[#allocation84_spill] sm:$0xff] }
 0x4bc   : > { %v2953_v50 = vsel %vm17180_vm12, %v17179_v26, %v17178_v41  ;;  %17182 = vst [vmem:[#allocation179_spill] sm:$0xff] %v12086_v57  ;;  %v17183_v42 = vmov 0  ;;  %vm17187_vm9 = vmmov %vm17180_vm12  ;;  %v3029_v30 = vperm.slane %v12032_v12, 0  ;;  %v2909_v32 = vsel %vm11978_vm4, %v2877_v44, 0.0  ;;  %v17204_v57 = vld [vmem:[#allocation114_spill] sm:$0xff] }
 0x4bd   : > { %v17184_v42 = vsel %vm12089_vm5, 4294967295, %v17183_v42  ;;  %v2954_v46 = vsel %vm17187_vm9, %v17186_v35, %v17179_v26  ;;  %vm17189_vm12 = vmmov %vm17187_vm9  ;;  %17190 = vst [vmem:[#allocation192_spill] sm:$0xff] %v12102_v24  ;;  %v3033_v26 = vperm.slane %v12032_v12, 4  ;;  %v2920_v52 = vmul.f32 %v17163_v54, %v2908_v45 }
 0x4be   : > { %17185 = vst [vmem:[#allocation178_spill] sm:$0xff] %v17184_v42  ;;  %v2952_v17 = vsel %vm17189_vm12, %v17178_v41, %v17188_v1  ;;  %vm17192_vm1 = vmmov %vm17187_vm9  ;;  %vm12113_vm9 = vcmp.eq.s32.totalorder %v2964_v38, 1  ;;  %v17193_v41 = vmov 0  ;;  %v3036_v25 = vperm.slane %v12032_v12, 7  ;;  %v17223_v42 = vld [vmem:[#allocation102_spill] sm:$0xff] }
 0x4bf   : > { %v2951_v14 = vsel %vm17192_vm1, %v17188_v1, %v17191_v56  ;;  %v17194_v41 = vsel %vm12113_vm9, 4294967295, %v17193_v41  ;;  %vm17197_vm12 = vmmov %vm17192_vm1  ;;  %v2975_v1 = vsel %vm12000_vm0, %v2953_v50, 0.0  ;;  %v2974_v38 = vsel %vm12017_vm15, %v2954_v46, 0.0 }
 0x4c0   : > { %17195 = vst [vmem:[#allocation198_spill] sm:$0xff] %v17194_v41  ;;  %v2955_v62 = vsel %vm17197_vm12, %v17196_v22, %v17186_v35  ;;  %vm17199_vm8 = vmmov %vm17192_vm1  ;;  %vm12134_vm4 = vcmp.eq.s32.totalorder %v3030_v19, 1  ;;  %v17200_v45 = vmov 0  ;;  %v2976_v35 = vsel %vm12047_vm6, %v2952_v17, 0.0  ;;  %3860 = vrot.lane.b32.xlu0 %v6988_v18, %s6291_s21 }
 0x4c1   : > { %v2950_v44 = vsel %vm17199_vm8, %v17191_v56, %v17198_v53  ;;  %vm3098_vm1 = vmand %vm11440_vm3, %vm16907_vm13  ;;  %v17201_v45 = vsel %vm12134_vm4, 4294967295, %v17200_v45  ;;  %v3031_v56 = vperm.slane %v12032_v12, 2  ;;  %v2921_v50 = vmul.f32 %v17163_v54, %v2909_v32 }
 0x4c2   : > { %17202 = vst [vmem:[#allocation181_spill] sm:$0xff] %v17201_v45  ;;  %v2949_v61 = vsel %vm17199_vm8, %v17198_v53, %v17203_v58  ;;  %v2986_v24 = vmul.f32 %v17204_v57, %v2974_v38  ;;  %vm12147_vm12 = vcmp.eq.s32.totalorder %v3029_v30, 1  ;;  %v17205_v46 = vmov 0 }
 0x4c3   : > { %v17206_v46 = vsel %vm12147_vm12, 4294967295, %v17205_v46  ;;  %v2977_v19 = vsel %vm12051_vm7, %v2951_v14, 0.0  ;;  %v3032_v17 = vperm.slane %v12032_v12, 3  ;;  %v2987_v54 = vmul.f32 %v17204_v57, %v2975_v1 }
 0x4c4   : > { %17207 = vst [vmem:[#allocation201_spill] sm:$0xff] %v17206_v46  ;;  %v2978_v53 = vsel %vm12036_vm14, %v2950_v44, 0.0  ;;  %vm12161_vm8 = vcmp.eq.s32.totalorder %v3033_v26, 1  ;;  %v17208_v30 = vmov 0  ;;  %v2928_v32 = vadd.f32 %v2920_v52, %v12010_v60  ;;  %v12181_v52 = vpop.permute.xlu1 %3442 }
 0x4c5   : > { %v17209_v30 = vsel %vm12161_vm8, 4294967295, %v17208_v30  ;;  %v2981_v14 = vsel %vm12055_vm10, %v2955_v62, 0.0  ;;  %v12174_v38 = vsel %vm3098_vm1, 1, %v16293_v63  ;;  %v2988_v26 = vmul.f32 %v17204_v57, %v2976_v35  ;;  %17211 = vst [vmem:[#allocation185_spill] sm:$0xff] %v12181_v52  ;;  %v12183_v62 = vpop.permute.xlu2 %3409 }
 0x4c6   : > { %17210 = vst [vmem:[#allocation210_spill] sm:$0xff] %v17209_v30  ;;  %v2990_v44 = vmul.f32 %v17204_v57, %v2978_v53  ;;  %v2993_v60 = vmul.f32 %v17204_v57, %v2981_v14  ;;  %v2989_v1 = vmul.f32 %v17204_v57, %v2977_v19  ;;  %v2979_v40 = vsel %vm12089_vm5, %v2949_v61, 0.0  ;;  %v12197_v53 = vpop.permute.xlu0 %3363 }
 0x4c7   : > { %vm12188_vm1 = vcmp.eq.s32.totalorder %v3036_v25, 1  ;;  %v17212_v36 = vmov 0  ;;  %v2929_v29 = vadd.f32 %v2921_v50, %v12060_v6  ;;  %vm17215_vm10 = vcmp.lt.s32.totalorder %v7906_v9, 112 }
 0x4c8   : > { %v17213_v36 = vsel %vm12188_vm1, 4294967295, %v17212_v36  ;;  %v2948_v35 = vsel %vm17215_vm10, %v17203_v58, %v17196_v22  ;;  %v12199_v14 = vadd.f32 %v2986_v24, %v2923_v28  ;;  %vm12201_vm14 = vcmp.eq.s32.totalorder %v3031_v56, 1  ;;  %3864 = vrot.lane.b32.xlu0 %v16286_v55, %s6291_s21 }
 0x4c9   : > { %17214 = vst [vmem:[#allocation190_spill] sm:$0xff] %v17213_v36  ;;  %v17216_v19 = vmov 0  ;;  %vm12205_vm5 = vcmp.eq.s32.totalorder %v3032_v17, 1  ;;  %v17219_v61 = vmov 0  ;;  %v3101_v25 = vperm.slane %v12174_v38, 1  ;;  %v17222_v17 = vld [vmem:[#allocation119_spill] sm:$0xff] }
 0x4ca   : > { %v17217_v19 = vsel %vm12201_vm14, 4294967295, %v17216_v19  ;;  %v17220_v61 = vsel %vm12205_vm5, 4294967295, %v17219_v61  ;;  %v12211_v6 = vadd.f32 %v2987_v54, %v12070_v37  ;;  %v3034_v50 = vperm.slane %v12032_v12, 5 }
 0x4cb   : > { %17218 = vst [vmem:[#allocation212_spill] sm:$0xff] %v17217_v19  ;;  %v3035_v22 = vperm.slane %v12032_v12, 6  ;;  %v12215_v58 = vadd.f32 %v2988_v26, %v2925_v39  ;;  %v2991_v28 = vmul.f32 %v17204_v57, %v2979_v40  ;;  %v12219_v24 = vadd.f32 %v2990_v44, %v12076_v10  ;;  %v4965_v12 = vld [vmem:[%s15177_s5] sm:$0xf]  ;;  %v17225_v10 = vld [vmem:[#allocation112_spill] sm:$0xff] }
 0x4cc   : > { %17221 = vst [vmem:[#allocation191_spill] sm:$0xff] %v17220_v61  ;;  %v12221_v56 = vadd.f32 %v2993_v60, %v2930_v31  ;;  %vm17224_vm10 = vcmp.lt.s32.totalorder %v7906_v9, 111  ;;  %v3100_v37 = vperm.slane %v12174_v38, 0  ;;  %v12232_v39 = vadd.f32 %v2989_v1, %v2926_v47  ;;  %v17229_v47 = vld [vmem:[#allocation106_spill] sm:$0xff] }
 0x4cd   : > { %v3024_v8 = vsel %vm17224_vm10, %v17223_v42, %v17222_v17  ;;  %v2980_v40 = vsel %vm12113_vm9, %v2948_v35, 0.0  ;;  %vm17226_vm6 = vmmov %vm17224_vm10  ;;  %v3107_v26 = vperm.slane %v12174_v38, 7  ;;  %v3104_v44 = vperm.slane %v12174_v38, 4  ;;  %v17231_v1 = vld [vmem:[#allocation122_spill] sm:$0xff]  ;;  %v17232_v35 = vld [vmem:[#allocation111_spill] sm:$0xff] }
 0x4ce   : > { %v3025_v31 = vsel %vm17226_vm6, %v17225_v10, %v17223_v42  ;;  %vm17227_vm10 = vmmov %vm17226_vm6  ;;  %vm17228_vm7 = vcmask 31744   ;;  %v3021_v42 = vsel %vm17226_vm6, %v17232_v35, %v17231_v1  ;;  %v12283_v34 = vadd.f32 %v2991_v28, %v2928_v32 }
 0x4cf   : > { %v3023_v54 = vsel %vm17227_vm10, %v17222_v17, %v10809_v0  ;;  %5842 = vmatmul.msk.f32.vlgmr.msra.gmra.mxu0 %vm17228_vm7, %v4965_v12  ;;  %vm17230_vm9 = vmmov %vm17226_vm6  ;;  %v12260_v17 = vld [vmem:[%s15176_s4] sm:$0xff]  ;;  %vm12263_vm7 = vcmp.eq.s32.totalorder %v3034_v50, 1  ;;  %v17233_v12 = vmov 0  ;;  %v3046_v50 = vsel %vm12134_vm4, %v3024_v8, 0.0  ;;  %v12298_v8 = vpop.permute.xlu2 %3432 }
 0x4d0   : > { %v3026_v60 = vsel %vm17230_vm9, %v17229_v47, %v17225_v10  ;;  %3693 = vperm.xlu2 %6112, %v12260_v17   ;;  %v17234_v12 = vsel %vm12263_vm7, 4294967295, %v17233_v12  ;;  %vm12267_vm9 = vcmp.eq.s32.totalorder %v3035_v22, 1  ;;  %v17236_v10 = vmov 0  ;;  %vm17239_vm10 = vmmov %vm17226_vm6 }
 0x4d1   : > { %17235 = vst [vmem:[#allocation215_spill] sm:$0xff] %v17234_v12  ;;  %v17237_v10 = vsel %vm12267_vm9, 4294967295, %v17236_v10  ;;  %v3022_v41 = vsel %vm17239_vm10, %v10809_v0, %v17232_v35  ;;  %vm12275_vm6 = vcmp.eq.s32.totalorder %v3101_v25, 1  ;;  %v2992_v22 = vmul.f32 %v17204_v57, %v2980_v40  ;;  %v12296_v35 = vpop.permute.xlu1 %3501  ;;  %v17277_v12 = vld [vmem:[#allocation120_spill] sm:$0xff] }
 0x4d2   : > { %17238 = vst [vmem:[#allocation218_spill] sm:$0xff] %v17237_v10  ;;  %vm12286_vm0 = vcmp.eq.s32.totalorder %v3100_v37, 1  ;;  %v3102_v0 = vperm.slane %v12174_v38, 2  ;;  %v3103_v25 = vperm.slane %v12174_v38, 3  ;;  %vm17244_vm10 = vnez %v16444_v15 }
 0x4d3   : > { %vm3169_vm15 = vmand %vm11440_vm3, %vm17244_vm10  ;;  %17245 = vst [vmem:[#allocation217_spill] sm:$0xff] %v12296_v35  ;;  %v3045_v57 = vsel %vm12147_vm12, %v3025_v31, 0.0  ;;  %v3047_v32 = vsel %vm12201_vm14, %v3023_v54, 0.0  ;;  %vm12304_vm4 = vcmp.eq.s32.totalorder %v3107_v26, 1  ;;  %vm12308_vm13 = vcmp.eq.s32.totalorder %v3104_v44, 1  ;;  %v12314_v35 = vpop.permute.xlu0 %3369 }
 0x4d4   : > { %v3105_v40 = vperm.slane %v12174_v38, 5  ;;  %v3106_v45 = vperm.slane %v12174_v38, 6  ;;  %v3049_v31 = vsel %vm12161_vm8, %v3021_v42, 0.0  ;;  %v3052_v54 = vsel %vm12188_vm1, %v3026_v60, 0.0 }
 0x4d5   : > { %v3057_v26 = vmul.f32 %v10803_v5, %v3045_v57  ;;  %v3058_v19 = vmul.f32 %v10803_v5, %v3046_v50  ;;  %v3048_v44 = vsel %vm12205_vm5, %v3022_v41, 0.0  ;;  %v3061_v46 = vmul.f32 %v10803_v5, %v3049_v31  ;;  %v17250_v50 = vld [vmem:[#allocation126_spill] sm:$0xff] }
 0x4d6   : > { %v12331_v38 = vsel %vm3169_vm15, 1, %v16293_v63  ;;  %v3059_v42 = vmul.f32 %v10803_v5, %v3047_v32  ;;  %v3064_v60 = vmul.f32 %v10803_v5, %v3052_v54  ;;  %v12335_v57 = vadd.f32 %v2992_v22, %v2929_v29  ;;  %v17262_v54 = vld [vmem:[#allocation115_spill] sm:$0xff] }
 0x4d7   : > { %vm17251_vm1 = vcmp.lt.s32.totalorder %v7906_v9, 111  ;;  %vm12341_vm8 = vcmp.eq.s32.totalorder %v3102_v0, 1  ;;  %vm12345_vm5 = vcmp.eq.s32.totalorder %v3103_v25, 1  ;;  %vm12353_vm15 = vcmp.eq.s32.totalorder %v3105_v40, 1 }
 0x4d8   : > { %v3020_v41 = vsel %vm17251_vm1, %v17231_v1, %v17250_v50  ;;  %vm17256_vm3 = vmmov %vm17251_vm1  ;;  %vm12357_vm14 = vcmp.eq.s32.totalorder %v3106_v45, 1  ;;  %v17261_v1 = vld [vmem:[#allocation148_spill] sm:$0xff]  ;;  %v3060_v0 = vmul.f32 %v10803_v5, %v3048_v44  ;;  %v3172_v25 = vperm.slane %v12331_v38, 1  ;;  %3716 = vrot.lane.b32.xlu2 %v6923_v49, %s6287_s0  ;;  %v17263_v44 = vld [vmem:[#allocation117_spill] sm:$0xff] }
 0x4d9   : > { %v3019_v32 = vsel %vm17256_vm3, %v17250_v50, %v17229_v47  ;;  %v12370_v45 = vadd.f32 %v3057_v26, %v12199_v14  ;;  %v12373_v47 = vadd.f32 %v3058_v19, %v12211_v6  ;;  %v12376_v40 = vadd.f32 %v3061_v46, %v12219_v24  ;;  %v17265_v46 = vld [vmem:[#allocation118_spill] sm:$0xff]  ;;  %v17267_v24 = vld [vmem:[#allocation135_spill] sm:$0xff] }
 0x4da   : > { %vm17264_vm3 = vcmp.lt.s32.totalorder %v7906_v9, 110  ;;  %v6292_v36 = vmov 42   ;;  %v3067_v30 = vadd.f32 %v3059_v42, %v12215_v58  ;;  %v3050_v14 = vsel %vm12263_vm7, %v3020_v41, 0.0  ;;  %v12408_v42 = vpop.permute.xlu2 %3438  ;;  %v17275_v41 = vld [vmem:[#allocation123_spill] sm:$0xff] }
 0x4db   : > { %v3095_v50 = vsel %vm17264_vm3, %v17263_v44, %v17262_v54  ;;  %6113 = vset.pattern.permute.xlu2 %v6292_v36  ;;  %v3072_v19 = vadd.f32 %v3064_v60, %v12221_v56  ;;  %vm17266_vm1 = vmmov %vm17264_vm3  ;;  %vm3160_vm12 = vcmp.lt.s32.totalorder %v7906_v9, 109  ;;  %v3171_v36 = vperm.slane %v12331_v38, 0  ;;  %v12406_v56 = vpop.permute.xlu1 %3507  ;;  %17274 = vst [vmem:[#allocation220_spill] sm:$0xff] %v12408_v42  ;;  %v12421_v23 = vpop.permute.xlu0 %3428 }
 0x4dc   : > { %v3096_v6 = vsel %vm17266_vm1, %v17265_v46, %v17263_v44  ;;  %vm17268_vm3 = vmmov %vm17266_vm1  ;;  %vm17269_vm10 = vcmp.lt.s32.totalorder %v17261_v1, 14  ;;  %vm17270_vm7 = vcmp.ge.s32.totalorder %v17261_v1, 4294967294  ;;  %17273 = vst [vmem:[#allocation197_spill] sm:$0xff] %v12406_v56  ;;  %v3051_v60 = vsel %vm12267_vm9, %v3019_v32, 0.0  ;;  %v17276_v44 = vld [vmem:[#allocation128_spill] sm:$0xff] }
 0x4dd   : > { %v3094_v26 = vsel %vm17268_vm3, %v17262_v54, %v17267_v24  ;;  %vm12402_vm11 = vmand %vm17270_vm7, %vm17269_vm10  ;;  %v3097_v54 = vsel %vm17266_vm1, %v17275_v41, %v17265_v46  ;;  %v3178_v61 = vperm.slane %v12331_v38, 7  ;;  %v3068_v15 = vadd.f32 %v3060_v0, %v12232_v39  ;;  %v17282_v0 = vld [vmem:[#allocation194_spill] sm:$0xff] }
 0x4de   : > { %vm17278_vm3 = vmmov %vm17266_vm1  ;;  %v3117_v10 = vsel %vm12275_vm6, %v3095_v50, 0.0  ;;  %v3175_v46 = vperm.slane %v12331_v38, 4  ;;  %v3062_v56 = vmul.f32 %v10803_v5, %v3050_v14  ;;  %v3116_v42 = vsel %vm12286_vm0, %v3096_v6, 0.0  ;;  %v17286_v14 = vld [vmem:[#allocation124_spill] sm:$0xff] }
 0x4df   : > { %v3092_v1 = vsel %vm17278_vm3, %v17277_v12, %v17276_v44  ;;  %vm17279_vm7 = vmmov %vm17266_vm1  ;;  %v3118_v52 = vsel %vm12341_vm8, %v3094_v26, 0.0  ;;  %vm12436_vm10 = vcmp.eq.s32.totalorder %v3172_v25, 1  ;;  %v3173_v2 = vperm.slane %v12331_v38, 2  ;;  %v17287_v26 = vld [vmem:[#allocation133_spill] sm:$0xff] }
 0x4e0   : > { %v3093_v32 = vsel %vm17279_vm7, %v17267_v24, %v17277_v12  ;;  %vm17283_vm6 = vnez %v17282_v0  ;;  %v3063_v12 = vmul.f32 %v10803_v5, %v3051_v60  ;;  %v3123_v3 = vsel %vm12304_vm4, %v3097_v54, 0.0  ;;  %vm17288_vm8 = vmmov %vm17278_vm3  ;;  %3722 = vrot.lane.b32.xlu2 %v16286_v55, %s6287_s0  ;;  %s6295_s0 = smov 80  }
 0x4e1   : > { %vm3240_vm1 = vmand %vm12402_vm11, %vm17283_vm6  ;;  %v3120_v31 = vsel %vm12308_vm13, %v3092_v1, 0.0  ;;  %vm12450_vm0 = vcmp.eq.s32.totalorder %v3171_v36, 1  ;;  %v3174_v50 = vperm.slane %v12331_v38, 3  ;;  %v3128_v6 = vmul.f32 %v17286_v14, %v3116_v42  ;;  %3925 = vrot.lane.b32.xlu1 %v16294_v51, %s6295_s0 }
 0x4e2   : > { %v3119_v24 = vsel %vm12345_vm5, %v3093_v32, 0.0  ;;  %v3090_v5 = vsel %vm17288_vm8, %v17287_v26, %v17275_v41  ;;  %vm17289_vm13 = vmmov %vm17278_vm3  ;;  %vm12466_vm4 = vcmp.eq.s32.totalorder %v3178_v61, 1  ;;  %v3129_v36 = vmul.f32 %v17286_v14, %v3117_v10 }
 0x4e3   : > { %v3091_v28 = vsel %vm17289_vm13, %v17276_v44, %v17287_v26  ;;  %v12472_v42 = vsel %vm3240_vm1, 1, %v16293_v63  ;;  %v3130_v59 = vmul.f32 %v17286_v14, %v3118_v52  ;;  %v3132_v60 = vmul.f32 %v17286_v14, %v3120_v31  ;;  %v12494_v32 = vpop.permute.xlu1 %3513  ;;  %v12509_v22 = vpop.permute.xlu0 %3434  ;;  %vm3311_vm13 = vmand %vm12402_vm11, %vm17051_vm2 }
 0x4e4   : > { %v3135_v61 = vmul.f32 %v17286_v14, %v3123_v3  ;;  %vm12481_vm5 = vcmp.eq.s32.totalorder %v3175_v46, 1  ;;  %v3176_v10 = vperm.slane %v12331_v38, 5  ;;  %v3177_v54 = vperm.slane %v12331_v38, 6  ;;  %17294 = vst [vmem:[#allocation209_spill] sm:$0xff] %v12494_v32  ;;  %v12496_v46 = vpop.permute.xlu2 %3480  ;;  %v17330_v32 = vld [vmem:[#allocation165_spill] sm:$0xff] }
 0x4e5   : > { %v3070_v44 = vadd.f32 %v3062_v56, %v12283_v34  ;;  %v3121_v52 = vsel %vm12353_vm15, %v3091_v28, 0.0  ;;  %v3122_v1 = vsel %vm12357_vm14, %v3090_v5, 0.0  ;;  %v3131_v3 = vmul.f32 %v17286_v14, %v3119_v24  ;;  %v17299_v24 = vld [vmem:[#allocation140_spill] sm:$0xff] }
 0x4e6   : > { %v3071_v31 = vadd.f32 %v3063_v12, %v12335_v57  ;;  %vm12500_vm3 = vcmp.eq.s32.totalorder %v3173_v2, 1  ;;  %vm12504_vm7 = vcmp.eq.s32.totalorder %v3174_v50, 1  ;;  %v3243_v29 = vperm.slane %v12472_v42, 1  ;;  %v17300_v28 = vld [vmem:[#allocation116_spill] sm:$0xff] }
 0x4e7   : > { %v3136_v56 = vadd.f32 %v3128_v6, %v12370_v45  ;;  %v3137_v26 = vadd.f32 %v3129_v36, %v12373_v47  ;;  %v12513_v5 = vadd.f32 %v3130_v59, %v3067_v30  ;;  %v3140_v57 = vadd.f32 %v3132_v60, %v12376_v40  ;;  %v17305_v47 = vld [vmem:[#allocation142_spill] sm:$0xff]  ;;  %v17306_v6 = vld [vmem:[#allocation125_spill] sm:$0xff]  ;;  %v17307_v59 = vld [vmem:[#allocation139_spill] sm:$0xff] }
 0x4e8   : > { %v3143_v2 = vadd.f32 %v3135_v61, %v3072_v19  ;;  %v3133_v12 = vmul.f32 %v17286_v14, %v3121_v52  ;;  %v3134_v50 = vmul.f32 %v17286_v14, %v3122_v1  ;;  %v3166_v0 = vsel %vm3160_vm12, %v17300_v28, %v17299_v24  ;;  %v17308_v60 = vld [vmem:[#allocation129_spill] sm:$0xff]  ;;  %3764 = vperm.xlu2 %6113, %v12260_v17  }
 0x4e9   : > { %vm12522_vm14 = vcmp.eq.s32.totalorder %v3176_v10, 1  ;;  %vm12526_vm15 = vcmp.eq.s32.totalorder %v3177_v54, 1  ;;  %vm3231_vm1 = vcmp.lt.s32.totalorder %v7906_v9, 99  ;;  %v3246_v30 = vperm.slane %v12472_v42, 4  ;;  %v17309_v10 = vld [vmem:[#allocation158_spill] sm:$0xff]  ;;  %3929 = vrot.lane.b32.xlu1 %v6923_v49, %s6295_s0 }
 0x4ea   : > { %v3167_v40 = vsel %vm3160_vm12, %v17305_v47, %v17300_v28  ;;  %v3242_v19 = vperm.slane %v12472_v42, 0  ;;  %v12537_v14 = vadd.f32 %v3131_v3, %v3068_v15  ;;  %v3168_v36 = vsel %vm3160_vm12, %v17306_v6, %v17305_v47 }
 0x4eb   : > { %v3163_v61 = vsel %vm3160_vm12, %v17308_v60, %v17307_v59  ;;  %v3165_v54 = vsel %vm3160_vm12, %v17299_v24, %v17309_v10  ;;  %v3249_v52 = vperm.slane %v12472_v42, 7  ;;  %v6293_v1 = vmov 45   ;;  %v12604_v41 = vpop.permute.xlu0 %3440 }
 0x4ec   : > { %6117 = vset.pattern.permute.xlu1 %v6293_v1  ;;  %v3188_v15 = vsel %vm12436_vm10, %v3166_v0, 0.0  ;;  %v3164_v3 = vsel %vm3160_vm12, %v17309_v10, %v17308_v60  ;;  %vm12558_vm8 = vcmp.eq.s32.totalorder %v3243_v29, 1  ;;  %v3244_v47 = vperm.slane %v12472_v42, 2  ;;  %v12593_v1 = vpop.permute.xlu1 %3572  ;;  %v12595_v43 = vpop.permute.xlu2 %3503 }
 0x4ed   : > { %v3245_v24 = vperm.slane %v12472_v42, 3  ;;  %v3187_v39 = vsel %vm12450_vm0, %v3167_v40, 0.0  ;;  %vm12569_vm10 = vcmp.eq.s32.totalorder %v3246_v30, 1  ;;  %v12579_v29 = vadd.f32 %v3133_v12, %v3070_v44  ;;  %17316 = vst [vmem:[#allocation213_spill] sm:$0xff] %v12593_v1  ;;  %v17318_v44 = vld [vmem:[#allocation156_spill] sm:$0xff] }
 0x4ee   : > { %v12581_v60 = vadd.f32 %v3134_v50, %v3071_v31  ;;  %v3194_v25 = vsel %vm12466_vm4, %v3168_v36, 0.0  ;;  %v3191_v30 = vsel %vm12481_vm5, %v3163_v61, 0.0  ;;  %v3189_v40 = vsel %vm12500_vm3, %v3165_v54, 0.0  ;;  %17317 = vst [vmem:[#allocation221_spill] sm:$0xff] %v12595_v43 }
 0x4ef   : > { %vm12589_vm0 = vcmp.eq.s32.totalorder %v3242_v19, 1  ;;  %v3199_v31 = vmul.f32 %v17318_v44, %v3187_v39  ;;  %v3190_v37 = vsel %vm12504_vm7, %v3164_v3, 0.0  ;;  %vm12600_vm4 = vcmp.eq.s32.totalorder %v3249_v52, 1  ;;  %v17325_v52 = vld [vmem:[#allocation151_spill] sm:$0xff] }
 0x4f0   : > { %v3200_v38 = vmul.f32 %v17318_v44, %v3188_v15  ;;  %v3203_v50 = vmul.f32 %v17318_v44, %v3191_v30  ;;  %v3206_v19 = vmul.f32 %v17318_v44, %v3194_v25  ;;  %vm12609_vm5 = vcmp.eq.s32.totalorder %v3244_v47, 1  ;;  %3787 = vrot.lane.b32.xlu2 %v6923_v49, %s6289_s23 }
 0x4f1   : > { %vm12613_vm3 = vcmp.eq.s32.totalorder %v3245_v24, 1  ;;  %v3247_v34 = vperm.slane %v12472_v42, 5  ;;  %v12624_v54 = vsel %vm3311_vm13, 1, %v16293_v63  ;;  %v3161_v15 = vsel %vm3160_vm12, %v17325_v52, %v17306_v6  ;;  %3935 = vrot.lane.b32.xlu1 %v16286_v55, %s6295_s0 }
 0x4f2   : > { %v3162_v3 = vsel %vm3160_vm12, %v17307_v59, %v17325_v52  ;;  %v3248_v47 = vperm.slane %v12472_v42, 6  ;;  %v3201_v24 = vmul.f32 %v17318_v44, %v3189_v40  ;;  %v12636_v39 = vadd.f32 %v3199_v31, %v3136_v56  ;;  %v17326_v56 = vld [vmem:[#allocation152_spill] sm:$0xff]  ;;  %v17327_v40 = vld [vmem:[#allocation134_spill] sm:$0xff] }
 0x4f3   : > { %v3202_v25 = vmul.f32 %v17318_v44, %v3190_v37  ;;  %v3314_v30 = vperm.slane %v12624_v54, 1  ;;  %v6294_v33 = vmov 44   ;;  %v12640_v1 = vadd.f32 %v3200_v38, %v3137_v26  ;;  %v17331_v26 = vld [vmem:[#allocation149_spill] sm:$0xff] }
 0x4f4   : > { %6116 = vset.pattern.permute.xlu0 %v6294_v33  ;;  %v12642_v6 = vadd.f32 %v3203_v50, %v3140_v57  ;;  %v12644_v43 = vadd.f32 %v3206_v19, %v3143_v2  ;;  %v3192_v59 = vsel %vm12522_vm14, %v3162_v3, 0.0  ;;  %v3193_v42 = vsel %vm12526_vm15, %v3161_v15, 0.0 }
 0x4f5   : > { %v3237_v31 = vsel %vm3231_vm1, %v17327_v40, %v17326_v56  ;;  %vm12654_vm12 = vcmp.eq.s32.totalorder %v3247_v34, 1  ;;  %v3317_v33 = vperm.slane %v12624_v54, 4  ;;  %v3234_v57 = vsel %vm3231_vm1, %v17331_v26, %v17330_v32  ;;  %v17334_v34 = vld [vmem:[#allocation164_spill] sm:$0xff]  ;;  %3906 = vperm.xlu0 %6116, %v12260_v17  }
 0x4f6   : > { %v3236_v2 = vsel %vm3231_vm1, %v17326_v56, %v11652_v4  ;;  %vm12672_vm14 = vcmp.eq.s32.totalorder %v3248_v47, 1  ;;  %v3313_v38 = vperm.slane %v12624_v54, 0  ;;  %v6296_v50 = vmov 43   ;;  %v12689_v47 = vpop.permute.xlu1 %3578  ;;  %v12691_v56 = vpop.permute.xlu2 %3509 }
 0x4f7   : > { %6114 = vset.pattern.permute.xlu2 %v6296_v50  ;;  %v3209_v19 = vadd.f32 %v3201_v24, %v12513_v5  ;;  %v3238_v52 = vsel %vm3231_vm1, %v17334_v34, %v17327_v40  ;;  %v3235_v15 = vsel %vm3231_vm1, %v11652_v4, %v17331_v26  ;;  %v3320_v3 = vperm.slane %v12624_v54, 7  ;;  %17335 = vst [vmem:[#allocation214_spill] sm:$0xff] %v12689_v47  ;;  %v12706_v47 = vpop.permute.xlu0 %3499 }
 0x4f8   : > { %v3210_v50 = vadd.f32 %v3202_v25, %v12537_v14  ;;  %v3204_v5 = vmul.f32 %v17318_v44, %v3192_v59  ;;  %v3205_v24 = vmul.f32 %v17318_v44, %v3193_v42  ;;  %v3259_v40 = vsel %vm12558_vm8, %v3237_v31, 0.0  ;;  %3793 = vrot.lane.b32.xlu2 %v16286_v55, %s6289_s23  ;;  %s6297_s23 = smov 79  }
 0x4f9   : > { %v3239_v4 = vsel %vm3231_vm1, %v17336_v11, %v17334_v34  ;;  %vm12702_vm15 = vcmp.eq.s32.totalorder %v3314_v30, 1  ;;  %v3262_v14 = vsel %vm12569_vm10, %v3234_v57, 0.0  ;;  %v3260_v44 = vsel %vm12609_vm5, %v3236_v2, 0.0  ;;  %3977 = vperm.xlu1 %6117, %v12260_v17  }
 0x4fa   : > { %vm12712_vm13 = vcmp.eq.s32.totalorder %v3317_v33, 1  ;;  %v3315_v25 = vperm.slane %v12624_v54, 2  ;;  %v3316_v59 = vperm.slane %v12624_v54, 3  ;;  %vm17341_vm8 = vnez %v16318_v20 }
 0x4fb   : > { %vm3382_vm7 = vmand %vm12402_vm11, %vm17341_vm8  ;;  %v3258_v0 = vsel %vm12589_vm0, %v3238_v52, 0.0  ;;  %v3261_v36 = vsel %vm12613_vm3, %v3235_v15, 0.0  ;;  %vm12726_vm10 = vcmp.eq.s32.totalorder %v3313_v38, 1  ;;  %v3318_v42 = vperm.slane %v12624_v54, 5 }
 0x4fc   : > { %v3319_v31 = vperm.slane %v12624_v54, 6  ;;  %v3265_v33 = vsel %vm12600_vm4, %v3239_v4, 0.0  ;;  %vm12734_vm5 = vcmp.eq.s32.totalorder %v3320_v3, 1  ;;  %v3270_v10 = vmul.f32 %v11638_v27, %v3258_v0 }
 0x4fd   : > { %v3271_v61 = vmul.f32 %v11638_v27, %v3259_v40  ;;  %v3274_v2 = vmul.f32 %v11638_v27, %v3262_v14  ;;  %v12742_v38 = vsel %vm3382_vm7, 1, %v16293_v63  ;;  %v3272_v34 = vmul.f32 %v11638_v27, %v3260_v44 }
 0x4fe   : > { %v12746_v54 = vadd.f32 %v3204_v5, %v12579_v29  ;;  %v3277_v12 = vmul.f32 %v11638_v27, %v3265_v33  ;;  %v3233_v52 = vsel %vm3231_vm1, %v17330_v32, %v11746_v13  ;;  %vm12753_vm0 = vcmp.eq.s32.totalorder %v3315_v25, 1 }
 0x4ff   : > { %v3273_v29 = vmul.f32 %v11638_v27, %v3261_v36  ;;  %v12763_v3 = vadd.f32 %v3205_v24, %v12581_v60  ;;  %v3232_v32 = vsel %vm3231_vm1, %v11746_v13, %v17336_v11  ;;  %vm12769_vm4 = vcmp.eq.s32.totalorder %v3316_v59, 1  ;;  %v12784_v24 = vpop.permute.xlu1 %3584  ;;  %v12786_v11 = vpop.permute.xlu2 %3551  ;;  %v17354_v59 = vld [vmem:[#allocation159_spill] sm:$0xff] }
 0x500   : > { %vm12773_vm3 = vcmp.eq.s32.totalorder %v3318_v42, 1  ;;  %vm12777_vm7 = vcmp.eq.s32.totalorder %v3319_v31, 1  ;;  %v3385_v60 = vperm.slane %v12742_v38, 1  ;;  %v3278_v13 = vadd.f32 %v3270_v10, %v12636_v39  ;;  %v12797_v36 = vpop.permute.xlu0 %3505  ;;  %v17358_v10 = vld [vmem:[#allocation167_spill] sm:$0xff]  ;;  %3835 = vperm.xlu2 %6114, %v12260_v17  }
 0x501   : > { %v3279_v14 = vadd.f32 %v3271_v61, %v12640_v1  ;;  %v3282_v44 = vadd.f32 %v3274_v2, %v12642_v6  ;;  %v3263_v25 = vsel %vm12654_vm12, %v3233_v52, 0.0  ;;  %vm17355_vm1 = vcmp.lt.s32.totalorder %v7906_v9, 98  ;;  %v17356_v1 = vld [vmem:[#allocation162_spill] sm:$0xff]  ;;  %4000 = vrot.lane.b32.xlu1 %v6923_v49, %s6297_s23 }
 0x502   : > { %v3308_v0 = vsel %vm17355_vm1, %v17354_v59, %v11733_v16  ;;  %v3280_v42 = vadd.f32 %v3272_v34, %v3209_v19  ;;  %v3285_v31 = vadd.f32 %v3277_v12, %v12644_v43  ;;  %v3264_v39 = vsel %vm12672_vm14, %v3232_v32, 0.0  ;;  %vm17357_vm9 = vmmov %vm17355_vm1  ;;  %v17359_v43 = vld [vmem:[#allocation174_spill] sm:$0xff] }
 0x503   : > { %v3305_v6 = vsel %vm17357_vm9, %v17356_v1, %v11818_v21  ;;  %vm3373_vm12 = vcmp.lt.s32.totalorder %v7906_v9, 97  ;;  %v3384_v37 = vperm.slane %v12742_v38, 0  ;;  %v3281_v33 = vadd.f32 %v3273_v29, %v3210_v50  ;;  %vm17360_vm8 = vmmov %vm17355_vm1  ;;  %v17362_v12 = vld [vmem:[#allocation154_spill] sm:$0xff] }
 0x504   : > { %v3309_v19 = vsel %vm17355_vm1, %v17358_v10, %v17354_v59  ;;  %v3306_v45 = vsel %vm17360_vm8, %v17359_v43, %v17356_v1  ;;  %vm17361_vm14 = vmmov %vm17355_vm1  ;;  %v3391_v2 = vperm.slane %v12742_v38, 7  ;;  %v3275_v34 = vmul.f32 %v11638_v27, %v3263_v25 }
 0x505   : > { %v3307_v61 = vsel %vm17361_vm14, %v11733_v16, %v17359_v43  ;;  %v3330_v50 = vsel %vm12702_vm15, %v3308_v0, 0.0  ;;  %vm17363_vm9 = vmmov %vm17355_vm1  ;;  %v3388_v29 = vperm.slane %v12742_v38, 4  ;;  %v3276_v32 = vmul.f32 %v11638_v27, %v3264_v39  ;;  %v17366_v0 = vld [vmem:[#allocation188_spill] sm:$0xff]  ;;  %v17430_v39 = vld [vmem:[#allocation23_spill] sm:$0xff] }
 0x506   : > { %v3310_v52 = vsel %vm17363_vm9, %v17362_v12, %v17358_v10  ;;  %v3333_v59 = vsel %vm12712_vm13, %v3305_v6, 0.0  ;;  %vm12832_vm8 = vcmp.eq.s32.totalorder %v3385_v60, 1  ;;  %v3386_v25 = vperm.slane %v12742_v38, 2  ;;  %vm17368_vm13 = vmmov %vm17363_vm9 }
 0x507   : > { %v3387_v26 = vperm.slane %v12742_v38, 3  ;;  %vm17367_vm15 = vnez %v17366_v0  ;;  %v3329_v1 = vsel %vm12726_vm10, %v3309_v19, 0.0  ;;  %v3331_v27 = vsel %vm12753_vm0, %v3307_v61, 0.0  ;;  %vm17371_vm10 = vmmov %vm17363_vm9  ;;  %v12876_v57 = vpop.permute.xlu1 %3643  ;;  %v12878_v19 = vpop.permute.xlu2 %3574 }
 0x508   : > { %vm3453_vm1 = vmand %vm12402_vm11, %vm17367_vm15  ;;  %v3332_v28 = vsel %vm12769_vm4, %v3306_v45, 0.0  ;;  %v3304_v60 = vsel %vm17368_vm13, %v11818_v21, %v12013_v7  ;;  %vm12852_vm14 = vcmp.eq.s32.totalorder %v3384_v37, 1  ;;  %v3336_v30 = vsel %vm12734_vm5, %v3310_v52, 0.0  ;;  %v17372_v21 = vld [vmem:[#allocation163_spill] sm:$0xff]  ;;  %17375 = vst [vmem:[#allocation29_spill] sm:$0xff] %v12878_v19  ;;  %3858 = vrot.lane.b32.xlu2 %v6923_v49, %s6291_s21 }
 0x509   : > { %v3303_v15 = vsel %vm17371_vm10, %v12013_v7, %v17362_v12  ;;  %v3389_v5 = vperm.slane %v12742_v38, 5  ;;  %v3341_v6 = vmul.f32 %v17372_v21, %v3329_v1  ;;  %vm12869_vm0 = vcmp.eq.s32.totalorder %v3391_v2, 1  ;;  %v12886_v12 = vpop.permute.xlu0 %3511  ;;  %6115 = vset.pattern.permute.xlu2 %v16293_v63  ;;  %v4966_v37 = vld [vmem:[%s15178_s6] sm:$0xf]  ;;  %4006 = vrot.lane.b32.xlu1 %v16286_v55, %s6297_s23 }
 0x50a   : > { %v12874_v10 = vsel %vm3453_vm1, 1, %v16293_v63  ;;  %v3342_v7 = vmul.f32 %v17372_v21, %v3330_v50  ;;  %v3345_v43 = vmul.f32 %v17372_v21, %v3333_v59  ;;  %v3348_v45 = vmul.f32 %v17372_v21, %v3336_v30  ;;  %v17388_v30 = vld [vmem:[#allocation179_spill] sm:$0xff] }
 0x50b   : > { %v3334_v61 = vsel %vm12773_vm3, %v3304_v60, 0.0  ;;  %v3390_v2 = vperm.slane %v12742_v38, 6  ;;  %v3343_v52 = vmul.f32 %v17372_v21, %v3331_v27  ;;  %v3344_v1 = vmul.f32 %v17372_v21, %v3332_v28 }
 0x50c   : > { %v3335_v20 = vsel %vm12777_vm7, %v3303_v15, 0.0  ;;  %vm12892_vm5 = vcmp.eq.s32.totalorder %v3388_v29, 1  ;;  %v3283_v59 = vadd.f32 %v3275_v34, %v12746_v54  ;;  %v3284_v40 = vadd.f32 %v3276_v32, %v12763_v3  ;;  %v17382_v32 = vld [vmem:[#allocation168_spill] sm:$0xff]  ;;  %v17389_v15 = vld [vmem:[#allocation161_spill] sm:$0xff] }
 0x50d   : > { %vm12898_vm4 = vcmp.eq.s32.totalorder %v3386_v25, 1  ;;  %vm12902_vm3 = vcmp.eq.s32.totalorder %v3387_v26, 1  ;;  %v3456_v27 = vperm.slane %v12874_v10, 1  ;;  %v3349_v4 = vadd.f32 %v3341_v6, %v3278_v13 }
 0x50e   : > { %v3346_v29 = vmul.f32 %v17372_v21, %v3334_v61  ;;  %v12909_v28 = vadd.f32 %v3342_v7, %v3279_v14  ;;  %v12911_v54 = vadd.f32 %v3345_v43, %v3282_v44  ;;  %v12913_v3 = vadd.f32 %v3348_v45, %v3285_v31  ;;  %v17387_v31 = vld [vmem:[#allocation192_spill] sm:$0xff] }
 0x50f   : > { %v3347_v34 = vmul.f32 %v17372_v21, %v3335_v20  ;;  %v3379_v25 = vsel %vm3373_vm12, %v17382_v32, %v11998_v48  ;;  %vm12920_vm9 = vcmp.eq.s32.totalorder %v3389_v5, 1  ;;  %vm12924_vm1 = vcmp.eq.s32.totalorder %v3390_v2, 1  ;;  %v17392_v2 = vld [vmem:[#allocation173_spill] sm:$0xff] }
 0x510   : > { %v12928_v14 = vadd.f32 %v3343_v52, %v3280_v42  ;;  %v12930_v44 = vadd.f32 %v3344_v1, %v3281_v33  ;;  %v3380_v20 = vsel %vm3373_vm12, %v17387_v31, %v17382_v32  ;;  %v3376_v5 = vsel %vm3373_vm12, %v17389_v15, %v17388_v30  ;;  %v17393_v52 = vld [vmem:[#allocation196_spill] sm:$0xff]  ;;  %v12973_v1 = vpop.permute.xlu1 %3649  ;;  %4969 = vperm.xlu2 %6115, %v4966_v37  }
 0x511   : > { %v3455_v21 = vperm.slane %v12874_v10, 0  ;;  %v3462_v6 = vperm.slane %v12874_v10, 7  ;;  %v3377_v42 = vsel %vm3373_vm12, %v12197_v53, %v17389_v15  ;;  %v3378_v33 = vsel %vm3373_vm12, %v11998_v48, %v12197_v53  ;;  %v12984_v15 = vpop.permute.xlu0 %3570 }
 0x512   : > { %vm12953_vm13 = vcmp.eq.s32.totalorder %v3456_v27, 1  ;;  %v3459_v43 = vperm.slane %v12874_v10, 4  ;;  %v3457_v45 = vperm.slane %v12874_v10, 2  ;;  %v3401_v61 = vsel %vm12832_vm8, %v3379_v25, 0.0  ;;  %v12975_v27 = vpop.permute.xlu2 %3580 }
 0x513   : > { %v3381_v48 = vsel %vm3373_vm12, %v17392_v2, %v17387_v31  ;;  %v3458_v53 = vperm.slane %v12874_v10, 3  ;;  %vm17394_vm10 = vnez %v17393_v52  ;;  %v12977_v32 = vadd.f32 %v3346_v29, %v3283_v59 }
 0x514   : > { %vm3524_vm7 = vmand %vm12402_vm11, %vm17394_vm10  ;;  %v3400_v16 = vsel %vm12852_vm14, %v3380_v20, 0.0  ;;  %v3404_v25 = vsel %vm12892_vm5, %v3376_v5, 0.0  ;;  %v3460_v31 = vperm.slane %v12874_v10, 5  ;;  %v12986_v0 = vadd.f32 %v3347_v34, %v3284_v40 }
 0x515   : > { %v3402_v51 = vsel %vm12898_vm4, %v3378_v33, 0.0  ;;  %v3403_v19 = vsel %vm12902_vm3, %v3377_v42, 0.0  ;;  %vm12992_vm8 = vcmp.eq.s32.totalorder %v3455_v21, 1  ;;  %vm12996_vm14 = vcmp.eq.s32.totalorder %v3462_v6, 1 }
 0x516   : > { %v3461_v50 = vperm.slane %v12874_v10, 6  ;;  %v3412_v29 = vmul.f32 %v12183_v62, %v3400_v16  ;;  %v3407_v40 = vsel %vm12869_vm0, %v3381_v48, 0.0  ;;  %vm13004_vm5 = vcmp.eq.s32.totalorder %v3459_v43, 1 }
 0x517   : > { %vm13008_vm4 = vcmp.eq.s32.totalorder %v3457_v45, 1  ;;  %v13018_v10 = vsel %vm3524_vm7, 1, %v16293_v63  ;;  %v3413_v34 = vmul.f32 %v12183_v62, %v3401_v61  ;;  %vm13024_vm0 = vcmp.eq.s32.totalorder %v3458_v53, 1 }
 0x518   : > { %v3416_v5 = vmul.f32 %v12183_v62, %v3404_v25  ;;  %v3419_v21 = vmul.f32 %v12183_v62, %v3407_v40  ;;  %v3374_v6 = vsel %vm3373_vm12, %v12314_v35, %v17392_v2  ;;  %v3375_v42 = vsel %vm3373_vm12, %v17388_v30, %v12314_v35  ;;  %3868 = vrot.lane.b32.xlu2 %v17430_v39, %s6291_s21  ;;  %s6299_s21 = smov 78  }
 0x519   : > { %v3414_v33 = vmul.f32 %v12183_v62, %v3402_v51  ;;  %v3415_v43 = vmul.f32 %v12183_v62, %v3403_v19  ;;  %vm13040_vm3 = vcmp.eq.s32.totalorder %v3460_v31, 1  ;;  %vm13044_vm7 = vcmp.eq.s32.totalorder %v3461_v50, 1  ;;  %v17409_v51 = vld [vmem:[#allocation189_spill] sm:$0xff]  ;;  %v13067_v50 = vpop.permute.xlu1 %3655  ;;  %v13071_v40 = vpop.permute.xlu0 %3576 }
 0x51a   : > { %v3527_v48 = vperm.slane %v13018_v10, 1  ;;  %v13051_v35 = vadd.f32 %v3412_v29, %v3349_v4  ;;  %vm17410_vm12 = vcmp.lt.s32.totalorder %v7906_v9, 96  ;;  %v3526_v30 = vperm.slane %v13018_v10, 0  ;;  %v13069_v29 = vpop.permute.xlu2 %3622 }
 0x51b   : > { %v3450_v19 = vsel %vm17410_vm12, %v17409_v51, %v12298_v8  ;;  %v6298_v2 = vmov 46   ;;  %v3421_v53 = vadd.f32 %v3413_v34, %v12909_v28  ;;  %v3405_v16 = vsel %vm12920_vm9, %v3375_v42, 0.0  ;;  %vm17411_vm9 = vmmov %vm17410_vm12  ;;  %v17412_v42 = vld [vmem:[#allocation185_spill] sm:$0xff] }
 0x51c   : > { %6118 = vset.pattern.permute.xlu1 %v6298_v2  ;;  %v3406_v4 = vsel %vm12924_vm1, %v3374_v6, 0.0  ;;  %v3533_v25 = vperm.slane %v13018_v10, 7  ;;  %v3530_v31 = vperm.slane %v13018_v10, 4  ;;  %v3422_v37 = vadd.f32 %v3414_v33, %v12928_v14  ;;  %vm17413_vm1 = vmmov %vm17411_vm9 }
 0x51d   : > { %v13075_v28 = vadd.f32 %v3415_v43, %v12930_v44  ;;  %v3424_v26 = vadd.f32 %v3416_v5, %v12911_v54  ;;  %v3427_v13 = vadd.f32 %v3419_v21, %v12913_v3  ;;  %v3472_v34 = vsel %vm12953_vm13, %v3450_v19, 0.0  ;;  %vm17414_vm12 = vmmov %vm17413_vm1  ;;  %v17417_v5 = vld [vmem:[#allocation220_spill] sm:$0xff]  ;;  %v17418_v21 = vld [vmem:[#allocation187_spill] sm:$0xff]  ;;  %4048 = vperm.xlu1 %6118, %v12260_v17  }
 0x51e   : > { %v3451_v6 = vsel %vm17411_vm9, %v12421_v23, %v17409_v51  ;;  %v3452_v14 = vsel %vm17413_vm1, %v17412_v42, %v12421_v23  ;;  %v3449_v54 = vsel %vm17414_vm12, %v12298_v8, %v12509_v22  ;;  %vm13093_vm10 = vcmp.eq.s32.totalorder %v3527_v48, 1  ;;  %vm17419_vm13 = vmmov %vm17413_vm1 }
 0x51f   : > { %v3417_v44 = vmul.f32 %v12183_v62, %v3405_v16  ;;  %v3418_v7 = vmul.f32 %v12183_v62, %v3406_v4  ;;  %v3447_v33 = vsel %vm17419_vm13, %v17418_v21, %v17417_v5  ;;  %vm17420_vm9 = vmmov %vm17413_vm1  ;;  %v3445_v8 = vsel %vm17413_vm1, %v12604_v41, %v17412_v42  ;;  %v17428_v16 = vld [vmem:[#allocation206_spill] sm:$0xff] }
 0x520   : > { %v3448_v23 = vsel %vm17420_vm9, %v12509_v22, %v17418_v21  ;;  %vm17421_vm12 = vmmov %vm17413_vm1  ;;  %vm13115_vm15 = vcmp.eq.s32.totalorder %v3526_v30, 1  ;;  %vm13119_vm13 = vcmp.eq.s32.totalorder %v3533_v25, 1  ;;  %vm13123_vm2 = vcmp.eq.s32.totalorder %v3530_v31, 1 }
 0x521   : > { %v3446_v62 = vsel %vm17421_vm12, %v17417_v5, %v12604_v41  ;;  %v3528_v51 = vperm.slane %v13018_v10, 2  ;;  %v3471_v19 = vsel %vm12992_vm8, %v3451_v6, 0.0  ;;  %v3478_v41 = vsel %vm12996_vm14, %v3452_v14, 0.0  ;;  %v17431_v6 = vld [vmem:[#allocation16_spill] sm:$0xff]  ;;  %v13161_v5 = vpop.permute.xlu1 %3714 }
 0x522   : > { %v3473_v30 = vsel %vm13008_vm4, %v3449_v54, 0.0  ;;  %v3529_v2 = vperm.slane %v13018_v10, 3  ;;  %vm17429_vm9 = vnez %v17428_v16  ;;  %v3475_v4 = vsel %vm13004_vm5, %v3447_v33, 0.0  ;;  %3933 = vrot.lane.b32.xlu0 %v17431_v6, %s6295_s0  ;;  %v13163_v21 = vpop.permute.xlu2 %3645 }
 0x523   : > { %vm3595_vm1 = vmand %vm12402_vm11, %vm17429_vm9  ;;  %v3474_v59 = vsel %vm13024_vm0, %v3448_v23, 0.0  ;;  %v3490_v25 = vmul.f32 %v12496_v46, %v3478_v41  ;;  %v3483_v38 = vmul.f32 %v12496_v46, %v3471_v19  ;;  %v3476_v31 = vsel %vm13040_vm3, %v3446_v62, 0.0  ;;  %v13172_v23 = vpop.permute.xlu0 %3582 }
 0x524   : > { %v3477_v60 = vsel %vm13044_vm7, %v3445_v8, 0.0  ;;  %v3484_v20 = vmul.f32 %v12496_v46, %v3472_v34  ;;  %v3487_v42 = vmul.f32 %v12496_v46, %v3475_v4  ;;  %v3531_v14 = vperm.slane %v13018_v10, 5  ;;  %v17434_v4 = vld [vmem:[#allocation221_spill] sm:$0xff] }
 0x525   : > { %v13159_v54 = vsel %vm3595_vm1, 1, %v16293_v63  ;;  %v3485_v45 = vmul.f32 %v12496_v46, %v3473_v30  ;;  %v3425_v61 = vadd.f32 %v3417_v44, %v12977_v32  ;;  %vm13167_vm8 = vcmp.eq.s32.totalorder %v3528_v51, 1  ;;  %v17435_v30 = vld [vmem:[#allocation217_spill] sm:$0xff]  ;;  %4071 = vrot.lane.b32.xlu1 %v6923_v49, %s6299_s21 }
 0x526   : > { %v3532_v34 = vperm.slane %v13018_v10, 6  ;;  %v3486_v8 = vmul.f32 %v12496_v46, %v3474_v59  ;;  %v3426_v62 = vadd.f32 %v3418_v7, %v12986_v0  ;;  %v3488_v19 = vmul.f32 %v12496_v46, %v3476_v31 }
 0x527   : > { %v3489_v41 = vmul.f32 %v12496_v46, %v3477_v60  ;;  %vm17436_vm14 = vcmp.lt.s32.totalorder %v7906_v9, 95  ;;  %v13183_v44 = vadd.f32 %v3483_v38, %v13051_v35  ;;  %vm13185_vm5 = vcmp.eq.s32.totalorder %v3529_v2, 1  ;;  %v17440_v35 = vld [vmem:[#allocation209_spill] sm:$0xff] }
 0x528   : > { %v3521_v32 = vsel %vm17436_vm14, %v17435_v30, %v17434_v4  ;;  %v13190_v59 = vadd.f32 %v3484_v20, %v3421_v53  ;;  %v13192_v0 = vadd.f32 %v3487_v42, %v3424_v26  ;;  %v13194_v7 = vadd.f32 %v3490_v25, %v3427_v13  ;;  %vm17439_vm4 = vmmov %vm17436_vm14  ;;  %v17442_v38 = vld [vmem:[#allocation197_spill] sm:$0xff]  ;;  %v17446_v20 = vld [vmem:[#allocation211_spill] sm:$0xff] }
 0x529   : > { %v3522_v46 = vsel %vm17439_vm4, %v12706_v47, %v17435_v30  ;;  %vm17441_vm0 = vmmov %vm17439_vm4  ;;  %vm13208_vm7 = vcmp.eq.s32.totalorder %v3531_v14, 1  ;;  %v13212_v13 = vadd.f32 %v3485_v45, %v3422_v37  ;;  %v3543_v25 = vsel %vm13093_vm10, %v3521_v32, 0.0  ;;  %v17450_v14 = vld [vmem:[#allocation7_spill] sm:$0xff]  ;;  %v13261_v48 = vpop.permute.xlu1 %3720 }
 0x52a   : > { %v3523_v2 = vsel %vm17441_vm0, %v17440_v35, %v12706_v47  ;;  %vm17443_vm3 = vmmov %vm17441_vm0  ;;  %vm17447_vm12 = vnez %v17446_v20  ;;  %v13223_v47 = vadd.f32 %v3486_v8, %v13075_v28  ;;  %vm13225_vm14 = vcmp.eq.s32.totalorder %v3532_v34, 1  ;;  %3927 = vrot.lane.b32.xlu2 %v17450_v14, %s6295_s0  ;;  %3939 = vrot.lane.b32.xlu0 %v17430_v39, %s6295_s0  ;;  %v13263_v22 = vpop.permute.xlu2 %3651 }
 0x52b   : > { %v3518_v53 = vsel %vm17443_vm3, %v17442_v38, %v12691_v56  ;;  %vm3666_vm1 = vmand %vm12402_vm11, %vm17447_vm12  ;;  %v3599_v3 = vperm.slane %v13159_v54, 2  ;;  %v13234_v45 = vadd.f32 %v3488_v19, %v3425_v61  ;;  %v13236_v30 = vadd.f32 %v3489_v41, %v3426_v62  ;;  %v3642_v41 = vpop.permute.xlu0 %3641 }
 0x52c   : > { %v3542_v28 = vsel %vm13115_vm15, %v3522_v46, 0.0  ;;  %v3549_v34 = vsel %vm13119_vm13, %v3523_v2, 0.0  ;;  %v3546_v8 = vsel %vm13123_vm2, %v3518_v53, 0.0  ;;  %v3600_v32 = vperm.slane %v13159_v54, 3  ;;  %vm17451_vm10 = vmmov %vm17441_vm0 }
 0x52d   : > { %v3520_v17 = vsel %vm17451_vm10, %v17434_v4, %v12797_v36  ;;  %v3602_v61 = vperm.slane %v13159_v54, 5  ;;  %vm3657_vm15 = vcmp.lt.s32.totalorder %v7906_v9, 93  ;;  %v13259_v43 = vsel %vm3666_vm1, 1, %v16293_v63  ;;  %vm17452_vm11 = vmmov %vm17441_vm0  ;;  %4077 = vrot.lane.b32.xlu1 %v16286_v55, %s6299_s21 }
 0x52e   : > { %vm3586_vm2 = vcmp.lt.s32.totalorder %v7906_v9, 94  ;;  %v3668_v62 = vperm.slane %v13259_v43, 0  ;;  %v3675_v19 = vperm.slane %v13259_v43, 7  ;;  %v3672_v4 = vperm.slane %v13259_v43, 4  ;;  %vm17453_vm13 = vmmov %vm17441_vm0 }
 0x52f   : > { %v3660_v58 = vsel %vm3657_vm15, %v12973_v1, %v13263_v22  ;;  %v13274_v46 = vmul.f32 %v12786_v11, %v3549_v34  ;;  %v3603_v2 = vperm.slane %v13159_v54, 6  ;;  %v3665_v53 = vsel %vm3657_vm15, %v13067_v50, %v3642_v41 }
 0x530   : > { %v3554_v60 = vmul.f32 %v12786_v11, %v3542_v28  ;;  %v13285_v37 = vsel %vm17452_vm11, %v12797_v36, %v17442_v38  ;;  %v3670_v31 = vperm.slane %v13259_v43, 2  ;;  %v3555_v51 = vmul.f32 %v12786_v11, %v3543_v25  ;;  %v17497_v36 = vld [vmem:[#allocation6_spill] sm:$0xff] }
 0x531   : > { %v13290_v34 = vmul.f32 %v12786_v11, %v3546_v8  ;;  %v3544_v20 = vsel %vm13167_vm8, %v3520_v17, 0.0  ;;  %v3517_v28 = vsel %vm17453_vm13, %v12691_v56, %v12886_v12  ;;  %v3671_v16 = vperm.slane %v13259_v43, 3  ;;  %v17485_v17 = vld [vmem:[#allocation29_spill] sm:$0xff] }
 0x532   : > { %vm13299_vm4 = vcmp.eq.s32.totalorder %v3668_v62, 1  ;;  %vm13303_vm0 = vcmp.eq.s32.totalorder %v3675_v19, 1  ;;  %v3664_v33 = vsel %vm3657_vm15, %v3642_v41, %v12876_v57  ;;  %vm13310_vm8 = vcmp.eq.s32.totalorder %v3672_v4, 1  ;;  %3931 = vrot.lane.b32.xlu2 %v6988_v18, %s6295_s0  ;;  %3998 = vrot.lane.b32.xlu0 %v17450_v14, %s6297_s23 }
 0x533   : > { %v3545_v56 = vsel %vm13185_vm5, %v13285_v37, 0.0  ;;  %v3516_v8 = vsel %vm17443_vm3, %v12886_v12, %v17440_v35  ;;  %vm13321_vm1 = vcmp.eq.s32.totalorder %v3602_v61, 1  ;;  %vm13325_vm10 = vcmp.eq.s32.totalorder %v3603_v2, 1  ;;  %v13357_v2 = vpop.permute.xlu2 %3693  ;;  %v6139_v12 = vld [vmem:[%s15954_s1] ss:$2 sm:$0xff] }
 0x534   : > { %v3547_v10 = vsel %vm13208_vm7, %v3517_v28, 0.0  ;;  %vm13337_vm5 = vcmp.eq.s32.totalorder %v3670_v31, 1  ;;  %v6300_v35 = vmov 47   ;;  %v13342_v37 = vadd.f32 %v3554_v60, %v13183_v44  ;;  %v13351_v31 = vpop.permute.xlu1 %3726  ;;  %v3648_v60 = vpop.permute.xlu0 %3647  ;;  %v13546_v28 = vld [vmem:[%s15176_s4] sm:$0xff] }
 0x535   : > { %6119 = vset.pattern.permute.xlu1 %v6300_v35  ;;  %v3556_v61 = vmul.f32 %v12786_v11, %v3544_v20  ;;  %v3684_v19 = vsel %vm13299_vm4, %v3664_v33, 0.0  ;;  %v3691_v26 = vsel %vm13303_vm0, %v3665_v53, 0.0  ;;  %v3688_v41 = vsel %vm13310_vm8, %v3660_v58, 0.0 }
 0x536   : > { %vm13353_vm7 = vcmp.eq.s32.totalorder %v3671_v16, 1  ;;  %v3548_v44 = vsel %vm13225_vm14, %v3516_v8, 0.0  ;;  %v13362_v20 = vmul.f32 %v13357_v2, %v3684_v19  ;;  %v13365_v53 = vmul.f32 %v13357_v2, %v3688_v41  ;;  %4119 = vperm.xlu1 %6119, %v13546_v28  }
 0x537   : > { %v13368_v58 = vmul.f32 %v13357_v2, %v3691_v26  ;;  %v17468_v16 = vperm.slane %v13159_v54, 1  ;;  %vm13376_vm13 = vcmp.eq.s32.totalorder %v3599_v3, 1  ;;  %vm13380_vm14 = vcmp.eq.s32.totalorder %v3600_v32, 1 }
 0x538   : > { %v3587_v38 = vsel %vm3586_vm2, %v13172_v23, %v12784_v24  ;;  %v3588_v33 = vsel %vm3586_vm2, %v12975_v27, %v13172_v23  ;;  %v3661_v3 = vsel %vm3657_vm15, %v3648_v60, %v12973_v1  ;;  %v3662_v32 = vsel %vm3657_vm15, %v13163_v21, %v3648_v60 }
 0x539   : > { %vm13372_vm11 = vcmp.eq.s32.totalorder %v17468_v16, 1  ;;  %v17475_v25 = vperm.slane %v13159_v54, 0  ;;  %v17478_v35 = vperm.slane %v13159_v54, 4  ;;  %v3686_v23 = vsel %vm13337_vm5, %v3662_v32, 0.0 }
 0x53a   : > { %v3687_v1 = vsel %vm13353_vm7, %v3661_v3, 0.0  ;;  %v3673_v26 = vperm.slane %v13259_v43, 5  ;;  %v3674_v41 = vperm.slane %v13259_v43, 6  ;;  %v17481_v60 = vperm.slane %v13159_v54, 7  ;;  %4004 = vrot.lane.b32.xlu0 %v17431_v6, %s6297_s23 }
 0x53b   : > { %vm13400_vm4 = vcmp.eq.s32.totalorder %v17475_v25, 1  ;;  %vm13406_vm0 = vcmp.eq.s32.totalorder %v17478_v35, 1  ;;  %v13423_v25 = vmul.f32 %v13357_v2, %v3686_v23  ;;  %v13426_v35 = vmul.f32 %v13357_v2, %v3687_v1  ;;  %v17484_v1 = vld [vmem:[#allocation27_spill] sm:$0xff] }
 0x53c   : > { %vm13418_vm8 = vcmp.eq.s32.totalorder %v17481_v60, 1  ;;  %vm727_vm3 = vcmp.ge.s32.totalorder %v6139_v12, 4294967293  ;;  %vm728_vm5 = vcmp.lt.s32.totalorder %v6139_v12, 13  ;;  %v3559_v4 = vmul.f32 %v12786_v11, %v3547_v10  ;;  %3937 = vrot.lane.b32.xlu2 %v17484_v1, %s6295_s0  ;;  %v13470_v60 = vpop.permute.xlu1 %3785 }
 0x53d   : > { %v3560_v54 = vmul.f32 %v12786_v11, %v3548_v44  ;;  %v3618_v3 = vsel %vm13321_vm1, %v3588_v33, 0.0  ;;  %v3619_v32 = vsel %vm13325_vm10, %v3587_v38, 0.0  ;;  %v3669_v23 = vperm.slane %v13259_v43, 1  ;;  %v17486_v33 = vld [vmem:[#allocation213_spill] sm:$0xff]  ;;  %vm13455_vm1 = vmand %vm727_vm3, %vm728_vm5 }
 0x53e   : > { %vm15767_vm7 = vcmp.lt.s32.totalorder %v7906_v9, 83  ;;  %v13444_v10 = vadd.f32 %v3555_v51, %v13190_v59  ;;  %v13447_v44 = vmul.f32 %v12786_v11, %v3545_v56  ;;  %v3592_v62 = vsel %vm3586_vm2, %v17486_v33, %v17485_v17  ;;  %4142 = vrot.lane.b32.xlu1 %v6923_v49, %s6301_s30  ;;  %v4999_v43 = vld [vmem:[%s15181_s9] sm:$0xff] }
 0x53f   : > { %v13460_v38 = vadd.f32 %v3556_v61, %v13212_v13  ;;  %v3566_v51 = vadd.f32 %v13290_v34, %v13192_v0  ;;  %v13466_v11 = vadd.f32 %v13274_v46, %v13194_v7  ;;  %v3630_v59 = vmul.f32 %v13069_v29, %v3618_v3  ;;  %v13480_v61 = vpop.permute.xlu2 %3716  ;;  %v17493_v0 = vld [vmem:[#allocation214_spill] sm:$0xff]  ;;  %v3654_v46 = vpop.permute.xlu0 %3653 }
 0x540   : > { %v3631_v56 = vmul.f32 %v13069_v29, %v3619_v32  ;;  %vm13472_vm10 = vcmp.eq.s32.totalorder %v3673_v26, 1  ;;  %vm13476_vm3 = vcmp.eq.s32.totalorder %v3674_v41, 1  ;;  %v3589_v7 = vsel %vm3586_vm2, %v17493_v0, %v12975_v27 }
 0x541   : > { %v13490_v34 = vsel %vm15767_vm7, %v13161_v5, %v13480_v61  ;;  %v3567_v26 = vadd.f32 %v3559_v4, %v13234_v45  ;;  %v3568_v41 = vadd.f32 %v3560_v54, %v13236_v30  ;;  %v3590_v3 = vsel %vm3586_vm2, %v13071_v40, %v17493_v0  ;;  %vm3737_vm7 = vmand %vm13455_vm1, %vm17283_vm6 }
 0x542   : > { %v3591_v27 = vsel %vm3586_vm2, %v17485_v17, %v13071_v40  ;;  %vm13502_vm5 = vcmp.eq.s32.totalorder %v3669_v23, 1  ;;  %v3658_v45 = vsel %vm3657_vm15, %v3654_v46, %v13067_v50  ;;  %v3659_v30 = vsel %vm3657_vm15, %v13263_v22, %v3654_v46  ;;  %4010 = vrot.lane.b32.xlu0 %v17430_v39, %s6297_s23 }
 0x543   : > { %v3593_v40 = vsel %vm3586_vm2, %v12984_v15, %v17486_v33  ;;  %v3594_v54 = vsel %vm3586_vm2, %v12784_v24, %v12984_v15  ;;  %v3689_v50 = vsel %vm13472_vm10, %v3659_v30, 0.0  ;;  %v3690_v22 = vsel %vm13476_vm3, %v3658_v45, 0.0 }
 0x544   : > { %v3701_v23 = vmul.f32 %v13357_v2, %v3689_v50  ;;  %v3702_v17 = vmul.f32 %v13357_v2, %v3690_v22  ;;  %v3638_v0 = vadd.f32 %v3630_v59, %v3567_v26  ;;  %v3639_v46 = vadd.f32 %v3631_v56, %v3568_v41  ;;  %3996 = vrot.lane.b32.xlu2 %v17497_v36, %s6297_s23 }
 0x545   : > { %v3614_v33 = vsel %vm13372_vm11, %v3592_v62, 0.0  ;;  %v3615_v4 = vsel %vm13376_vm13, %v3591_v27, 0.0  ;;  %v3616_v24 = vsel %vm13380_vm14, %v3590_v3, 0.0  ;;  %v13537_v15 = vsel %vm3737_vm7, 1, %v16293_v63  ;;  %v13566_v27 = vpop.permute.xlu1 %3791 }
 0x546   : > { %v3613_v12 = vsel %vm13400_vm4, %v3593_v40, 0.0  ;;  %v3617_v13 = vsel %vm13406_vm0, %v3589_v7, 0.0  ;;  %v13551_v42 = vadd.f32 %v3701_v23, %v3638_v0  ;;  %v13553_v62 = vadd.f32 %v3702_v17, %v3639_v46  ;;  %4148 = vrot.lane.b32.xlu1 %v16286_v55, %s6301_s30 }
 0x547   : > { %v3620_v8 = vsel %vm13418_vm8, %v3594_v54, 0.0  ;;  %v3625_v19 = vmul.f32 %v13069_v29, %v3613_v12  ;;  %v3626_v59 = vmul.f32 %v13069_v29, %v3614_v33  ;;  %v3629_v56 = vmul.f32 %v13069_v29, %v3617_v13  ;;  %v13568_v16 = vpop.permute.xlu2 %3722  ;;  %v3713_v40 = vpop.permute.xlu0 %3712 }
 0x548   : > { %v3627_v7 = vmul.f32 %v13069_v29, %v3615_v4  ;;  %v3628_v26 = vmul.f32 %v13069_v29, %v3616_v24  ;;  %v3632_v41 = vmul.f32 %v13069_v29, %v3620_v8  ;;  %v3740_v3 = vperm.slane %v13537_v15, 1 }
 0x549   : > { %v3739_v45 = vperm.slane %v13537_v15, 0  ;;  %v3746_v30 = vperm.slane %v13537_v15, 7  ;;  %v3743_v54 = vperm.slane %v13537_v15, 4  ;;  %vm17498_vm6 = vcmp.lt.s32.totalorder %v7906_v9, 83 }
 0x54a   : > { %v3731_v50 = vsel %vm17498_vm6, %v13261_v48, %v13568_v16  ;;  %v3663_v29 = vsel %vm3657_vm15, %v12876_v57, %v13163_v21  ;;  %vm17499_vm2 = vmmov %vm17498_vm6  ;;  %v3741_v17 = vperm.slane %v13537_v15, 2  ;;  %v3742_v0 = vperm.slane %v13537_v15, 3  ;;  %4069 = vrot.lane.b32.xlu0 %v17450_v14, %s6299_s21 }
 0x54b   : > { %v3735_v22 = vsel %vm17499_vm2, %v3713_v40, %v13161_v5  ;;  %vm17500_vm11 = vmmov %vm17499_vm2  ;;  %v3565_v46 = vadd.f32 %v13447_v44, %v13223_v47  ;;  %v3633_v33 = vadd.f32 %v3625_v19, %v13342_v37  ;;  %v3637_v4 = vadd.f32 %v3629_v56, %v3566_v51 }
 0x54c   : > { %v3736_v23 = vsel %vm17500_vm11, %v13351_v31, %v3713_v40  ;;  %vm13592_vm13 = vcmp.eq.s32.totalorder %v3740_v3, 1  ;;  %v3634_v5 = vadd.f32 %v3626_v59, %v13444_v10  ;;  %v3640_v21 = vadd.f32 %v3632_v41, %v13466_v11  ;;  %4002 = vrot.lane.b32.xlu2 %v6988_v18, %s6297_s23  ;;  %vm17513_vm7 = vmmov %vm17499_vm2 }
 0x54d   : > { %v3685_v24 = vsel %vm13502_vm5, %v3663_v29, 0.0  ;;  %vm13600_vm15 = vcmp.eq.s32.totalorder %v3739_v45, 1  ;;  %vm13604_vm14 = vcmp.eq.s32.totalorder %v3746_v30, 1  ;;  %vm13608_vm4 = vcmp.eq.s32.totalorder %v3743_v54, 1  ;;  %vm17514_vm10 = vmmov %vm17499_vm2 }
 0x54e   : > { %v3697_v44 = vmul.f32 %v13357_v2, %v3685_v24  ;;  %vm13617_vm0 = vcmp.eq.s32.totalorder %v3741_v17, 1  ;;  %v3635_v51 = vadd.f32 %v3627_v7, %v13460_v38  ;;  %v3636_v11 = vadd.f32 %v3628_v26, %v3565_v46  ;;  %v13640_v7 = vpop.permute.xlu1 %3797  ;;  %vm17515_vm11 = vmmov %vm17499_vm2  ;;  %v17516_v24 = vld [vmem:[#allocation193_spill] sm:$0xff] }
 0x54f   : > { %vm13624_vm8 = vcmp.eq.s32.totalorder %v3742_v0, 1  ;;  %v3744_v2 = vperm.slane %v13537_v15, 5  ;;  %v3745_v49 = vperm.slane %v13537_v15, 6  ;;  %v6302_v13 = vmov 48   ;;  %v3765_v15 = vpop.permute.xlu2 %3764  ;;  %v3719_v26 = vpop.permute.xlu0 %3718 }
 0x550   : > { %6120 = vset.pattern.permute.xlu1 %v6302_v13  ;;  %v3704_v8 = vadd.f32 %v13362_v20, %v3633_v33  ;;  %v3756_v38 = vsel %vm13592_vm13, %v13490_v34, 0.0  ;;  %v3755_v19 = vsel %vm13600_vm15, %v3735_v22, 0.0  ;;  %v3762_v59 = vsel %vm13604_vm14, %v3736_v23, 0.0 }
 0x551   : > { %v3759_v56 = vsel %vm13608_vm4, %v3731_v50, 0.0  ;;  %v3767_v41 = vmul.f32 %v3765_v15, %v3755_v19  ;;  %v3768_v3 = vmul.f32 %v3765_v15, %v3756_v38  ;;  %v3774_v45 = vmul.f32 %v3765_v15, %v3762_v59  ;;  %4190 = vperm.xlu1 %6120, %v13546_v28  }
 0x552   : > { %v3771_v20 = vmul.f32 %v3765_v15, %v3759_v56  ;;  %v3732_v34 = vsel %vm17513_vm7, %v3719_v26, %v13261_v48  ;;  %v3733_v30 = vsel %vm17514_vm10, %v13480_v61, %v3719_v26  ;;  %v3708_v40 = vadd.f32 %v13365_v53, %v3637_v4  ;;  %4075 = vrot.lane.b32.xlu0 %v17431_v6, %s6299_s21  ;;  %v17522_v26 = vld [vmem:[#allocation14_spill] sm:$0xff] }
 0x553   : > { %v3705_v54 = vadd.f32 %v3697_v44, %v3634_v5  ;;  %v3757_v50 = vsel %vm13617_vm0, %v3733_v30, 0.0  ;;  %v3758_v29 = vsel %vm13624_vm8, %v3732_v34, 0.0  ;;  %v13653_v22 = vadd.f32 %v3767_v41, %v3704_v8 }
 0x554   : > { %v3711_v23 = vadd.f32 %v13368_v58, %v3640_v21  ;;  %v3769_v17 = vmul.f32 %v3765_v15, %v3757_v50  ;;  %v3770_v0 = vmul.f32 %v3765_v15, %v3758_v29  ;;  %v3706_v48 = vadd.f32 %v13423_v25, %v3635_v51  ;;  %4008 = vrot.lane.b32.xlu2 %v17484_v1, %s6297_s23  ;;  %s17534_s23 = smov 1  }
 0x555   : > { %v3707_v46 = vadd.f32 %v13426_v35, %v3636_v11  ;;  %v13658_v61 = vadd.f32 %v3771_v20, %v3708_v40  ;;  %v13660_v53 = vadd.f32 %v3768_v3, %v3705_v54  ;;  %vm3799_vm3 = vcmp.lt.s32.totalorder %v7906_v9, 82 }
 0x556   : > { %v13662_v33 = vadd.f32 %v3774_v45, %v3711_v23  ;;  %v13669_v58 = vadd.f32 %v3769_v17, %v3706_v48  ;;  %v13675_v25 = vpop.permute.xlu1 %3856  ;;  %vm3752_vm5 = vcmp.eq.s32.totalorder %v3744_v2, 1  ;;  %vm3753_vm6 = vcmp.eq.s32.totalorder %v3745_v49, 1 }
 0x557   : > { %v13671_v4 = vadd.f32 %v3770_v0, %v3707_v46  ;;  %v3788_v35 = vpop.permute.xlu2 %3787  ;;  %v3725_v57 = vpop.permute.xlu0 %3724  ;;  %vm17517_vm13 = vnez %v17516_v24 }
 0x558   : > { %v3805_v55 = vsel %vm3799_vm3, %v13470_v60, %v3788_v35  ;;  %v3729_v5 = vsel %vm17499_vm2, %v3725_v57, %v13351_v31  ;;  %v3730_v21 = vsel %vm17515_vm11, %v13568_v16, %v3725_v57  ;;  %vm3808_vm15 = vmand %vm13455_vm1, %vm17517_vm13 }
 0x559   : > { %v3760_v12 = vsel %vm3752_vm5, %v3730_v21, 0.0  ;;  %v3761_v47 = vsel %vm3753_vm6, %v3729_v5, 0.0  ;;  %v3809_v10 = vsel %vm3808_vm15, 1, %v16293_v63  ;;  %4223 = vrot.lane.b32.xlu1 %v17522_v26, %s6238_s22  ;;  %v6303_v21 = vmov 50  }
 0x55a   : > { %v3772_v37 = vmul.f32 %v3765_v15, %v3760_v12  ;;  %v3773_v44 = vmul.f32 %v3765_v15, %v3761_v47  ;;  %4081 = vrot.lane.b32.xlu0 %v17430_v39, %s6299_s21  ;;  %v3811_v51 = vperm.slane %v3809_v10, 1  ;;  %v3810_v2 = vperm.slane %v3809_v10, 0 }
 0x55b   : > { %v3817_v49 = vperm.slane %v3809_v10, 7  ;;  %v3814_v8 = vperm.slane %v3809_v10, 4  ;;  %v3812_v19 = vperm.slane %v3809_v10, 2  ;;  %v3813_v59 = vperm.slane %v3809_v10, 3  ;;  %6122 = vset.pattern.permute.xlu0 %v6303_v21 }
 0x55c   : > { %4067 = vrot.lane.b32.xlu2 %v17497_v36, %s6299_s21  ;;  %v13695_v31 = vadd.f32 %v3772_v37, %v13551_v42  ;;  %v13698_v16 = vadd.f32 %v3773_v44, %v13553_v62  ;;  %vm13713_vm14 = vcmp.eq.s32.totalorder %v3811_v51, 1  ;;  %vm3818_vm4 = vcmp.eq.s32.totalorder %v3810_v2, 1 }
 0x55d   : > { %vm13717_vm0 = vcmp.eq.s32.totalorder %v3817_v49, 1  ;;  %vm3822_vm8 = vcmp.eq.s32.totalorder %v3814_v8, 1  ;;  %vm13727_vm7 = vcmp.eq.s32.totalorder %v3812_v19, 1  ;;  %vm13731_vm10 = vcmp.eq.s32.totalorder %v3813_v59, 1  ;;  %v4995_v8 = vpop.f32.mrf.mxu0 }
 0x55e   : > { %v13702_v11 = vpop.permute.xlu1 %3862  ;;  %v3827_v3 = vsel %vm13713_vm14, %v3805_v55, 0.0  ;;  %v3815_v57 = vperm.slane %v3809_v10, 5  ;;  %v3816_v55 = vperm.slane %v3809_v10, 6  ;;  %vm3870_vm5 = vcmp.lt.s32.totalorder %v7906_v9, 81 }
 0x55f   : > { %v3794_v32 = vpop.permute.xlu2 %3793  ;;  %v3784_v13 = vpop.permute.xlu0 %3783  ;;  %v6304_v49 = vmov 52  }
 0x560   : > { %v3802_v38 = vsel %vm3799_vm3, %v13566_v27, %v3794_v32  ;;  %v3806_v42 = vsel %vm3799_vm3, %v3784_v13, %v13470_v60  ;;  %v3807_v62 = vsel %vm3799_vm3, %v13640_v7, %v3784_v13  ;;  %vm3823_vm6 = vcmp.eq.s32.totalorder %v3815_v57, 1  ;;  %6124 = vset.pattern.permute.xlu1 %v6304_v49  ;;  %v17527_v13 = vld [vmem:[#allocation9_spill] sm:$0xff]  ;;  %v17532_v60 = vld [vmem:[#allocation195_spill] sm:$0xff] }
 0x561   : > { %v3826_v20 = vsel %vm3818_vm4, %v3806_v42, 0.0  ;;  %v3833_v45 = vsel %vm13717_vm0, %v3807_v62, 0.0  ;;  %v3830_v34 = vsel %vm3822_vm8, %v3802_v38, 0.0  ;;  %4275 = vrot.lane.b32.xlu1 %v17522_v26, %s15769_s15  ;;  %vm3824_vm2 = vcmp.eq.s32.totalorder %v3816_v55, 1 }
 0x562   : > { %4140 = vrot.lane.b32.xlu0 %v17450_v14, %s6301_s30  ;;  %vm17533_vm15 = vnez %v17532_v60  ;;  %vm3941_vm4 = vcmp.lt.s32.totalorder %v7906_v9, 80 }
 0x563   : > { %vm3879_vm14 = vmand %vm13455_vm1, %vm17533_vm15 }
 0x564   : > { %4073 = vrot.lane.b32.xlu2 %v6988_v18, %s6299_s21 }
 0x566   : > { %v13739_v30 = vpop.permute.xlu1 %3866 }
 0x567   : > { %v3836_v40 = vpop.permute.xlu2 %3835  ;;  %v3790_v14 = vpop.permute.xlu0 %3789 }
 0x568   : > { %v3838_v54 = vmul.f32 %v3836_v40, %v3826_v20  ;;  %v3842_v50 = vmul.f32 %v3836_v40, %v3830_v34  ;;  %v3839_v29 = vmul.f32 %v3836_v40, %v3827_v3  ;;  %v3845_v23 = vmul.f32 %v3836_v40, %v3833_v45 }
 0x569   : > { %v3803_v17 = vsel %vm3799_vm3, %v3790_v14, %v13566_v27  ;;  %v3804_v0 = vsel %vm3799_vm3, %v3788_v35, %v3790_v14  ;;  %4313 = vrot.lane.b32.xlu1 %v17527_v13, %s6242_s24  ;;  %v3880_v14 = vsel %vm3879_vm14, 1, %v16293_v63 }
 0x56a   : > { %v3828_v48 = vsel %vm13727_vm7, %v3804_v0, 0.0  ;;  %v3829_v46 = vsel %vm13731_vm10, %v3803_v17, 0.0  ;;  %v13751_v5 = vadd.f32 %v3838_v54, %v13653_v22  ;;  %v13754_v24 = vadd.f32 %v3842_v50, %v13658_v61  ;;  %4146 = vrot.lane.b32.xlu0 %v17431_v6, %s6301_s30 }
 0x56b   : > { %v13757_v27 = vadd.f32 %v3839_v29, %v13660_v53  ;;  %v3840_v35 = vmul.f32 %v3836_v40, %v3828_v48  ;;  %v3841_v12 = vmul.f32 %v3836_v40, %v3829_v46  ;;  %v13765_v22 = vadd.f32 %v3845_v23, %v13662_v33 }
 0x56c   : > { %4079 = vrot.lane.b32.xlu2 %v17484_v1, %s6299_s21  ;;  %v3882_v54 = vperm.slane %v3880_v14, 1  ;;  %v3881_v23 = vperm.slane %v3880_v14, 0  ;;  %v3883_v17 = vperm.slane %v3880_v14, 2  ;;  %v3884_v0 = vperm.slane %v3880_v14, 3  ;;  %s17569_s21 = smov 112  }
 0x56d   : > { %v13770_v61 = vadd.f32 %v3840_v35, %v13669_v58  ;;  %v13773_v53 = vadd.f32 %v3841_v12, %v13671_v4  ;;  %v3887_v48 = vperm.slane %v3880_v14, 6  ;;  %v3888_v57 = vperm.slane %v3880_v14, 7 }
 0x56e   : > { %v13775_v47 = vpop.permute.xlu1 %3925  ;;  %v3885_v55 = vperm.slane %v3880_v14, 4  ;;  %vm13883_vm7 = vcmp.eq.s32.totalorder %v3882_v54, 1  ;;  %vm13887_vm10 = vcmp.eq.s32.totalorder %v3881_v23, 1 }
 0x56f   : > { %v3859_v37 = vpop.permute.xlu2 %3858  ;;  %v3796_v44 = vpop.permute.xlu0 %3795 }
 0x570   : > { %v13780_v33 = vsel %vm3870_vm5, %v13675_v25, %v3859_v37  ;;  %v3800_v6 = vsel %vm3799_vm3, %v3796_v44, %v13640_v7  ;;  %v3801_v58 = vsel %vm3799_vm3, %v3794_v32, %v3796_v44  ;;  %vm17528_vm3 = vcmask 1043456  }
 0x571   : > { %v3831_v4 = vsel %vm3823_vm6, %v3801_v58, 0.0  ;;  %v3832_v10 = vsel %vm3824_vm2, %v3800_v6, 0.0  ;;  %4327 = vrot.lane.b32.xlu1 %v17522_v26, %s6242_s24  ;;  %vm13895_vm6 = vcmp.eq.s32.totalorder %v3884_v0, 1  ;;  %vm13899_vm2 = vcmp.eq.s32.totalorder %v3887_v48, 1 }
 0x572   : > { %v3843_v51 = vmul.f32 %v3836_v40, %v3831_v4  ;;  %v3844_v2 = vmul.f32 %v3836_v40, %v3832_v10  ;;  %4152 = vrot.lane.b32.xlu0 %v17430_v39, %s6301_s30  ;;  %v17531_v39 = vld [vmem:[#allocation8_spill] sm:$0xff]  ;;  %v3886_v4 = vperm.slane %v3880_v14, 5 }
 0x574   : > { %4138 = vrot.lane.b32.xlu2 %v17497_v36, %s6301_s30  ;;  %v13792_v38 = vadd.f32 %v3843_v51, %v13695_v31  ;;  %v13795_v7 = vadd.f32 %v3844_v2, %v13698_v16  ;;  %v17529_v31 = vld [vmem:[#allocation188_spill] sm:$0xff]  ;;  %v6305_v16 = vmov 49  }
 0x575   : > { %vm17530_vm11 = vnez %v17529_v31  ;;  %6121 = vset.pattern.permute.xlu2 %v6305_v16 }
 0x576   : > { %v13799_v32 = vpop.permute.xlu1 %3929  ;;  %vm3950_vm13 = vmand %vm13455_vm1, %vm17530_vm11  ;;  %vm13911_vm11 = vcmp.eq.s32.totalorder %v3885_v55, 1 }
 0x577   : > { %v4970_v42 = vpop.permute.xlu2 %4969  ;;  %v3855_v62 = vpop.permute.xlu0 %3854  ;;  %v13820_v15 = vsel %vm3950_vm13, 1, %v16293_v63  ;;  %vm13915_vm13 = vcmp.eq.s32.totalorder %v3886_v4, 1 }
 0x578   : > { %v4996_v19 = vadd.f32 %v4995_v8, %v4970_v42  ;;  %v13804_v59 = vsel %vm3870_vm5, %v3855_v62, %v13675_v25  ;;  %v3952_v34 = vperm.slane %v13820_v15, 0  ;;  %v3953_v40 = vperm.slane %v13820_v15, 1 }
 0x579   : > { %4367 = vrot.lane.b32.xlu1 %v17531_v39, %s17534_s23  ;;  %v3954_v2 = vperm.slane %v13820_v15, 2  ;;  %v3897_v60 = vsel %vm13887_vm10, %v13804_v59, 0.0  ;;  %v3956_v14 = vperm.slane %v13820_v15, 4  ;;  %v3957_v29 = vperm.slane %v13820_v15, 5 }
 0x57a   : > { %v4998_v36 = vmax.f32 %v4996_v19, 0.0  ;;  %4211 = vrot.lane.b32.xlu0 %v17531_v39, %s6238_s22  ;;  %vm13854_vm0 = vcmp.eq.s32.totalorder %v3952_v34, 1  ;;  %vm13858_vm8 = vcmp.eq.s32.totalorder %v3953_v40, 1  ;;  %v3955_v40 = vperm.slane %v13820_v15, 3 }
 0x57b   : > { %vm13920_vm15 = vcmp.eq.s32.totalorder %v3954_v2, 1  ;;  %vm13970_vm14 = vcmp.eq.s32.totalorder %v3957_v29, 1  ;;  %v3959_v16 = vperm.slane %v13820_v15, 7 }
 0x57c   : > { %5843 = vmatpush.msk.msra.mxu1 %vm17528_vm3, %v4998_v36  ;;  %4144 = vrot.lane.b32.xlu2 %v6988_v18, %s6301_s30  ;;  %vm13907_vm3 = vcmp.eq.s32.totalorder %v3888_v57, 1 }
 0x57e   : > { %v13817_v25 = vpop.permute.xlu1 %3935 }
 0x57f   : > { %v3869_v56 = vpop.permute.xlu2 %3868  ;;  %v3861_v41 = vpop.permute.xlu0 %3860 }
 0x580   : > { %v13829_v3 = vsel %vm3870_vm5, %v13739_v30, %v3869_v56  ;;  %v13833_v18 = vsel %vm3870_vm5, %v3869_v56, %v3855_v62  ;;  %v13838_v20 = vsel %vm3870_vm5, %v3861_v41, %v13702_v11  ;;  %v13842_v45 = vsel %vm3870_vm5, %v3859_v37, %v3861_v41  ;;  %v17549_v62 = vld [vmem:[#allocation10_spill] sm:$0xff] }
 0x581   : > { %4215 = vrot.lane.b32.xlu1 %v17549_v62, %s6238_s22  ;;  %v3898_v56 = vsel %vm13883_vm7, %v13780_v33, 0.0  ;;  %v3900_v50 = vsel %vm13895_vm6, %v13838_v20, 0.0  ;;  %vm17560_vm7 = vnez %v17393_v52  ;;  %vm3967_vm6 = vcmp.eq.s32.totalorder %v3959_v16, 1 }
 0x582   : > { %4263 = vrot.lane.b32.xlu0 %v17531_v39, %s15769_s15  ;;  %vm4021_vm10 = vmand %vm13455_vm1, %vm17560_vm7  ;;  %vm4083_vm7 = vcmp.lt.s32.totalorder %v7906_v9, 78 }
 0x584   : > { %4150 = vrot.lane.b32.xlu2 %v17484_v1, %s6301_s30 }
 0x586   : > { %v13862_v46 = vpop.permute.xlu1 %3977 }
 0x587   : > { %v3928_v1 = vpop.permute.xlu2 %3927  ;;  %v3865_v21 = vpop.permute.xlu0 %3864 }
 0x588   : > { %v3947_v35 = vsel %vm3941_vm4, %v3928_v1, %v13799_v32  ;;  %v3948_v12 = vsel %vm3941_vm4, %v13775_v47, %v3928_v1  ;;  %v3872_v37 = vsel %vm3870_vm5, %v3865_v21, %v13739_v30  ;;  %v3873_v44 = vsel %vm3870_vm5, %v13702_v11, %v3865_v21 }
 0x589   : > { %v3968_v6 = vsel %vm13854_vm0, %v3948_v12, 0.0  ;;  %v3969_v58 = vsel %vm13858_vm8, %v3947_v35, 0.0  ;;  %vm13891_vm5 = vcmp.eq.s32.totalorder %v3883_v17, 1  ;;  %v3901_v23 = vsel %vm13911_vm11, %v3873_v44, 0.0  ;;  %4398 = vperm.xlu1 %6124, %v13546_v28  }
 0x58a   : > { %v3980_v10 = vmul.f32 %v13862_v46, %v3968_v6  ;;  %v3981_v51 = vmul.f32 %v13862_v46, %v3969_v58  ;;  %4294 = vperm.xlu0 %6122, %v13546_v28   ;;  %v3899_v54 = vsel %vm13891_vm5, %v13842_v45, 0.0  ;;  %v3902_v17 = vsel %vm13915_vm13, %v3872_v37, 0.0 }
 0x58b   : > { %v3904_v58 = vsel %vm13907_vm3, %v13833_v18, 0.0  ;;  %vm3963_vm0 = vcmp.eq.s32.totalorder %v3955_v40, 1  ;;  %vm3964_vm8 = vcmp.eq.s32.totalorder %v3956_v14, 1  ;;  %v17561_v40 = vld [vmem:[#allocation11_spill] sm:$0xff]  ;;  %v14016_v14 = vsel %vm4021_vm10, 1, %v16293_v63 }
 0x58c   : > { %4209 = vrot.lane.b32.xlu2 %v17527_v13, %s6238_s22  ;;  %v4029_v16 = vperm.slane %v14016_v14, 6 }
 0x58e   : > { %v13930_v41 = vpop.permute.xlu1 %4000 }
 0x58f   : > { %v3932_v34 = vpop.permute.xlu2 %3931  ;;  %v3907_v33 = vpop.permute.xlu0 %3906 }
 0x590   : > { %v3946_v59 = vsel %vm3941_vm4, %v13799_v32, %v3932_v34  ;;  %v3909_v0 = vmul.f32 %v3907_v33, %v3897_v60  ;;  %v3913_v20 = vmul.f32 %v3907_v33, %v3901_v23  ;;  %v3910_v1 = vmul.f32 %v3907_v33, %v3898_v56 }
 0x591   : > { %v3970_v45 = vsel %vm13920_vm15, %v3946_v59, 0.0  ;;  %v3914_v57 = vmul.f32 %v3907_v33, %v3902_v17  ;;  %v3903_v32 = vsel %vm13899_vm2, %v13829_v3, 0.0  ;;  %v3911_v21 = vmul.f32 %v3907_v33, %v3899_v54 }
 0x592   : > { %v3982_v48 = vmul.f32 %v13862_v46, %v3970_v45  ;;  %v3917_v55 = vadd.f32 %v3909_v0, %v13751_v5  ;;  %v3912_v35 = vmul.f32 %v3907_v33, %v3900_v50  ;;  %v3921_v12 = vadd.f32 %v3913_v20, %v13754_v24  ;;  %4365 = vrot.lane.b32.xlu0 %v17527_v13, %s17534_s23 }
 0x593   : > { %v3918_v37 = vadd.f32 %v3910_v1, %v13757_v27  ;;  %v3922_v44 = vadd.f32 %v3914_v57, %v13792_v38  ;;  %v3915_v6 = vmul.f32 %v3907_v33, %v3903_v32  ;;  %v3919_v5 = vadd.f32 %v3911_v21, %v13770_v61 }
 0x594   : > { %4261 = vrot.lane.b32.xlu2 %v17527_v13, %s15769_s15  ;;  %v13964_v3 = vadd.f32 %v3980_v10, %v3917_v55  ;;  %v3920_v24 = vadd.f32 %v3912_v35, %v13773_v53  ;;  %v3916_v4 = vmul.f32 %v3907_v33, %v3904_v58  ;;  %v6306_v56 = vmov 53  }
 0x595   : > { %v13974_v38 = vadd.f32 %v3981_v51, %v3918_v37  ;;  %v3923_v18 = vadd.f32 %v3915_v6, %v13795_v7  ;;  %v13979_v61 = vadd.f32 %v3982_v48, %v3919_v5  ;;  %6125 = vset.pattern.permute.xlu1 %v6306_v56  ;;  %v4025_v23 = vperm.slane %v14016_v14, 2 }
 0x596   : > { %v13977_v2 = vpop.permute.xlu1 %4006  ;;  %v3924_v30 = vadd.f32 %v3916_v4, %v13765_v22  ;;  %v3958_v22 = vperm.slane %v13820_v15, 6  ;;  %4426 = vperm.xlu1 %6125, %v13546_v28   ;;  %v4023_v0 = vperm.slane %v14016_v14, 0  ;;  %v4024_v48 = vperm.slane %v14016_v14, 1 }
 0x597   : > { %v3938_v10 = vpop.permute.xlu2 %3937  ;;  %v3934_v53 = vpop.permute.xlu0 %3933  ;;  %vm4012_vm2 = vcmp.lt.s32.totalorder %v7906_v9, 79  ;;  %v6307_v21 = vmov 51   ;;  %v6308_v35 = vmov 54   ;;  %v4030_v56 = vperm.slane %v14016_v14, 7 }
 0x598   : > { %v3943_v49 = vsel %vm3941_vm4, %v13817_v25, %v3938_v10  ;;  %v3944_v51 = vsel %vm3941_vm4, %v3934_v53, %v13817_v25  ;;  %v3945_v7 = vsel %vm3941_vm4, %v3932_v34, %v3934_v53  ;;  %vm3966_vm5 = vcmp.eq.s32.totalorder %v3958_v22, 1 }
 0x599   : > { %v3973_v11 = vsel %vm13970_vm14, %v3943_v49, 0.0  ;;  %v3971_v8 = vsel %vm3963_vm0, %v3945_v7, 0.0  ;;  %v3972_v42 = vsel %vm3964_vm8, %v3944_v51, 0.0  ;;  %vm14045_vm3 = vcmp.eq.s32.totalorder %v4023_v0, 1  ;;  %vm4092_vm0 = vmand %vm13455_vm1, %vm17429_vm9 }
 0x59a   : > { %v3985_v19 = vmul.f32 %v13862_v46, %v3973_v11  ;;  %v3983_v36 = vmul.f32 %v13862_v46, %v3971_v8  ;;  %v3984_v31 = vmul.f32 %v13862_v46, %v3972_v42  ;;  %4213 = vrot.lane.b32.xlu0 %v17561_v40, %s6238_s22  ;;  %vm14049_vm11 = vcmp.eq.s32.totalorder %v4024_v48, 1 }
 0x59b   : > { %v4027_v53 = vperm.slane %v14016_v14, 4  ;;  %vm4037_vm9 = vcmp.eq.s32.totalorder %v4029_v16, 1  ;;  %vm4038_vm8 = vcmp.eq.s32.totalorder %v4030_v56, 1 }
 0x59c   : > { %v14001_v25 = vadd.f32 %v3985_v19, %v3922_v44  ;;  %4242 = vperm.xlu2 %6121, %v13546_v28   ;;  %v14004_v60 = vadd.f32 %v3984_v31, %v3921_v12  ;;  %v14006_v34 = vadd.f32 %v3983_v36, %v3920_v24 }
 0x59d   : > { %vm4035_vm14 = vcmp.eq.s32.totalorder %v4027_v53, 1  ;;  %v17570_v53 = vld [vmem:[#allocation12_spill] sm:$0xff] }
 0x59e   : > { %v14011_v15 = vpop.permute.xlu1 %4048  ;;  %4449 = vrot.lane.b32.xlu1 %v17561_v40, %s6254_s20 }
 0x59f   : > { %v14013_v52 = vpop.permute.xlu2 %3996  ;;  %v3940_v54 = vpop.permute.xlu0 %3939  ;;  %6126 = vset.pattern.permute.xlu1 %v6308_v35 }
 0x5a0   : > { %v3942_v50 = vsel %vm3941_vm4, %v3938_v10, %v3940_v54  ;;  %v3949_v33 = vsel %vm3941_vm4, %v3940_v54, %v13775_v47  ;;  %vm14039_vm4 = vcmp.eq.s32.totalorder %v4025_v23, 1  ;;  %v4026_v10 = vperm.slane %v14016_v14, 3 }
 0x5a1   : > { %v3974_v59 = vsel %vm3966_vm5, %v3942_v50, 0.0  ;;  %v3975_v29 = vsel %vm3967_vm6, %v3949_v33, 0.0 }
 0x5a2   : > { %v3986_v17 = vmul.f32 %v13862_v46, %v3974_v59  ;;  %v3987_v45 = vmul.f32 %v13862_v46, %v3975_v29  ;;  %4267 = vrot.lane.b32.xlu0 %v17549_v62, %s15769_s15  ;;  %vm4034_vm15 = vcmp.eq.s32.totalorder %v4026_v10, 1  ;;  %v14126_v59 = vsel %vm4092_vm0, 1, %v16293_v63 }
 0x5a3   : > { %v4094_v46 = vperm.slane %v14126_v59, 0  ;;  %v4095_v57 = vperm.slane %v14126_v59, 1 }
 0x5a4   : > { %4315 = vrot.lane.b32.xlu2 %v17531_v39, %s6242_s24  ;;  %v14031_v20 = vadd.f32 %v3986_v17, %v3923_v18  ;;  %v14033_v47 = vadd.f32 %v3987_v45, %v3924_v30  ;;  %v4028_v18 = vperm.slane %v14016_v14, 5  ;;  %v4096_v45 = vperm.slane %v14126_v59, 2 }
 0x5a5   : > { %6123 = vset.pattern.permute.xlu2 %v6307_v21  ;;  %vm4102_vm5 = vcmp.eq.s32.totalorder %v4094_v46, 1  ;;  %vm4103_vm6 = vcmp.eq.s32.totalorder %v4095_v57, 1  ;;  %v6310_v57 = vmov 57  }
 0x5a6   : > { %v14043_v1 = vpop.permute.xlu1 %4071  ;;  %4478 = vperm.xlu1 %6126, %v13546_v28   ;;  %vm4036_vm13 = vcmp.eq.s32.totalorder %v4028_v18, 1  ;;  %vm4104_vm10 = vcmp.eq.s32.totalorder %v4096_v45, 1  ;;  %v4098_v18 = vperm.slane %v14126_v59, 4  ;;  %6129 = vset.pattern.permute.xlu0 %v6310_v57 }
 0x5a7   : > { %v4003_v55 = vpop.permute.xlu2 %4002  ;;  %v3999_v12 = vpop.permute.xlu0 %3998 }
 0x5a8   : > { %v4017_v37 = vsel %vm4012_vm2, %v13930_v41, %v4003_v55  ;;  %v4018_v44 = vsel %vm4012_vm2, %v3999_v12, %v13930_v41  ;;  %v4019_v6 = vsel %vm4012_vm2, %v14013_v52, %v3999_v12 }
 0x5a9   : > { %v4041_v58 = vsel %vm14039_vm4, %v4017_v37, 0.0  ;;  %v4039_v5 = vsel %vm14045_vm3, %v4019_v6, 0.0  ;;  %v4040_v24 = vsel %vm14049_vm11, %v4018_v44, 0.0  ;;  %v4097_v37 = vperm.slane %v14126_v59, 3  ;;  %vm4163_vm11 = vmand %vm13455_vm1, %vm17447_vm12 }
 0x5aa   : > { %v4053_v27 = vmul.f32 %v14011_v15, %v4041_v58  ;;  %v4051_v4 = vmul.f32 %v14011_v15, %v4039_v5  ;;  %v4052_v41 = vmul.f32 %v14011_v15, %v4040_v24  ;;  %4319 = vrot.lane.b32.xlu0 %v17549_v62, %s6242_s24  ;;  %v4099_v5 = vperm.slane %v14126_v59, 5 }
 0x5ab   : > { %vm4105_vm4 = vcmp.eq.s32.totalorder %v4097_v37, 1  ;;  %vm4106_vm3 = vcmp.eq.s32.totalorder %v4098_v18, 1 }
 0x5ac   : > { %v14075_v49 = vadd.f32 %v4053_v27, %v13979_v61  ;;  %4346 = vperm.xlu2 %6123, %v13546_v28   ;;  %v14079_v30 = vadd.f32 %v4051_v4, %v13964_v3  ;;  %v14082_v51 = vadd.f32 %v4052_v41, %v13974_v38 }
 0x5ae   : > { %v14087_v7 = vpop.permute.xlu1 %4077  ;;  %4501 = vrot.lane.b32.xlu1 %v17561_v40, %s6263_s16 }
 0x5af   : > { %v4009_v61 = vpop.permute.xlu2 %4008  ;;  %v4005_v11 = vpop.permute.xlu0 %4004 }
 0x5b0   : > { %v4014_v3 = vsel %vm4012_vm2, %v13977_v2, %v4009_v61  ;;  %v4015_v38 = vsel %vm4012_vm2, %v4005_v11, %v13977_v2  ;;  %v4016_v8 = vsel %vm4012_vm2, %v4003_v55, %v4005_v11 }
 0x5b1   : > { %v4044_v42 = vsel %vm4036_vm13, %v4014_v3, 0.0  ;;  %v4042_v28 = vsel %vm4034_vm15, %v4016_v8, 0.0  ;;  %v4043_v19 = vsel %vm4035_vm14, %v4015_v38, 0.0  ;;  %vm17573_vm13 = vcmask 31744  }
 0x5b2   : > { %v4056_v36 = vmul.f32 %v14011_v15, %v4044_v42  ;;  %v4054_v31 = vmul.f32 %v14011_v15, %v4042_v28  ;;  %v4055_v22 = vmul.f32 %v14011_v15, %v4043_v19  ;;  %4447 = vrot.lane.b32.xlu0 %v17531_v39, %s6254_s20  ;;  %5844 = vmatmul.msk.f32.vlgmr.msra.gmra.mxu1 %vm17573_vm13, %v4999_v43  ;;  %vm4154_vm15 = vcmp.lt.s32.totalorder %v7906_v9, 77 }
 0x5b4   : > { %v14107_v2 = vadd.f32 %v4056_v36, %v14001_v25  ;;  %4379 = vrot.lane.b32.xlu2 %v17522_v26, %s17534_s23  ;;  %v14112_v50 = vadd.f32 %v4055_v22, %v14004_v60  ;;  %v14115_v33 = vadd.f32 %v4054_v31, %v14006_v34  ;;  %v4100_v31 = vperm.slane %v14126_v59, 6 }
 0x5b5   : > { %v4101_v22 = vperm.slane %v14126_v59, 7 }
 0x5b6   : > { %v14121_v14 = vpop.permute.xlu1 %4119  ;;  %4551 = vrot.lane.b32.xlu1 %v17531_v39, %s17569_s21  ;;  %vm4108_vm12 = vcmp.eq.s32.totalorder %v4100_v31, 1 }
 0x5b7   : > { %v14123_v25 = vpop.permute.xlu2 %4067  ;;  %v4011_v60 = vpop.permute.xlu0 %4010  ;;  %vm4109_vm1 = vcmp.eq.s32.totalorder %v4101_v22, 1 }
 0x5b8   : > { %v4013_v34 = vsel %vm4012_vm2, %v4009_v61, %v4011_v60  ;;  %v4020_v29 = vsel %vm4012_vm2, %v4011_v60, %v14013_v52  ;;  %vm4107_vm2 = vcmp.eq.s32.totalorder %v4099_v5, 1  ;;  %v5000_v5 = vld [vmem:[%s15181_s9 + $0x8] sm:$0xff] }
 0x5b9   : > { %v4045_v23 = vsel %vm4037_vm9, %v4013_v34, 0.0  ;;  %v4046_v17 = vsel %vm4038_vm8, %v4020_v29, 0.0  ;;  %vm17575_vm8 = vmmov %vm17573_vm13 }
 0x5ba   : > { %v4057_v0 = vmul.f32 %v14011_v15, %v4045_v23  ;;  %v4058_v48 = vmul.f32 %v14011_v15, %v4046_v17  ;;  %4371 = vrot.lane.b32.xlu0 %v17549_v62, %s17534_s23  ;;  %5845 = vmatmul.msk.f32.gmra.mxu1 %vm17575_vm8, %v5000_v5 }
 0x5bc   : > { %4265 = vrot.lane.b32.xlu2 %v17561_v40, %s15769_s15  ;;  %v14142_v32 = vadd.f32 %v4057_v0, %v14031_v20  ;;  %v14145_v52 = vadd.f32 %v4058_v48, %v14033_v47 }
 0x5be   : > { %v14151_v15 = vpop.permute.xlu1 %4142  ;;  %4453 = vrot.lane.b32.xlu1 %v17570_v53, %s6254_s20 }
 0x5bf   : > { %v4074_v55 = vpop.permute.xlu2 %4073  ;;  %v4070_v21 = vpop.permute.xlu0 %4069 }
 0x5c0   : > { %v4088_v20 = vsel %vm4083_vm7, %v14043_v1, %v4074_v55  ;;  %v4089_v47 = vsel %vm4083_vm7, %v4070_v21, %v14043_v1  ;;  %v4090_v35 = vsel %vm4083_vm7, %v14123_v25, %v4070_v21  ;;  %v6309_v1 = vmov 55  }
 0x5c1   : > { %v4112_v12 = vsel %vm4104_vm10, %v4088_v20, 0.0  ;;  %v4110_v44 = vsel %vm4102_vm5, %v4090_v35, 0.0  ;;  %v4111_v6 = vsel %vm4103_vm6, %v4089_v47, 0.0  ;;  %6127 = vset.pattern.permute.xlu2 %v6309_v1 }
 0x5c2   : > { %v4124_v58 = vmul.f32 %v14121_v14, %v4112_v12  ;;  %v4122_v24 = vmul.f32 %v14121_v14, %v4110_v44  ;;  %v4123_v27 = vmul.f32 %v14121_v14, %v4111_v6  ;;  %4499 = vrot.lane.b32.xlu0 %v17531_v39, %s6263_s16 }
 0x5c4   : > { %v14169_v4 = vadd.f32 %v4124_v58, %v14075_v49  ;;  %4317 = vrot.lane.b32.xlu2 %v17561_v40, %s6242_s24  ;;  %v14174_v41 = vadd.f32 %v4122_v24, %v14079_v30  ;;  %v14177_v10 = vadd.f32 %v4123_v27, %v14082_v51 }
 0x5c6   : > { %v14183_v61 = vpop.permute.xlu1 %4148  ;;  %4603 = vrot.lane.b32.xlu1 %v17531_v39, %s17572_s17 }
 0x5c7   : > { %v4080_v49 = vpop.permute.xlu2 %4079  ;;  %v4076_v11 = vpop.permute.xlu0 %4075 }
 0x5c8   : > { %v4085_v30 = vsel %vm4083_vm7, %v14087_v7, %v4080_v49  ;;  %v4086_v51 = vsel %vm4083_vm7, %v4076_v11, %v14087_v7  ;;  %v4087_v3 = vsel %vm4083_vm7, %v4074_v55, %v4076_v11 }
 0x5c9   : > { %v4115_v38 = vsel %vm4107_vm2, %v4085_v30, 0.0  ;;  %v4113_v8 = vsel %vm4105_vm4, %v4087_v3, 0.0  ;;  %v4114_v42 = vsel %vm4106_vm3, %v4086_v51, 0.0  ;;  %vm17580_vm4 = vcmp.lt.s32.totalorder %v7906_v9, 17 }
 0x5ca   : > { %v4127_v28 = vmul.f32 %v14121_v14, %v4115_v38  ;;  %v4125_v19 = vmul.f32 %v14121_v14, %v4113_v8  ;;  %v4126_v36 = vmul.f32 %v14121_v14, %v4114_v42  ;;  %4549 = vrot.lane.b32.xlu0 %v17527_v13, %s17569_s21  ;;  %vm17581_vm3 = vcmp.lt.s32.totalorder %v7906_v9, 16 }
 0x5cc   : > { %v14203_v7 = vadd.f32 %v4127_v28, %v14107_v2  ;;  %4445 = vrot.lane.b32.xlu2 %v17527_v13, %s6254_s20  ;;  %v14208_v56 = vadd.f32 %v4126_v36, %v14112_v50  ;;  %v14211_v54 = vadd.f32 %v4125_v19, %v14115_v33  ;;  %v14225_v50 = vsel %vm4163_vm11, 1, %v16293_v63  ;;  %vm17582_vm11 = vmmov %vm17580_vm4 }
 0x5cd   : > { %v4167_v17 = vperm.slane %v14225_v50, 2  ;;  %v4165_v48 = vperm.slane %v14225_v50, 0  ;;  %v4166_v46 = vperm.slane %v14225_v50, 1  ;;  %v4170_v58 = vperm.slane %v14225_v50, 5 }
 0x5ce   : > { %v14220_v2 = vpop.permute.xlu1 %4190  ;;  %v4169_v18 = vperm.slane %v14225_v50, 4  ;;  %v4171_v31 = vperm.slane %v14225_v50, 6  ;;  %v4172_v22 = vperm.slane %v14225_v50, 7 }
 0x5cf   : > { %v14222_v59 = vpop.permute.xlu2 %4138  ;;  %v4082_v33 = vpop.permute.xlu0 %4081  ;;  %vm4175_vm14 = vcmp.eq.s32.totalorder %v4167_v17, 1  ;;  %vm4173_vm0 = vcmp.eq.s32.totalorder %v4165_v48, 1  ;;  %vm4174_vm9 = vcmp.eq.s32.totalorder %v4166_v46, 1  ;;  %v6311_v46 = vmov 56  }
 0x5d0   : > { %v4084_v60 = vsel %vm4083_vm7, %v4080_v49, %v4082_v33  ;;  %v4091_v34 = vsel %vm4083_vm7, %v4082_v33, %v14123_v25  ;;  %vm4178_vm7 = vcmp.eq.s32.totalorder %v4170_v58, 1  ;;  %vm4177_vm5 = vcmp.eq.s32.totalorder %v4169_v18, 1  ;;  %v17587_v58 = vld [vmem:[#allocation67_spill] sm:$0xff] }
 0x5d1   : > { %v4116_v29 = vsel %vm4108_vm12, %v4084_v60, 0.0  ;;  %v4117_v23 = vsel %vm4109_vm1, %v4091_v34, 0.0  ;;  %vm4179_vm6 = vcmp.eq.s32.totalorder %v4171_v31, 1  ;;  %vm4180_vm2 = vcmp.eq.s32.totalorder %v4172_v22, 1  ;;  %vm17583_vm12 = vmmov %vm17581_vm3 }
 0x5d2   : > { %v4128_v45 = vmul.f32 %v14121_v14, %v4116_v29  ;;  %v4129_v0 = vmul.f32 %v14121_v14, %v4117_v23  ;;  %4451 = vrot.lane.b32.xlu0 %v17549_v62, %s6254_s20  ;;  %v17574_v14 = vld [vmem:[#allocation13_spill] sm:$0xff]  ;;  %vm17588_vm13 = vnez %v17587_v58 }
 0x5d3   : > { %4219 = vrot.lane.b32.xlu1 %v17574_v14, %s6238_s22  ;;  %v17605_v58 = vld [vmem:[#allocation141_spill] sm:$0xff] }
 0x5d4   : > { %4369 = vrot.lane.b32.xlu2 %v17561_v40, %s17534_s23  ;;  %v14242_v25 = vadd.f32 %v4128_v45, %v14142_v32  ;;  %v14245_v55 = vadd.f32 %v4129_v0, %v14145_v52 }
 0x5d6   : > { %v14251_v21 = vpop.permute.xlu1 %4223 }
 0x5d7   : > { %v4145_v20 = vpop.permute.xlu2 %4144  ;;  %v4141_v47 = vpop.permute.xlu0 %4140 }
 0x5d8   : > { %v4159_v32 = vsel %vm4154_vm15, %v14151_v15, %v4145_v20  ;;  %v4160_v52 = vsel %vm4154_vm15, %v4141_v47, %v14151_v15  ;;  %v4161_v35 = vsel %vm4154_vm15, %v14222_v59, %v4141_v47  ;;  %v4168_v15 = vperm.slane %v14225_v50, 3 }
 0x5d9   : > { %v4183_v12 = vsel %vm4175_vm14, %v4159_v32, 0.0  ;;  %v4181_v37 = vsel %vm4173_vm0, %v4161_v35, 0.0  ;;  %v4182_v44 = vsel %vm4174_vm9, %v4160_v52, 0.0  ;;  %v17584_v35 = vld [vmem:[#allocation15_spill] sm:$0xff]  ;;  %vm17593_vm0 = vcmp.lt.s32.totalorder %v7906_v9, 15 }
 0x5da   : > { %v4195_v6 = vmul.f32 %v14220_v2, %v4183_v12  ;;  %v4193_v24 = vmul.f32 %v14220_v2, %v4181_v37  ;;  %v4194_v27 = vmul.f32 %v14220_v2, %v4182_v44  ;;  %4601 = vrot.lane.b32.xlu0 %v17527_v13, %s17572_s17  ;;  %vm4176_vm10 = vcmp.eq.s32.totalorder %v4168_v15, 1  ;;  %v17585_v12 = vld [vmem:[#allocation87_spill] sm:$0xff]  ;;  %v17591_v15 = vld [vmem:[#allocation90_spill] sm:$0xff]  ;;  %vm17594_vm9 = vmmov %vm17593_vm0 }
 0x5db   : > { %4503 = vrot.lane.b32.xlu1 %v17549_v62, %s6263_s16  ;;  %vm17586_vm1 = vnez %v17585_v12  ;;  %vm17592_vm14 = vnez %v17591_v15 }
 0x5dc   : > { %v14273_v1 = vadd.f32 %v4195_v6, %v14169_v4  ;;  %4497 = vrot.lane.b32.xlu2 %v17527_v13, %s6263_s16  ;;  %v14278_v49 = vadd.f32 %v4193_v24, %v14174_v41  ;;  %v14281_v11 = vadd.f32 %v4194_v27, %v14177_v10  ;;  %v17589_v24 = vld [vmem:[#allocation88_spill] sm:$0xff] }
 0x5de   : > { %17576 = vst [vmem:[#allocation34_spill] sm:$0xff] %v14273_v1  ;;  %v14287_v30 = vpop.permute.xlu1 %4275 }
 0x5df   : > { %v4151_v4 = vpop.permute.xlu2 %4150  ;;  %v4147_v51 = vpop.permute.xlu0 %4146 }
 0x5e0   : > { %v4156_v41 = vsel %vm4154_vm15, %v14183_v61, %v4151_v4  ;;  %v4157_v10 = vsel %vm4154_vm15, %v4147_v51, %v14183_v61  ;;  %v4158_v3 = vsel %vm4154_vm15, %v4145_v20, %v4147_v51  ;;  %v6141_v61 = vld [vmem:[%s15176_s4] sm:$0xff] }
 0x5e1   : > { %v4186_v38 = vsel %vm4178_vm7, %v4156_v41, 0.0  ;;  %v4184_v8 = vsel %vm4176_vm10, %v4158_v3, 0.0  ;;  %v4185_v42 = vsel %vm4177_vm5, %v4157_v10, 0.0  ;;  %vm17599_vm10 = vcmp.lt.s32.totalorder %v7906_v9, 1 }
 0x5e2   : > { %v4198_v28 = vmul.f32 %v14220_v2, %v4186_v38  ;;  %v4196_v19 = vmul.f32 %v14220_v2, %v4184_v8  ;;  %v4197_v36 = vmul.f32 %v14220_v2, %v4185_v42  ;;  %4217 = vrot.lane.b32.xlu0 %v17570_v53, %s6238_s22 }
 0x5e3   : > { %4321 = vrot.lane.b32.xlu1 %v17570_v53, %s6242_s24 }
 0x5e4   : > { %v14303_v16 = vadd.f32 %v4198_v28, %v14203_v7  ;;  %4530 = vperm.xlu2 %6127, %v6141_v61   ;;  %v14309_v43 = vadd.f32 %v4197_v36, %v14208_v56  ;;  %v14312_v33 = vadd.f32 %v4196_v19, %v14211_v54  ;;  %v17595_v28 = vld [vmem:[#allocation113_spill] sm:$0xff]  ;;  %v17597_v36 = vld [vmem:[#allocation94_spill] sm:$0xff] }
 0x5e5   : > { %vm17596_vm8 = vnez %v17595_v28  ;;  %vm17598_vm7 = vnez %v17597_v36 }
 0x5e6   : > { %17577 = vst [vmem:[#allocation36_spill] sm:$0xff] %v14312_v33  ;;  %v4314_v50 = vpop.permute.xlu1 %4313 }
 0x5e7   : > { %v4210_v7 = vpop.permute.xlu2 %4209  ;;  %v4153_v60 = vpop.permute.xlu0 %4152 }
 0x5e8   : > { %v4155_v34 = vsel %vm4154_vm15, %v4151_v4, %v4153_v60  ;;  %v4162_v56 = vsel %vm4154_vm15, %v4153_v60, %v14222_v59  ;;  %v4232_v32 = vsel %vm17582_vm11, %v14251_v21, %v4210_v7  ;;  %vm17590_vm15 = vnez %v17589_v24 }
 0x5e9   : > { %v4187_v54 = vsel %vm4179_vm6, %v4155_v34, 0.0  ;;  %v4188_v29 = vsel %vm4180_vm2, %v4162_v56, 0.0  ;;  %v4233_v37 = vsel %vm17586_vm1, %v4232_v32, 0.0  ;;  %v17600_v56 = vld [vmem:[#allocation121_spill] sm:$0xff]  ;;  %vm17602_vm6 = vmmov %vm17599_vm10 }
 0x5ea   : > { %v4199_v23 = vmul.f32 %v14220_v2, %v4187_v54  ;;  %v4200_v17 = vmul.f32 %v14220_v2, %v4188_v29  ;;  %4271 = vrot.lane.b32.xlu0 %v17574_v14, %s15769_s15  ;;  %vm17601_vm5 = vnez %v17600_v56 }
 0x5eb   : > { %4555 = vrot.lane.b32.xlu1 %v17549_v62, %s17569_s21 }
 0x5ec   : > { %4553 = vrot.lane.b32.xlu2 %v17561_v40, %s17569_s21  ;;  %v14328_v45 = vadd.f32 %v4199_v23, %v14242_v25  ;;  %v14331_v0 = vadd.f32 %v4200_v17, %v14245_v55 }
 0x5ed   : > { %6128 = vset.pattern.permute.xlu2 %v6311_v46 }
 0x5ee   : > { %17578 = vst [vmem:[#allocation216_spill] sm:$0xff] %v14328_v45  ;;  %v14337_v59 = vpop.permute.xlu1 %4327 }
 0x5ef   : > { %17579 = vst [vmem:[#allocation41_spill] sm:$0xff] %v14331_v0  ;;  %v4262_v48 = vpop.permute.xlu2 %4261  ;;  %v4212_v2 = vpop.permute.xlu0 %4211  ;;  %v4336_v42 = vsel %vm17594_vm9, %v14337_v59, %v4314_v50  ;;  %v17673_v0 = vld [vmem:[#allocation182_spill] sm:$0xff] }
 0x5f0   : > { %v4231_v57 = vsel %vm17580_vm4, %v4210_v7, %v4212_v2  ;;  %v4284_v52 = vsel %vm17583_vm12, %v14287_v30, %v4262_v48  ;;  %v4337_v19 = vsel %vm17596_vm8, %v4336_v42, 0.0  ;;  %vm17609_vm12 = vmmov %vm17580_vm4  ;;  %vm17620_vm8 = vcmp.lt.s32.totalorder %v7906_v9, 15 }
 0x5f1   : > { %v4234_v5 = vsel %vm17588_vm13, %v4231_v57, 0.0  ;;  %v4285_v27 = vsel %vm17590_vm15, %v4284_v52, 0.0  ;;  %v17603_v52 = vld [vmem:[#allocation199_spill] sm:$0xff]  ;;  %vm17614_vm15 = vcmp.lt.s32.totalorder %v7906_v9, 16 }
 0x5f2   : > { %4634 = vperm.xlu0 %6129, %v6141_v61   ;;  %vm17604_vm2 = vnez %v17603_v52 }
 0x5f3   : > { %4375 = vrot.lane.b32.xlu1 %v17574_v14, %s17534_s23  ;;  %v4418_v12 = vsel %vm17604_vm2, %v17531_v39, 0.0  ;;  %vm17626_vm2 = vmmov %vm17602_vm6 }
 0x5f4   : > { %4582 = vperm.xlu2 %6128, %v6141_v61  }
 0x5f6   : > { %v14343_v25 = vpop.permute.xlu1 %4367 }
 0x5f7   : > { %v14345_v55 = vpop.permute.xlu2 %4242  ;;  %v14347_v20 = vpop.permute.xlu0 %4263 }
 0x5f8   : > { %v4283_v47 = vsel %vm17581_vm3, %v4262_v48, %v14347_v20  ;;  %v4245_v41 = vmul.f32 %v14345_v55, %v4233_v37  ;;  %vm17606_vm3 = vnez %v17605_v58  ;;  %v17624_v58 = vld [vmem:[#allocation99_spill] sm:$0xff] }
 0x5f9   : > { %v4286_v18 = vsel %vm17592_vm14, %v4283_v47, 0.0  ;;  %vm17615_vm14 = vmmov %vm17614_vm15 }
 0x5fa   : > { %4373 = vrot.lane.b32.xlu0 %v17570_v53, %s17534_s23 }
 0x5fb   : > { %4221 = vrot.lane.b32.xlu1 %v17584_v35, %s6238_s22  ;;  %6131 = vset.pattern.permute.xlu0 %v16293_v63  ;;  %s434_s22 = sand.u32 1, %s6196_s26  }
 0x5fc   : > { %4605 = vrot.lane.b32.xlu2 %v17561_v40, %s17572_s17  ;;  %s5727_s30 = scalar_lea.sflag [#allocation3], %s434_s22 }
 0x5fd   : > { %6130 = vset.pattern.permute.xlu2 %v16293_v63  ;;  %v4246_v63 = vmul.f32 %v14345_v55, %v4234_v5 }
 0x5fe   : > { %v14366_v44 = vpop.permute.xlu1 %4215 }
 0x5ff   : > { %v14368_v6 = vpop.permute.xlu2 %4315  ;;  %v14378_v4 = vpop.permute.xlu0 %4294 }
 0x600   : > { %v4335_v51 = vsel %vm17593_vm0, %v4314_v50, %v14368_v6  ;;  %v4297_v10 = vmul.f32 %v14378_v4, %v4285_v27  ;;  %v4298_v3 = vmul.f32 %v14378_v4, %v4286_v18  ;;  %v17607_v18 = vld [vmem:[#allocation200_spill] sm:$0xff] }
 0x601   : > { %v4338_v31 = vsel %vm17598_vm7, %v4335_v51, 0.0  ;;  %vm17608_vm11 = vnez %v17607_v18  ;;  %vm17621_vm7 = vmmov %vm17620_vm8 }
 0x602   : > { %v4305_v38 = vadd.f32 %v4297_v10, %v4245_v41  ;;  %v4306_v8 = vadd.f32 %v4298_v3, %v4246_v63  ;;  %4609 = vrot.lane.b32.xlu0 %v17570_v53, %s17572_s17  ;;  %v4417_v51 = vsel %vm17608_vm11, %v17527_v13, 0.0  ;;  %v17610_v63 = vld [vmem:[#allocation70_spill] sm:$0xff] }
 0x603   : > { %4455 = vrot.lane.b32.xlu1 %v17574_v14, %s6254_s20  ;;  %vm17611_vm1 = vnez %v17610_v63 }
 0x604   : > { %4269 = vrot.lane.b32.xlu2 %v17570_v53, %s15769_s15 }
 0x606   : > { %v14402_v61 = vpop.permute.xlu1 %4398 }
 0x607   : > { %v14400_v22 = vpop.permute.xlu2 %4346  ;;  %v4366_v50 = vpop.permute.xlu0 %4365 }
 0x608   : > { %v4349_v7 = vmul.f32 %v14400_v22, %v4337_v19  ;;  %v4350_v60 = vmul.f32 %v14400_v22, %v4338_v31  ;;  %v4387_v34 = vsel %vm17599_vm10, %v4366_v50, %v14343_v25  ;;  %v17616_v31 = vld [vmem:[#allocation93_spill] sm:$0xff] }
 0x609   : > { %v4390_v54 = vsel %vm17601_vm5, %v4387_v34, 0.0  ;;  %vm17617_vm0 = vnez %v17616_v31  ;;  %vm17625_vm5 = vnez %v17624_v58 }
 0x60a   : > { %v4357_v29 = vadd.f32 %v4349_v7, %v4305_v38  ;;  %v4358_v23 = vadd.f32 %v4350_v60, %v4306_v8  ;;  %v4402_v17 = vmul.f32 %v14402_v61, %v4390_v54  ;;  %4325 = vrot.lane.b32.xlu0 %v17584_v35, %s6242_s24  ;;  %v17612_v38 = vld [vmem:[#allocation64_spill] sm:$0xff] }
 0x60b   : > { %4507 = vrot.lane.b32.xlu1 %v17574_v14, %s6263_s16  ;;  %vm17613_vm13 = vnez %v17612_v38  ;;  %v17618_v60 = vld [vmem:[#allocation80_spill] sm:$0xff] }
 0x60c   : > { %4505 = vrot.lane.b32.xlu2 %v17570_v53, %s6263_s16  ;;  %v4410_v48 = vadd.f32 %v4402_v17, %v4358_v23  ;;  %vm17619_vm9 = vnez %v17618_v60  ;;  %v17631_v60 = vld [vmem:[#allocation202_spill] sm:$0xff] }
 0x60d   : > { %vm17632_vm11 = vnez %v17631_v60 }
 0x60e   : > { %v14423_v32 = vpop.permute.xlu1 %4426 }
 0x60f   : > { %v14418_v46 = vpop.permute.xlu2 %4379  ;;  %v4214_v57 = vpop.permute.xlu0 %4213  ;;  %v4430_v24 = vmul.f32 %v14423_v32, %v4418_v12  ;;  %v4429_v10 = vmul.f32 %v14423_v32, %v4417_v51  ;;  %v17622_v12 = vld [vmem:[#allocation105_spill] sm:$0xff] }
 0x610   : > { %v4388_v47 = vsel %vm17602_vm6, %v14418_v46, %v4366_v50  ;;  %v4230_v37 = vsel %vm17580_vm4, %v4212_v2, %v4214_v57  ;;  %v4229_v39 = vsel %vm17609_vm12, %v4214_v57, %v14366_v44  ;;  %vm17623_vm10 = vnez %v17622_v12 }
 0x611   : > { %v4389_v5 = vsel %vm17606_vm3, %v4388_v47, 0.0  ;;  %v14434_v15 = vadd.f32 %v4430_v24, %v4410_v48  ;;  %v4235_v13 = vsel %vm17611_vm1, %v4230_v37, 0.0  ;;  %v4236_v8 = vsel %vm17613_vm13, %v4229_v39, 0.0 }
 0x612   : > { %v4401_v27 = vmul.f32 %v14402_v61, %v4389_v5  ;;  %4377 = vrot.lane.b32.xlu0 %v17584_v35, %s17534_s23  ;;  %v4247_v7 = vmul.f32 %v14345_v55, %v4235_v13  ;;  %v4248_v54 = vmul.f32 %v14345_v55, %v4236_v8  ;;  %v17627_v8 = vld [vmem:[#allocation132_spill] sm:$0xff]  ;;  %vm17636_vm1 = vcmp.lt.s32.totalorder %v7906_v9, 127 }
 0x613   : > { %4561 = vrot.lane.b32.xlu1 %v17584_v35, %s17569_s21  ;;  %vm17628_vm4 = vnez %v17627_v8 }
 0x614   : > { %v4409_v41 = vadd.f32 %v4401_v27, %v4357_v29  ;;  %4323 = vrot.lane.b32.xlu2 %v17574_v14, %s6242_s24  ;;  %s5809_s24 = sshll.u32 %s434_s22, 7 }
 0x615   : > { %s15087_s23 = scalar_lea.vmem [#allocation2], %s5809_s24 }
 0x616   : > { %v14449_v2 = vadd.f32 %v4429_v10, %v4409_v41  ;;  %v14460_v19 = vpop.permute.xlu1 %4449 }
 0x617   : > { %v4266_v3 = vpop.permute.xlu2 %4265  ;;  %v14455_v42 = vpop.permute.xlu0 %4267 }
 0x618   : > { %v4282_v28 = vsel %vm17614_vm15, %v14347_v20, %v4266_v3  ;;  %v4281_v36 = vsel %vm17615_vm14, %v4266_v3, %v14455_v42  ;;  %vm17639_vm15 = vcmask 1043456  }
 0x619   : > { %v4287_v50 = vsel %vm17617_vm0, %v4282_v28, 0.0  ;;  %v4288_v34 = vsel %vm17619_vm9, %v4281_v36, 0.0  ;;  %v17629_v36 = vld [vmem:[#allocation131_spill] sm:$0xff]  ;;  %vm17640_vm14 = vmmov %vm17639_vm15  ;;  %vm17641_vm0 = vcmask 31744  }
 0x61a   : > { %v4299_v56 = vmul.f32 %v14378_v4, %v4287_v50  ;;  %v4300_v20 = vmul.f32 %v14378_v4, %v4288_v34  ;;  %4559 = vrot.lane.b32.xlu0 %v17574_v14, %s17569_s21  ;;  %vm17630_vm3 = vnez %v17629_v36  ;;  %v5049_v36 = vld.sshfl [vmem:[#allocation1 + $0x8] sm:$0xff pattern:$0x75316420]  ;;  %vm17642_vm9 = vmmov %vm17641_vm0 }
 0x61b   : > { %4613 = vrot.lane.b32.xlu1 %v17584_v35, %s17572_s17  ;;  %5849 = vmatpush.msk.msra.mxu3 %vm17640_vm14, %v5049_v36 }
 0x61c   : > { %v4307_v29 = vadd.f32 %v4299_v56, %v4247_v7  ;;  %v4308_v23 = vadd.f32 %v4300_v20, %v4248_v54  ;;  %4557 = vrot.lane.b32.xlu2 %v17570_v53, %s17569_s21  ;;  %v17633_v56 = vld [vmem:[#allocation203_spill] sm:$0xff] }
 0x61d   : > { %vm17634_vm12 = vnez %v17633_v56 }
 0x61e   : > { %v14484_v47 = vpop.permute.xlu1 %4478  ;;  %v4420_v54 = vsel %vm17634_vm12, %v17549_v62, 0.0  ;;  %vm17653_vm12 = vmmov %vm17636_vm1 }
 0x61f   : > { %v4318_v17 = vpop.permute.xlu2 %4317  ;;  %v14479_v48 = vpop.permute.xlu0 %4319 }
 0x620   : > { %v4334_v57 = vsel %vm17620_vm8, %v14368_v6, %v4318_v17  ;;  %v4333_v52 = vsel %vm17621_vm7, %v4318_v17, %v14479_v48  ;;  %vm17643_vm8 = vmmov %vm17640_vm14 }
 0x621   : > { %v4339_v37 = vsel %vm17623_vm10, %v4334_v57, 0.0  ;;  %v4340_v5 = vsel %vm17625_vm5, %v4333_v52, 0.0  ;;  %vm17644_vm7 = vmmov %vm17643_vm8  ;;  %vm17645_vm10 = vcmp.lt.s32.totalorder %v7906_v9, 113 }
 0x622   : > { %v4351_v24 = vmul.f32 %v14400_v22, %v4339_v37  ;;  %v4352_v27 = vmul.f32 %v14400_v22, %v4340_v5  ;;  %4611 = vrot.lane.b32.xlu0 %v17574_v14, %s17572_s17  ;;  %vm17646_vm5 = vmmov %vm17644_vm7 }
 0x623   : > { %4615 = vrot.lane.b32.xlu1 %v17522_v26, %s17572_s17  ;;  %vm17657_vm14 = vmmov %vm17641_vm0 }
 0x624   : > { %v4359_v18 = vadd.f32 %v4351_v24, %v4307_v29  ;;  %v4360_v51 = vadd.f32 %v4352_v27, %v4308_v23  ;;  %4607 = vrot.lane.b32.xlu2 %v17549_v62, %s17572_s17  ;;  %v4432_v23 = vmul.f32 %v14423_v32, %v4420_v54  ;;  %v5035_v24 = vld [vmem:[%s15184_s12 + $0x10] sm:$0xff] }
 0x625   : > { %5045 = vst [vmem:[#allocation1 + $0x20] ss:$2 sm:$0xff] %v5035_v24 }
 0x626   : > { %v14505_v10 = vpop.permute.xlu1 %4501 }
 0x627   : > { %v14501_v6 = vpop.permute.xlu2 %4445  ;;  %v14503_v41 = vpop.permute.xlu0 %4447 }
 0x62a   : > { %4563 = vrot.lane.b32.xlu0 %v17522_v26, %s17569_s21  ;;  %s5922_s21 = sshll.u32 %s6404_s29, 7  ;;  %s5740_s29 = sshll.u32 %s15087_s23, 4  ;;  %s5741_s29 = int_to_ptr.vmem [resolvable:$true] %s5740_s29 }
 0x62b   : > { %s5739_s17 = scalar_lea.hbm %s15185_s13, %s5922_s21 }
 0x62c   : > { %4273 = vrot.lane.b32.xlu2 %v17584_v35, %s15769_s15  ;;  %v5052_v60 = vld.sshfl [vmem:[#allocation1 + $0x20] sm:$0xff pattern:$0x75316420]  ;;  %s5742_s0 = sshll.u32 %s5739_s17, 4  ;;  %s6162_s15 = scalar_lea.hbm %s15185_s13, 256  ;;  %s5743_s0 = int_to_ptr.hbm [resolvable:$true] %s5742_s0 }
 0x62d   : > { %s6156_s24 = sshra.s32 %s5743_s0, 4  ;;  %s6157_s24 = int_to_ptr.hbm [resolvable:$true] %s6156_s24 }
 0x62e   : > { %v14516_v3 = vpop.permute.xlu1 %4551  ;;  %s6158_s21 = scalar_lea.hbm %s6157_s24, 128  ;;  %p6163_p0 = scmp.lt.s32.totalorder %s6157_s24, %s15185_s13 }
 0x62f   : > { %v4370_v39 = vpop.permute.xlu2 %4369  ;;  %v14511_v63 = vpop.permute.xlu0 %4371  ;;  %p6159_p11 = scmp.ne.s32.totalorder %s6157_s24, %s6158_s21  ;;  %p6164_p1 = scmp.lt.s32.totalorder %s6162_s15, %s6158_s21 }
 0x630   : > { %v4386_v13 = vsel %vm17602_vm6, %v14343_v25, %v4370_v39  ;;  %v4385_v38 = vsel %vm17626_vm2, %v4370_v39, %v14511_v63  ;;  %v4419_v25 = vsel %vm17632_vm11, %v17561_v40, 0.0  ;;  %vm17647_vm6 = vmmov %vm17646_vm5 }
 0x631   : > { %v4391_v28 = vsel %vm17628_vm4, %v4386_v13, 0.0  ;;  %v4392_v31 = vsel %vm17630_vm3, %v4385_v38, 0.0  ;;  %v4431_v20 = vmul.f32 %v14423_v32, %v4419_v25  ;;  %v17637_v13 = vld [vmem:[#allocation150_spill] sm:$0xff]  ;;  %vm17650_vm4 = vmmov %vm17641_vm0  ;;  %p6160_p12 = pnand %p6159_p11, %p6421_p5  ;;  %p6165_p2 = por %p6164_p1, %p6163_p0 }
 0x632   : > { %v4403_v50 = vmul.f32 %v14402_v61, %v4391_v28  ;;  %v4404_v7 = vmul.f32 %v14402_v61, %v4392_v31  ;;  %vm17638_vm13 = vnez %v17637_v13  ;;  %v5048_v28 = vld.sshfl [vmem:[#allocation1] sm:$0xff pattern:$0x75316420]  ;;  %v5027_v31 = vpop.f32.mrf.mxu1  ;;  %v5053_v25 = vld.sshfl [vmem:[#allocation1 + $0x28] sm:$0xff pattern:$0x75316420]  ;;  %vm17651_vm3 = vmmov %vm17641_vm0 }
 0x633   : > { %5846 = vmatpush.msk.msrb.mxu2 %vm17639_vm15, %v5048_v28  ;;  %5850 = vmatmul.msk.f32.vlgmr.msra.gmra.mxu3 %vm17642_vm9, %v5027_v31  ;;  %vm17652_vm11 = vmmov %vm17636_vm1  ;;  %p6161_p13 = pneg %p6160_p12 }
 0x634   : > { %v4411_v34 = vadd.f32 %v4403_v50, %v4359_v18  ;;  %v4412_v29 = vadd.f32 %v4404_v7, %v4360_v51  ;;  %4457 = vrot.lane.b32.xlu2 %v17584_v35, %s6254_s20  ;;  %v5034_v51 = vld [vmem:[%s15184_s12 + $0x8] sm:$0xff]  ;;  %5847 = vmatmul.msk.f32.vlgmr.msrb.gmra.mxu2 %vm17641_vm0, %v5027_v31  ;;  %v4466_v36 = vsel %vm17652_vm11, %v14503_v41, %v14460_v19  ;;  %vm17656_vm15 = vmmov %vm17641_vm0 }
 0x635   : > { %5043 = vst [vmem:[#allocation1 + $0x10] ss:$2 sm:$0xff] %v5034_v51  ;;  %5858 = vmatpush.msk.msra.mxu2 %vm17643_vm8, %v5052_v60  ;;  %5861 = vmatpush.msk.msrb.mxu3 %vm17644_vm7, %v5053_v25  ;;  %v17658_v60 = vld [vmem:[#allocation144_spill] sm:$0xff]  ;;  %vm17662_vm8 = vmmov %vm17645_vm10  ;;  %p6166_p3 = pnand %p6165_p2, %p6161_p13 }
 0x636   : > { %v4439_v17 = vadd.f32 %v4431_v20, %v4411_v34  ;;  %v14539_v52 = vadd.f32 %v4432_v23, %v4412_v29  ;;  %v14541_v40 = vpop.permute.xlu1 %4453  ;;  %v17648_v23 = vld [vmem:[#allocation177_spill] sm:$0xff]  ;;  %vm17663_vm7 = vmmov %vm17662_vm8 }
 0x637   : > { %v14537_v57 = vpop.permute.xlu2 %4497  ;;  %v4500_v12 = vpop.permute.xlu0 %4499  ;;  %vm17649_vm2 = vnez %v17648_v23 }
 0x638   : > { %17635 = vst [vmem:[#allocation31_spill] sm:$0xff] %v14537_v57 }
 0x63a   : > { %v5030_v28 = vpop.f32.mrf.mxu1 }
 0x63c   : > { %4509 = vrot.lane.b32.xlu2 %v17584_v35, %s6263_s16  ;;  %v5050_v54 = vld.sshfl [vmem:[#allocation1 + $0x10] sm:$0xff pattern:$0x75316420]  ;;  %v5051_v20 = vld.sshfl [vmem:[#allocation1 + $0x18] sm:$0xff pattern:$0x75316420] }
 0x63d   : > { %5852 = vmatpush.msk.msrb.mxu0 %vm17646_vm5, %v5050_v54  ;;  %5855 = vmatpush.msk.msrb.mxu1 %vm17647_vm6, %v5051_v20  ;;  %v17660_v54 = vld [vmem:[#allocation146_spill] sm:$0xff] }
 0x63e   : > { %v14549_v58 = vpop.permute.xlu1 %4603  ;;  %5853 = vmatmul.msk.f32.vlgmr.msrb.gmra.mxu0 %vm17650_vm4, %v5027_v31  ;;  %5856 = vmatmul.msk.f32.vlgmr.msrb.gmra.mxu1 %vm17651_vm3, %v5027_v31  ;;  %vm17661_vm9 = vnez %v17660_v54  ;;  %v17669_v54 = vld [vmem:[#allocation160_spill] sm:$0xff] }
 0x63f   : > { %v14545_v62 = vpop.permute.xlu2 %4530  ;;  %v14547_v37 = vpop.permute.xlu0 %4549  ;;  %vm17670_vm3 = vnez %v17669_v54 }
 0x644   : > { %4459 = vrot.lane.b32.xlu2 %v17522_v26, %s6254_s20 }
 0x646   : > { %v14560_v18 = vpop.permute.xlu1 %4219  ;;  %5854 = vmatmul.msk.f32.gmra.mxu0 %vm17656_vm15, %v5030_v28  ;;  %5857 = vmatmul.msk.f32.gmra.mxu1 %vm17657_vm14, %v5030_v28 }
 0x647   : > { %v14553_v5 = vpop.permute.xlu2 %4553  ;;  %v14558_v27 = vpop.permute.xlu0 %4451 }
 0x648   : > { %v4465_v39 = vsel %vm17636_vm1, %v14460_v19, %v14558_v27  ;;  %vm17654_vm1 = vmmov %vm17641_vm0  ;;  %v4518_v19 = vsel %vm17662_vm8, %v4500_v12, %v14505_v10  ;;  %vm17681_vm8 = vcmp.lt.s32.totalorder %v7906_v9, 16 }
 0x649   : > { %v4471_v38 = vsel %vm17638_vm13, %v4465_v39, 0.0  ;;  %5848 = vmatmul.msk.f32.gmra.mxu2 %vm17654_vm1, %v5030_v28  ;;  %vm17655_vm13 = vmmov %vm17641_vm0  ;;  %vm17659_vm0 = vnez %v17658_v60  ;;  %v17667_v60 = vld [vmem:[#allocation157_spill] sm:$0xff] }
 0x64a   : > { %v4483_v8 = vmul.f32 %v14484_v47, %v4471_v38  ;;  %5851 = vmatmul.msk.f32.gmra.mxu3 %vm17655_vm13, %v5030_v28  ;;  %v4470_v25 = vsel %vm17659_vm0, %v4466_v36, 0.0  ;;  %vm17668_vm4 = vnez %v17667_v60  ;;  %vm17671_vm11 = vmmov %vm17654_vm1  ;;  %vm17679_vm0 = vcmp.lt.s32.totalorder %v7906_v9, 111 }
 0x64b   : > { %v4482_v23 = vmul.f32 %v14484_v47, %v4470_v25  ;;  %v4522_v25 = vsel %vm17668_vm4, %v4518_v19, 0.0  ;;  %vm17675_vm13 = vmmov %vm17671_vm11  ;;  %vm17691_vm4 = vcmp.lt.s32.totalorder %v7906_v9, 15 }
 0x64c   : > { %v4491_v50 = vadd.f32 %v4483_v8, %v4439_v17  ;;  %4511 = vrot.lane.b32.xlu2 %v17522_v26, %s6263_s16  ;;  %v5036_v8 = vld [vmem:[%s15184_s12 + $0x18] sm:$0xff]  ;;  %vm17676_vm15 = vmmov %vm17671_vm11 }
 0x64d   : > { %5047 = vst [vmem:[#allocation1 + $0x30] ss:$2 sm:$0xff] %v5036_v8  ;;  %v4490_v19 = vadd.f32 %v4482_v23, %v14434_v15 }
 0x64e   : > { %v14582_v56 = vpop.permute.xlu1 %4503 }
 0x64f   : > { %v14577_v7 = vpop.permute.xlu2 %4582  ;;  %v14580_v34 = vpop.permute.xlu0 %4601  ;;  %v4517_v29 = vsel %vm17645_vm10, %v14505_v10, %v14582_v56  ;;  %vm17664_vm10 = vcmp.lt.s32.totalorder %v7906_v9, 112 }
 0x650   : > { %v4523_v17 = vsel %vm17649_vm2, %v4517_v29, 0.0  ;;  %vm17665_vm5 = vmmov %vm17664_vm10 }
 0x651   : > { %v4535_v24 = vmul.f32 %v14545_v62, %v4523_v17  ;;  %vm17666_vm2 = vmmov %vm17647_vm6  ;;  %5859 = vmatmul.msk.f32.vlgmr.msra.gmra.mxu2 %vm17671_vm11, %v5027_v31 }
 0x653   : > { %v14597_v51 = vadd.f32 %v4535_v24, %v4491_v50  ;;  %v4467_v50 = vsel %vm17653_vm12, %v14501_v6, %v14503_v41  ;;  %v4519_v41 = vsel %vm17663_vm7, %v14537_v57, %v4500_v12  ;;  %v4571_v24 = vsel %vm17664_vm10, %v14547_v37, %v14516_v3  ;;  %vm17672_vm12 = vmmov %vm17654_vm1 }
 0x654   : > { %v4469_v20 = vsel %vm17661_vm9, %v4467_v50, 0.0  ;;  %v5054_v10 = vld.sshfl [vmem:[#allocation1 + $0x30] sm:$0xff pattern:$0x75316420]  ;;  %v4570_v12 = vsel %vm17665_vm5, %v14516_v3, %v14553_v5  ;;  %5862 = vmatmul.msk.f32.vlgmr.msrb.gmra.mxu3 %vm17672_vm12, %v5027_v31  ;;  %vm17674_vm1 = vnez %v17673_v0  ;;  %v4534_v3 = vmul.f32 %v14545_v62, %v4522_v25  ;;  %vm17680_vm9 = vmmov %vm17679_vm0 }
 0x655   : > { %v4481_v17 = vmul.f32 %v14484_v47, %v4469_v20  ;;  %v5055_v50 = vld.sshfl [vmem:[#allocation1 + $0x38] sm:$0xff pattern:$0x75316420]  ;;  %5864 = vmatpush.msk.msra.mxu0 %vm17647_vm6, %v5054_v10  ;;  %v4521_v20 = vsel %vm17670_vm3, %v4519_v41, 0.0  ;;  %v4573_v45 = vsel %vm17674_vm1, %v4571_v24, 0.0  ;;  %v4623_v0 = vsel %vm17679_vm0, %v14580_v34, %v14549_v58  ;;  %vm17692_vm3 = vmmov %vm17671_vm11 }
 0x656   : > { %v14603_v38 = vpop.permute.xlu1 %4321  ;;  %5867 = vmatpush.msk.msra.mxu1 %vm17666_vm2, %v5055_v50  ;;  %v4533_v33 = vmul.f32 %v14545_v62, %v4521_v20  ;;  %5865 = vmatmul.msk.f32.vlgmr.msra.gmra.mxu0 %vm17675_vm13, %v5027_v31  ;;  %v17677_v41 = vld [vmem:[#allocation180_spill] sm:$0xff]  ;;  %v4585_v60 = vmul.f32 %v14577_v7, %v4573_v45  ;;  %vm17682_vm7 = vcmp.lt.s32.totalorder %v7906_v9, 17  ;;  %vm17693_vm11 = vmmov %vm17692_vm3  ;;  %vm17701_vm0 = vcmp.lt.s32.totalorder %v7906_v9, 127 }
 0x657   : > { %v14599_v39 = vpop.permute.xlu2 %4605  ;;  %v14601_v13 = vpop.permute.xlu0 %4217  ;;  %5868 = vmatmul.msk.f32.vlgmr.msra.gmra.mxu1 %vm17676_vm15, %v5027_v31  ;;  %v4489_v10 = vadd.f32 %v4481_v17, %v14449_v2  ;;  %vm17678_vm14 = vnez %v17677_v41  ;;  %v4542_v17 = vadd.f32 %v4534_v3, %v4490_v19  ;;  %v17687_v20 = vld [vmem:[#allocation96_spill] sm:$0xff]  ;;  %v17689_v3 = vld [vmem:[#allocation73_spill] sm:$0xff]  ;;  %vm17694_vm12 = vmmov %vm17692_vm3  ;;  %vm17698_vm15 = vcmp.lt.s32.totalorder %v7906_v9, 1 }
 0x658   : > { %v4574_v50 = vsel %vm17678_vm14, %v4570_v12, 0.0  ;;  %v4622_v24 = vsel %vm17680_vm9, %v14549_v58, %v14599_v39  ;;  %v4228_v45 = vsel %vm17682_vm7, %v14366_v44, %v14601_v13  ;;  %v17683_v12 = vld [vmem:[#allocation201_spill] sm:$0xff]  ;;  %vm17688_vm6 = vnez %v17687_v20  ;;  %vm17695_vm1 = vmmov %vm17692_vm3 }
 0x659   : > { %v4586_v2 = vmul.f32 %v14577_v7, %v4574_v50  ;;  %v4541_v23 = vadd.f32 %v4533_v33, %v4489_v10  ;;  %vm17684_vm10 = vnez %v17683_v12  ;;  %v17685_v58 = vld [vmem:[#allocation181_spill] sm:$0xff]  ;;  %vm17690_vm2 = vnez %v17689_v3  ;;  %5860 = vmatmul.msk.f32.gmra.mxu2 %vm17692_vm3, %v5030_v28 }
 0x65a   : > { %v4625_v25 = vsel %vm17684_vm10, %v4623_v0, 0.0  ;;  %vm17686_vm5 = vnez %v17685_v58  ;;  %v4237_v19 = vsel %vm17690_vm2, %v4228_v45, 0.0  ;;  %v4332_v10 = vsel %vm17691_vm4, %v14479_v48, %v14603_v38  ;;  %v14725_v20 = vld [vmem:[%s15180_s8] sm:$0xff]  ;;  %vm17711_vm4 = vmmov %vm17701_vm0 }
 0x65b   : > { %v4626_v54 = vsel %vm17686_vm5, %v4622_v24, 0.0  ;;  %v4593_v1 = vadd.f32 %v4585_v60, %v4541_v23  ;;  %v4594_v57 = vadd.f32 %v4586_v2, %v4542_v17  ;;  %v17696_v2 = vld [vmem:[#allocation97_spill] sm:$0xff]  ;;  %vm17704_vm7 = vcmp.lt.s32.totalorder %v7906_v9, 113 }
 0x65c   : > { %5863 = vmatmul.msk.f32.gmra.mxu3 %vm17693_vm11, %v5030_v28  ;;  %vm17697_vm13 = vnez %v17696_v2  ;;  %vm17707_vm5 = vcmp.lt.s32.totalorder %v7906_v9, 112 }
 0x65d   : > { %v4341_v45 = vsel %vm17697_vm13, %v4332_v10, 0.0 }
 0x65e   : > { %v14640_v36 = vpop.permute.xlu1 %4555  ;;  %5866 = vmatmul.msk.f32.gmra.mxu0 %vm17694_vm12, %v5030_v28 }
 0x65f   : > { %v14630_v29 = vpop.permute.xlu2 %4269  ;;  %v14638_v8 = vpop.permute.xlu0 %4271  ;;  %5869 = vmatmul.msk.f32.gmra.mxu1 %vm17695_vm1, %v5030_v28  ;;  %v17699_v28 = vld [vmem:[#allocation137_spill] sm:$0xff]  ;;  %vm17718_vm1 = vcmp.lt.s32.totalorder %v7906_v9, 111 }
 0x660   : > { %v4280_v15 = vsel %vm17681_vm8, %v14455_v42, %v14630_v29  ;;  %vm17700_vm14 = vnez %v17699_v28  ;;  %vm5266_vm8 = vcmask 64512   ;;  %v17714_v28 = vld [vmem:[#allocation183_spill] sm:$0xff]  ;;  %vm17719_vm13 = vmmov %vm17718_vm1 }
 0x661   : > { %v4289_v42 = vsel %vm17688_vm6, %v4280_v15, 0.0  ;;  %v4249_v15 = vmul.f32 %v14345_v55, %v4237_v19  ;;  %vm17708_vm6 = vmmov %vm17707_vm5  ;;  %vm17715_vm11 = vnez %v17714_v28 }
 0x662   : > { %v4301_v0 = vmul.f32 %v14378_v4, %v4289_v42  ;;  %v4464_v42 = vsel %vm17701_vm0, %v14558_v27, %v14541_v40  ;;  %v17705_v27 = vld [vmem:[#allocation143_spill] sm:$0xff]  ;;  %vm17724_vm0 = vcmp.lt.s32.totalorder %v7906_v9, 16 }
 0x663   : > { %vm17706_vm10 = vnez %v17705_v27  ;;  %v4279_v28 = vsel %vm17724_vm0, %v14630_v29, %v14638_v8 }
 0x664   : > { %v4309_v48 = vadd.f32 %v4301_v0, %v4249_v15  ;;  %v4472_v10 = vsel %vm17706_vm10, %v4464_v42, 0.0  ;;  %v14776_v42 = vld [vmem:[%s15180_s8 + $0x8] sm:$0xff]  ;;  %vm17727_vm10 = vcmp.lt.s32.totalorder %v7906_v9, 15 }
 0x666   : > { %v14692_v50 = vpop.permute.xlu1 %4375 }
 0x667   : > { %v14682_v31 = vpop.permute.xlu2 %4505  ;;  %v14690_v41 = vpop.permute.xlu0 %4634 }
 0x668   : > { %v4637_v44 = vmul.f32 %v14690_v41, %v4625_v25  ;;  %v4638_v33 = vmul.f32 %v14690_v41, %v4626_v54  ;;  %v4516_v19 = vsel %vm17704_vm7, %v14582_v56, %v14682_v31  ;;  %v17709_v56 = vld [vmem:[#allocation176_spill] sm:$0xff] }
 0x669   : > { %vm17710_vm2 = vnez %v17709_v56 }
 0x66a   : > { %v4645_v60 = vadd.f32 %v4637_v44, %v4593_v1  ;;  %v4646_v24 = vadd.f32 %v4638_v33, %v4594_v57  ;;  %v4353_v1 = vmul.f32 %v14400_v22, %v4341_v45  ;;  %v17702_v44 = vld [vmem:[#allocation204_spill] sm:$0xff]  ;;  %v4524_v45 = vsel %vm17710_vm2, %v4516_v19, 0.0 }
 0x66b   : > { %vm17703_vm9 = vnez %v17702_v44 }
 0x66c   : > { %5288 = vmatpush.msrb.mxu2 %v4645_v60  ;;  %5311 = vmatpush.msra.mxu3 %v4646_v24  ;;  %v4361_v58 = vadd.f32 %v4353_v1, %v4309_v48  ;;  %v4569_v60 = vsel %vm17707_vm5, %v14553_v5, %v14640_v36  ;;  %v4484_v1 = vmul.f32 %v14484_v47, %v4472_v10  ;;  %v17712_v5 = vld [vmem:[#allocation136_spill] sm:$0xff]  ;;  %vm17728_vm5 = vmmov %vm17727_vm10 }
 0x66d   : > { %5870 = vmatmul.msk.f32.vlgmr.msrb.gmra.mxu2 %vm5266_vm8, %v14725_v20  ;;  %5872 = vmatmul.msk.f32.vlgmr.msra.gmra.mxu3 %vm5266_vm8, %v14725_v20  ;;  %vm17713_vm3 = vnez %v17712_v5 }
 0x66e   : > { %v14712_v12 = vpop.permute.xlu1 %4221 }
 0x66f   : > { %v4324_v23 = vpop.permute.xlu2 %4323  ;;  %v14710_v17 = vpop.permute.xlu0 %4373 }
 0x670   : > { %v4384_v57 = vsel %vm17698_vm15, %v14511_v63, %v14710_v17  ;;  %v4421_v63 = vsel %vm17703_vm9, %v17570_v53, 0.0  ;;  %vm17725_vm9 = vcmp.lt.s32.totalorder %v7906_v9, 17 }
 0x671   : > { %v4393_v25 = vsel %vm17700_vm14, %v4384_v57, 0.0  ;;  %v4433_v3 = vmul.f32 %v14423_v32, %v4421_v63  ;;  %v4492_v63 = vadd.f32 %v4484_v1, %v14539_v52  ;;  %v17722_v52 = vld [vmem:[#allocation191_spill] sm:$0xff]  ;;  %vm17726_vm7 = vmmov %vm17725_vm9 }
 0x672   : > { %v4405_v54 = vmul.f32 %v14402_v61, %v4393_v25  ;;  %v4575_v25 = vsel %vm17715_vm11, %v4569_v60, 0.0  ;;  %vm17723_vm14 = vnez %v17722_v52  ;;  %v17741_v52 = vld [vmem:[#allocation95_spill] sm:$0xff] }
 0x674   : > { %v4413_v33 = vadd.f32 %v4405_v54, %v4361_v58  ;;  %v17716_v58 = vld [vmem:[#allocation186_spill] sm:$0xff] }
 0x675   : > { %vm17717_vm12 = vnez %v17716_v58  ;;  %5871 = vmatmul.msk.f32.gmra.mxu2 %vm5266_vm8, %v14776_v42  ;;  %5873 = vmatmul.msk.f32.gmra.mxu3 %vm5266_vm8, %v14776_v42 }
 0x676   : > { %v4441_v53 = vadd.f32 %v4433_v3, %v4413_v33  ;;  %v14757_v2 = vpop.permute.xlu1 %4455  ;;  %v4587_v33 = vmul.f32 %v14577_v7, %v4575_v25 }
 0x677   : > { %v14745_v0 = vpop.permute.xlu2 %4557  ;;  %v14751_v24 = vpop.permute.xlu0 %4609  ;;  %v4463_v48 = vsel %vm17711_vm4, %v14541_v40, %v14757_v2  ;;  %v4536_v40 = vmul.f32 %v14545_v62, %v4524_v45 }
 0x678   : > { %v4568_v15 = vsel %vm17708_vm6, %v14640_v36, %v14745_v0  ;;  %v4473_v57 = vsel %vm17713_vm3, %v4463_v48, 0.0  ;;  %v4595_v48 = vadd.f32 %v4587_v33, %v14597_v51  ;;  %v4227_v51 = vsel %vm17726_vm7, %v14601_v13, %v14560_v18  ;;  %v17731_v33 = vld [vmem:[#allocation81_spill] sm:$0xff]  ;;  %vm17735_vm3 = vmmov %vm17724_vm0 }
 0x679   : > { %v4576_v36 = vsel %vm17717_vm12, %v4568_v15, 0.0  ;;  %v4485_v54 = vmul.f32 %v14484_v47, %v4473_v57  ;;  %v4544_v27 = vadd.f32 %v4536_v40, %v4492_v63  ;;  %v17720_v15 = vld [vmem:[#allocation212_spill] sm:$0xff]  ;;  %v17729_v40 = vld [vmem:[#allocation89_spill] sm:$0xff]  ;;  %vm17732_vm2 = vnez %v17731_v33 }
 0x67a   : > { %v4588_v3 = vmul.f32 %v14577_v7, %v4576_v36  ;;  %vm17721_vm15 = vnez %v17720_v15  ;;  %vm17730_vm6 = vnez %v17729_v40 }
 0x67b   : > { %v14779_v44 = vadd.f32 %v4485_v54, %v4441_v53  ;;  %v4331_v54 = vsel %vm17727_vm10, %v14603_v38, %v4324_v23  ;;  %v4290_v63 = vsel %vm17730_vm6, %v4279_v28, 0.0  ;;  %vm17751_vm10 = vcmp.lt.s32.totalorder %v7906_v9, 17 }
 0x67c   : > { %v4596_v1 = vadd.f32 %v4588_v3, %v4544_v27  ;;  %v17736_v27 = vld [vmem:[#allocation108_spill] sm:$0xff] }
 0x67d   : > { %vm17737_vm11 = vnez %v17736_v27 }
 0x67e   : > { %v14811_v36 = vpop.permute.xlu1 %4507 }
 0x67f   : > { %v4608_v19 = vpop.permute.xlu2 %4607  ;;  %v14788_v10 = vpop.permute.xlu0 %4325 }
 0x680   : > { %v4620_v53 = vsel %vm17718_vm1, %v4608_v19, %v14751_v24  ;;  %v4621_v60 = vsel %vm17719_vm13, %v14599_v39, %v4608_v19  ;;  %v4226_v39 = vsel %vm17725_vm9, %v14560_v18, %v14712_v12  ;;  %v4330_v29 = vsel %vm17728_vm5, %v4324_v23, %v14788_v10  ;;  %v17733_v18 = vld [vmem:[#allocation86_spill] sm:$0xff] }
 0x681   : > { %v4627_v56 = vsel %vm17721_vm15, %v4621_v60, 0.0  ;;  %v4628_v45 = vsel %vm17723_vm14, %v4620_v53, 0.0  ;;  %v4239_v3 = vsel %vm17732_vm2, %v4226_v39, 0.0  ;;  %vm17734_vm4 = vnez %v17733_v18  ;;  %v17738_v60 = vld [vmem:[#allocation98_spill] sm:$0xff]  ;;  %vm17755_vm2 = vmmov %vm17735_vm3 }
 0x682   : > { %v4639_v5 = vmul.f32 %v14690_v41, %v4627_v56  ;;  %v4640_v57 = vmul.f32 %v14690_v41, %v4628_v45  ;;  %v4238_v13 = vsel %vm17734_vm4, %v4227_v51, 0.0  ;;  %v4342_v53 = vsel %vm17737_vm11, %v4331_v54, 0.0  ;;  %v17746_v54 = vld [vmem:[#allocation207_spill] sm:$0xff] }
 0x683   : > { %vm17739_vm12 = vnez %v17738_v60  ;;  %vm17740_vm1 = vcmp.lt.s32.totalorder %v7906_v9, 1  ;;  %vm17742_vm13 = vnez %v17741_v52  ;;  %vm17747_vm0 = vnez %v17746_v54 }
 0x684   : > { %v4647_v25 = vadd.f32 %v4639_v5, %v4595_v48  ;;  %v4648_v58 = vadd.f32 %v4640_v57, %v4596_v1  ;;  %v4343_v15 = vsel %vm17739_vm12, %v4330_v29, 0.0  ;;  %v4302_v48 = vmul.f32 %v14378_v4, %v4290_v63  ;;  %v17743_v57 = vld [vmem:[#allocation138_spill] sm:$0xff]  ;;  %vm17745_vm14 = vmmov %vm17740_vm1 }
 0x685   : > { %v4251_v1 = vmul.f32 %v14345_v55, %v4239_v3  ;;  %vm17744_vm15 = vnez %v17743_v57  ;;  %v4383_v39 = vsel %vm17745_vm14, %v14710_v17, %v14692_v50  ;;  %v4423_v29 = vsel %vm17747_vm0, %v17584_v35, 0.0 }
 0x686   : > { %5334 = vmatpush.msrb.mxu0 %v4647_v25  ;;  %5357 = vmatpush.msrb.mxu1 %v4648_v58  ;;  %v4354_v25 = vmul.f32 %v14400_v22, %v4342_v53  ;;  %v4355_v58 = vmul.f32 %v14400_v22, %v4343_v15  ;;  %vm17748_vm9 = vcmp.lt.s32.totalorder %v7906_v9, 113  ;;  %v14865_v18 = vpop.permute.xlu1 %4561  ;;  %vm17752_vm5 = vcmp.lt.s32.totalorder %v7906_v9, 127  ;;  %v17753_v15 = vld [vmem:[#allocation171_spill] sm:$0xff] }
 0x687   : > { %v4274_v19 = vpop.permute.xlu2 %4273  ;;  %5874 = vmatmul.msk.f32.vlgmr.msrb.gmra.mxu0 %vm5266_vm8, %v14725_v20  ;;  %5876 = vmatmul.msk.f32.vlgmr.msrb.gmra.mxu1 %vm5266_vm8, %v14725_v20  ;;  %v4378_v38 = vpop.permute.xlu0 %4377  ;;  %v4515_v63 = vsel %vm17748_vm9, %v14682_v31, %v14811_v36  ;;  %v4225_v31 = vsel %vm17751_vm10, %v14712_v12, %v14251_v21  ;;  %vm17754_vm6 = vnez %v17753_v15  ;;  %vm17756_vm4 = vcmp.lt.s32.totalorder %v7906_v9, 112  ;;  %v17757_v12 = vld [vmem:[#allocation79_spill] sm:$0xff] }
 0x688   : > { %v4278_v23 = vsel %vm17735_vm3, %v14638_v8, %v4274_v19  ;;  %v4382_v56 = vsel %vm17740_vm1, %v14692_v50, %v4378_v38  ;;  %v4250_v8 = vmul.f32 %v14345_v55, %v4238_v13  ;;  %v17749_v50 = vld [vmem:[#allocation127_spill] sm:$0xff]  ;;  %v4277_v52 = vsel %vm17755_vm2, %v4274_v19, %v14287_v30  ;;  %v17763_v19 = vld [vmem:[#allocation172_spill] sm:$0xff]  ;;  %vm17768_vm14 = vmmov %vm17756_vm4 }
 0x689   : > { %v4291_v45 = vsel %vm17742_vm13, %v4278_v23, 0.0  ;;  %v4395_v28 = vsel %vm17744_vm15, %v4382_v56, 0.0  ;;  %vm17750_vm7 = vnez %v17749_v50  ;;  %v4435_v23 = vmul.f32 %v14423_v32, %v4423_v29 }
 0x68a   : > { %v4303_v5 = vmul.f32 %v14378_v4, %v4291_v45  ;;  %v4310_v40 = vadd.f32 %v4302_v48, %v4250_v8  ;;  %v4407_v33 = vmul.f32 %v14402_v61, %v4395_v28  ;;  %v4394_v17 = vsel %vm17750_vm7, %v4383_v39, 0.0  ;;  %v17761_v28 = vld [vmem:[#allocation91_spill] sm:$0xff] }
 0x68b   : > { %v4525_v56 = vsel %vm17754_vm6, %v4515_v63, 0.0  ;;  %v4406_v48 = vmul.f32 %v14402_v61, %v4394_v17  ;;  %vm17758_vm3 = vnez %v17757_v12  ;;  %vm17762_vm12 = vnez %v17761_v28  ;;  %v17780_v12 = vld [vmem:[#allocation215_spill] sm:$0xff] }
 0x68c   : > { %v4311_v51 = vadd.f32 %v4303_v5, %v4251_v1  ;;  %v4362_v35 = vadd.f32 %v4354_v25, %v4310_v40  ;;  %v4240_v1 = vsel %vm17758_vm3, %v4225_v31, 0.0  ;;  %v4537_v57 = vmul.f32 %v14545_v62, %v4525_v56  ;;  %v17766_v25 = vld [vmem:[#allocation205_spill] sm:$0xff]  ;;  %v17771_v31 = vld [vmem:[#allocation178_spill] sm:$0xff] }
 0x68d   : > { %v4292_v30 = vsel %vm17762_vm12, %v4277_v52, 0.0  ;;  %vm17764_vm1 = vnez %v17763_v19  ;;  %vm17765_vm13 = vcmp.lt.s32.totalorder %v7906_v9, 15  ;;  %vm17767_vm15 = vnez %v17766_v25  ;;  %v17778_v56 = vld [vmem:[#allocation210_spill] sm:$0xff] }
 0x68e   : > { %v4363_v3 = vadd.f32 %v4355_v58, %v4311_v51  ;;  %v4414_v8 = vadd.f32 %v4406_v48, %v4362_v35  ;;  %v4422_v58 = vsel %vm17767_vm15, %v17574_v14, 0.0  ;;  %v4252_v40 = vmul.f32 %v14345_v55, %v4240_v1  ;;  %v4614_v17 = vpop.permute.xlu1 %4613 }
 0x68f   : > { %v4458_v13 = vpop.permute.xlu2 %4457  ;;  %5875 = vmatmul.msk.f32.gmra.mxu0 %vm5266_vm8, %v14776_v42  ;;  %5877 = vmatmul.msk.f32.gmra.mxu1 %vm5266_vm8, %v14776_v42  ;;  %v4560_v27 = vpop.permute.xlu0 %4559  ;;  %v4434_v54 = vmul.f32 %v14423_v32, %v4422_v58  ;;  %v4304_v63 = vmul.f32 %v14378_v4, %v4292_v30  ;;  %v4545_v14 = vadd.f32 %v4537_v57, %v14779_v44  ;;  %vm17773_vm10 = vcmp.lt.s32.totalorder %v7906_v9, 111 }
 0x690   : > { %v4462_v53 = vsel %vm17752_vm5, %v14757_v2, %v4458_v13  ;;  %v4415_v60 = vadd.f32 %v4407_v33, %v4363_v3  ;;  %v4567_v45 = vsel %vm17756_vm4, %v14745_v0, %v4560_v27  ;;  %v17759_v2 = vld [vmem:[#allocation153_spill] sm:$0xff]  ;;  %v4329_v0 = vsel %vm17765_vm13, %v14788_v10, %v14337_v59  ;;  %v17769_v59 = vld [vmem:[#allocation103_spill] sm:$0xff]  ;;  %vm17774_vm5 = vmmov %vm17773_vm10 }
 0x691   : > { %vm17760_vm11 = vnez %v17759_v2  ;;  %v4577_v39 = vsel %vm17764_vm1, %v4567_v45, 0.0  ;;  %v4566_v51 = vsel %vm17768_vm14, %v4560_v27, %v14865_v18  ;;  %vm17770_vm0 = vnez %v17769_v59 }
 0x692   : > { %v14890_v21 = vadd.f32 %v4435_v23, %v4415_v60  ;;  %v4474_v5 = vsel %vm17760_vm11, %v4462_v53, 0.0  ;;  %v4589_v33 = vmul.f32 %v14577_v7, %v4577_v39  ;;  %v4344_v10 = vsel %vm17770_vm0, %v4329_v0, 0.0  ;;  %v17775_v53 = vld [vmem:[#allocation166_spill] sm:$0xff] }
 0x693   : > { %v4486_v29 = vmul.f32 %v14484_v47, %v4474_v5  ;;  %v4442_v50 = vadd.f32 %v4434_v54, %v4414_v8  ;;  %vm17772_vm7 = vnez %v17771_v31  ;;  %vm17776_vm6 = vnez %v17775_v53  ;;  %v17803_v31 = vld [vmem:[#allocation169_spill] sm:$0xff] }
 0x694   : > { %v4578_v55 = vsel %vm17772_vm7, %v4566_v51, 0.0  ;;  %vm17777_vm2 = vcmp.lt.s32.totalorder %v7906_v9, 1  ;;  %vm17779_vm4 = vnez %v17778_v56  ;;  %v4312_v45 = vadd.f32 %v4304_v63, %v4252_v40  ;;  %v17788_v63 = vld [vmem:[#allocation147_spill] sm:$0xff]  ;;  %vm17794_vm7 = vmmov %vm17774_vm5 }
 0x695   : > { %v4381_v60 = vsel %vm17777_vm2, %v4378_v38, %v14418_v46  ;;  %v4494_v15 = vadd.f32 %v4486_v29, %v4442_v50  ;;  %v4597_v48 = vadd.f32 %v4589_v33, %v4545_v14  ;;  %vm17781_vm3 = vnez %v17780_v12  ;;  %v17782_v46 = vld [vmem:[#allocation130_spill] sm:$0xff]  ;;  %v17786_v29 = vld [vmem:[#allocation155_spill] sm:$0xff] }
 0x696   : > { %v4590_v2 = vmul.f32 %v14577_v7, %v4578_v55  ;;  %v4356_v8 = vmul.f32 %v14400_v22, %v4344_v10  ;;  %vm17783_vm11 = vnez %v17782_v46  ;;  %vm17784_vm12 = vcmp.lt.s32.totalorder %v7906_v9, 127  ;;  %v5263_v46 = vld [vmem:[%s15179_s7 + $0x8] sm:$0xff] }
 0x697   : > { %v4510_v3 = vpop.permute.xlu2 %4509  ;;  %v4612_v23 = vpop.permute.xlu0 %4611  ;;  %v4396_v38 = vsel %vm17783_vm11, %v4381_v60, 0.0  ;;  %vm17785_vm1 = vmmov %vm17784_vm12  ;;  %vm17787_vm13 = vnez %v17786_v29  ;;  %vm17789_vm15 = vnez %v17788_v63  ;;  %vm17792_vm0 = vcmp.lt.s32.totalorder %v7906_v9, 112 }
 0x698   : > { %v4514_v35 = vsel %vm17748_vm9, %v14811_v36, %v4510_v3  ;;  %v4618_v4 = vsel %vm17773_vm10, %v4612_v23, %v4614_v17  ;;  %v4619_v27 = vsel %vm17774_vm5, %v14751_v24, %v4612_v23  ;;  %v4364_v19 = vadd.f32 %v4356_v8, %v4312_v45  ;;  %vm17793_vm9 = vmmov %vm17792_vm0  ;;  %v17811_v8 = vld [vmem:[#allocation34_spill] sm:$0xff] }
 0x699   : > { %v4526_v44 = vsel %vm17776_vm6, %v4514_v35, 0.0  ;;  %v4629_v36 = vsel %vm17779_vm4, %v4619_v27, 0.0  ;;  %v4630_v1 = vsel %vm17781_vm3, %v4618_v4, 0.0  ;;  %v4408_v58 = vmul.f32 %v14402_v61, %v4396_v38  ;;  %vm17795_vm10 = vmmov %vm17774_vm5  ;;  %v17801_v35 = vld [vmem:[#allocation175_spill] sm:$0xff]  ;;  %v17814_v38 = vld [vmem:[#allocation41_spill] sm:$0xff] }
 0x69a   : > { %v4538_v52 = vmul.f32 %v14545_v62, %v4526_v44  ;;  %v4641_v24 = vmul.f32 %v14690_v41, %v4629_v36  ;;  %v4642_v28 = vmul.f32 %v14690_v41, %v4630_v1  ;;  %vm17796_vm5 = vcmp.lt.s32.totalorder %v7906_v9, 113  ;;  %v17807_v44 = vld [vmem:[#allocation218_spill] sm:$0xff] }
 0x69b   : > { %v4416_v54 = vadd.f32 %v4408_v58, %v4364_v19  ;;  %vm17798_vm6 = vmmov %vm17796_vm5  ;;  %vm17802_vm4 = vnez %v17801_v35  ;;  %vm17804_vm3 = vnez %v17803_v31 }
 0x69c   : > { %v4546_v5 = vadd.f32 %v4538_v52, %v4494_v15  ;;  %v4649_v57 = vadd.f32 %v4641_v24, %v4597_v48  ;;  %v17809_v15 = vld [vmem:[#allocation190_spill] sm:$0xff] }
 0x69d   : > { %v5664_v48 = vld [vmem:[%s15182_s10 + $0x8] sm:$0xff] }
 0x69e   : > { %v4598_v30 = vadd.f32 %v4590_v2, %v4546_v5  ;;  %5380 = vmatpush.msra.mxu2 %v4649_v57  ;;  %5672 = vperm.xlu0 %6131, %v5664_v48   ;;  %v17812_v57 = vld [vmem:[#allocation36_spill] sm:$0xff] }
 0x69f   : > { %v4460_v39 = vpop.permute.xlu2 %4459  ;;  %5878 = vmatmul.msk.f32.vlgmr.msra.gmra.mxu2 %vm5266_vm8, %v14725_v20  ;;  %v4564_v51 = vpop.permute.xlu0 %4563 }
 0x6a0   : > { %v4461_v0 = vsel %vm17784_vm12, %v4458_v13, %v4460_v39  ;;  %v4468_v22 = vsel %vm17785_vm1, %v4460_v39, %v14501_v6  ;;  %v4650_v25 = vadd.f32 %v4642_v28, %v4598_v30  ;;  %5478 = vmatpush.msrb.mxu2 %v14278_v49  ;;  %v17790_v6 = vld [vmem:[#allocation208_spill] sm:$0xff]  ;;  %v4616_v49 = vpop.permute.xlu1 %4615  ;;  %v4565_v33 = vsel %vm17792_vm0, %v14865_v18, %v4564_v51 }
 0x6a1   : > { %v4475_v40 = vsel %vm17787_vm13, %v4461_v0, 0.0  ;;  %v4476_v13 = vsel %vm17789_vm15, %v4468_v22, 0.0  ;;  %vm17791_vm14 = vnez %v17790_v6  ;;  %v4572_v59 = vsel %vm17793_vm9, %v4564_v51, %v14547_v37  ;;  %v17797_v37 = vld [vmem:[#allocation31_spill] sm:$0xff] }
 0x6a2   : > { %5570 = vmatpush.msra.mxu2 %v14309_v43  ;;  %5403 = vmatpush.msrb.mxu3 %v4650_v25  ;;  %v4424_v61 = vsel %vm17791_vm14, %v17522_v26, 0.0  ;;  %v4487_v10 = vmul.f32 %v14484_v47, %v4475_v40  ;;  %v4488_v14 = vmul.f32 %v14484_v47, %v4476_v13  ;;  %v17799_v47 = vld [vmem:[#allocation198_spill] sm:$0xff]  ;;  %vm17808_vm12 = vnez %v17807_v44 }
 0x6a3   : > { %5880 = vmatmul.msk.f32.vlgmr.msrb.gmra.mxu3 %vm5266_vm8, %v14725_v20  ;;  %v4436_v43 = vmul.f32 %v14423_v32, %v4424_v61  ;;  %vm17800_vm2 = vnez %v17799_v47  ;;  %vm17810_vm1 = vnez %v17809_v15 }
 0x6a4   : > { %5501 = vmatpush.msra.mxu3 %v14281_v11  ;;  %v4617_v11 = vsel %vm17794_vm7, %v4614_v17, %v4616_v49  ;;  %v4579_v23 = vsel %vm17800_vm2, %v4565_v33, 0.0  ;;  %v4580_v17 = vsel %vm17802_vm4, %v4572_v59, 0.0  ;;  %v4495_v27 = vadd.f32 %v4487_v10, %v14890_v21 }
 0x6a5   : > { %v4444_v26 = vadd.f32 %v4436_v43, %v4416_v54  ;;  %v4631_v60 = vsel %vm17808_vm12, %v4617_v11, 0.0  ;;  %v4591_v36 = vmul.f32 %v14577_v7, %v4579_v23  ;;  %v4592_v52 = vmul.f32 %v14577_v7, %v4580_v17 }
 0x6a6   : > { %5593 = vmatpush.msrb.mxu3 %v14303_v16  ;;  %v4624_v16 = vsel %vm17795_vm10, %v4616_v49, %v14580_v34  ;;  %v17805_v34 = vld [vmem:[#allocation170_spill] sm:$0xff]  ;;  %v4643_v12 = vmul.f32 %v14690_v41, %v4631_v60 }
 0x6a7   : > { %v4512_v50 = vpop.permute.xlu2 %4511  ;;  %5879 = vmatmul.msk.f32.gmra.mxu2 %vm5266_vm8, %v14776_v42  ;;  %vm17806_vm11 = vnez %v17805_v34  ;;  %v4496_v53 = vadd.f32 %v4488_v14, %v4444_v26  ;;  %v4632_v56 = vsel %vm17810_vm1, %v4624_v16, 0.0 }
 0x6a8   : > { %v4513_v32 = vsel %vm17796_vm5, %v4510_v3, %v4512_v50  ;;  %v4520_v18 = vsel %vm17798_vm6, %v4512_v50, %v17797_v37  ;;  %v4644_v1 = vmul.f32 %v14690_v41, %v4632_v56  ;;  %v17813_v41 = vld [vmem:[#allocation216_spill] sm:$0xff] }
 0x6a9   : > { %v4527_v55 = vsel %vm17804_vm3, %v4513_v32, 0.0  ;;  %v4528_v4 = vsel %vm17806_vm11, %v4520_v18, 0.0 }
 0x6aa   : > { %v4539_v3 = vmul.f32 %v14545_v62, %v4527_v55  ;;  %v4540_v9 = vmul.f32 %v14545_v62, %v4528_v4  ;;  %v5262_v62 = vld [vmem:[%s15179_s7] sm:$0xff] }
 0x6ab   : > { %5881 = vmatmul.msk.f32.gmra.mxu3 %vm5266_vm8, %v14776_v42 }
 0x6ac   : > { %v4547_v45 = vadd.f32 %v4539_v3, %v4495_v27  ;;  %v4548_v21 = vadd.f32 %v4540_v9, %v4496_v53 }
 0x6ae   : > { %v4599_v24 = vadd.f32 %v4591_v36, %v4547_v45  ;;  %v4600_v2 = vadd.f32 %v4592_v52, %v4548_v21 }
 0x6af   : > { %5886 = vmatmul.msk.f32.vlgmr.msrb.gmra.mxu2 %vm5266_vm8, %v5262_v62 }
 0x6b0   : > { %v4651_v7 = vadd.f32 %v4643_v12, %v4599_v24  ;;  %v4652_v5 = vadd.f32 %v4644_v1, %v4600_v2 }
 0x6b2   : > { %5426 = vmatpush.msra.mxu0 %v4651_v7  ;;  %5449 = vmatpush.msra.mxu1 %v4652_v5 }
 0x6b3   : > { %5882 = vmatmul.msk.f32.vlgmr.msra.gmra.mxu0 %vm5266_vm8, %v14725_v20  ;;  %5884 = vmatmul.msk.f32.vlgmr.msra.gmra.mxu1 %vm5266_vm8, %v14725_v20  ;;  %v5663_v20 = vld [vmem:[%s15182_s10] sm:$0xff] }
 0x6b4   : > { %5888 = vmatmul.msk.f32.vlgmr.msra.gmra.mxu3 %vm5266_vm8, %v5262_v62  ;;  %5524 = vmatpush.msrb.mxu0 %v17811_v8 }
 0x6b5   : > { %5547 = vmatpush.msrb.mxu1 %v17812_v57  ;;  %5667 = vperm.xlu2 %6130, %v5663_v20  }
 0x6b6   : > { %5616 = vmatpush.msra.mxu0 %v17813_v41  ;;  %v5118_v28 = vpop.f32.mrf.mxu3 }
 0x6b7   : > { %5639 = vmatpush.msra.mxu1 %v17814_v38  ;;  %5887 = vmatmul.msk.f32.gmra.mxu2 %vm5266_vm8, %v5263_v46 }
 0x6bb   : > { %5883 = vmatmul.msk.f32.gmra.mxu0 %vm5266_vm8, %v14776_v42  ;;  %5885 = vmatmul.msk.f32.gmra.mxu1 %vm5266_vm8, %v14776_v42  ;;  %v5095_v42 = vpop.f32.mrf.mxu2  ;;  %v5141_v19 = vpop.f32.mrf.mxu0 }
 0x6bc   : > { %5889 = vmatmul.msk.f32.gmra.mxu3 %vm5266_vm8, %v5263_v46  ;;  %v5164_v39 = vpop.f32.mrf.mxu1 }
 0x6bf   : > { %5894 = vmatmul.msk.f32.vlgmr.msra.gmra.mxu2 %vm5266_vm8, %v5262_v62 }
 0x6c3   : > { %5890 = vmatmul.msk.f32.vlgmr.msrb.gmra.mxu0 %vm5266_vm8, %v5262_v62  ;;  %5892 = vmatmul.msk.f32.vlgmr.msrb.gmra.mxu1 %vm5266_vm8, %v5262_v62  ;;  %v15050_v25 = vpop.f32.mrf.mxu0 }
 0x6c4   : > { %5896 = vmatmul.msk.f32.vlgmr.msrb.gmra.mxu3 %vm5266_vm8, %v5262_v62  ;;  %v15052_v58 = vpop.f32.mrf.mxu1 }
 0x6c7   : > { %5895 = vmatmul.msk.f32.gmra.mxu2 %vm5266_vm8, %v5263_v46 }
 0x6cb   : > { %5891 = vmatmul.msk.f32.gmra.mxu0 %vm5266_vm8, %v5263_v46  ;;  %5893 = vmatmul.msk.f32.gmra.mxu1 %vm5266_vm8, %v5263_v46 }
 0x6cc   : > { %5897 = vmatmul.msk.f32.gmra.mxu3 %vm5266_vm8, %v5263_v46  ;;  %v5098_v30 = vpop.f32.mrf.mxu2 }
 0x6cd   : > { %v5121_v0 = vpop.f32.mrf.mxu3 }
 0x6d3   : > { %5898 = vmatmul.msk.f32.vlgmr.msra.gmra.mxu0 %vm5266_vm8, %v5262_v62  ;;  %5900 = vmatmul.msk.f32.vlgmr.msra.gmra.mxu1 %vm5266_vm8, %v5262_v62  ;;  %v15058_v29 = vpop.f32.mrf.mxu0 }
 0x6d4   : > { %v15048_v22 = vpop.f32.mrf.mxu2  ;;  %v15060_v40 = vpop.f32.mrf.mxu1 }
 0x6d7   : > { %v15054_v51 = vpop.f32.mrf.mxu3 }
 0x6db   : > { %5899 = vmatmul.msk.f32.gmra.mxu0 %vm5266_vm8, %v5263_v46  ;;  %5901 = vmatmul.msk.f32.gmra.mxu1 %vm5266_vm8, %v5263_v46  ;;  %v15064_v61 = vpop.f32.mrf.mxu0 }
 0x6dc   : > { %v15056_v54 = vpop.f32.mrf.mxu2  ;;  %v15066_v49 = vpop.f32.mrf.mxu1 }
 0x6df   : > { %v15062_v63 = vpop.f32.mrf.mxu3 }
 0x6f0   : > { %v5290_v13 = vpop.f32.mrf.mxu2  ;;  %v5313_v6 = vpop.f32.mrf.mxu3 }
 0x6f8   : > { %v5293_v43 = vpop.f32.mrf.mxu2  ;;  %v5316_v59 = vpop.f32.mrf.mxu3 }
 0x704   : > { %v5336_v33 = vpop.f32.mrf.mxu0  ;;  %v5359_v10 = vpop.f32.mrf.mxu1 }
 0x70c   : > { %v5339_v26 = vpop.f32.mrf.mxu0  ;;  %v5362_v11 = vpop.f32.mrf.mxu1 }
 0x70f   : > { %v15077_v35 = vpop.permute.xlu2 %5667 }
 0x710   : > { %v15090_v15 = vpop.permute.xlu0 %5672 }
 0x722   : > { %v5382_v14 = vpop.f32.mrf.mxu2 }
 0x726   : > { %v5405_v50 = vpop.f32.mrf.mxu3 }
 0x72a   : > { %v15068_v16 = vpop.f32.mrf.mxu2 }
 0x72e   : > { %v15070_v32 = vpop.f32.mrf.mxu3 }
 0x730   : > { %v15072_v37 = vpop.f32.mrf.mxu0  ;;  %v15074_v18 = vpop.f32.mrf.mxu1 }
 0x732   : > { %v5480_v47 = vpop.f32.mrf.mxu2 }
 0x733   : > { %v5481_v23 = vadd.f32 %v5480_v47, %v5290_v13 }
 0x735   : > { %v5647_v17 = vadd.f32 %v5481_v23, %v5095_v42 }
 0x737   : > { %v5503_v31 = vpop.f32.mrf.mxu3  ;;  %v5675_v34 = vadd.f32 %v15077_v35, %v5647_v17 }
 0x738   : > { %v5504_v55 = vadd.f32 %v5503_v31, %v5313_v6  ;;  %v15082_v4 = vpop.f32.mrf.mxu0  ;;  %v15084_v27 = vpop.f32.mrf.mxu1 }
 0x739   : > { %v5691_v3 = vmax.f32 %v5675_v34, 0.0 }
 0x73a   : > { %v5648_v53 = vadd.f32 %v5504_v55, %v5118_v28  ;;  %v5483_v9 = vpop.f32.mrf.mxu2 }
 0x73b   : > { %5707 = vst [vmem:[%s15087_s23] sm:$0xff] %v5691_v3  ;;  %v5484_v60 = vadd.f32 %v5483_v9, %v5293_v43 }
 0x73c   : > { %v5676_v44 = vadd.f32 %v15077_v35, %v5648_v53 }
 0x73d   : > { %v5655_v36 = vadd.f32 %v5484_v60, %v5098_v30 }
 0x73e   : > { %v5692_v56 = vmax.f32 %v5676_v44, 0.0 }
 0x73f   : > { %v5506_v52 = vpop.f32.mrf.mxu3  ;;  %v5683_v45 = vadd.f32 %v15090_v15, %v5655_v36 }
 0x740   : > { %5708 = vst [vmem:[%s15087_s23 + $0x8] sm:$0xff] %v5692_v56  ;;  %v5507_v21 = vadd.f32 %v5506_v52, %v5316_v59  ;;  %v5526_v48 = vpop.f32.mrf.mxu0  ;;  %v5549_v62 = vpop.f32.mrf.mxu1 }
 0x741   : > { %v5527_v12 = vadd.f32 %v5526_v48, %v5336_v33  ;;  %v5550_v1 = vadd.f32 %v5549_v62, %v5359_v10  ;;  %v5699_v24 = vmax.f32 %v5683_v45, 0.0 }
 0x742   : > { %v5656_v2 = vadd.f32 %v5507_v21, %v5121_v0  ;;  %v5572_v8 = vpop.f32.mrf.mxu2 }
 0x743   : > { %v5649_v7 = vadd.f32 %v5527_v12, %v5141_v19  ;;  %v5650_v5 = vadd.f32 %v5550_v1, %v5164_v39  ;;  %5709 = vst [vmem:[%s15087_s23 + $0x10] sm:$0xff] %v5699_v24  ;;  %v5573_v41 = vadd.f32 %v5572_v8, %v5382_v14 }
 0x744   : > { %v5684_v57 = vadd.f32 %v15090_v15, %v5656_v2 }
 0x745   : > { %v5677_v46 = vadd.f32 %v15077_v35, %v5649_v7  ;;  %v5678_v38 = vadd.f32 %v15077_v35, %v5650_v5  ;;  %v5651_v42 = vadd.f32 %v5573_v41, %v15048_v22 }
 0x746   : > { %v5700_v20 = vmax.f32 %v5684_v57, 0.0 }
 0x747   : > { %v5693_v28 = vmax.f32 %v5677_v46, 0.0  ;;  %v5694_v30 = vmax.f32 %v5678_v38, 0.0  ;;  %v5595_v0 = vpop.f32.mrf.mxu3  ;;  %v5679_v19 = vadd.f32 %v15077_v35, %v5651_v42 }
 0x748   : > { %5710 = vst [vmem:[%s15087_s23 + $0x18] sm:$0xff] %v5700_v20  ;;  %v5596_v39 = vadd.f32 %v5595_v0, %v5405_v50  ;;  %v5529_v13 = vpop.f32.mrf.mxu0  ;;  %v5552_v6 = vpop.f32.mrf.mxu1 }
 0x749   : > { %5902 = vst [vmem:[%s15087_s23 + $0x20] sm:$0xff] %v5693_v28  ;;  %v5530_v43 = vadd.f32 %v5529_v13, %v5339_v26  ;;  %v5553_v33 = vadd.f32 %v5552_v6, %v5362_v11  ;;  %v5695_v59 = vmax.f32 %v5679_v19, 0.0 }
 0x74a   : > { %5903 = vst [vmem:[%s15087_s23 + $0x28] sm:$0xff] %v5694_v30  ;;  %v5652_v10 = vadd.f32 %v5596_v39, %v15054_v51  ;;  %v5575_v47 = vpop.f32.mrf.mxu2 }
 0x74b   : > { %v5657_v22 = vadd.f32 %v5530_v43, %v15050_v25  ;;  %v5658_v14 = vadd.f32 %v5553_v33, %v15052_v58  ;;  %5906 = vst [vmem:[%s15087_s23 + $0x40] sm:$0xff] %v5695_v59  ;;  %v5576_v50 = vadd.f32 %v5575_v47, %v15068_v16 }
 0x74c   : > { %v5680_v23 = vadd.f32 %v15077_v35, %v5652_v10 }
 0x74d   : > { %v5685_v26 = vadd.f32 %v15090_v15, %v5657_v22  ;;  %v5686_v11 = vadd.f32 %v15090_v15, %v5658_v14  ;;  %v5659_v31 = vadd.f32 %v5576_v50, %v15056_v54 }
 0x74e   : > { %v5696_v17 = vmax.f32 %v5680_v23, 0.0 }
 0x74f   : > { %v5701_v51 = vmax.f32 %v5685_v26, 0.0  ;;  %v5702_v25 = vmax.f32 %v5686_v11, 0.0  ;;  %v5598_v55 = vpop.f32.mrf.mxu3  ;;  %v5687_v58 = vadd.f32 %v15090_v15, %v5659_v31 }
 0x750   : > { %5907 = vst [vmem:[%s15087_s23 + $0x48] sm:$0xff] %v5696_v17  ;;  %v5599_v34 = vadd.f32 %v5598_v55, %v15070_v32  ;;  %v5618_v53 = vpop.f32.mrf.mxu0  ;;  %v5641_v3 = vpop.f32.mrf.mxu1 }
 0x751   : > { %5904 = vst [vmem:[%s15087_s23 + $0x30] sm:$0xff] %v5701_v51  ;;  %v5619_v16 = vadd.f32 %v5618_v53, %v15072_v37  ;;  %v5642_v9 = vadd.f32 %v5641_v3, %v15074_v18  ;;  %v5703_v54 = vmax.f32 %v5687_v58, 0.0 }
 0x752   : > { %5905 = vst [vmem:[%s15087_s23 + $0x38] sm:$0xff] %v5702_v25  ;;  %v5660_v44 = vadd.f32 %v5599_v34, %v15062_v63 }
 0x753   : > { %v5653_v60 = vadd.f32 %v5619_v16, %v15058_v29  ;;  %v5654_v56 = vadd.f32 %v5642_v9, %v15060_v40  ;;  %5908 = vst [vmem:[%s15087_s23 + $0x50] sm:$0xff] %v5703_v54 }
 0x754   : > { %v5688_v32 = vadd.f32 %v15090_v15, %v5660_v44 }
 0x755   : > { %v5681_v36 = vadd.f32 %v15077_v35, %v5653_v60  ;;  %v5682_v37 = vadd.f32 %v15077_v35, %v5654_v56 }
 0x756   : > { %v5704_v52 = vmax.f32 %v5688_v32, 0.0 }
 0x757   : > { %v5697_v18 = vmax.f32 %v5681_v36, 0.0  ;;  %v5698_v45 = vmax.f32 %v5682_v37, 0.0 }
 0x758   : > { %5909 = vst [vmem:[%s15087_s23 + $0x58] sm:$0xff] %v5704_v52  ;;  %v5621_v21 = vpop.f32.mrf.mxu0  ;;  %v5644_v63 = vpop.f32.mrf.mxu1 }
 0x759   : > { %5910 = vst [vmem:[%s15087_s23 + $0x60] sm:$0xff] %v5697_v18  ;;  %v5622_v29 = vadd.f32 %v5621_v21, %v15082_v4  ;;  %v5645_v40 = vadd.f32 %v5644_v63, %v15084_v27 }
 0x75a   : > { %5911 = vst [vmem:[%s15087_s23 + $0x68] sm:$0xff] %v5698_v45 }
 0x75b   : > { %v5661_v35 = vadd.f32 %v5622_v29, %v15064_v61  ;;  %v5662_v48 = vadd.f32 %v5645_v40, %v15066_v49 }
 0x75d   : > { %v5689_v62 = vadd.f32 %v15090_v15, %v5661_v35  ;;  %v5690_v12 = vadd.f32 %v15090_v15, %v5662_v48 }
 0x75f   : > { %v5705_v4 = vmax.f32 %v5689_v62, 0.0  ;;  %v5706_v1 = vmax.f32 %v5690_v12, 0.0 }
 0x761   : > { %5912 = vst [vmem:[%s15087_s23 + $0x70] sm:$0xff] %v5705_v4 }
 0x762   : > { %5913 = vst [vmem:[%s15087_s23 + $0x78] sm:$0xff] %v5706_v1 }
 0x763   : > { %6169 = shalt.err (!%p6166_p3)
}
 0x764   : > { %s6312_s22 = smov 256   ;;  %s17815_s23 = smov 16  }
 0x765   : > { %5924 = dma.vmem_to_hbm [thread:$0]  (%p6421_p5), %s5741_s29, 2048, %s5743_s0, %s5727_s30, %s6312_s22, %s6312_s22, %s17815_s23  }
 0x766 PF: > { %p5930_p4 = scmp.ge.s32.totalorder %s6204_s28, 2  ;;  %s5757_s20 = sand.u32 1, %s6192_s25  }
 0x767   : > { %s5758_s1 = scalar_lea.sflag [#allocation3], %s5757_s20 }
 0x768   : > { %p5927_p7 = pnand %p5930_p4, %p6425_p6 }
 0x76a   : > { %p5928_p8 = pneg %p5927_p7 }
 0x76c   : > { %6187 = dma.done.wait (%p5928_p8), %s5758_s1, 2048  }
 0x76d   : > { %6189 = vsyncadd (%p5928_p8), %s5758_s1, 4294965248  ;;  %s17816_s15 = sld [smem:[#allocation5_spill]]  ;;  %p23_p9 = scmp.ge.s32.totalorder %s6408_s14, 4  }
 0x76e   : > { %s17817_s25 = smov %s6196_s26  ;;  %s17818_s26 = smov %s6200_s27 }
 0x76f   : > { %s17820_s28 = smov %s6408_s14  ;;  %25 = sbr.rel (!%p23_p9) target bundleno = 6 (0x6), region = 117 }
 0x773   : > { %s17819_s27 = smov %s17816_s15 }
 0x774   :  { %5764 = vsyncpa [#allocation3], 1 }
 0x775   :  { %5766 = vsyncpa [#allocation3 + $0x1], 1 }

</bundles_post_ra>
